<compile_context>
chip_gen: v7x
topology: tpu7x:2x2x1
jax: 0.10.0
libtpu: 0.0.40
codegen_flags: <defaults>
</compile_context>

<pallas_src>
import jax
import jax.numpy as jnp
import numpy as np
from jax.experimental import pallas as pl
from jax.experimental.pallas import tpu as pltpu


# ------------------------------ in-kernel helpers ------------------------------

def _shift_prev(x, prev_mask):
    """y[:, l] = x[:, l-1]; zeroed where l-1 crosses a sample boundary (padding=1)."""
    return pltpu.roll(x, shift=1, axis=1) * prev_mask


def _shift_next(x, next_mask):
    """y[:, l] = x[:, l+1]; pltpu.roll needs shift >= 0, so roll by W-1 == roll by -1."""
    return pltpu.roll(x, shift=x.shape[1] - 1, axis=1) * next_mask


def _pair_max(x, msk):
    # MaxPool1d(2,2) step 1: valid result at even lanes; odd lanes dropped later.
    # x is post-ReLU (>= 0), so the masked-to-zero neighbour never wins spuriously.
    return jnp.maximum(x, _shift_next(x, msk[1:2, :]))


def _conv_relu_cat(x, wcat, b, msk):
    """Conv1d(k=3, stride=1, padding=1) + ReLU, all 3 taps fused into one MXU matmul.

    x: (Ci, W) lane-packed; wcat: (Co, 3*Ci) = [tap(t-1) | tap(t) | tap(t+1)]; b: (Co, 1).
    """
    xcat = jnp.concatenate(
        [_shift_prev(x, msk[0:1, :]), x, _shift_next(x, msk[1:2, :])], axis=0)  # (3*Ci, W)
    y = jnp.dot(wcat, xcat, preferred_element_type=jnp.float32) + b
    return jnp.maximum(y, 0.0)


# --------------------------------- fused kernel ---------------------------------

def _cnn_fused_kernel(x_ref,
                      w1_ref, b1_ref, msk1_ref, s1_ref,
                      w2_ref, b2_ref, msk2_ref, s2_ref,
                      w3_ref, b3_ref, msk3_ref,
                      selpm_ref, w1p_ref, b1r_ref, w2p_ref, b2r_ref,
                      o_ref):
    f32 = jnp.float32
    msk1 = msk1_ref[...]
    msk2 = msk2_ref[...]
    msk3 = msk3_ref[...]

    # ---- conv1 (Ci = 1): three broadcast taps on the VPU + bias + ReLU ----
    x = x_ref[...]                                                            # (1, W)
    w1 = w1_ref[...]                                                          # (3, 16, 1)
    h = (w1[0] * _shift_prev(x, msk1[0:1, :])
         + w1[1] * x
         + w1[2] * _shift_next(x, msk1[1:2, :]))
    h = jnp.maximum(h + b1_ref[...], 0.0)                                     # (16, W)

    # ---- pool1 / conv2 / pool2 / conv3 (fused-tap MXU matmuls) ----
    h = jnp.dot(_pair_max(h, msk1), s1_ref[...], preferred_element_type=f32)  # (16, W/2)
    h = _conv_relu_cat(h, w2_ref[...], b2_ref[...], msk2)                     # (32, W/2)
    h = jnp.dot(_pair_max(h, msk2), s2_ref[...], preferred_element_type=f32)  # (32, W/4)
    h = _conv_relu_cat(h, w3_ref[...], b3_ref[...], msk3)                     # (64, W/4)
    m = _pair_max(h, msk3)                                                    # (64, W/4); valid at even lanes

    # ---- flatten-free FC1: 1 selection matmul + one batched (per-position) matmul ----
    # feat[p*chunk + s, c] = pooled3[sample s, channel c, position p]
    feat = jnp.dot(selpm_ref[...], m.T, preferred_element_type=f32)           # (P*chunk, 64)
    P, _, HP = w1p_ref.shape
    chunk = feat.shape[0] // P
    feat3 = feat.reshape(P, chunk, feat.shape[1])                             # leading-dim split only (layout-free)
    part = jnp.einsum("psc,pcj->psj", feat3, w1p_ref[...],
                      preferred_element_type=f32)                             # (P, chunk, HP)
    acc = jnp.sum(part, axis=0)                                               # (chunk, HP)

    hfc = jnp.maximum(acc + b1r_ref[...], 0.0)                                # ReLU(fc1)
    # TODO(synk): nn.Dropout(0.3) is identity in eval mode; training-mode dropout
    # (pltpu.prng_seed / pltpu.stateful_bernoulli) is intentionally omitted.
    logits = jnp.dot(hfc, w2p_ref[...], preferred_element_type=f32) + b2r_ref[...]
    o_ref[0] = logits                                                         # full (chunk, HP) lane-dense store


# ------------------------- host-side geometry constants -------------------------

def _geometry(chunk, L):
    """Per-sample boundary masks, pool even-column selectors, pool3/FC1 selector."""
    def masks(sub):
        l = np.arange(chunk * sub)
        prev_ok = (l % sub != 0).astype(np.float32)          # zero where x[l-1] crosses a sample
        next_ok = (l % sub != sub - 1).astype(np.float32)    # zero where x[l+1] crosses a sample
        return jnp.asarray(np.stack([prev_ok, next_ok]), jnp.float32)        # (2, chunk*sub)

    def even_sel(W):                                          # (W, W//2): pick even columns
        S = np.zeros((W, W // 2), np.float32)
        S[2 * np.arange(W // 2), np.arange(W // 2)] = 1.0
        return jnp.asarray(S)

    msk1, msk2, msk3 = masks(L), masks(L // 2), masks(L // 4)
    s1, s2 = even_sel(chunk * L), even_sel(chunk * L // 2)

    P, Ls3 = L // 8, L // 4
    selpm = np.zeros((P * chunk, chunk * Ls3), np.float32)    # rows ordered p-major, s-minor
    for p in range(P):
        for s in range(chunk):
            selpm[p * chunk + s, s * Ls3 + 2 * p] = 1.0
    return msk1, msk2, msk3, s1, s2, jnp.asarray(selpm)


# ----------------------------------- wrapper ------------------------------------

def cnn_model_forward(x, params, chunk=8):
    """x: (N, Cin, L) float32 -> (N, num_classes) float32."""
    N, Cin, L = x.shape
    assert Cin == 1, "conv1 broadcast path assumes input_size == 1 (module default)"
    assert L % 8 == 0, "seq_length must be divisible by 8 (three 2x pools)"
    assert (chunk * L) % 512 == 0, \
        "chunk*L/4 must be a multiple of 128 so every layer stays on the 128-lane roll path"

    Np = pl.cdiv(N, chunk) * chunk                            # pad batch to a multiple of chunk
    if Np != N:
        x = jnp.pad(x, ((0, Np - N), (0, 0), (0, 0)))
    G = Np // chunk
    W0 = chunk * L

    xp = jnp.transpose(x, (1, 0, 2)).reshape(Cin, Np * L)     # samples packed along lanes
    msk1, msk2, msk3, s1, s2, selpm = _geometry(chunk, L)
    HP = params["w1p"].shape[2]                               # lane-padded FC width (128)

    args = (xp,
            params["w1"], params["b1"], msk1, s1,
            params["w2cat"], params["b2"], msk2, s2,
            params["w3cat"], params["b3"], msk3,
            selpm, params["w1p"], params["b1row"], params["w2pad"], params["b2row"])

    def full(a):                                              # VMEM-resident across grid steps
        zeros = (0,) * a.ndim
        def idx(g, _z=zeros):
            del g
            return _z
        return pl.BlockSpec(a.shape, idx)

    # NOTE: at larger chunk (>= 16), add pipeline_mode=pl.Buffered(1) on these constant
    # specs to avoid double-buffering them (relevant for v7x's 32 MiB scoped default).
    in_specs = [pl.BlockSpec((Cin, W0), lambda g: (0, g))] + [full(a) for a in args[1:]]

    out = pl.pallas_call(
        _cnn_fused_kernel,
        out_shape=jax.ShapeDtypeStruct((G, chunk, HP), jnp.float32),
        grid=(G,),
        in_specs=in_specs,
        out_specs=pl.BlockSpec((1, chunk, HP), lambda g: (g, 0, 0)),
        compiler_params=pltpu.CompilerParams(
            dimension_semantics=("parallel",),
            vmem_limit_bytes=32 * 1024 * 1024,
        ),
    )(*args)

    return out.reshape(Np, HP)[:N, :params["num_classes"]]


# ------------------------ deterministic parameter setup -------------------------

def init_params(key, input_size=1, seq_length=64, num_classes=4, hidden_pad=128):
    ks = jax.random.split(key, 10)

    def w(k, shape, scale):
        return (scale * jax.random.normal(k, shape)).astype(jnp.float32)

    conv1 = w(ks[0], (16, input_size, 3), 0.3)                # torch layout (Co, Ci, K)
    conv2 = w(ks[1], (32, 16, 3), 0.10)
    conv3 = w(ks[2], (64, 32, 3), 0.08)
    cb1, cb2, cb3 = w(ks[3], (16,), 0.05), w(ks[4], (32,), 0.05), w(ks[5], (64,), 0.05)
    P = seq_length // 8
    fsz = P * 64
    fc1_w, fc1_b = w(ks[6], (100, fsz), 0.05), w(ks[7], (100,), 0.05)
    fc2_w, fc2_b = w(ks[8], (num_classes, 100), 0.10), w(ks[9], (num_classes,), 0.05)

    HP = hidden_pad
    assert 100 <= HP and num_classes <= HP

    # fc1 input index is c*P + p (torch x.view on (N, 64, P)); repack per pooled position,
    # lane-padded on the hidden axis: w1p[p, c, j] = fc1_w[j, c*P + p]  (zeros for j >= 100).
    w1p = jnp.transpose(fc1_w.reshape(100, 64, P), (2, 1, 0))
    w1p = jnp.pad(w1p, ((0, 0), (0, 0), (0, HP - 100)))
    b1row = jnp.pad(fc1_b.reshape(1, 100), ((0, 0), (0, HP - 100)))
    w2pad = jnp.zeros((HP, HP), jnp.float32).at[:100, :num_classes].set(fc2_w.T)
    b2row = jnp.pad(fc2_b.reshape(1, num_classes), ((0, 0), (0, HP - num_classes)))

    kernel_params = dict(
        # conv1: tap-major (K, Co, Ci) for the Ci=1 broadcast path; bias as a column
        w1=jnp.transpose(conv1, (2, 0, 1)), b1=cb1.reshape(16, 1),
        # conv2/conv3: all 3 taps packed as (Co, 3*Ci) = [tap(t-1) | tap(t) | tap(t+1)]
        w2cat=jnp.transpose(conv2, (0, 2, 1)).reshape(32, 3 * 16), b2=cb2.reshape(32, 1),
        w3cat=jnp.transpose(conv3, (0, 2, 1)).reshape(64, 3 * 32), b3=cb3.reshape(64, 1),
        w1p=w1p, b1row=b1row, w2pad=w2pad, b2row=b2row,
        num_classes=num_classes,
    )
    torch_style = dict(conv1=conv1, conv2=conv2, conv3=conv3,
                       cb1=cb1, cb2=cb2, cb3=cb3,
                       fc1_w=fc1_w, fc1_b=fc1_b, fc2_w=fc2_w, fc2_b=fc2_b)
    return kernel_params, torch_style


# ------------------------------- pure-JAX reference ------------------------------

def ref_forward(x, p):
    def conv(x, w, b):  # x (N,Ci,L), w (Co,Ci,3), b (Co,)
        N, Ci, L = x.shape
        xp = jnp.pad(x, ((0, 0), (0, 0), (1, 1)))
        y = sum(jnp.einsum("oi,nil->nol", w[:, :, k], xp[:, :, k:k + L])
                for k in range(3))
        return y + b[None, :, None]

    def pool(x):
        N, C, L = x.shape
        return x.reshape(N, C, L // 2, 2).max(axis=-1)

    h = pool(jax.nn.relu(conv(x, p["conv1"], p["cb1"])))
    h = pool(jax.nn.relu(conv(h, p["conv2"], p["cb2"])))
    h = pool(jax.nn.relu(conv(h, p["conv3"], p["cb3"])))
    h = h.reshape(x.shape[0], -1)
    h = jax.nn.relu(h @ p["fc1_w"].T + p["fc1_b"])
    return h @ p["fc2_w"].T + p["fc2_b"]


# -------------------------------------- main -------------------------------------

if __name__ == "__main__":
    # chunk=8 samples per grid step -> widths 512/256/128, grid=(2,) ("parallel" for v7x's 2 TCs)
    N, INPUT_SIZE, SEQ_LEN, NUM_CLASSES = 16, 1, 64, 4

    key = jax.random.PRNGKey(0)
    kx, kp = jax.random.split(key)
    x = jax.random.normal(kx, (N, INPUT_SIZE, SEQ_LEN), jnp.float32)
    params, torch_params = init_params(kp, INPUT_SIZE, SEQ_LEN, NUM_CLASSES)

    # Full-f32 matmuls on both sides so the 1e-4 parity check is meaningful.
    with jax.default_matmul_precision("highest"):
        out = jax.block_until_ready(cnn_model_forward(x, params, chunk=8))
        ref = jax.block_until_ready(ref_forward(x, torch_params))

    np.testing.assert_allclose(np.asarray(out), np.asarray(ref), rtol=1e-4, atol=1e-4)
    assert out.shape == (N, NUM_CLASSES) and out.dtype == jnp.float32

    print("KERNEL_OK")
</pallas_src>

<mosaic_0001>
module attributes {stable_mosaic.version = 11 : i64} {
  func.func @_cnn_fused_kernel(%arg0: i32, %arg1: memref<1x512xf32, #tpu.memory_space<vmem>>, %arg2: memref<3x16x1xf32, #tpu.memory_space<vmem>>, %arg3: memref<16x1xf32, #tpu.memory_space<vmem>>, %arg4: memref<2x512xf32, #tpu.memory_space<vmem>>, %arg5: memref<512x256xf32, #tpu.memory_space<vmem>>, %arg6: memref<32x48xf32, #tpu.memory_space<vmem>>, %arg7: memref<32x1xf32, #tpu.memory_space<vmem>>, %arg8: memref<2x256xf32, #tpu.memory_space<vmem>>, %arg9: memref<256x128xf32, #tpu.memory_space<vmem>>, %arg10: memref<64x96xf32, #tpu.memory_space<vmem>>, %arg11: memref<64x1xf32, #tpu.memory_space<vmem>>, %arg12: memref<2x128xf32, #tpu.memory_space<vmem>>, %arg13: memref<64x128xf32, #tpu.memory_space<vmem>>, %arg14: memref<8x64x128xf32, #tpu.memory_space<vmem>>, %arg15: memref<1x128xf32, #tpu.memory_space<vmem>>, %arg16: memref<128x128xf32, #tpu.memory_space<vmem>>, %arg17: memref<1x128xf32, #tpu.memory_space<vmem>>, %arg18: memref<1x8x128xf32, #tpu.memory_space<vmem>>) attributes {dimension_semantics = [#tpu.dimension_semantics<parallel>], iteration_bounds = array<i64: 2>, scalar_prefetch = 0 : i64, scratch_operands = 0 : i64, tpu.core_type = #tpu.core_type<tc>, window_params = [{transform_indices = @transform_0, window_bounds = array<i64: 1, 512>}, {pipeline_mode = #tpu.pipeline_mode<synchronous>, transform_indices = @transform_1, window_bounds = array<i64: 3, 16, 1>}, {pipeline_mode = #tpu.pipeline_mode<synchronous>, transform_indices = @transform_2, window_bounds = array<i64: 16, 1>}, {pipeline_mode = #tpu.pipeline_mode<synchronous>, transform_indices = @transform_3, window_bounds = array<i64: 2, 512>}, {pipeline_mode = #tpu.pipeline_mode<synchronous>, transform_indices = @transform_4, window_bounds = array<i64: 512, 256>}, {pipeline_mode = #tpu.pipeline_mode<synchronous>, transform_indices = @transform_5, window_bounds = array<i64: 32, 48>}, {pipeline_mode = #tpu.pipeline_mode<synchronous>, transform_indices = @transform_6, window_bounds = array<i64: 32, 1>}, {pipeline_mode = #tpu.pipeline_mode<synchronous>, transform_indices = @transform_7, window_bounds = array<i64: 2, 256>}, {pipeline_mode = #tpu.pipeline_mode<synchronous>, transform_indices = @transform_8, window_bounds = array<i64: 256, 128>}, {pipeline_mode = #tpu.pipeline_mode<synchronous>, transform_indices = @transform_9, window_bounds = array<i64: 64, 96>}, {pipeline_mode = #tpu.pipeline_mode<synchronous>, transform_indices = @transform_10, window_bounds = array<i64: 64, 1>}, {pipeline_mode = #tpu.pipeline_mode<synchronous>, transform_indices = @transform_11, window_bounds = array<i64: 2, 128>}, {pipeline_mode = #tpu.pipeline_mode<synchronous>, transform_indices = @transform_12, window_bounds = array<i64: 64, 128>}, {pipeline_mode = #tpu.pipeline_mode<synchronous>, transform_indices = @transform_13, window_bounds = array<i64: 8, 64, 128>}, {pipeline_mode = #tpu.pipeline_mode<synchronous>, transform_indices = @transform_14, window_bounds = array<i64: 1, 128>}, {pipeline_mode = #tpu.pipeline_mode<synchronous>, transform_indices = @transform_15, window_bounds = array<i64: 128, 128>}, {pipeline_mode = #tpu.pipeline_mode<synchronous>, transform_indices = @transform_16, window_bounds = array<i64: 1, 128>}, {transform_indices = @transform_17, window_bounds = array<i64: 1, 8, 128>}]} {
    %c0 = arith.constant 0 : index
    %c0_0 = arith.constant 0 : index
    %0 = vector.load %arg4[%c0, %c0_0] : memref<2x512xf32, #tpu.memory_space<vmem>>, vector<2x512xf32>
    %c0_1 = arith.constant 0 : index
    %c0_2 = arith.constant 0 : index
    %1 = vector.load %arg8[%c0_1, %c0_2] : memref<2x256xf32, #tpu.memory_space<vmem>>, vector<2x256xf32>
    %c0_3 = arith.constant 0 : index
    %c0_4 = arith.constant 0 : index
    %2 = vector.load %arg12[%c0_3, %c0_4] : memref<2x128xf32, #tpu.memory_space<vmem>>, vector<2x128xf32>
    %c0_5 = arith.constant 0 : index
    %c0_6 = arith.constant 0 : index
    %3 = vector.load %arg1[%c0_5, %c0_6] : memref<1x512xf32, #tpu.memory_space<vmem>>, vector<1x512xf32>
    %c0_7 = arith.constant 0 : index
    %c0_8 = arith.constant 0 : index
    %c0_9 = arith.constant 0 : index
    %4 = vector.load %arg2[%c0_7, %c0_8, %c0_9] : memref<3x16x1xf32, #tpu.memory_space<vmem>>, vector<3x16x1xf32>
    %5 = vector.extract_strided_slice %4 {offsets = [0, 0, 0], sizes = [1, 16, 1], strides = [1, 1, 1]} : vector<3x16x1xf32> to vector<1x16x1xf32>
    %6 = vector.shape_cast %5 : vector<1x16x1xf32> to vector<16x1xf32>
    %7 = vector.extract_strided_slice %0 {offsets = [0, 0], sizes = [1, 512], strides = [1, 1]} : vector<2x512xf32> to vector<1x512xf32>
    %c1_i32 = arith.constant 1 : i32
    %8 = tpu.dynamic_rotate %3 by %c1_i32 dim 1 : vector<1x512xf32>, i32 -> vector<1x512xf32>
    %9 = arith.mulf %8, %7 : vector<1x512xf32>
    %10 = vector.broadcast %6 : vector<16x1xf32> to vector<16x512xf32>
    %11 = vector.broadcast %9 : vector<1x512xf32> to vector<16x512xf32>
    %12 = arith.mulf %10, %11 : vector<16x512xf32>
    %13 = vector.extract_strided_slice %4 {offsets = [1, 0, 0], sizes = [1, 16, 1], strides = [1, 1, 1]} : vector<3x16x1xf32> to vector<1x16x1xf32>
    %14 = vector.shape_cast %13 : vector<1x16x1xf32> to vector<16x1xf32>
    %15 = vector.broadcast %14 : vector<16x1xf32> to vector<16x512xf32>
    %16 = vector.broadcast %3 : vector<1x512xf32> to vector<16x512xf32>
    %17 = arith.mulf %15, %16 : vector<16x512xf32>
    %18 = arith.addf %12, %17 : vector<16x512xf32>
    %19 = vector.extract_strided_slice %4 {offsets = [2, 0, 0], sizes = [1, 16, 1], strides = [1, 1, 1]} : vector<3x16x1xf32> to vector<1x16x1xf32>
    %20 = vector.shape_cast %19 : vector<1x16x1xf32> to vector<16x1xf32>
    %21 = vector.extract_strided_slice %0 {offsets = [1, 0], sizes = [1, 512], strides = [1, 1]} : vector<2x512xf32> to vector<1x512xf32>
    %c511_i32 = arith.constant 511 : i32
    %22 = tpu.dynamic_rotate %3 by %c511_i32 dim 1 : vector<1x512xf32>, i32 -> vector<1x512xf32>
    %23 = arith.mulf %22, %21 : vector<1x512xf32>
    %24 = vector.broadcast %20 : vector<16x1xf32> to vector<16x512xf32>
    %25 = vector.broadcast %23 : vector<1x512xf32> to vector<16x512xf32>
    %26 = arith.mulf %24, %25 : vector<16x512xf32>
    %27 = arith.addf %18, %26 : vector<16x512xf32>
    %c0_10 = arith.constant 0 : index
    %c0_11 = arith.constant 0 : index
    %28 = vector.load %arg3[%c0_10, %c0_11] : memref<16x1xf32, #tpu.memory_space<vmem>>, vector<16x1xf32>
    %29 = vector.broadcast %28 : vector<16x1xf32> to vector<16x512xf32>
    %30 = arith.addf %27, %29 : vector<16x512xf32>
    %cst = arith.constant 0.000000e+00 : f32
    %31 = vector.broadcast %cst : f32 to vector<16x512xf32>
    %32 = arith.maximumf %30, %31 : vector<16x512xf32>
    %33 = vector.extract_strided_slice %0 {offsets = [1, 0], sizes = [1, 512], strides = [1, 1]} : vector<2x512xf32> to vector<1x512xf32>
    %c511_i32_12 = arith.constant 511 : i32
    %34 = tpu.dynamic_rotate %32 by %c511_i32_12 dim 1 : vector<16x512xf32>, i32 -> vector<16x512xf32>
    %35 = vector.broadcast %33 : vector<1x512xf32> to vector<16x512xf32>
    %36 = arith.mulf %34, %35 : vector<16x512xf32>
    %37 = arith.maximumf %32, %36 : vector<16x512xf32>
    %c0_13 = arith.constant 0 : index
    %c0_14 = arith.constant 0 : index
    %38 = vector.load %arg5[%c0_13, %c0_14] : memref<512x256xf32, #tpu.memory_space<vmem>>, vector<512x256xf32>
    %cst_15 = arith.constant dense<0.000000e+00> : vector<16x256xf32>
    %39 = tpu.matmul %37, %38, %cst_15 {dimension_numbers = #tpu.dot_dimension_numbers<[1], [0], [0], [1], [0, 0, 1, 1], [], []>, precision = #tpu.contract_precision<fp32>} : vector<16x512xf32>, vector<512x256xf32>, vector<16x256xf32> -> vector<16x256xf32>
    %c0_16 = arith.constant 0 : index
    %c0_17 = arith.constant 0 : index
    %40 = vector.load %arg6[%c0_16, %c0_17] : memref<32x48xf32, #tpu.memory_space<vmem>>, vector<32x48xf32>
    %c0_18 = arith.constant 0 : index
    %c0_19 = arith.constant 0 : index
    %41 = vector.load %arg7[%c0_18, %c0_19] : memref<32x1xf32, #tpu.memory_space<vmem>>, vector<32x1xf32>
    %42 = vector.extract_strided_slice %1 {offsets = [0, 0], sizes = [1, 256], strides = [1, 1]} : vector<2x256xf32> to vector<1x256xf32>
    %c1_i32_20 = arith.constant 1 : i32
    %43 = tpu.dynamic_rotate %39 by %c1_i32_20 dim 1 : vector<16x256xf32>, i32 -> vector<16x256xf32>
    %44 = vector.broadcast %42 : vector<1x256xf32> to vector<16x256xf32>
    %45 = arith.mulf %43, %44 : vector<16x256xf32>
    %46 = vector.extract_strided_slice %1 {offsets = [1, 0], sizes = [1, 256], strides = [1, 1]} : vector<2x256xf32> to vector<1x256xf32>
    %c255_i32 = arith.constant 255 : i32
    %47 = tpu.dynamic_rotate %39 by %c255_i32 dim 1 : vector<16x256xf32>, i32 -> vector<16x256xf32>
    %48 = vector.broadcast %46 : vector<1x256xf32> to vector<16x256xf32>
    %49 = arith.mulf %47, %48 : vector<16x256xf32>
    %50 = tpu.concatenate %45, %39, %49 in 0 : vector<16x256xf32>, vector<16x256xf32>, vector<16x256xf32> -> vector<48x256xf32>
    %cst_21 = arith.constant dense<0.000000e+00> : vector<32x256xf32>
    %51 = tpu.matmul %40, %50, %cst_21 {dimension_numbers = #tpu.dot_dimension_numbers<[1], [0], [0], [1], [0, 0, 1, 1], [], []>, precision = #tpu.contract_precision<fp32>} : vector<32x48xf32>, vector<48x256xf32>, vector<32x256xf32> -> vector<32x256xf32>
    %52 = vector.broadcast %41 : vector<32x1xf32> to vector<32x256xf32>
    %53 = arith.addf %51, %52 : vector<32x256xf32>
    %cst_22 = arith.constant 0.000000e+00 : f32
    %54 = vector.broadcast %cst_22 : f32 to vector<32x256xf32>
    %55 = arith.maximumf %53, %54 : vector<32x256xf32>
    %56 = vector.extract_strided_slice %1 {offsets = [1, 0], sizes = [1, 256], strides = [1, 1]} : vector<2x256xf32> to vector<1x256xf32>
    %c255_i32_23 = arith.constant 255 : i32
    %57 = tpu.dynamic_rotate %55 by %c255_i32_23 dim 1 : vector<32x256xf32>, i32 -> vector<32x256xf32>
    %58 = vector.broadcast %56 : vector<1x256xf32> to vector<32x256xf32>
    %59 = arith.mulf %57, %58 : vector<32x256xf32>
    %60 = arith.maximumf %55, %59 : vector<32x256xf32>
    %c0_24 = arith.constant 0 : index
    %c0_25 = arith.constant 0 : index
    %61 = vector.load %arg9[%c0_24, %c0_25] : memref<256x128xf32, #tpu.memory_space<vmem>>, vector<256x128xf32>
    %cst_26 = arith.constant dense<0.000000e+00> : vector<32x128xf32>
    %62 = tpu.matmul %60, %61, %cst_26 {dimension_numbers = #tpu.dot_dimension_numbers<[1], [0], [0], [1], [0, 0, 1, 1], [], []>, precision = #tpu.contract_precision<fp32>} : vector<32x256xf32>, vector<256x128xf32>, vector<32x128xf32> -> vector<32x128xf32>
    %c0_27 = arith.constant 0 : index
    %c0_28 = arith.constant 0 : index
    %63 = vector.load %arg10[%c0_27, %c0_28] : memref<64x96xf32, #tpu.memory_space<vmem>>, vector<64x96xf32>
    %c0_29 = arith.constant 0 : index
    %c0_30 = arith.constant 0 : index
    %64 = vector.load %arg11[%c0_29, %c0_30] : memref<64x1xf32, #tpu.memory_space<vmem>>, vector<64x1xf32>
    %65 = vector.extract_strided_slice %2 {offsets = [0, 0], sizes = [1, 128], strides = [1, 1]} : vector<2x128xf32> to vector<1x128xf32>
    %c1_i32_31 = arith.constant 1 : i32
    %66 = tpu.dynamic_rotate %62 by %c1_i32_31 dim 1 : vector<32x128xf32>, i32 -> vector<32x128xf32>
    %67 = vector.broadcast %65 : vector<1x128xf32> to vector<32x128xf32>
    %68 = arith.mulf %66, %67 : vector<32x128xf32>
    %69 = vector.extract_strided_slice %2 {offsets = [1, 0], sizes = [1, 128], strides = [1, 1]} : vector<2x128xf32> to vector<1x128xf32>
    %c127_i32 = arith.constant 127 : i32
    %70 = tpu.dynamic_rotate %62 by %c127_i32 dim 1 : vector<32x128xf32>, i32 -> vector<32x128xf32>
    %71 = vector.broadcast %69 : vector<1x128xf32> to vector<32x128xf32>
    %72 = arith.mulf %70, %71 : vector<32x128xf32>
    %73 = tpu.concatenate %68, %62, %72 in 0 : vector<32x128xf32>, vector<32x128xf32>, vector<32x128xf32> -> vector<96x128xf32>
    %cst_32 = arith.constant dense<0.000000e+00> : vector<64x128xf32>
    %74 = tpu.matmul %63, %73, %cst_32 {dimension_numbers = #tpu.dot_dimension_numbers<[1], [0], [0], [1], [0, 0, 1, 1], [], []>, precision = #tpu.contract_precision<fp32>} : vector<64x96xf32>, vector<96x128xf32>, vector<64x128xf32> -> vector<64x128xf32>
    %75 = vector.broadcast %64 : vector<64x1xf32> to vector<64x128xf32>
    %76 = arith.addf %74, %75 : vector<64x128xf32>
    %cst_33 = arith.constant 0.000000e+00 : f32
    %77 = vector.broadcast %cst_33 : f32 to vector<64x128xf32>
    %78 = arith.maximumf %76, %77 : vector<64x128xf32>
    %79 = vector.extract_strided_slice %2 {offsets = [1, 0], sizes = [1, 128], strides = [1, 1]} : vector<2x128xf32> to vector<1x128xf32>
    %c127_i32_34 = arith.constant 127 : i32
    %80 = tpu.dynamic_rotate %78 by %c127_i32_34 dim 1 : vector<64x128xf32>, i32 -> vector<64x128xf32>
    %81 = vector.broadcast %79 : vector<1x128xf32> to vector<64x128xf32>
    %82 = arith.mulf %80, %81 : vector<64x128xf32>
    %83 = arith.maximumf %78, %82 : vector<64x128xf32>
    %c0_35 = arith.constant 0 : index
    %c0_36 = arith.constant 0 : index
    %84 = vector.load %arg13[%c0_35, %c0_36] : memref<64x128xf32, #tpu.memory_space<vmem>>, vector<64x128xf32>
    %85 = tpu.transpose %83, [1, 0] : vector<64x128xf32> -> vector<128x64xf32>
    %cst_37 = arith.constant dense<0.000000e+00> : vector<64x64xf32>
    %86 = tpu.matmul %84, %85, %cst_37 {dimension_numbers = #tpu.dot_dimension_numbers<[1], [0], [0], [1], [0, 0, 1, 1], [], []>, precision = #tpu.contract_precision<fp32>} : vector<64x128xf32>, vector<128x64xf32>, vector<64x64xf32> -> vector<64x64xf32>
    %87 = vector.shape_cast %86 : vector<64x64xf32> to vector<8x8x64xf32>
    %c0_38 = arith.constant 0 : index
    %c0_39 = arith.constant 0 : index
    %c0_40 = arith.constant 0 : index
    %88 = vector.load %arg14[%c0_38, %c0_39, %c0_40] : memref<8x64x128xf32, #tpu.memory_space<vmem>>, vector<8x64x128xf32>
    "tpu.trace_start"() <{level = 10 : i32, message = "psc,pcj->psj"}> : () -> ()
    %cst_41 = arith.constant dense<0.000000e+00> : vector<8x8x128xf32>
    %89 = tpu.matmul %87, %88, %cst_41 {dimension_numbers = #tpu.dot_dimension_numbers<[2], [1], [1], [2], [0, 0, 0, 1, 1, 2], [0], [0]>, precision = #tpu.contract_precision<fp32>} : vector<8x8x64xf32>, vector<8x64x128xf32>, vector<8x8x128xf32> -> vector<8x8x128xf32>
    "tpu.trace_stop"() : () -> ()
    %cst_42 = arith.constant dense<0.000000e+00> : vector<8x128xf32>
    %90 = vector.multi_reduction <add>, %89, %cst_42 [0] : vector<8x8x128xf32> to vector<8x128xf32>
    %c0_43 = arith.constant 0 : index
    %c0_44 = arith.constant 0 : index
    %91 = vector.load %arg15[%c0_43, %c0_44] : memref<1x128xf32, #tpu.memory_space<vmem>>, vector<1x128xf32>
    %92 = vector.broadcast %91 : vector<1x128xf32> to vector<8x128xf32>
    %93 = arith.addf %90, %92 : vector<8x128xf32>
    %cst_45 = arith.constant 0.000000e+00 : f32
    %94 = vector.broadcast %cst_45 : f32 to vector<8x128xf32>
    %95 = arith.maximumf %93, %94 : vector<8x128xf32>
    %c0_46 = arith.constant 0 : index
    %c0_47 = arith.constant 0 : index
    %96 = vector.load %arg16[%c0_46, %c0_47] : memref<128x128xf32, #tpu.memory_space<vmem>>, vector<128x128xf32>
    %cst_48 = arith.constant dense<0.000000e+00> : vector<8x128xf32>
    %97 = tpu.matmul %95, %96, %cst_48 {dimension_numbers = #tpu.dot_dimension_numbers<[1], [0], [0], [1], [0, 0, 1, 1], [], []>, precision = #tpu.contract_precision<fp32>} : vector<8x128xf32>, vector<128x128xf32>, vector<8x128xf32> -> vector<8x128xf32>
    %c0_49 = arith.constant 0 : index
    %c0_50 = arith.constant 0 : index
    %98 = vector.load %arg17[%c0_49, %c0_50] : memref<1x128xf32, #tpu.memory_space<vmem>>, vector<1x128xf32>
    %99 = vector.broadcast %98 : vector<1x128xf32> to vector<8x128xf32>
    %100 = arith.addf %97, %99 : vector<8x128xf32>
    %c0_51 = arith.constant 0 : index
    %c0_52 = arith.constant 0 : index
    %c0_53 = arith.constant 0 : index
    %101 = vector.load %arg18[%c0_51, %c0_52, %c0_53] : memref<1x8x128xf32, #tpu.memory_space<vmem>>, vector<1x8x128xf32>
    %102 = vector.shape_cast %101 : vector<1x8x128xf32> to vector<8x128xf32>
    %103 = vector.shape_cast %100 : vector<8x128xf32> to vector<1x8x128xf32>
    tpu.vector_store %arg18[%c0_51, %c0_52, %c0_53], %103 {strides = array<i32>} : memref<1x8x128xf32, #tpu.memory_space<vmem>>, vector<1x8x128xf32>,
    return
  }
  func.func @transform_0(%arg0: i32) -> (i32, i32) {
    %c0_i32 = arith.constant 0 : i32
    %c0_i32_0 = arith.constant 0 : i32
    return %c0_i32, %arg0 : i32, i32
  }
  func.func @transform_1(%arg0: i32) -> (i32, i32, i32) {
    %c0_i32 = arith.constant 0 : i32
    %c0_i32_0 = arith.constant 0 : i32
    %c0_i32_1 = arith.constant 0 : i32
    %c0_i32_2 = arith.constant 0 : i32
    return %c0_i32, %c0_i32_0, %c0_i32_1 : i32, i32, i32
  }
  func.func @transform_2(%arg0: i32) -> (i32, i32) {
    %c0_i32 = arith.constant 0 : i32
    %c0_i32_0 = arith.constant 0 : i32
    %c0_i32_1 = arith.constant 0 : i32
    return %c0_i32, %c0_i32_0 : i32, i32
  }
  func.func @transform_3(%arg0: i32) -> (i32, i32) {
    %c0_i32 = arith.constant 0 : i32
    %c0_i32_0 = arith.constant 0 : i32
    %c0_i32_1 = arith.constant 0 : i32
    return %c0_i32, %c0_i32_0 : i32, i32
  }
  func.func @transform_4(%arg0: i32) -> (i32, i32) {
    %c0_i32 = arith.constant 0 : i32
    %c0_i32_0 = arith.constant 0 : i32
    %c0_i32_1 = arith.constant 0 : i32
    return %c0_i32, %c0_i32_0 : i32, i32
  }
  func.func @transform_5(%arg0: i32) -> (i32, i32) {
    %c0_i32 = arith.constant 0 : i32
    %c0_i32_0 = arith.constant 0 : i32
    %c0_i32_1 = arith.constant 0 : i32
    return %c0_i32, %c0_i32_0 : i32, i32
  }
  func.func @transform_6(%arg0: i32) -> (i32, i32) {
    %c0_i32 = arith.constant 0 : i32
    %c0_i32_0 = arith.constant 0 : i32
    %c0_i32_1 = arith.constant 0 : i32
    return %c0_i32, %c0_i32_0 : i32, i32
  }
  func.func @transform_7(%arg0: i32) -> (i32, i32) {
    %c0_i32 = arith.constant 0 : i32
    %c0_i32_0 = arith.constant 0 : i32
    %c0_i32_1 = arith.constant 0 : i32
    return %c0_i32, %c0_i32_0 : i32, i32
  }
  func.func @transform_8(%arg0: i32) -> (i32, i32) {
    %c0_i32 = arith.constant 0 : i32
    %c0_i32_0 = arith.constant 0 : i32
    %c0_i32_1 = arith.constant 0 : i32
    return %c0_i32, %c0_i32_0 : i32, i32
  }
  func.func @transform_9(%arg0: i32) -> (i32, i32) {
    %c0_i32 = arith.constant 0 : i32
    %c0_i32_0 = arith.constant 0 : i32
    %c0_i32_1 = arith.constant 0 : i32
    return %c0_i32, %c0_i32_0 : i32, i32
  }
  func.func @transform_10(%arg0: i32) -> (i32, i32) {
    %c0_i32 = arith.constant 0 : i32
    %c0_i32_0 = arith.constant 0 : i32
    %c0_i32_1 = arith.constant 0 : i32
    return %c0_i32, %c0_i32_0 : i32, i32
  }
  func.func @transform_11(%arg0: i32) -> (i32, i32) {
    %c0_i32 = arith.constant 0 : i32
    %c0_i32_0 = arith.constant 0 : i32
    %c0_i32_1 = arith.constant 0 : i32
    return %c0_i32, %c0_i32_0 : i32, i32
  }
  func.func @transform_12(%arg0: i32) -> (i32, i32) {
    %c0_i32 = arith.constant 0 : i32
    %c0_i32_0 = arith.constant 0 : i32
    %c0_i32_1 = arith.constant 0 : i32
    return %c0_i32, %c0_i32_0 : i32, i32
  }
  func.func @transform_13(%arg0: i32) -> (i32, i32, i32) {
    %c0_i32 = arith.constant 0 : i32
    %c0_i32_0 = arith.constant 0 : i32
    %c0_i32_1 = arith.constant 0 : i32
    %c0_i32_2 = arith.constant 0 : i32
    return %c0_i32, %c0_i32_0, %c0_i32_1 : i32, i32, i32
  }
  func.func @transform_14(%arg0: i32) -> (i32, i32) {
    %c0_i32 = arith.constant 0 : i32
    %c0_i32_0 = arith.constant 0 : i32
    %c0_i32_1 = arith.constant 0 : i32
    return %c0_i32, %c0_i32_0 : i32, i32
  }
  func.func @transform_15(%arg0: i32) -> (i32, i32) {
    %c0_i32 = arith.constant 0 : i32
    %c0_i32_0 = arith.constant 0 : i32
    %c0_i32_1 = arith.constant 0 : i32
    return %c0_i32, %c0_i32_0 : i32, i32
  }
  func.func @transform_16(%arg0: i32) -> (i32, i32) {
    %c0_i32 = arith.constant 0 : i32
    %c0_i32_0 = arith.constant 0 : i32
    %c0_i32_1 = arith.constant 0 : i32
    return %c0_i32, %c0_i32_0 : i32, i32
  }
  func.func @transform_17(%arg0: i32) -> (i32, i32, i32) {
    %c0_i32 = arith.constant 0 : i32
    %c0_i32_0 = arith.constant 0 : i32
    %c0_i32_1 = arith.constant 0 : i32
    return %arg0, %c0_i32, %c0_i32_0 : i32, i32, i32
  }
}

</mosaic_0001>

<bundles_post_ra>
// kernel: tpu_custom_call.1
= control target key start
LH: loop header
LB: loop body
LE: loop exit
PB: predicated region body
PF: predicated region fallthrough
CT: control target
= control target key end

     0   :  { %s24255_s0 = inlined_call_operand.vmem [shape: f32[1,1024], index: 0, kind: input, shape index: {}]   ;;  %s24256_s1 = inlined_call_operand.vmem [shape: f32[3,16,1], index: 1, kind: input, shape index: {}]   ;;  %s24257_s2 = inlined_call_operand.vmem [shape: f32[16,1], index: 2, kind: input, shape index: {}]   ;;  %s24258_s3 = inlined_call_operand.vmem [shape: f32[2,512], index: 3, kind: input, shape index: {}]   ;;  %s24259_s4 = inlined_call_operand.hbm [shape: f32[512,256], index: 4, kind: input, shape index: {}]   ;;  %s24260_s5 = inlined_call_operand.hbm [shape: f32[32,48], index: 5, kind: input, shape index: {}]   ;;  %s24261_s6 = inlined_call_operand.vmem [shape: f32[32,1], index: 6, kind: input, shape index: {}]   ;;  %s24262_s7 = inlined_call_operand.vmem [shape: f32[2,256], index: 7, kind: input, shape index: {}]   ;;  %s24263_s8 = inlined_call_operand.hbm [shape: f32[256,128], index: 8, kind: input, shape index: {}]   ;;  %s24264_s9 = inlined_call_operand.vmem [shape: f32[64,96], index: 9, kind: input, shape index: {}]   ;;  %s24265_s10 = inlined_call_operand.vmem [shape: f32[64,1], index: 10, kind: input, shape index: {}]   ;;  %s24266_s11 = inlined_call_operand.vmem [shape: f32[2,128], index: 11, kind: input, shape index: {}]   ;;  %s24267_s12 = inlined_call_operand.hbm [shape: f32[64,128], index: 12, kind: input, shape index: {}]   ;;  %s24268_s13 = inlined_call_operand.hbm [shape: f32[8,64,128], index: 13, kind: input, shape index: {}]   ;;  %s24269_s14 = inlined_call_operand.vmem [shape: f32[1,128], index: 14, kind: input, shape index: {}]   ;;  %s24270_s15 = inlined_call_operand.vmem [shape: f32[128,128], index: 15, kind: input, shape index: {}]   ;;  %s24271_s16 = inlined_call_operand.vmem [shape: f32[1,128], index: 16, kind: input, shape index: {}]   ;;  %s24272_s17 = inlined_call_operand.hbm [shape: f32[2,8,128], index: 17, kind: output, shape index: {}]  }
   0x1   :  { %25029 = sst [smem:[#allocation123_spill]] %s24255_s0 }
   0x2   :  { %25030 = sst [smem:[#allocation124_spill]] %s24256_s1 }
   0x3   :  { %25031 = sst [smem:[#allocation125_spill]] %s24260_s5 }
   0x4   :  { %25032 = sst [smem:[#allocation126_spill]] %s24267_s12 }
   0x5   :  { %25033 = sst [smem:[#allocation127_spill]] %s24269_s14 }
   0x6   :  { %25034 = sst [smem:[#allocation128_spill]] %s24271_s16 }
   0x7   :  { %25035 = sst [smem:[#allocation129_spill]] %s24272_s17 }
   0x8   :  { %22 = vsyncpa [#allocation3], 0 }
   0x9   :  { %23 = vsyncpa [#allocation6], 0 }
   0xa   :  { %24 = vsyncpa [#allocation9], 0 }
   0xb   :  { %25 = vsyncpa [#allocation4], 0 }
   0xc   :  { %27 = vsyncpa [#allocation4 + $0x1], 0  ;;  %s17918_s24 = smov 0   ;;  %s17920_s25 = smov 0  }
   0xd   :  { %s17922_s26 = smov 0   ;;  %s17924_s27 = smov 0  }
   0xe LB: > { %25036 = sst [smem:[#allocation16_spill]] %s17798_s24  ;;  %s17939_s28 = sadd.s32 4294967295, %s17810_s27   ;;  %s17810_s27 = sphi %s17924_s27, %s26217_s27   ;;  %s17806_s26 = sphi %s17922_s26, %s26220_s26   ;;  %s17802_s25 = sphi %s17920_s25, %s26219_s25   ;;  %s17798_s24 = sphi %s17918_s24, %s26218_s24  }
   0xf   : > { %25037 = sst [smem:[#allocation17_spill]] %s17802_s25  ;;  %s12770_s29 = sadd.s32 4294967294, %s17810_s27  }
  0x10   : > { %25038 = sst [smem:[#allocation18_spill]] %s17806_s26  ;;  %s17943_s0 = sadd.s32 1, %s17810_s27  }
  0x11   : > { %25039 = sst [smem:[#allocation19_spill]] %s17810_s27  ;;  %s402_s30 = sadd.s32 1, %s17806_s26 }
  0x12   : > { %25040 = sst [smem:[#allocation20_spill]] %s17943_s0  ;;  %s399_s18 = ssub.s32 %s17810_s27, %s17943_s0 }
  0x13   : > { %p412_p0 = scmp.ne.s32.totalorder %s17806_s26, %s17802_s25  ;;  %p400_p1 = scmp.eq.s32.totalorder %s399_s18, 0 }
  0x14   : > { %p413_p2 = scmp.eq.s32.totalorder %s17939_s28, 1  ;;  %p418_p3 = scmp.ne.s32.totalorder %s17802_s25, %s17798_s24 }
  0x15   : > { %p419_p4 = scmp.eq.s32.totalorder %s12770_s29, 1  ;;  %p12771_p7 = scmp.ge.s32.totalorder %s17810_s27, 1 }
  0x16   : > { %s17954_s19 = scalar_select %p400_p1, %s17806_s26, %s402_s30  }
  0x17   : > { %p17956_p5 = por %p413_p2, %p412_p0  ;;  %p17960_p6 = por %p419_p4, %p418_p3 }
  0x18   : > { %25041 = sst [smem:[#allocation21_spill]] %s17954_s19  ;;  %p426_p8 = scmp.lt.s32.totalorder %s17810_s27, 3 }
  0x19   : > { %s25042_s1 = scalar_select %p17956_p5, 1, 0 }
  0x1a   : > { %s25044_s20 = scalar_select %p17960_p6, 1, 0 }
  0x1b   : > { %25043 = sst [smem:[#allocation22_spill]] %s25042_s1  ;;  %p24281_p9 = scmp.eq.s32.totalorder %s17939_s28, 0 }
  0x1c   : > { %25045 = sst [smem:[#allocation23_spill]] %s25044_s20  ;;  %p17967_p10 = pnand %p12771_p7, %p426_p8 }
  0x1d   : > { %s17812_s22 = smov [#allocation5]   ;;  %s17813_s30 = smov [#allocation8]  }
  0x1e   : > { %s25046_s21 = scalar_select %p17967_p10, 1, 0 }
  0x1f   : > { %s460_s23 = sshll.u32 %s17812_s22, 4  ;;  %p17516_p11 = pneg %p17967_p10  ;;  %s17973_s23 = int_to_ptr.vmem [resolvable:$true] %s460_s23 }
  0x20   : > { %s501_s18 = sshll.u32 %s17813_s30, 4  ;;  %s17814_s19 = smov [#allocation2]   ;;  %s17981_s18 = int_to_ptr.vmem [resolvable:$true] %s501_s18 }
  0x21   : > { %p17977_p12 = pnand %p24281_p9, %p17516_p11  ;;  %s17983_s26 = sshll.u32 %s17814_s19, 4  ;;  %s448_s26 = int_to_ptr.vmem [resolvable:$true] %s17983_s26 }
  0x22   : > { %s25048_s5 = sld [smem:[#allocation125_spill]] }
  0x23   : > { %p17993_p0 = pneg %p17977_p12 }
  0x28   : > { %s17596_s22 = scalar_lea.hbm %s25048_s5, 512 }
  0x29   : > { %p17597_p13 = scmp.ne.s32.totalorder %s25048_s5, %s17596_s22  ;;  %p17603_p3 = scmp.lt.u32.totalorder %s17596_s22, %s25048_s5 }
  0x2b   : > { %p17599_p1 = pnand %p17993_p0, %p17597_p13 }
  0x2d   : > { %p17600_p2 = pneg %p17599_p1 }
  0x2f   : > { %p17605_p4 = pnand %p17603_p3, %p17600_p2 }
  0x31   : > { %17608 = shalt.err (!%p17605_p4)
}
  0x32   : > { %s17609_s24 = scalar_lea.vmem %s17973_s23, 512  ;;  %p17617_p9 = scmp.lt.s32.totalorder %s17973_s23, %s17973_s23 }
  0x33   : > { %p17610_p7 = scmp.ne.s32.totalorder %s17973_s23, %s17609_s24  ;;  %p17618_p6 = scmp.lt.s32.totalorder %s17609_s24, %s17609_s24 }
  0x35   : > { %p17612_p8 = pnand %p17610_p7, %p17993_p0  ;;  %p17619_p13 = por %p17618_p6, %p17617_p9 }
  0x37   : > { %p17613_p11 = pneg %p17612_p8 }
  0x39   : > { %p17620_p1 = pnand %p17619_p13, %p17613_p11 }
  0x3b   : > { %17623 = shalt.err (!%p17620_p1)
}
  0x3c   : > { %s24287_s27 = smov 128   ;;  %s24289_s0 = smov 8  }
  0x3d   : > { %17522 = dma.hbm_to_vmem [thread:$0]  (!%p17977_p12), %s25048_s5, 512, %s17973_s23, [#allocation6], %s24287_s27, %s24287_s27, %s24289_s0  }
  0x3e   : > { %s25050_s12 = sld [smem:[#allocation126_spill]] }
  0x44   : > { %s17624_s24 = scalar_lea.hbm %s25050_s12, 1024 }
  0x45   : > { %p17625_p6 = scmp.ne.s32.totalorder %s25050_s12, %s17624_s24  ;;  %p17631_p3 = scmp.lt.u32.totalorder %s17624_s24, %s25050_s12 }
  0x47   : > { %p17627_p9 = pnand %p17625_p6, %p17993_p0 }
  0x49   : > { %p17628_p2 = pneg %p17627_p9 }
  0x4b   : > { %p17633_p4 = pnand %p17631_p3, %p17628_p2 }
  0x4d   : > { %17636 = shalt.err (!%p17633_p4)
}
  0x4e   : > { %s17637_s23 = scalar_lea.vmem %s17981_s18, 1024  ;;  %p17645_p13 = scmp.lt.s32.totalorder %s17981_s18, %s17981_s18 }
  0x4f   : > { %p17638_p7 = scmp.ne.s32.totalorder %s17981_s18, %s17637_s23  ;;  %p17646_p1 = scmp.lt.s32.totalorder %s17637_s23, %s17637_s23 }
  0x51   : > { %p17640_p8 = pnand %p17638_p7, %p17993_p0  ;;  %p17647_p6 = por %p17646_p1, %p17645_p13 }
  0x53   : > { %p17641_p11 = pneg %p17640_p8 }
  0x55   : > { %p17648_p9 = pnand %p17647_p6, %p17641_p11 }
  0x57   : > { %17651 = shalt.err (!%p17648_p9)
}
  0x58   : > { %17528 = dma.hbm_to_vmem [thread:$0]  (!%p17977_p12), %s25050_s12, 1024, %s17981_s18, [#allocation9], %s24287_s27, %s24287_s27, %s24289_s0  }
  0x59   : > { %s17652_s20 = scalar_lea.hbm %s24259_s4, 16384 }
  0x5a   : > { %p17653_p2 = scmp.ne.s32.totalorder %s24259_s4, %s17652_s20  ;;  %p17659_p7 = scmp.lt.u32.totalorder %s17652_s20, %s24259_s4 }
  0x5c   : > { %p17655_p3 = pnand %p17653_p2, %p17993_p0 }
  0x5e   : > { %p17656_p4 = pneg %p17655_p3 }
  0x60   : > { %p17661_p8 = pnand %p17659_p7, %p17656_p4 }
  0x62   : > { %17664 = shalt.err (!%p17661_p8)
}
  0x63   : > { %s17665_s23 = scalar_lea.vmem %s448_s26, 16384  ;;  %p17673_p6 = scmp.lt.s32.totalorder %s448_s26, %s448_s26 }
  0x64   : > { %p17666_p11 = scmp.ne.s32.totalorder %s448_s26, %s17665_s23  ;;  %p17674_p9 = scmp.lt.s32.totalorder %s17665_s23, %s17665_s23 }
  0x66   : > { %p17668_p13 = pnand %p17666_p11, %p17993_p0  ;;  %p17675_p5 = por %p17674_p9, %p17673_p6 }
  0x68   : > { %p17669_p1 = pneg %p17668_p13 }
  0x6a   : > { %p17676_p10 = pnand %p17675_p5, %p17669_p1 }
  0x6c   : > { %17679 = shalt.err (!%p17676_p10)
}
  0x6d   : > { %s17817_s18 = smov 256   ;;  %s17818_s14 = smov 16  }
  0x6e   : > { %17519 = dma.hbm_to_vmem [thread:$0]  (!%p17977_p12), %s24259_s4, 16384, %s448_s26, [#allocation3], %s17817_s18, %s17817_s18, %s17818_s14  }
  0x6f   : > { %s17819_s1 = smov [#allocation7]   ;;  %s17820_s22 = smov [#allocation10]  }
  0x70   : > { %s479_s20 = sshll.u32 %s17819_s1, 4  ;;  %s514_s30 = sshll.u32 %s17820_s22, 4  ;;  %s480_s20 = int_to_ptr.vmem [resolvable:$true] %s479_s20  ;;  %s515_s30 = int_to_ptr.vmem [resolvable:$true] %s514_s30 }
  0x71   : > { %s17680_s23 = scalar_lea.hbm %s24263_s8, 4096 }
  0x72   : > { %p17681_p5 = scmp.ne.s32.totalorder %s24263_s8, %s17680_s23  ;;  %p17687_p3 = scmp.lt.u32.totalorder %s17680_s23, %s24263_s8 }
  0x74   : > { %p17683_p10 = pnand %p17681_p5, %p17993_p0 }
  0x76   : > { %p17684_p2 = pneg %p17683_p10 }
  0x78   : > { %p17689_p4 = pnand %p17687_p3, %p17684_p2 }
  0x7a   : > { %17692 = shalt.err (!%p17689_p4)
}
  0x7b   : > { %s17693_s26 = scalar_lea.vmem %s480_s20, 4096  ;;  %p17701_p13 = scmp.lt.s32.totalorder %s480_s20, %s480_s20 }
  0x7c   : > { %p17694_p7 = scmp.ne.s32.totalorder %s480_s20, %s17693_s26  ;;  %p17702_p1 = scmp.lt.s32.totalorder %s17693_s26, %s17693_s26 }
  0x7e   : > { %p17696_p8 = pnand %p17694_p7, %p17993_p0  ;;  %p17703_p6 = por %p17702_p1, %p17701_p13 }
  0x80   : > { %p17697_p11 = pneg %p17696_p8 }
  0x82   : > { %p17704_p9 = pnand %p17703_p6, %p17697_p11 }
  0x84   : > { %17707 = shalt.err (!%p17704_p9)
}
  0x85   : > { %s25051_s27 = smov 8   ;;  %s25052_s0 = smov 128  }
  0x86   : > { %17525 = dma.hbm_to_vmem [thread:$0]  (!%p17977_p12), %s24263_s8, 4096, %s480_s20, [#allocation6], %s25052_s0, %s25052_s0, %s25051_s27  }
  0x87   : > { %s17708_s16 = scalar_lea.hbm %s24268_s13, 8192 }
  0x88   : > { %p17709_p5 = scmp.ne.s32.totalorder %s24268_s13, %s17708_s16  ;;  %p17715_p3 = scmp.lt.u32.totalorder %s17708_s16, %s24268_s13 }
  0x8a   : > { %p17711_p10 = pnand %p17709_p5, %p17993_p0 }
  0x8c   : > { %p17712_p2 = pneg %p17711_p10 }
  0x8e   : > { %p17717_p4 = pnand %p17715_p3, %p17712_p2 }
  0x90   : > { %17720 = shalt.err (!%p17717_p4)
}
  0x91   : > { %s17721_s24 = scalar_lea.vmem %s515_s30, 8192  ;;  %p17729_p13 = scmp.lt.s32.totalorder %s515_s30, %s515_s30 }
  0x92   : > { %p17722_p7 = scmp.ne.s32.totalorder %s515_s30, %s17721_s24  ;;  %p17730_p1 = scmp.lt.s32.totalorder %s17721_s24, %s17721_s24 }
  0x94   : > { %p17724_p8 = pnand %p17722_p7, %p17993_p0  ;;  %p17731_p6 = por %p17730_p1, %p17729_p13 }
  0x96   : > { %p17725_p11 = pneg %p17724_p8 }
  0x98   : > { %p17732_p9 = pnand %p17731_p6, %p17725_p11 }
  0x9a   : > { %17735 = shalt.err (!%p17732_p9)
}
  0x9b   : > { %17531 = dma.hbm_to_vmem [thread:$0]  (!%p17977_p12), %s24268_s13, 8192, %s515_s30, [#allocation9], %s25052_s0, %s25052_s0, %s25051_s27  }
  0x9c   : > { %p25053_p5 = scmp.ne.s32.totalorder %s25046_s21, 0 }
  0x9e   : > { %547 = sbr.rel (%p25053_p5) target bundleno = 4341 (0x10f5), region = 88 }
  0xa5   : > { %p25054_p0 = scmp.eq.s32.totalorder %s17939_s28, 0 }
  0xa7   : > { %17781 = dma.done.wait (%p25054_p0), [#allocation3], 16384   ;;  %p25055_p10 = pmov %p25054_p0 }
  0xa8   : > { %p25056_p2 = pmov %p25054_p0 }
  0xa9   : > { %17783 = vsyncadd (%p25055_p10), [#allocation3], 4294950912 }
  0xaa   : > { %17785 = dma.done.wait (%p25056_p2), [#allocation6], 4608   ;;  %p25057_p3 = pmov %p25054_p0 }
  0xab   : > { %p25058_p4 = pmov %p25054_p0 }
  0xac   : > { %17787 = vsyncadd (%p25057_p3), [#allocation6], 4294962688 }
  0xad   : > { %17789 = dma.done.wait (%p25058_p4), [#allocation9], 9216   ;;  %p25059_p12 = pmov %p25054_p0 }
  0xae   : > { %s12785_s17 = sshll.u32 %s17939_s28, 2  ;;  %v24305_v0 = vlaneseq  ;;  %v17821_v1 = vmov 0   ;;  %s25060_s30 = sld [smem:[#allocation123_spill]]  ;;  %v829_v15 = vld [vmem:[%s24257_s2] sm:$0xff]  ;;  %v830_v19 = vld [vmem:[%s24257_s2 + $0x8] sm:$0xff]  ;;  %v916_v21 = vld [vmem:[#allocation2 + $0x18] sm:$0xff] }
  0xaf   : > { %17791 = vsyncadd (%p25059_p12), [#allocation9], 4294958080  ;;  %17595 = vset.pattern.permute.xlu1 %v17821_v1  ;;  %17594 = vset.pattern.permute.xlu0 %v17821_v1  ;;  %p615_p7 = scmp.lt.s32.totalorder %s12785_s17, 7  ;;  %s25062_s5 = sld [smem:[#allocation124_spill]]  ;;  %v914_v20 = vld [vmem:[#allocation2 + $0x8] sm:$0xff]  ;;  %v18189_v22 = vld [vmem:[#allocation2] sm:$0xff] }
  0xb0   : > { %v18120_v2 = vshrl.u32 %v24305_v0, 7  ;;  %s17822_s25 = smov 1   ;;  %s17823_s1 = smov 127   ;;  %v1041_v23 = vand.u32 4294901760, %v914_v20  ;;  %v1045_v24 = vand.u32 4294901760, %v916_v21  ;;  %v18191_v25 = vld [vmem:[#allocation2 + $0x10] sm:$0xff] }
  0xb1   : > { %s26222_s17 = smov (!%p615_p7, %s12785_s17), 7  ;;  %v1043_v26 = vand.u32 4294901760, %v18189_v22  ;;  %v18194_v27 = vld [vmem:[#allocation2 + $0x28] sm:$0xff]  ;;  %v18196_v28 = vld [vmem:[#allocation2 + $0x38] sm:$0xff]  ;;  %v1047_v29 = vand.u32 4294901760, %v18191_v25  ;;  %v18201_v32 = vld [vmem:[#allocation2 + $0x20] sm:$0xff] }
  0xb2   : > { %v18126_v3 = vsub.s32 0, %v18120_v2  ;;  %v18135_v7 = vsub.s32 2, %v18120_v2  ;;  %v18138_v8 = vsub.s32 1, %v18120_v2  ;;  %v18155_v13 = vsub.s32 3, %v18120_v2  ;;  %v18203_v33 = vld [vmem:[#allocation2 + $0x30] sm:$0xff]  ;;  %v18265_v58 = vld [vmem:[#allocation2 + $0x48] sm:$0xff] }
  0xb3   : > { %v1049_v30 = vand.u32 4294901760, %v18194_v27  ;;  %v1053_v31 = vand.u32 4294901760, %v18196_v28  ;;  %v18205_v34 = vsub.f32 %v914_v20, %v1041_v23  ;;  %v18207_v35 = vsub.f32 %v916_v21, %v1045_v24  ;;  %v18267_v59 = vld [vmem:[#allocation2 + $0x58] sm:$0xff]  ;;  %v18281_v20 = vld [vmem:[#allocation2 + $0x68] sm:$0xff]  ;;  %s26197_s23 = sld [smem:[#allocation127_spill]]  ;;  %s26209_s21 = sld [smem:[#allocation22_spill]] }
  0xb4   : > { %s617_s26 = scalar_lea.vmem %s25060_s30, %s26222_s17  ;;  %25061 = vst [vmem:[#allocation24_spill] sm:$0xff] %v18126_v3  ;;  %25063 = vst [vmem:[#allocation25_spill] sm:$0xff] %v18135_v7  ;;  %v18212_v36 = vsub.f32 %v18189_v22, %v1043_v26  ;;  %v1051_v37 = vand.u32 4294901760, %v18201_v32  ;;  %v18216_v38 = vsub.f32 %v18191_v25, %v1047_v29  ;;  %v1055_v41 = vand.u32 4294901760, %v18203_v33  ;;  %v18283_v21 = vld [vmem:[#allocation2 + $0x78] sm:$0xff]  ;;  %s26208_s17 = sld [smem:[#allocation17_spill]] }
  0xb5   : > { %v627_v4 = vld [vmem:[%s25062_s5 + $0x20] sm:$0xff]  ;;  %25064 = vst [vmem:[#allocation26_spill] sm:$0xff] %v18138_v8  ;;  %v625_v9 = vld [vmem:[%s25062_s5 + $0x10] sm:$0xff]  ;;  %25065 = vst [vmem:[#allocation27_spill] sm:$0xff] %v18155_v13  ;;  %v18221_v39 = vsub.f32 %v18194_v27, %v1049_v30  ;;  %v18226_v40 = vsub.f32 %v18196_v28, %v1053_v31  ;;  %v24304_v42 = vand.u32 4294901760, %v18205_v34  ;;  %v24301_v43 = vand.u32 4294901760, %v18207_v35 }
  0xb6   : > { %v623_v5 = vld [vmem:[%s25062_s5] sm:$0xff]  ;;  %789 = vperm.xlu1 %17595, %v627_v4   ;;  %v624_v16 = vld [vmem:[%s25062_s5 + $0x8] sm:$0xff]  ;;  %v626_v17 = vld [vmem:[%s25062_s5 + $0x18] sm:$0xff]  ;;  %v24300_v44 = vand.u32 4294901760, %v18212_v36  ;;  %v18235_v45 = vsub.f32 %v18201_v32, %v1051_v37  ;;  %v24297_v46 = vand.u32 4294901760, %v18216_v38  ;;  %v18243_v49 = vsub.f32 %v18203_v33, %v1055_v41  ;;  %s12789_s27 = sshll.u32 %s17939_s28, 7 }
  0xb7   : > { %692 = vperm.xlu0 %17594, %v623_v5   ;;  %v622_v6 = vld [vmem:[%s617_s26] sm:$0xf]  ;;  %v628_v18 = vld [vmem:[%s25062_s5 + $0x28] sm:$0xff]  ;;  %v24296_v47 = vand.u32 4294901760, %v18221_v39  ;;  %v24295_v48 = vand.u32 4294901760, %v18226_v40  ;;  %v1205_v50 = vsub.f32 %v18205_v34, %v24304_v42  ;;  %v1217_v51 = vsub.f32 %v18207_v35, %v24301_v43  ;;  %s26210_s26 = sld [smem:[#allocation128_spill]] }
  0xb8   : > { %v18144_v10 = vrot.slane %v622_v6, %v18126_v3  ;;  %v18149_v11 = vrot.slane %v622_v6, %v18135_v7  ;;  %v18152_v12 = vrot.slane %v622_v6, %v18138_v8  ;;  %v18162_v14 = vrot.slane %v622_v6, %v18155_v13  ;;  %s26211_s16 = sld [smem:[#allocation129_spill]]  ;;  %s17827_s28 = smov [#allocation11]  }
  0xb9   : > { %v1211_v52 = vsub.f32 %v18212_v36, %v24300_v44  ;;  %v24294_v53 = vand.u32 4294901760, %v18235_v45  ;;  %v1223_v54 = vsub.f32 %v18216_v38, %v24297_v46  ;;  %v1229_v55 = vsub.f32 %v18221_v39, %v24296_v47  ;;  %p26212_p11 = scmp.ne.s32.totalorder %s26209_s21, 0  ;;  %s17740_s20 = sshll.u32 %s17827_s28, 4  ;;  %s17741_s20 = int_to_ptr.vmem [resolvable:$false] %s17740_s20 }
  0xba   : > { %650 = vrot.lane.b32.xlu1 %v18144_v10, %s17822_s25  ;;  %v1241_v56 = vsub.f32 %v18226_v40, %v24295_v48  ;;  %v24291_v57 = vand.u32 4294901760, %v18243_v49  ;;  %v1206_v60 = vand.u32 4294901760, %v1205_v50  ;;  %v1218_v61 = vand.u32 4294901760, %v1217_v51 }
  0xbb   : > { %726 = vperm.xlu0 %17594, %v625_v9   ;;  %v1212_v62 = vand.u32 4294901760, %v1211_v52  ;;  %v1235_v63 = vsub.f32 %v18235_v45, %v24294_v53  ;;  %v1224_v1 = vand.u32 4294901760, %v1223_v54  ;;  %v1230_v4 = vand.u32 4294901760, %v1229_v55  ;;  %v18275_v9 = vld [vmem:[#allocation2 + $0x40] sm:$0xff] }
  0xbc   : > { %v1242_v5 = vand.u32 4294901760, %v1241_v56  ;;  %v1247_v6 = vsub.f32 %v18243_v49, %v24291_v57  ;;  %v18285_v52 = vpack.c.bf16 %v1045_v24, %v1041_v23  ;;  %v1059_v56 = vand.u32 4294901760, %v18275_v9 }
  0xbd   : > { %v15378_v25 = vpack.c.bf16 %v1224_v1, %v1212_v62  ;;  %v18304_v24 = vpack.c.bf16 %v1047_v29, %v1043_v26  ;;  %v1065_v62 = vand.u32 4294901760, %v18281_v20  ;;  %v18320_v26 = vld [vmem:[#allocation2 + $0x70] sm:$0xff]  ;;  %vm3830_vm2 = vcmask 392192  }
  0xbe   : > { %652 = vrot.lane.b32.xlu1 %v18152_v12, %s17822_s25  ;;  %v15380_v50 = vpack.c.bf16 %v1242_v5, %v1230_v4  ;;  %v1248_v51 = vand.u32 4294901760, %v1247_v6  ;;  %25066 = vst [vmem:[#allocation28_spill] sm:$0xff] %v18285_v52  ;;  %15313 = vmatprep.subr.bf16.mxu1 %v18285_v52  ;;  %v18313_v5 = vsub.f32 %v18275_v9, %v1059_v56  ;;  %vm5783_vm3 = vcmask 785408   ;;  %s24213_s22 = scalar_lea.hbm %s26211_s16, %s12789_s27 }
  0xbf   : > { %654 = vrot.lane.b32.xlu0 %v18149_v11, %s17822_s25  ;;  %25069 = vst [vmem:[#allocation31_spill] sm:$0xff] %v18304_v24  ;;  %15315 = vmatpush1.bf16.msra.mxu1 %v18304_v24  ;;  %v18326_v29 = vsub.f32 %v18281_v20, %v1065_v62  ;;  %v18513_v24 = vld [vmem:[#allocation2 + $0xd0] sm:$0xff]  ;;  %vm17826_vm4 = vmmov 0   ;;  %vm7648_vm5 = vcmask 523264  }
  0xc0   : > { %25070 = vst [vmem:[#allocation32_spill] sm:$0xff] %v18313_v5 }
  0xc1   : > { %25072 = vst [vmem:[#allocation34_spill] sm:$0xff] %v18326_v29  ;;  %v24302_v27 = vand.u32 4294901760, %v18326_v29 }
  0xc2   : > { %752 = vrot.lane.b32.xlu1 %v18152_v12, %s17823_s1 }
  0xc3   : > { %656 = vrot.lane.b32.xlu0 %v18162_v14, %s17822_s25  ;;  %v1277_v48 = vsub.f32 %v18326_v29, %v24302_v27  ;;  %v18383_v27 = vpack.c.bf16 %v1055_v41, %v1051_v37  ;;  %v18402_v41 = vld [vmem:[#allocation2 + $0xa8] sm:$0xff] }
  0xc5   : > { %25077 = vst [vmem:[#allocation39_spill] sm:$0xff] %v18383_v27  ;;  %v1278_v42 = vand.u32 4294901760, %v1277_v48 }
  0xc6   : > { %756 = vrot.lane.b32.xlu1 %v18162_v14, %s17823_s1 }
  0xc7   : > { %754 = vrot.lane.b32.xlu0 %v18149_v11, %s17823_s1 }
  0xca   : > { %833 = vperm.xlu1 %17595, %v829_v15   ;;  %v18277_v15 = vld [vmem:[#allocation2 + $0x50] sm:$0xff] }
  0xcb   : > { %750 = vrot.lane.b32.xlu0 %v18144_v10, %s17823_s1 }
  0xce   : > { %731 = vperm.xlu1 %17595, %v626_v17   ;;  %v1236_v17 = vand.u32 4294901760, %v1235_v63  ;;  %v24308_v63 = vand.u32 4294901760, %v18283_v21 }
  0xcf   : > { %697 = vperm.xlu0 %17594, %v624_v16   ;;  %v15376_v16 = vpack.c.bf16 %v1218_v61, %v1206_v60  ;;  %v1063_v60 = vand.u32 4294901760, %v18277_v15  ;;  %v18299_v61 = vld [vmem:[#allocation2 + $0x60] sm:$0xff] }
  0xd0   : > { %v15382_v23 = vpack.c.bf16 %v1248_v51, %v1236_v17  ;;  %v18331_v6 = vsub.f32 %v18283_v21, %v24308_v63  ;;  %v24307_v17 = vand.u32 4294901760, %v18299_v61  ;;  %v24298_v51 = vand.u32 4294901760, %v18313_v5  ;;  %v18391_v63 = vld [vmem:[#allocation2 + $0x90] sm:$0xff] }
  0xd1   : > { %15377 = vmatprep.subr.bf16.mxu0 %v15376_v16  ;;  %v18318_v22 = vsub.f32 %v18277_v15, %v1063_v60  ;;  %v18337_v16 = vpack.c.bf16 %v1053_v31, %v1049_v30  ;;  %v24306_v30 = vand.u32 4294901760, %v18320_v26 }
  0xd2   : > { %838 = vperm.xlu1 %17595, %v830_v19   ;;  %v1061_v19 = vand.u32 4294901760, %v18267_v59  ;;  %15379 = vmatpush1.bf16.msra.mxu0 %v15378_v25  ;;  %25073 = vst [vmem:[#allocation35_spill] sm:$0xff] %v18331_v6  ;;  %v24303_v28 = vand.u32 4294901760, %v18331_v6  ;;  %v18355_v31 = vsub.f32 %v18299_v61, %v24307_v17  ;;  %v1259_v53 = vsub.f32 %v18313_v5, %v24298_v51  ;;  %v18377_v51 = vld [vmem:[#allocation2 + $0x98] sm:$0xff] }
  0xd3   : > { %794 = vperm.xlu0 %17594, %v628_v18   ;;  %v1057_v18 = vand.u32 4294901760, %v18265_v58  ;;  %15381 = vmatprep.subr.bf16.mxu0 %v15380_v50  ;;  %25071 = vst [vmem:[#allocation33_spill] sm:$0xff] %v18318_v22  ;;  %25074 = vst [vmem:[#allocation36_spill] sm:$0xff] %v18337_v16  ;;  %v24299_v57 = vand.u32 4294901760, %v18318_v22  ;;  %v24318_v33 = vand.u32 4294901760, %v18377_v51 }
  0xd4   : > { %v18295_v55 = vsub.f32 %v18267_v59, %v1061_v19  ;;  %15317 = vmatprep.subr.bf16.mxu1 %v18337_v16  ;;  %25075 = vst [vmem:[#allocation37_spill] sm:$0xff] %v18355_v31  ;;  %v1289_v47 = vsub.f32 %v18331_v6, %v24303_v28  ;;  %v24310_v46 = vand.u32 4294901760, %v18355_v31  ;;  %v1260_v44 = vand.u32 4294901760, %v1259_v53  ;;  %v18385_v28 = vld [vmem:[#allocation2 + $0x80] sm:$0xff] }
  0xd5   : > { %v18290_v54 = vsub.f32 %v18265_v58, %v1057_v18  ;;  %15319 = vmatpush1.bf16.msra.mxu1 %v18383_v27  ;;  %v18400_v37 = vpack.c.bf16 %v1061_v19, %v1057_v18  ;;  %v18418_v58 = vsub.f32 %v18377_v51, %v24318_v33  ;;  %v24313_v19 = vand.u32 4294901760, %v18402_v41 }
  0xd6   : > { %25068 = vst [vmem:[#allocation30_spill] sm:$0xff] %v18295_v55  ;;  %v24293_v4 = vand.u32 4294901760, %v18295_v55  ;;  %15383 = vmatpush1.bf16.msra.mxu0 %v15382_v23  ;;  %v1271_v23 = vsub.f32 %v18318_v22, %v24299_v57  ;;  %v1290_v0 = vand.u32 4294901760, %v1289_v47  ;;  %v18404_v47 = vld [vmem:[#allocation2 + $0xb8] sm:$0xff] }
  0xd7   : > { %25067 = vst [vmem:[#allocation29_spill] sm:$0xff] %v18290_v54  ;;  %v24292_v1 = vand.u32 4294901760, %v18290_v54  ;;  %25078 = vst [vmem:[#allocation40_spill] sm:$0xff] %v18400_v37  ;;  %15321 = vmatprep.subr.bf16.mxu1 %v18400_v37  ;;  %v24315_v9 = vand.u32 4294901760, %v18418_v58  ;;  %v18509_v37 = vld [vmem:[#allocation2 + $0xc0] sm:$0xff] }
  0xd8   : > { %v1265_v50 = vsub.f32 %v18295_v55, %v24293_v4  ;;  %v1272_v43 = vand.u32 4294901760, %v1271_v23  ;;  %v15388_v48 = vpack.c.bf16 %v1290_v0, %v1278_v42  ;;  %25080 = vst [vmem:[#allocation42_spill] sm:$0xff] %v18418_v58  ;;  %v24314_v0 = vand.u32 4294901760, %v18391_v63 }
  0xd9   : > { %v1253_v25 = vsub.f32 %v18290_v54, %v24292_v1  ;;  %v18426_v42 = vpack.c.bf16 %v1063_v60, %v1059_v56  ;;  %v25084_v56 = vand.u32 4294901760, %v18283_v21  ;;  %v1313_v21 = vsub.f32 %v18418_v58, %v24315_v9 }
  0xda   : > { %v1266_v4 = vand.u32 4294901760, %v1265_v50  ;;  %v18375_v50 = vld [vmem:[#allocation2 + $0x88] sm:$0xff]  ;;  %v15386_v53 = vpack.c.bf16 %v1272_v43, %v1260_v44  ;;  %v24316_v44 = vand.u32 4294901760, %v18385_v28  ;;  %v18442_v15 = vsub.f32 %v18391_v63, %v24314_v0 }
  0xdb   : > { %v1254_v1 = vand.u32 4294901760, %v1253_v25  ;;  %v18373_v25 = vsub.f32 %v18320_v26, %v24306_v30  ;;  %v1283_v30 = vsub.f32 %v18355_v31, %v24310_v46  ;;  %v24321_v32 = vand.u32 4294901760, %v18375_v50  ;;  %25081 = vst [vmem:[#allocation43_spill] sm:$0xff] %v18426_v42  ;;  %15323 = vmatpush1.bf16.msra.mxu1 %v18426_v42 }
  0xdc   : > { %v18431_v18 = vsub.f32 %v18385_v28, %v24316_v44  ;;  %25083 = vst [vmem:[#allocation45_spill] sm:$0xff] %v18442_v15  ;;  %v18449_v60 = vpack.c.bf16 %v25084_v56, %v1065_v62  ;;  %v24319_v62 = vand.u32 4294901760, %v18442_v15  ;;  %v1314_v0 = vand.u32 4294901760, %v1313_v21  ;;  %v18487_v44 = vld [vmem:[#allocation2 + $0xc8] sm:$0xff] }
  0xdd   : > { %25076 = vst [vmem:[#allocation38_spill] sm:$0xff] %v18373_v25  ;;  %v15384_v57 = vpack.c.bf16 %v1266_v4, %v1254_v1  ;;  %v24309_v17 = vand.u32 4294901760, %v18373_v25  ;;  %v1284_v1 = vand.u32 4294901760, %v1283_v30  ;;  %v24311_v4 = vand.u32 4294901760, %v18404_v47  ;;  %v18435_v30 = vld [vmem:[#allocation2 + $0xa0] sm:$0xff] }
  0xde   : > { %25082 = vst [vmem:[#allocation44_spill] sm:$0xff] %v18431_v18  ;;  %25085 = vst [vmem:[#allocation46_spill] sm:$0xff] %v18449_v60  ;;  %15325 = vmatprep.subr.bf16.mxu1 %v18449_v60  ;;  %v1319_v9 = vsub.f32 %v18442_v15, %v24319_v62  ;;  %v18500_v62 = vld [vmem:[#allocation2 + $0xd8] sm:$0xff]  ;;  %v25091_v42 = vand.u32 4294901760, %v18320_v26 }
  0xdf   : > { %15385 = vmatprep.subr.bf16.mxu0 %v15384_v57  ;;  %v1295_v43 = vsub.f32 %v18373_v25, %v24309_v17  ;;  %v18413_v57 = vsub.f32 %v18375_v50, %v24321_v32  ;;  %v18457_v17 = vsub.f32 %v18402_v41, %v24313_v19  ;;  %v18462_v46 = vsub.f32 %v18404_v47, %v24311_v4 }
  0xe0   : > { %15387 = vmatpush1.bf16.msra.mxu0 %v15386_v53  ;;  %v18451_v53 = vld [vmem:[#allocation2 + $0xb0] sm:$0xff]  ;;  %v1320_v32 = vand.u32 4294901760, %v1319_v9  ;;  %v24339_v26 = vand.u32 4294901760, %v18500_v62  ;;  %v18526_v9 = vld [vmem:[#allocation2 + $0xe8] sm:$0xff] }
  0xe1   : > { %25079 = vst [vmem:[#allocation41_spill] sm:$0xff] %v18413_v57  ;;  %15389 = vmatprep.subr.bf16.mxu0 %v15388_v48  ;;  %v1296_v59 = vand.u32 4294901760, %v1295_v43  ;;  %v24312_v23 = vand.u32 4294901760, %v18413_v57  ;;  %v24317_v43 = vand.u32 4294901760, %v18431_v18  ;;  %25086 = vst [vmem:[#allocation47_spill] sm:$0xff] %v18457_v17  ;;  %v24326_v56 = vand.u32 4294901760, %v18457_v17 }
  0xe2   : > { %25087 = vst [vmem:[#allocation48_spill] sm:$0xff] %v18462_v46  ;;  %v24329_v4 = vand.u32 4294901760, %v18462_v46  ;;  %v25113_v52 = vand.u32 4294901760, %v18451_v53 }
  0xe3   : > { %v15390_v48 = vpack.c.bf16 %v1296_v59, %v1284_v1  ;;  %v1301_v20 = vsub.f32 %v18413_v57, %v24312_v23  ;;  %v24320_v1 = vand.u32 4294901760, %v18435_v30  ;;  %v1307_v59 = vsub.f32 %v18431_v18, %v24317_v43 }
  0xe4   : > { %v24334_v23 = vand.u32 4294901760, %v18451_v53  ;;  %v1325_v33 = vsub.f32 %v18457_v17, %v24326_v56 }
  0xe5   : > { %15391 = vmatpush1.bf16.msra.mxu0 %v15390_v48  ;;  %v1302_v19 = vand.u32 4294901760, %v1301_v20  ;;  %v18485_v48 = vsub.f32 %v18435_v30, %v24320_v1  ;;  %v1308_v43 = vand.u32 4294901760, %v1307_v59  ;;  %v1337_v20 = vsub.f32 %v18462_v46, %v24329_v4 }
  0xe6   : > { %v18498_v21 = vsub.f32 %v18451_v53, %v24334_v23  ;;  %v25090_v59 = vand.u32 4294901760, %v18299_v61  ;;  %v1326_v4 = vand.u32 4294901760, %v1325_v33  ;;  %v24340_v23 = vand.u32 4294901760, %v18487_v44  ;;  %v18639_v53 = vld [vmem:[#allocation2 + $0x110] sm:$0xff] }
  0xe7   : > { %25088 = vst [vmem:[#allocation49_spill] sm:$0xff] %v18485_v48  ;;  %v15392_v1 = vpack.c.bf16 %v1314_v0, %v1302_v19  ;;  %v24338_v60 = vand.u32 4294901760, %v18485_v48  ;;  %v1338_v27 = vand.u32 4294901760, %v1337_v20  ;;  %v15394_v0 = vpack.c.bf16 %v1320_v32, %v1308_v43 }
  0xe8   : > { %25089 = vst [vmem:[#allocation50_spill] sm:$0xff] %v18498_v21  ;;  %v18507_v56 = vpack.c.bf16 %v25091_v42, %v25090_v59  ;;  %v24337_v16 = vand.u32 4294901760, %v18498_v21  ;;  %v25093_v42 = vand.u32 4294901760, %v18375_v50  ;;  %v25094_v33 = vand.u32 4294901760, %v18377_v51  ;;  %v18537_v59 = vld [vmem:[#allocation2 + $0xf8] sm:$0xff] }
  0xe9   : > { %15393 = vmatprep.subr.bf16.mxu0 %v15392_v1  ;;  %v1331_v61 = vsub.f32 %v18485_v48, %v24338_v60  ;;  %v15396_v20 = vpack.c.bf16 %v1338_v27, %v1326_v4  ;;  %v18534_v43 = vsub.f32 %v18487_v44, %v24340_v23  ;;  %v24341_v1 = vand.u32 4294901760, %v18509_v37 }
  0xea   : > { %25092 = vst [vmem:[#allocation51_spill] sm:$0xff] %v18507_v56  ;;  %15327 = vmatpush1.bf16.msra.mxu1 %v18507_v56  ;;  %v18524_v19 = vpack.c.bf16 %v25094_v33, %v25093_v42  ;;  %v1343_v32 = vsub.f32 %v18498_v21, %v24337_v16  ;;  %15395 = vmatpush1.bf16.msra.mxu0 %v15394_v0  ;;  %v24342_v27 = vand.u32 4294901760, %v18513_v24  ;;  %v25098_v4 = vand.u32 4294901760, %v18385_v28 }
  0xeb   : > { %25096 = vst [vmem:[#allocation53_spill] sm:$0xff] %v18534_v43  ;;  %v1332_v51 = vand.u32 4294901760, %v1331_v61  ;;  %v18542_v50 = vsub.f32 %v18500_v62, %v24339_v26  ;;  %v25099_v42 = vand.u32 4294901760, %v18391_v63  ;;  %15397 = vmatprep.subr.bf16.mxu0 %v15396_v20  ;;  %v24345_v0 = vand.u32 4294901760, %v18534_v43  ;;  %v18559_v26 = vld [vmem:[#allocation2 + $0xe0] sm:$0xff] }
  0xec   : > { %25095 = vst [vmem:[#allocation52_spill] sm:$0xff] %v18524_v19  ;;  %15329 = vmatprep.subr.bf16.mxu1 %v18524_v19  ;;  %v1344_v16 = vand.u32 4294901760, %v1343_v32  ;;  %v18556_v61 = vsub.f32 %v18509_v37, %v24341_v1  ;;  %v24346_v60 = vand.u32 4294901760, %v18526_v9  ;;  %v18565_v63 = vsub.f32 %v18513_v24, %v24342_v27 }
  0xed   : > { %25097 = vst [vmem:[#allocation54_spill] sm:$0xff] %v18542_v50  ;;  %v18550_v33 = vpack.c.bf16 %v25099_v42, %v25098_v4  ;;  %v24349_v28 = vand.u32 4294901760, %v18537_v59  ;;  %v25103_v20 = vand.u32 4294901760, %v18402_v41  ;;  %v25104_v32 = vand.u32 4294901760, %v18404_v47  ;;  %v18575_v42 = vld [vmem:[#allocation2 + $0xf0] sm:$0xff] }
  0xee   : > { %25101 = vst [vmem:[#allocation56_spill] sm:$0xff] %v18556_v61  ;;  %25102 = vst [vmem:[#allocation57_spill] sm:$0xff] %v18565_v63  ;;  %v15398_v1 = vpack.c.bf16 %v1344_v16, %v1332_v51  ;;  %v1349_v23 = vsub.f32 %v18534_v43, %v24345_v0  ;;  %v24354_v27 = vand.u32 4294901760, %v18556_v61  ;;  %v25107_v41 = vand.u32 4294901760, %v18542_v50 }
  0xef   : > { %25100 = vst [vmem:[#allocation55_spill] sm:$0xff] %v18550_v33  ;;  %15331 = vmatpush1.bf16.msra.mxu1 %v18550_v33  ;;  %v18573_v4 = vpack.c.bf16 %v25104_v32, %v25103_v20  ;;  %v18584_v33 = vsub.f32 %v18526_v9, %v24346_v60  ;;  %v18593_v16 = vsub.f32 %v18537_v59, %v24349_v28  ;;  %v24357_v51 = vand.u32 4294901760, %v18559_v26 }
  0xf0   : > { %v1361_v47 = vsub.f32 %v18542_v50, %v25107_v41  ;;  %15399 = vmatpush1.bf16.msra.mxu0 %v15398_v1  ;;  %v1350_v32 = vand.u32 4294901760, %v1349_v23  ;;  %v1355_v0 = vsub.f32 %v18556_v61, %v24354_v27  ;;  %v24369_v41 = vand.u32 4294901760, %v18575_v42  ;;  %v18611_v23 = vld [vmem:[#allocation2 + $0x108] sm:$0xff] }
  0xf1   : > { %25105 = vst [vmem:[#allocation58_spill] sm:$0xff] %v18573_v4  ;;  %25106 = vst [vmem:[#allocation59_spill] sm:$0xff] %v18584_v33  ;;  %15333 = vmatprep.subr.bf16.mxu1 %v18573_v4  ;;  %v24366_v60 = vand.u32 4294901760, %v18584_v33  ;;  %v25109_v19 = vand.u32 4294901760, %v18565_v63  ;;  %v18609_v1 = vsub.f32 %v18559_v26, %v24357_v51  ;;  %v18613_v4 = vld [vmem:[#allocation2 + $0x118] sm:$0xff]  ;;  %v25112_v56 = vand.u32 4294901760, %v18435_v30 }
  0xf2   : > { %25108 = vst [vmem:[#allocation60_spill] sm:$0xff] %v18593_v16  ;;  %v1362_v20 = vand.u32 4294901760, %v1361_v47  ;;  %v1356_v27 = vand.u32 4294901760, %v1355_v0  ;;  %v25115_v50 = vand.u32 4294901760, %v18593_v16 }
  0xf3   : > { %v1367_v28 = vsub.f32 %v18565_v63, %v25109_v19  ;;  %25110 = vst [vmem:[#allocation61_spill] sm:$0xff] %v18609_v1  ;;  %v1373_v47 = vsub.f32 %v18584_v33, %v24366_v60  ;;  %v18621_v19 = vsub.f32 %v18575_v42, %v24369_v41  ;;  %v18627_v51 = vpack.c.bf16 %v25113_v52, %v25112_v56  ;;  %v18633_v60 = vld [vmem:[#allocation2 + $0x100] sm:$0xff] }
  0xf4   : > { %v15400_v63 = vpack.c.bf16 %v1362_v20, %v1350_v32  ;;  %v1385_v0 = vsub.f32 %v18593_v16, %v25115_v50  ;;  %v24371_v43 = vand.u32 4294901760, %v18609_v1  ;;  %v25116_v20 = vand.u32 4294901760, %v18487_v44 }
  0xf5   : > { %25111 = vst [vmem:[#allocation62_spill] sm:$0xff] %v18621_v19  ;;  %25114 = vst [vmem:[#allocation63_spill] sm:$0xff] %v18627_v51  ;;  %v1368_v61 = vand.u32 4294901760, %v1367_v28  ;;  %v1374_v33 = vand.u32 4294901760, %v1373_v47  ;;  %v24370_v41 = vand.u32 4294901760, %v18621_v19  ;;  %15335 = vmatpush1.bf16.msra.mxu1 %v18627_v51  ;;  %v25117_v32 = vand.u32 4294901760, %v18500_v62 }
  0xf6   : > { %15401 = vmatprep.subr.bf16.mxu0 %v15400_v63  ;;  %v1386_v28 = vand.u32 4294901760, %v1385_v0  ;;  %v1379_v50 = vsub.f32 %v18609_v1, %v24371_v43  ;;  %v25119_v52 = vand.u32 4294901760, %v18611_v23  ;;  %v18664_v0 = vld [vmem:[#allocation2 + $0x128] sm:$0xff]  ;;  %v18666_v62 = vld [vmem:[#allocation2 + $0x138] sm:$0xff]  ;;  %v25124_v43 = vand.u32 4294901760, %v18513_v24 }
  0xf7   : > { %v15402_v56 = vpack.c.bf16 %v1368_v61, %v1356_v27  ;;  %v18648_v47 = vpack.c.bf16 %v25117_v32, %v25116_v20  ;;  %v1391_v30 = vsub.f32 %v18621_v19, %v24370_v41  ;;  %v25121_v27 = vand.u32 4294901760, %v18613_v4 }
  0xf8   : > { %v18656_v63 = vsub.f32 %v18611_v23, %v25119_v52  ;;  %v15404_v20 = vpack.c.bf16 %v1386_v28, %v1374_v33  ;;  %v1380_v32 = vand.u32 4294901760, %v1379_v50  ;;  %v24378_v41 = vand.u32 4294901760, %v18639_v53  ;;  %v18699_v50 = vld [vmem:[#allocation2 + $0x130] sm:$0xff] }
  0xf9   : > { %25118 = vst [vmem:[#allocation64_spill] sm:$0xff] %v18648_v47  ;;  %v18661_v61 = vsub.f32 %v18613_v4, %v25121_v27  ;;  %15403 = vmatpush1.bf16.msra.mxu0 %v15402_v56  ;;  %15337 = vmatprep.subr.bf16.mxu1 %v18648_v47  ;;  %v25123_v52 = vand.u32 4294901760, %v18509_v37  ;;  %v1392_v27 = vand.u32 4294901760, %v1391_v30  ;;  %v25126_v1 = vand.u32 4294901760, %v18633_v60  ;;  %v18683_v56 = vld [vmem:[#allocation2 + $0x120] sm:$0xff] }
  0xfa   : > { %25120 = vst [vmem:[#allocation65_spill] sm:$0xff] %v18656_v63  ;;  %v24380_v44 = vand.u32 4294901760, %v18656_v63  ;;  %15405 = vmatprep.subr.bf16.mxu0 %v15404_v20  ;;  %v18688_v37 = vsub.f32 %v18639_v53, %v24378_v41  ;;  %v25129_v30 = vand.u32 4294901760, %v18526_v9  ;;  %v25130_v28 = vand.u32 4294901760, %v18537_v59 }
  0xfb   : > { %25122 = vst [vmem:[#allocation66_spill] sm:$0xff] %v18661_v61  ;;  %v18674_v51 = vpack.c.bf16 %v25124_v43, %v25123_v52  ;;  %v24379_v19 = vand.u32 4294901760, %v18661_v61  ;;  %v18681_v33 = vsub.f32 %v18633_v60, %v25126_v1  ;;  %v15406_v20 = vpack.c.bf16 %v1392_v27, %v1380_v32 }
  0xfc   : > { %25128 = vst [vmem:[#allocation69_spill] sm:$0xff] %v18688_v37  ;;  %v18697_v1 = vpack.c.bf16 %v25130_v28, %v25129_v30  ;;  %v1397_v52 = vsub.f32 %v18656_v63, %v24380_v44  ;;  %v25132_v9 = vand.u32 4294901760, %v18664_v0  ;;  %v25134_v30 = vand.u32 4294901760, %v18666_v62 }
  0xfd   : > { %25125 = vst [vmem:[#allocation67_spill] sm:$0xff] %v18674_v51  ;;  %25127 = vst [vmem:[#allocation68_spill] sm:$0xff] %v18681_v33  ;;  %15339 = vmatpush1.bf16.msra.mxu1 %v18674_v51  ;;  %v1409_v41 = vsub.f32 %v18661_v61, %v24379_v19  ;;  %v24385_v24 = vand.u32 4294901760, %v18681_v33  ;;  %v24392_v27 = vand.u32 4294901760, %v18683_v56  ;;  %15407 = vmatpush1.bf16.msra.mxu0 %v15406_v20  ;;  %v24397_v43 = vand.u32 4294901760, %v18699_v50 }
  0xfe   : > { %25131 = vst [vmem:[#allocation70_spill] sm:$0xff] %v18697_v1  ;;  %v18712_v59 = vsub.f32 %v18664_v0, %v25132_v9  ;;  %v18717_v32 = vsub.f32 %v18666_v62, %v25134_v30  ;;  %15341 = vmatprep.subr.bf16.mxu1 %v18697_v1  ;;  %v1398_v28 = vand.u32 4294901760, %v1397_v52  ;;  %v25136_v9 = vand.u32 4294901760, %v18688_v37  ;;  %v18737_v52 = vld [vmem:[#allocation2 + $0x158] sm:$0xff] }
  0xff   : > { %v1410_v19 = vand.u32 4294901760, %v1409_v41  ;;  %v1403_v44 = vsub.f32 %v18681_v33, %v24385_v24  ;;  %v18733_v20 = vsub.f32 %v18683_v56, %v24392_v27  ;;  %v18735_v41 = vld [vmem:[#allocation2 + $0x148] sm:$0xff]  ;;  %v18742_v33 = vsub.f32 %v18699_v50, %v24397_v43 }
 0x100   : > { %25133 = vst [vmem:[#allocation71_spill] sm:$0xff] %v18712_v59  ;;  %25135 = vst [vmem:[#allocation72_spill] sm:$0xff] %v18717_v32  ;;  %v1415_v51 = vsub.f32 %v18688_v37, %v25136_v9  ;;  %v25139_v9 = vand.u32 4294901760, %v18559_v26  ;;  %v25140_v47 = vand.u32 4294901760, %v18575_v42  ;;  %v25142_v27 = vand.u32 4294901760, %v18712_v59 }
 0x101   : > { %25137 = vst [vmem:[#allocation73_spill] sm:$0xff] %v18733_v20  ;;  %v15408_v24 = vpack.c.bf16 %v1410_v19, %v1398_v28  ;;  %v1404_v1 = vand.u32 4294901760, %v1403_v44  ;;  %25138 = vst [vmem:[#allocation74_spill] sm:$0xff] %v18742_v33  ;;  %v25143_v63 = vand.u32 4294901760, %v18717_v32  ;;  %v18757_v28 = vld [vmem:[#allocation2 + $0x140] sm:$0xff] }
 0x102   : > { %v18748_v30 = vpack.c.bf16 %v25140_v47, %v25139_v9  ;;  %v1416_v37 = vand.u32 4294901760, %v1415_v51  ;;  %v1421_v61 = vsub.f32 %v18712_v59, %v25142_v27  ;;  %v25144_v47 = vand.u32 4294901760, %v18611_v23 }
 0x103   : > { %v1433_v19 = vsub.f32 %v18717_v32, %v25143_v63  ;;  %15409 = vmatprep.subr.bf16.mxu0 %v15408_v24  ;;  %v25145_v27 = vand.u32 4294901760, %v18613_v4  ;;  %v18769_v63 = vld [vmem:[#allocation2 + $0x150] sm:$0xff]  ;;  %v25147_v24 = vand.u32 4294901760, %v18733_v20  ;;  %v25149_v51 = vand.u32 4294901760, %v18735_v41 }
 0x104   : > { %25141 = vst [vmem:[#allocation75_spill] sm:$0xff] %v18748_v30  ;;  %15343 = vmatpush1.bf16.msra.mxu1 %v18748_v30  ;;  %v15410_v43 = vpack.c.bf16 %v1416_v37, %v1404_v1  ;;  %v1422_v44 = vand.u32 4294901760, %v1421_v61  ;;  %v25148_v30 = vand.u32 4294901760, %v18742_v33  ;;  %v25151_v4 = vand.u32 4294901760, %v18737_v52  ;;  %v18789_v37 = vld [vmem:[#allocation2 + $0x168] sm:$0xff]  ;;  %v18791_v1 = vld [vmem:[#allocation2 + $0x178] sm:$0xff] }
 0x105   : > { %v18767_v9 = vpack.c.bf16 %v25145_v27, %v25144_v47  ;;  %v1434_v32 = vand.u32 4294901760, %v1433_v19  ;;  %v1427_v26 = vsub.f32 %v18733_v20, %v25147_v24  ;;  %v18780_v23 = vsub.f32 %v18735_v41, %v25149_v51 }
 0x106   : > { %v1439_v42 = vsub.f32 %v18742_v33, %v25148_v30  ;;  %v18785_v47 = vsub.f32 %v18737_v52, %v25151_v4  ;;  %15411 = vmatpush1.bf16.msra.mxu0 %v15410_v43  ;;  %v24410_v27 = vand.u32 4294901760, %v18769_v63  ;;  %v25153_v51 = vand.u32 4294901760, %v18633_v60  ;;  %v18807_v43 = vld [vmem:[#allocation2 + $0x160] sm:$0xff] }
 0x107   : > { %25146 = vst [vmem:[#allocation76_spill] sm:$0xff] %v18767_v9  ;;  %25150 = vst [vmem:[#allocation77_spill] sm:$0xff] %v18780_v23  ;;  %15345 = vmatprep.subr.bf16.mxu1 %v18767_v9  ;;  %v15412_v30 = vpack.c.bf16 %v1434_v32, %v1422_v44  ;;  %v1428_v19 = vand.u32 4294901760, %v1427_v26  ;;  %v25154_v24 = vand.u32 4294901760, %v18639_v53  ;;  %v24412_v9 = vand.u32 4294901760, %v18780_v23 }
 0x108   : > { %25152 = vst [vmem:[#allocation78_spill] sm:$0xff] %v18785_v47  ;;  %v1440_v4 = vand.u32 4294901760, %v1439_v42  ;;  %v24411_v61 = vand.u32 4294901760, %v18785_v47  ;;  %v25156_v20 = vand.u32 4294901760, %v18757_v28  ;;  %v18812_v60 = vsub.f32 %v18769_v63, %v24410_v27  ;;  %v18823_v42 = vld [vmem:[#allocation2 + $0x170] sm:$0xff] }
 0x109   : > { %v18798_v33 = vpack.c.bf16 %v25154_v24, %v25153_v51  ;;  %15413 = vmatprep.subr.bf16.mxu0 %v15412_v30  ;;  %v24413_v53 = vand.u32 4294901760, %v18789_v37  ;;  %v25159_v44 = vand.u32 4294901760, %v18664_v0  ;;  %v25160_v26 = vand.u32 4294901760, %v18666_v62 }
 0x10a   : > { %v18805_v59 = vsub.f32 %v18757_v28, %v25156_v20  ;;  %25158 = vst [vmem:[#allocation81_spill] sm:$0xff] %v18812_v60  ;;  %v15414_v30 = vpack.c.bf16 %v1440_v4, %v1428_v19  ;;  %v1445_v51 = vsub.f32 %v18780_v23, %v24412_v9  ;;  %v1457_v24 = vsub.f32 %v18785_v47, %v24411_v61 }
 0x10b   : > { %25155 = vst [vmem:[#allocation79_spill] sm:$0xff] %v18798_v33  ;;  %15347 = vmatpush1.bf16.msra.mxu1 %v18798_v33  ;;  %v18821_v20 = vpack.c.bf16 %v25160_v26, %v25159_v44  ;;  %v24421_v32 = vand.u32 4294901760, %v18812_v60  ;;  %v18836_v0 = vsub.f32 %v18789_v37, %v24413_v53  ;;  %v25163_v62 = vand.u32 4294901760, %v18791_v1 }
 0x10c   : > { %25157 = vst [vmem:[#allocation80_spill] sm:$0xff] %v18805_v59  ;;  %v24416_v27 = vand.u32 4294901760, %v18805_v59  ;;  %v24424_v4 = vand.u32 4294901760, %v18807_v43  ;;  %15415 = vmatpush1.bf16.msra.mxu0 %v15414_v30  ;;  %v1446_v44 = vand.u32 4294901760, %v1445_v51  ;;  %v1458_v26 = vand.u32 4294901760, %v1457_v24  ;;  %v18859_v51 = vld [vmem:[#allocation2 + $0x188] sm:$0xff] }
 0x10d   : > { %25161 = vst [vmem:[#allocation82_spill] sm:$0xff] %v18821_v20  ;;  %25162 = vst [vmem:[#allocation83_spill] sm:$0xff] %v18836_v0  ;;  %v18841_v19 = vsub.f32 %v18791_v1, %v25163_v62  ;;  %15349 = vmatprep.subr.bf16.mxu1 %v18821_v20  ;;  %v24429_v9 = vand.u32 4294901760, %v18823_v42  ;;  %v1463_v53 = vsub.f32 %v18812_v60, %v24421_v32  ;;  %v18861_v24 = vld [vmem:[#allocation2 + $0x198] sm:$0xff]  ;;  %v25167_v32 = vand.u32 4294901760, %v18683_v56 }
 0x10e   : > { %v1451_v61 = vsub.f32 %v18805_v59, %v24416_v27  ;;  %v18857_v30 = vsub.f32 %v18807_v43, %v24424_v4  ;;  %v15416_v27 = vpack.c.bf16 %v1458_v26, %v1446_v44  ;;  %v25168_v33 = vand.u32 4294901760, %v18699_v50  ;;  %v18881_v26 = vld [vmem:[#allocation2 + $0x180] sm:$0xff] }
 0x10f   : > { %25164 = vst [vmem:[#allocation84_spill] sm:$0xff] %v18841_v19  ;;  %v18866_v59 = vsub.f32 %v18823_v42, %v24429_v9  ;;  %v1464_v60 = vand.u32 4294901760, %v1463_v53  ;;  %v25170_v4 = vand.u32 4294901760, %v18836_v0  ;;  %v25171_v23 = vand.u32 4294901760, %v18841_v19 }
 0x110   : > { %25165 = vst [vmem:[#allocation85_spill] sm:$0xff] %v18857_v30  ;;  %v1452_v20 = vand.u32 4294901760, %v1451_v61  ;;  %v18872_v62 = vpack.c.bf16 %v25168_v33, %v25167_v32  ;;  %15417 = vmatprep.subr.bf16.mxu0 %v15416_v27  ;;  %v25172_v53 = vand.u32 4294901760, %v18735_v41  ;;  %v25173_v32 = vand.u32 4294901760, %v18737_v52 }
 0x111   : > { %25166 = vst [vmem:[#allocation86_spill] sm:$0xff] %v18866_v59  ;;  %v1469_v47 = vsub.f32 %v18836_v0, %v25170_v4  ;;  %v1481_v61 = vsub.f32 %v18841_v19, %v25171_v23  ;;  %v18893_v23 = vld [vmem:[#allocation2 + $0x190] sm:$0xff]  ;;  %v25175_v27 = vand.u32 4294901760, %v18857_v30  ;;  %v25177_v50 = vand.u32 4294901760, %v18859_v51 }
 0x112   : > { %25169 = vst [vmem:[#allocation87_spill] sm:$0xff] %v18872_v62  ;;  %15351 = vmatpush1.bf16.msra.mxu1 %v18872_v62  ;;  %v18891_v4 = vpack.c.bf16 %v25173_v32, %v25172_v53  ;;  %v15418_v9 = vpack.c.bf16 %v1464_v60, %v1452_v20  ;;  %v25176_v62 = vand.u32 4294901760, %v18866_v59  ;;  %v25179_v52 = vand.u32 4294901760, %v18861_v24  ;;  %v18913_v60 = vld [vmem:[#allocation2 + $0x1a8] sm:$0xff]  ;;  %v18915_v20 = vld [vmem:[#allocation2 + $0x1b8] sm:$0xff] }
 0x113   : > { %v1470_v44 = vand.u32 4294901760, %v1469_v47  ;;  %v1482_v19 = vand.u32 4294901760, %v1481_v61  ;;  %v1475_v56 = vsub.f32 %v18857_v30, %v25175_v27  ;;  %v18904_v41 = vsub.f32 %v18859_v51, %v25177_v50 }
 0x114   : > { %25174 = vst [vmem:[#allocation88_spill] sm:$0xff] %v18891_v4  ;;  %v1487_v33 = vsub.f32 %v18866_v59, %v25176_v62  ;;  %v18909_v53 = vsub.f32 %v18861_v24, %v25179_v52  ;;  %15353 = vmatprep.subr.bf16.mxu1 %v18891_v4  ;;  %15419 = vmatpush1.bf16.msra.mxu0 %v15418_v9  ;;  %v24442_v32 = vand.u32 4294901760, %v18893_v23  ;;  %v25181_v50 = vand.u32 4294901760, %v18757_v28  ;;  %v18931_v9 = vld [vmem:[#allocation2 + $0x1a0] sm:$0xff] }
 0x115   : > { %25178 = vst [vmem:[#allocation89_spill] sm:$0xff] %v18904_v41  ;;  %v15420_v62 = vpack.c.bf16 %v1482_v19, %v1470_v44  ;;  %v1476_v61 = vand.u32 4294901760, %v1475_v56  ;;  %v25182_v27 = vand.u32 4294901760, %v18769_v63  ;;  %v24444_v4 = vand.u32 4294901760, %v18904_v41 }
 0x116   : > { %25180 = vst [vmem:[#allocation90_spill] sm:$0xff] %v18909_v53  ;;  %v1488_v52 = vand.u32 4294901760, %v1487_v33  ;;  %v24443_v47 = vand.u32 4294901760, %v18909_v53  ;;  %v25184_v30 = vand.u32 4294901760, %v18881_v26  ;;  %v18936_v28 = vsub.f32 %v18893_v23, %v24442_v32  ;;  %v18947_v33 = vld [vmem:[#allocation2 + $0x1b0] sm:$0xff] }
 0x117   : > { %v18922_v59 = vpack.c.bf16 %v25182_v27, %v25181_v50  ;;  %15421 = vmatprep.subr.bf16.mxu0 %v15420_v62  ;;  %v24445_v63 = vand.u32 4294901760, %v18913_v60  ;;  %v25187_v44 = vand.u32 4294901760, %v18789_v37  ;;  %v25188_v56 = vand.u32 4294901760, %v18791_v1 }
 0x118   : > { %v18929_v0 = vsub.f32 %v18881_v26, %v25184_v30  ;;  %25186 = vst [vmem:[#allocation93_spill] sm:$0xff] %v18936_v28  ;;  %v15422_v62 = vpack.c.bf16 %v1488_v52, %v1476_v61  ;;  %v1493_v50 = vsub.f32 %v18904_v41, %v24444_v4  ;;  %v1505_v27 = vsub.f32 %v18909_v53, %v24443_v47 }
 0x119   : > { %25183 = vst [vmem:[#allocation91_spill] sm:$0xff] %v18922_v59  ;;  %15355 = vmatpush1.bf16.msra.mxu1 %v18922_v59  ;;  %v18945_v30 = vpack.c.bf16 %v25188_v56, %v25187_v44  ;;  %v24451_v19 = vand.u32 4294901760, %v18936_v28  ;;  %v18960_v37 = vsub.f32 %v18913_v60, %v24445_v63  ;;  %v25191_v1 = vand.u32 4294901760, %v18915_v20 }
 0x11a   : > { %25185 = vst [vmem:[#allocation92_spill] sm:$0xff] %v18929_v0  ;;  %v24448_v32 = vand.u32 4294901760, %v18929_v0  ;;  %v24457_v52 = vand.u32 4294901760, %v18931_v9  ;;  %15423 = vmatpush1.bf16.msra.mxu0 %v15422_v62  ;;  %v1494_v44 = vand.u32 4294901760, %v1493_v50  ;;  %v1506_v56 = vand.u32 4294901760, %v1505_v27 }
 0x11b   : > { %25189 = vst [vmem:[#allocation94_spill] sm:$0xff] %v18945_v30  ;;  %25190 = vst [vmem:[#allocation95_spill] sm:$0xff] %v18960_v37  ;;  %v18965_v61 = vsub.f32 %v18915_v20, %v25191_v1  ;;  %15357 = vmatprep.subr.bf16.mxu1 %v18945_v30  ;;  %v24456_v4 = vand.u32 4294901760, %v18947_v33  ;;  %v1511_v63 = vsub.f32 %v18936_v28, %v24451_v19  ;;  %v24458_v1 = vand.u32 4294901760, %v18960_v37 }
 0x11c   : > { %v1499_v47 = vsub.f32 %v18929_v0, %v24448_v32  ;;  %v18981_v62 = vsub.f32 %v18931_v9, %v24457_v52  ;;  %v15424_v50 = vpack.c.bf16 %v1506_v56, %v1494_v44 }
 0x11d   : > { %25192 = vst [vmem:[#allocation96_spill] sm:$0xff] %v18965_v61  ;;  %v24459_v59 = vand.u32 4294901760, %v18965_v61  ;;  %v18986_v32 = vsub.f32 %v18947_v33, %v24456_v4  ;;  %v1512_v30 = vand.u32 4294901760, %v1511_v63  ;;  %v1517_v19 = vsub.f32 %v18960_v37, %v24458_v1 }
 0x11e   : > { %25193 = vst [vmem:[#allocation97_spill] sm:$0xff] %v18981_v62  ;;  %v1500_v27 = vand.u32 4294901760, %v1499_v47  ;;  %v24468_v0 = vand.u32 4294901760, %v18981_v62  ;;  %15425 = vmatprep.subr.bf16.mxu0 %v15424_v50  ;;  %v676_v50 = vsub.s32 4, %v18120_v2 }
 0x11f   : > { %25194 = vst [vmem:[#allocation98_spill] sm:$0xff] %v18986_v32  ;;  %v1529_v28 = vsub.f32 %v18965_v61, %v24459_v59  ;;  %v24471_v44 = vand.u32 4294901760, %v18986_v32  ;;  %v1518_v52 = vand.u32 4294901760, %v1517_v19  ;;  %v25195_v61 = vlaneseq }
 0x120   : > { %v15426_v4 = vpack.c.bf16 %v1512_v30, %v1500_v27  ;;  %v1523_v1 = vsub.f32 %v18981_v62, %v24468_v0  ;;  %v680_v0 = vsub.s32 6, %v18120_v2  ;;  %v773_v62 = vsub.s32 5, %v18120_v2 }
 0x121   : > { %v1530_v63 = vand.u32 4294901760, %v1529_v28  ;;  %v1535_v59 = vsub.f32 %v18986_v32, %v24471_v44  ;;  %v19007_v37 = vand.u32 127, %v25195_v61  ;;  %v619_v28 = vld [vmem:[%s24258_s3] sm:$0xff] }
 0x122   : > { %15427 = vmatpush1.bf16.msra.mxu0 %v15426_v4  ;;  %v1524_v41 = vand.u32 4294901760, %v1523_v1  ;;  %v673_v61 = vrot.slane %v619_v28, %v18135_v7  ;;  %v677_v44 = vrot.slane %v619_v28, %v676_v50  ;;  %v681_v32 = vrot.slane %v619_v28, %v680_v0  ;;  %v19027_v7 = vld [vmem:[#allocation2 + $0x1d8] sm:$0xff] }
 0x123   : > { %25196 = vst [vmem:[#allocation99_spill] sm:$0xff] %v19007_v37  ;;  %v15428_v53 = vpack.c.bf16 %v1530_v63, %v1518_v52  ;;  %v1536_v19 = vand.u32 4294901760, %v1535_v59  ;;  %vm660_vm0 = vcmp.lt.s32.totalorder %v19007_v37, 1  ;;  %vm758_vm1 = vcmp.lt.s32.totalorder %v19007_v37, 127  ;;  %v25255_v37 = vld [vmem:[#allocation54_spill] sm:$0xff] }
 0x124   : > { %v777_v52 = vsub.s32 7, %v18120_v2  ;;  %v669_v59 = vrot.slane %v619_v28, %v18126_v3  ;;  %v19021_v16 = vrot.slane %v619_v28, %v18155_v13  ;;  %v19023_v21 = vrot.slane %v619_v28, %v773_v62  ;;  %v19037_v13 = vld [vmem:[#allocation2 + $0x1d0] sm:$0xff] }
 0x125   : > { %15429 = vmatprep.subr.bf16.mxu0 %v15428_v53  ;;  %v15430_v4 = vpack.c.bf16 %v1536_v19, %v1524_v41  ;;  %v19025_v53 = vld [vmem:[#allocation2 + $0x1c8] sm:$0xff]  ;;  %v24490_v0 = vand.u32 4294901760, %v19027_v7  ;;  %v19035_v19 = vld [vmem:[#allocation2 + $0x1c0] sm:$0xff]  ;;  %v24499_v46 = vand.u32 4294901760, %v19037_v13  ;;  %v19042_v17 = vrot.slane %v619_v28, %v18138_v8 }
 0x126   : > { %v24491_v50 = vand.u32 4294901760, %v19025_v53  ;;  %v24494_v48 = vand.u32 4294901760, %v19035_v19  ;;  %v19044_v15 = vrot.slane %v619_v28, %v777_v52 }
 0x127   : > { %15431 = vmatpush1.bf16.msra.mxu0 %v15430_v4  ;;  %v19054_v18 = vsub.f32 %v19027_v7, %v24490_v0  ;;  %v19070_v52 = vsub.f32 %v19037_v13, %v24499_v46 }
 0x128   : > { %v19065_v28 = vsub.f32 %v19035_v19, %v24494_v48 }
 0x129   : > { %25198 = vst [vmem:[#allocation101_spill] sm:$0xff] %v19054_v18  ;;  %25199 = vst [vmem:[#allocation102_spill] sm:$0xff] %v19070_v52 }
 0x135   : > { %v18996_v47 = vpop.permute.xlu1 %789 }
 0x136   : > { %v18998_v56 = vpop.permute.xlu0 %692 }
 0x139   : > { %v651_v27 = vpop.permute.xlu1 %650 }
 0x13a   : > { %v727_v30 = vpop.permute.xlu0 %726 }
 0x13b   : > { %v734_v58 = vmul.f32 %v727_v30, %v18144_v10  ;;  %v735_v48 = vmul.f32 %v727_v30, %v18152_v12 }
 0x13d   : > { %v653_v63 = vpop.permute.xlu1 %652 }
 0x13e   : > { %v655_v1 = vpop.permute.xlu0 %654  ;;  %v663_v2 = vsel %vm660_vm0, %v651_v27, %v653_v63 }
 0x13f   : > { %v662_v41 = vsel %vm660_vm0, %v653_v63, %v655_v1  ;;  %v687_v62 = vmul.f32 %v673_v61, %v663_v2  ;;  %v19049_v63 = vsub.f32 %v19025_v53, %v24491_v50  ;;  %v24509_v50 = vand.u32 4294901760, %v19054_v18 }
 0x140   : > { %v688_v4 = vmul.f32 %v677_v44, %v662_v41 }
 0x141   : > { %25197 = vst [vmem:[#allocation100_spill] sm:$0xff] %v19049_v63  ;;  %v19057_v44 = vrot.slane %v687_v62, %v18126_v3  ;;  %v753_v2 = vpop.permute.xlu1 %752 }
 0x142   : > { %v19060_v61 = vrot.slane %v688_v4, %v18126_v3  ;;  %v657_v41 = vpop.permute.xlu0 %656  ;;  %v24506_v4 = vand.u32 4294901760, %v19049_v63 }
 0x143   : > { %v661_v0 = vsel %vm660_vm0, %v655_v1, %v657_v41  ;;  %v664_v62 = vsel %vm660_vm0, %v657_v41, %v651_v27  ;;  %v717_v46 = vmul.f32 %v19057_v44, %v18998_v56  ;;  %v1553_v1 = vsub.f32 %v19054_v18, %v24509_v50 }
 0x144   : > { %v686_v57 = vmul.f32 %v669_v59, %v664_v62  ;;  %v689_v25 = vmul.f32 %v681_v32, %v661_v0  ;;  %v718_v31 = vmul.f32 %v19060_v61, %v18998_v56  ;;  %v1541_v27 = vsub.f32 %v19049_v63, %v24506_v4 }
 0x145   : > { %v736_v41 = vmul.f32 %v727_v30, %v18149_v11  ;;  %v757_v32 = vpop.permute.xlu1 %756  ;;  %v25200_v63 = vand.u32 4294901760, %v18807_v43  ;;  %v25201_v50 = vand.u32 4294901760, %v18823_v42  ;;  %v1554_v43 = vand.u32 4294901760, %v1553_v1 }
 0x146   : > { %v703_v6 = vrot.slane %v686_v57, %v18126_v3  ;;  %v755_v59 = vpop.permute.xlu0 %754  ;;  %v1542_v22 = vand.u32 4294901760, %v1541_v27  ;;  %v19105_v57 = vmul.f32 %v727_v30, %v18162_v14  ;;  %v715_v0 = vrot.slane %v689_v25, %v18126_v3 }
 0x147   : > { %v760_v29 = vsel %vm758_vm1, %v753_v2, %v755_v59  ;;  %v759_v4 = vsel %vm758_vm1, %v755_v59, %v757_v32  ;;  %v19102_v18 = vpack.c.bf16 %v25201_v50, %v25200_v63  ;;  %v744_v54 = vadd.f32 %v736_v41, %v718_v31 }
 0x148   : > { %v784_v62 = vmul.f32 %v19021_v16, %v760_v29  ;;  %v785_v5 = vmul.f32 %v19023_v21, %v759_v4  ;;  %v716_v55 = vmul.f32 %v703_v6, %v18998_v56  ;;  %v743_v59 = vadd.f32 %v735_v48, %v717_v46 }
 0x149   : > { %25202 = vst [vmem:[#allocation103_spill] sm:$0xff] %v19102_v18  ;;  %15359 = vmatpush1.bf16.msra.mxu1 %v19102_v18  ;;  %v19114_v30 = vpop.permute.xlu1 %833  ;;  %v25203_v25 = vand.u32 4294901760, %v19065_v28  ;;  %v25204_v4 = vand.u32 4294901760, %v19070_v52  ;;  %v15432_v48 = vpack.c.bf16 %v1554_v43, %v1542_v22  ;;  %v25206_v1 = vand.u32 4294901760, %v18861_v24 }
 0x14a   : > { %v804_v42 = vrot.slane %v784_v62, %v18126_v3  ;;  %v808_v50 = vrot.slane %v785_v5, %v18126_v3  ;;  %v751_v63 = vpop.permute.xlu0 %750  ;;  %v25205_v5 = vand.u32 4294901760, %v18859_v51  ;;  %v25208_v22 = vand.u32 4294901760, %v18881_v26 }
 0x14b   : > { %v1547_v29 = vsub.f32 %v19065_v28, %v25203_v25  ;;  %v1559_v27 = vsub.f32 %v19070_v52, %v25204_v4  ;;  %v761_v46 = vsel %vm758_vm1, %v751_v63, %v753_v2  ;;  %v762_v31 = vsel %vm758_vm1, %v757_v32, %v751_v63  ;;  %15433 = vmatprep.subr.bf16.mxu0 %v15432_v48 }
 0x14c   : > { %v19130_v41 = vpack.c.bf16 %v25206_v1, %v25205_v5  ;;  %v814_v62 = vmul.f32 %v804_v42, %v18996_v47  ;;  %v815_v25 = vmul.f32 %v808_v50, %v18996_v47  ;;  %v783_v18 = vmul.f32 %v19042_v17, %v761_v46 }
 0x14d   : > { %v786_v4 = vmul.f32 %v19044_v15, %v762_v31  ;;  %v719_v2 = vmul.f32 %v715_v0, %v18998_v56  ;;  %v742_v52 = vadd.f32 %v734_v58, %v716_v55  ;;  %v25209_v51 = vand.u32 4294901760, %v18893_v23  ;;  %v732_v46 = vpop.permute.xlu1 %731 }
 0x14e   : > { %25207 = vst [vmem:[#allocation104_spill] sm:$0xff] %v19130_v41  ;;  %15361 = vmatprep.subr.bf16.mxu1 %v19130_v41  ;;  %v800_v32 = vrot.slane %v783_v18, %v18126_v3  ;;  %v698_v63 = vpop.permute.xlu0 %697  ;;  %v823_v5 = vadd.f32 %v815_v25, %v744_v54  ;;  %v822_v31 = vadd.f32 %v814_v62, %v743_v59  ;;  %v1548_v56 = vand.u32 4294901760, %v1547_v29 }
 0x14f   : > { %v19142_v24 = vpack.c.bf16 %v25209_v51, %v25208_v22  ;;  %v812_v43 = vrot.slane %v786_v4, %v18126_v3  ;;  %v720_v1 = vmul.f32 %v703_v6, %v698_v63  ;;  %v721_v55 = vmul.f32 %v19057_v44, %v698_v63 }
 0x150   : > { %v722_v58 = vmul.f32 %v19060_v61, %v698_v63  ;;  %v813_v26 = vmul.f32 %v800_v32, %v18996_v47  ;;  %v738_v23 = vmul.f32 %v732_v46, %v18144_v10  ;;  %v739_v18 = vmul.f32 %v732_v46, %v18152_v12 }
 0x151   : > { %25210 = vst [vmem:[#allocation105_spill] sm:$0xff] %v19142_v24  ;;  %15363 = vmatpush1.bf16.msra.mxu1 %v19142_v24  ;;  %v1560_v48 = vand.u32 4294901760, %v1559_v27  ;;  %v723_v4 = vmul.f32 %v715_v0, %v698_v63  ;;  %v740_v22 = vmul.f32 %v732_v46, %v18149_v11  ;;  %v19154_v54 = vadd.f32 %v19114_v30, %v823_v5  ;;  %v974_v0 = vld [vmem:[#allocation2 + $0x1e8] sm:$0xff] }
 0x152   : > { %v19157_v6 = vadd.f32 %v19114_v30, %v822_v31  ;;  %v816_v44 = vmul.f32 %v812_v43, %v18996_v47  ;;  %v741_v61 = vmul.f32 %v732_v46, %v18162_v14  ;;  %v746_v59 = vadd.f32 %v738_v23, %v720_v1  ;;  %v795_v29 = vpop.permute.xlu0 %794  ;;  %v976_v46 = vld [vmem:[#allocation2 + $0x1f8] sm:$0xff]  ;;  %v839_v1 = vpop.permute.xlu1 %838 }
 0x153   : > { %25211 = vst [vmem:[#allocation106_spill] sm:$0xff] %v19154_v54  ;;  %v821_v62 = vadd.f32 %v813_v26, %v742_v52  ;;  %v747_v10 = vadd.f32 %v739_v18, %v721_v55  ;;  %v748_v25 = vadd.f32 %v740_v22, %v722_v58  ;;  %v817_v12 = vmul.f32 %v800_v32, %v795_v29 }
 0x154   : > { %v818_v27 = vmul.f32 %v804_v42, %v795_v29  ;;  %v819_v51 = vmul.f32 %v808_v50, %v795_v29  ;;  %v820_v11 = vmul.f32 %v812_v43, %v795_v29  ;;  %v24528_v63 = vmax.f32 %v19154_v54, 0.0  ;;  %v973_v43 = vld [vmem:[#allocation2 + $0x1e0] sm:$0xff] }
 0x155   : > { %v850_v5 = vmax.f32 %v19157_v6, 0.0  ;;  %v19164_v31 = vadd.f32 %v19114_v30, %v821_v62  ;;  %v825_v3 = vadd.f32 %v817_v12, %v746_v59  ;;  %v745_v14 = vadd.f32 %v19105_v57, %v719_v2  ;;  %v25263_v54 = vld [vmem:[#allocation66_spill] sm:$0xff] }
 0x156   : > { %v826_v47 = vadd.f32 %v818_v27, %v747_v10  ;;  %v749_v52 = vadd.f32 %v741_v61, %v723_v4  ;;  %865 = vrot.lane.b32.xlu1 %v24528_v63, %s17823_s1  ;;  %v827_v42 = vadd.f32 %v819_v51, %v748_v25  ;;  %v15434_v50 = vpack.c.bf16 %v1560_v48, %v1548_v56  ;;  %v975_v4 = vld [vmem:[#allocation2 + $0x1f0] sm:$0xff] }
 0x157   : > { %861 = vrot.lane.b32.xlu0 %v850_v5, %s17823_s1  ;;  %v1161_v32 = vand.u32 4294901760, %v974_v0  ;;  %v849_v55 = vmax.f32 %v19164_v31, 0.0  ;;  %v824_v57 = vadd.f32 %v816_v44, %v745_v14  ;;  %v1165_v23 = vand.u32 4294901760, %v976_v46 }
 0x158   : > { %v19174_v58 = vadd.f32 %v839_v1, %v826_v47  ;;  %v19176_v2 = vadd.f32 %v839_v1, %v827_v42  ;;  %v828_v26 = vadd.f32 %v820_v11, %v749_v52  ;;  %15435 = vmatpush1.bf16.msra.mxu0 %v15434_v50  ;;  %v19181_v61 = vadd.f32 %v839_v1, %v825_v3 }
 0x159   : > { %v19178_v18 = vsub.f32 %v974_v0, %v1161_v32  ;;  %v25213_v56 = vand.u32 4294901760, %v18913_v60  ;;  %v25214_v48 = vand.u32 4294901760, %v18915_v20  ;;  %v1163_v29 = vand.u32 4294901760, %v973_v43 }
 0x15a   : > { %25212 = vst [vmem:[#allocation107_spill] sm:$0xff] %v19176_v2  ;;  %v854_v22 = vmax.f32 %v19174_v58, 0.0  ;;  %v24526_v44 = vmax.f32 %v19176_v2, 0.0  ;;  %v19194_v10 = vsub.f32 %v976_v46, %v1165_v23  ;;  %v1167_v3 = vand.u32 4294901760, %v975_v4 }
 0x15b   : > { %v19187_v59 = vpack.c.bf16 %v25214_v48, %v25213_v56  ;;  %857 = vrot.lane.b32.xlu0 %v849_v55, %s17823_s1  ;;  %v24533_v62 = vand.u32 4294901760, %v19178_v18  ;;  %v19200_v60 = vsub.f32 %v973_v43, %v1163_v29  ;;  %v25218_v20 = vand.u32 4294901760, %v18931_v9 }
 0x15c   : > { %25216 = vst [vmem:[#allocation109_spill] sm:$0xff] %v19194_v10  ;;  %863 = vrot.lane.b32.xlu1 %v854_v22, %s17823_s1  ;;  %v25219_v25 = vand.u32 4294901760, %v18947_v33  ;;  %v19209_v27 = vadd.f32 %v19114_v30, %v824_v57  ;;  %v24532_v51 = vand.u32 4294901760, %v19194_v10  ;;  %v25222_v11 = vand.u32 4294901760, %v19025_v53 }
 0x15d   : > { %25215 = vst [vmem:[#allocation108_spill] sm:$0xff] %v19187_v59  ;;  %15365 = vmatprep.subr.bf16.mxu1 %v19187_v59  ;;  %25217 = vst [vmem:[#allocation110_spill] sm:$0xff] %v19200_v60  ;;  %v1565_v0 = vsub.f32 %v19178_v18, %v24533_v62  ;;  %v25223_v47 = vand.u32 4294901760, %v19027_v7  ;;  %v853_v9 = vmax.f32 %v19181_v61, 0.0  ;;  %v19222_v33 = vadd.f32 %v839_v1, %v828_v26 }
 0x15e   : > { %v19206_v12 = vpack.c.bf16 %v25219_v25, %v25218_v20  ;;  %25221 = vst [vmem:[#allocation112_spill] sm:$0xff] %v19209_v27  ;;  %v24531_v46 = vand.u32 4294901760, %v19200_v60  ;;  %v19225_v30 = vsub.f32 %v975_v4, %v1167_v3  ;;  %v1577_v7 = vsub.f32 %v19194_v10, %v24532_v51  ;;  %v25247_v51 = vld [vmem:[#allocation42_spill] sm:$0xff] }
 0x15f   : > { %v19219_v14 = vpack.c.bf16 %v25223_v47, %v25222_v11  ;;  %25225 = vst [vmem:[#allocation114_spill] sm:$0xff] %v19222_v33  ;;  %867 = vrot.lane.b32.xlu0 %v24526_v44, %s17823_s1  ;;  %v1566_v52 = vand.u32 4294901760, %v1565_v0  ;;  %v25227_v53 = vand.u32 4294901760, %v19035_v19  ;;  %v25228_v1 = vand.u32 4294901760, %v19037_v13 }
 0x160   : > { %25220 = vst [vmem:[#allocation111_spill] sm:$0xff] %v19206_v12  ;;  %25226 = vst [vmem:[#allocation115_spill] sm:$0xff] %v19225_v30  ;;  %15367 = vmatpush1.bf16.msra.mxu1 %v19206_v12  ;;  %859 = vrot.lane.b32.xlu1 %v853_v9, %s17823_s1  ;;  %v1571_v50 = vsub.f32 %v19200_v60, %v24531_v46  ;;  %v24530_v43 = vand.u32 4294901760, %v19225_v30  ;;  %v19248_v57 = vpack.c.bf16 %v1165_v23, %v1161_v32  ;;  %v25246_v46 = vld [vmem:[#allocation41_spill] sm:$0xff] }
 0x161   : > { %25224 = vst [vmem:[#allocation113_spill] sm:$0xff] %v19219_v14  ;;  %15369 = vmatprep.subr.bf16.mxu1 %v19219_v14  ;;  %v19239_v42 = vpack.c.bf16 %v25228_v1, %v25227_v53  ;;  %v24529_v26 = vmax.f32 %v19209_v27, 0.0  ;;  %v1578_v4 = vand.u32 4294901760, %v1577_v7  ;;  %v24527_v19 = vmax.f32 %v19222_v33, 0.0  ;;  %v25260_v33 = vld [vmem:[#allocation61_spill] sm:$0xff] }
 0x162   : > { %25230 = vst [vmem:[#allocation117_spill] sm:$0xff] %v19248_v57  ;;  %v1572_v13 = vand.u32 4294901760, %v1571_v50  ;;  %v1583_v56 = vsub.f32 %v19225_v30, %v24530_v43  ;;  %v19256_v48 = vpack.c.bf16 %v1167_v3, %v1163_v29  ;;  %v15440_v20 = vpack.c.bf16 %v18207_v35, %v18205_v34  ;;  %v25251_v3 = vld [vmem:[#allocation48_spill] sm:$0xff]  ;;  %v25265_v27 = vld [vmem:[#allocation69_spill] sm:$0xff] }
 0x163   : > { %25229 = vst [vmem:[#allocation116_spill] sm:$0xff] %v19239_v42  ;;  %869 = vrot.lane.b32.xlu0 %v24529_v26, %s17823_s1  ;;  %v15436_v32 = vpack.c.bf16 %v1578_v4, %v1566_v52  ;;  %v888_v0 = vrot.slane %v19021_v16, %v18138_v8  ;;  %v884_v53 = vrot.slane %v19042_v17, %v18138_v8 }
 0x164   : > { %15371 = vmatpush1.bf16.msra.mxu1 %v19239_v42  ;;  %871 = vrot.lane.b32.xlu1 %v24527_v19, %s17823_s1  ;;  %v1584_v23 = vand.u32 4294901760, %v1583_v56  ;;  %v15442_v17 = vpack.c.bf16 %v18216_v38, %v18212_v36  ;;  %v896_v31 = vrot.slane %v19044_v15, %v18138_v8  ;;  %v15446_v44 = vpack.c.bf16 %v18243_v49, %v18235_v45 }
 0x165   : > { %15373 = vmatprep.subr.bf16.mxu1 %v19248_v57  ;;  %15437 = vmatprep.subr.bf16.mxu0 %v15436_v32  ;;  %v15456_v62 = vpack.c.bf16 %v25247_v51, %v25246_v46 }
 0x166   : > { %v15438_v25 = vpack.c.bf16 %v1584_v23, %v1572_v13 }
 0x168   : > { %15375 = vmatpush1.bf16.msra.mxu1 %v19256_v48  ;;  %15439 = vmatpush1.bf16.msra.mxu0 %v15438_v25  ;;  %v892_v25 = vrot.slane %v19023_v21, %v18138_v8  ;;  %v25252_v8 = vld [vmem:[#allocation49_spill] sm:$0xff] }
 0x169   : > { %15441 = vmatprep.subr.bf16.mxu0 %v15440_v20 }
 0x1c8   : > { %v866_v11 = vpop.permute.xlu1 %865 }
 0x1c9   : > { %v862_v47 = vpop.permute.xlu0 %861 }
 0x1ca   : > { %v875_v52 = vsel %vm758_vm1, %v862_v47, %v866_v11 }
 0x1cb   : > { %v898_v7 = vmul.f32 %v888_v0, %v875_v52 }
 0x1cd   : > { %v906_v1 = vmax.f32 %v850_v5, %v898_v7  ;;  %v858_v50 = vpop.permute.xlu0 %857 }
 0x1ce   : > { %v877_v4 = vsel %vm758_vm1, %v858_v50, %v862_v47  ;;  %v864_v13 = vpop.permute.xlu1 %863 }
 0x1cf   : > { %v19282_v56 = vand.u32 4294901760, %v906_v1  ;;  %v897_v16 = vmul.f32 %v884_v53, %v877_v4 }
 0x1d1   : > { %v905_v32 = vmax.f32 %v849_v55, %v897_v16  ;;  %1587 = vmatprep.mubr.f32.mxu0 %v19282_v56  ;;  %v868_v23 = vpop.permute.xlu0 %867  ;;  %v19290_v6 = vsub.f32 %v906_v1, %v19282_v56  ;;  %v15444_v55 = vpack.c.bf16 %v18226_v40, %v18221_v39 }
 0x1d2   : > { %v876_v5 = vsel %vm758_vm1, %v864_v13, %v868_v23  ;;  %v860_v20 = vpop.permute.xlu1 %859 }
 0x1d3   : > { %v19300_v47 = vand.u32 4294901760, %v905_v32  ;;  %v902_v52 = vmul.f32 %v888_v0, %v876_v5  ;;  %v878_v7 = vsel %vm758_vm1, %v860_v20, %v864_v13  ;;  %v24535_v1 = vand.u32 4294901760, %v19290_v6  ;;  %v25232_v0 = vld [vmem:[#allocation29_spill] sm:$0xff]  ;;  %v25233_v5 = vld [vmem:[#allocation30_spill] sm:$0xff] }
 0x1d4   : > { %v901_v4 = vmul.f32 %v884_v53, %v878_v7  ;;  %v15448_v19 = vpack.c.bf16 %v25233_v5, %v25232_v0 }
 0x1d5   : > { %25231 = vst [vmem:[#allocation118_spill] sm:$0xff] %v19300_v47  ;;  %v910_v16 = vmax.f32 %v854_v22, %v902_v52  ;;  %1589 = vmatmul.mubr.f32.vlgmr.msra.gmra.mrb[0].mxu0 %v19300_v47  ;;  %v870_v21 = vpop.permute.xlu0 %869  ;;  %v1172_v15 = vsub.f32 %v19290_v6, %v24535_v1  ;;  %v19316_v13 = vsub.f32 %v905_v32, %v19300_v47  ;;  %v25248_v1 = vld [vmem:[#allocation44_spill] sm:$0xff]  ;;  %v25269_v47 = vld [vmem:[#allocation74_spill] sm:$0xff] }
 0x1d6   : > { %v909_v58 = vmax.f32 %v853_v9, %v901_v4  ;;  %15443 = vmatpush1.bf16.msra.mxu0 %v15442_v17  ;;  %v873_v22 = vsel %vm758_vm1, %v866_v11, %v870_v21  ;;  %v879_v53 = vsel %vm758_vm1, %v870_v21, %v858_v50  ;;  %v872_v52 = vpop.permute.xlu1 %871 }
 0x1d7   : > { %v19324_v7 = vand.u32 4294901760, %v910_v16  ;;  %v19326_v63 = vmul.f32 %v892_v25, %v873_v22  ;;  %v19328_v26 = vmul.f32 %v896_v31, %v879_v53  ;;  %v874_v32 = vsel %vm758_vm1, %v868_v23, %v872_v52  ;;  %15445 = vmatprep.subr.bf16.mxu0 %v15444_v55  ;;  %v25240_v55 = vld [vmem:[#allocation32_spill] sm:$0xff]  ;;  %v25241_v22 = vld [vmem:[#allocation33_spill] sm:$0xff] }
 0x1d8   : > { %v19332_v61 = vand.u32 4294901760, %v909_v58  ;;  %v880_v9 = vsel %vm758_vm1, %v872_v52, %v860_v20  ;;  %v19336_v11 = vmul.f32 %v892_v25, %v874_v32  ;;  %v1173_v17 = vand.u32 4294901760, %v1172_v15  ;;  %v25242_v25 = vld [vmem:[#allocation34_spill] sm:$0xff] }
 0x1d9   : > { %25234 = vst [vmem:[#allocation29_spill] sm:$0xff] %v19324_v7  ;;  %25235 = vst [vmem:[#allocation30_spill] sm:$0xff] %v19326_v63  ;;  %v19339_v50 = vsub.f32 %v910_v16, %v19324_v7  ;;  %v19341_v4 = vmul.f32 %v896_v31, %v880_v9  ;;  %1595 = vmatprep.mubr.f32.mxu0 %v19324_v7  ;;  %v24534_v23 = vand.u32 4294901760, %v19316_v13  ;;  %v25243_v16 = vld [vmem:[#allocation35_spill] sm:$0xff]  ;;  %v25245_v32 = vld [vmem:[#allocation38_spill] sm:$0xff] }
 0x1da   : > { %25236 = vst [vmem:[#allocation119_spill] sm:$0xff] %v19328_v26  ;;  %25237 = vst [vmem:[#allocation120_spill] sm:$0xff] %v19332_v61  ;;  %v19345_v21 = vsub.f32 %v909_v58, %v19332_v61  ;;  %1174 = vmatprep.mubr.f32.mxu1 %v1173_v17  ;;  %15447 = vmatpush1.bf16.msra.mxu0 %v15446_v44  ;;  %v15450_v20 = vpack.c.bf16 %v25241_v22, %v25240_v55 }
 0x1db   : > { %25238 = vst [vmem:[#allocation121_spill] sm:$0xff] %v19336_v11  ;;  %25239 = vst [vmem:[#allocation122_spill] sm:$0xff] %v19341_v4  ;;  %1597 = vmatmul.mubr.f32.gmra.mrb[2].mxu0 %v19332_v61  ;;  %15449 = vmatprep.subr.bf16.mxu0 %v15448_v19  ;;  %v15452_v15 = vpack.c.bf16 %v25243_v16, %v25242_v25  ;;  %v24536_v31 = vand.u32 4294901760, %v19339_v50  ;;  %v1178_v58 = vsub.f32 %v19316_v13, %v24534_v23  ;;  %v25244_v19 = vld [vmem:[#allocation37_spill] sm:$0xff]  ;;  %v25259_v11 = vld [vmem:[#allocation60_spill] sm:$0xff] }
 0x1dc   : > { %1797 = vmatprep.mubr.f32.mxu0 %v19290_v6  ;;  %v24539_v44 = vand.u32 4294901760, %v19345_v21  ;;  %v15454_v9 = vpack.c.bf16 %v25245_v32, %v25244_v19  ;;  %v25261_v4 = vld [vmem:[#allocation62_spill] sm:$0xff]  ;;  %v25267_v61 = vld [vmem:[#allocation72_spill] sm:$0xff] }
 0x1dd   : > { %v1188_v53 = vsub.f32 %v19339_v50, %v24536_v31  ;;  %v1179_v52 = vand.u32 4294901760, %v1178_v58  ;;  %v25249_v31 = vld [vmem:[#allocation45_spill] sm:$0xff] }
 0x1de   : > { %15451 = vmatpush1.bf16.msra.mxu0 %v15450_v20  ;;  %v1194_v17 = vsub.f32 %v19345_v21, %v24539_v44  ;;  %v15458_v58 = vpack.c.bf16 %v25249_v31, %v25248_v1  ;;  %v25250_v20 = vld [vmem:[#allocation47_spill] sm:$0xff]  ;;  %v25253_v44 = vld [vmem:[#allocation50_spill] sm:$0xff] }
 0x1df   : > { %15453 = vmatprep.subr.bf16.mxu0 %v15452_v15  ;;  %v1189_v43 = vand.u32 4294901760, %v1188_v53  ;;  %1180 = vmatmul.mubr.f32.vlgmr.msra.gmra.mrb[0].mxu1 %v1179_v52  ;;  %v15460_v29 = vpack.c.bf16 %v25251_v3, %v25250_v20  ;;  %v15462_v15 = vpack.c.bf16 %v25253_v44, %v25252_v8  ;;  %v25254_v53 = vld [vmem:[#allocation53_spill] sm:$0xff]  ;;  %v25256_v52 = vld [vmem:[#allocation56_spill] sm:$0xff] }
 0x1e0   : > { %v1195_v23 = vand.u32 4294901760, %v1194_v17  ;;  %v15464_v2 = vpack.c.bf16 %v25255_v37, %v25254_v53  ;;  %v25258_v17 = vld [vmem:[#allocation59_spill] sm:$0xff] }
 0x1e1   : > { %1190 = vmatprep.mubr.f32.mxu1 %v1189_v43  ;;  %v25257_v43 = vld [vmem:[#allocation57_spill] sm:$0xff] }
 0x1e2   : > { %15455 = vmatpush1.bf16.msra.mxu0 %v15454_v9  ;;  %v15466_v9 = vpack.c.bf16 %v25257_v43, %v25256_v52 }
 0x1e3   : > { %15457 = vmatprep.subr.bf16.mxu0 %v15456_v62  ;;  %1196 = vmatmul.mubr.f32.gmra.mrb[2].mxu1 %v1195_v23  ;;  %v15468_v62 = vpack.c.bf16 %v25259_v11, %v25258_v17  ;;  %v15470_v23 = vpack.c.bf16 %v25261_v4, %v25260_v33  ;;  %v25271_v17 = vld [vmem:[#allocation78_spill] sm:$0xff]  ;;  %v25273_v33 = vld [vmem:[#allocation81_spill] sm:$0xff] }
 0x1e6   : > { %15459 = vmatpush1.bf16.msra.mxu0 %v15458_v58  ;;  %v25262_v58 = vld [vmem:[#allocation65_spill] sm:$0xff] }
 0x1e7   : > { %15461 = vmatprep.subr.bf16.mxu0 %v15460_v29  ;;  %v15472_v63 = vpack.c.bf16 %v25263_v54, %v25262_v58  ;;  %v25264_v29 = vld [vmem:[#allocation68_spill] sm:$0xff] }
 0x1e8   : > { %v15474_v26 = vpack.c.bf16 %v25265_v27, %v25264_v29  ;;  %v25275_v58 = vld [vmem:[#allocation84_spill] sm:$0xff]  ;;  %v25277_v29 = vld [vmem:[#allocation86_spill] sm:$0xff] }
 0x1ea   : > { %15463 = vmatpush1.bf16.msra.mxu0 %v15462_v15  ;;  %v25266_v15 = vld [vmem:[#allocation71_spill] sm:$0xff] }
 0x1eb   : > { %15465 = vmatprep.subr.bf16.mxu0 %v15464_v2  ;;  %v15476_v7 = vpack.c.bf16 %v25267_v61, %v25266_v15  ;;  %v25268_v2 = vld [vmem:[#allocation73_spill] sm:$0xff]  ;;  %v25279_v15 = vld [vmem:[#allocation90_spill] sm:$0xff] }
 0x1ec   : > { %v15478_v11 = vpack.c.bf16 %v25269_v47, %v25268_v2  ;;  %v25281_v2 = vld [vmem:[#allocation93_spill] sm:$0xff] }
 0x1ee   : > { %15467 = vmatpush1.bf16.msra.mxu0 %v15466_v9  ;;  %v25270_v9 = vld [vmem:[#allocation77_spill] sm:$0xff] }
 0x1ef   : > { %15469 = vmatprep.subr.bf16.mxu0 %v15468_v62  ;;  %v15480_v4 = vpack.c.bf16 %v25271_v17, %v25270_v9  ;;  %v25272_v62 = vld [vmem:[#allocation80_spill] sm:$0xff] }
 0x1f0   : > { %v15482_v54 = vpack.c.bf16 %v25273_v33, %v25272_v62  ;;  %v25283_v9 = vld [vmem:[#allocation96_spill] sm:$0xff]  ;;  %v25285_v62 = vld [vmem:[#allocation98_spill] sm:$0xff] }
 0x1f2   : > { %15471 = vmatpush1.bf16.msra.mxu0 %v15470_v23  ;;  %v25274_v23 = vld [vmem:[#allocation83_spill] sm:$0xff] }
 0x1f3   : > { %15473 = vmatprep.subr.bf16.mxu0 %v15472_v63  ;;  %v15484_v27 = vpack.c.bf16 %v25275_v58, %v25274_v23  ;;  %v25276_v63 = vld [vmem:[#allocation85_spill] sm:$0xff] }
 0x1f4   : > { %v15486_v61 = vpack.c.bf16 %v25277_v29, %v25276_v63  ;;  %v25287_v23 = vld [vmem:[#allocation101_spill] sm:$0xff] }
 0x1f6   : > { %15475 = vmatpush1.bf16.msra.mxu0 %v15474_v26  ;;  %v25278_v26 = vld [vmem:[#allocation89_spill] sm:$0xff] }
 0x1f7   : > { %15477 = vmatprep.subr.bf16.mxu0 %v15476_v7  ;;  %v15488_v47 = vpack.c.bf16 %v25279_v15, %v25278_v26  ;;  %v25280_v7 = vld [vmem:[#allocation92_spill] sm:$0xff] }
 0x1f8   : > { %v15490_v17 = vpack.c.bf16 %v25281_v2, %v25280_v7 }
 0x1fa   : > { %15479 = vmatpush1.bf16.msra.mxu0 %v15478_v11  ;;  %v25282_v11 = vld [vmem:[#allocation95_spill] sm:$0xff] }
 0x1fb   : > { %15481 = vmatprep.subr.bf16.mxu0 %v15480_v4  ;;  %v15492_v33 = vpack.c.bf16 %v25283_v9, %v25282_v11  ;;  %v25284_v4 = vld [vmem:[#allocation97_spill] sm:$0xff] }
 0x1fc   : > { %v15494_v58 = vpack.c.bf16 %v25285_v62, %v25284_v4 }
 0x1fe   : > { %15483 = vmatpush1.bf16.msra.mxu0 %v15482_v54  ;;  %v25286_v54 = vld [vmem:[#allocation100_spill] sm:$0xff] }
 0x1ff   : > { %15485 = vmatprep.subr.bf16.mxu0 %v15484_v27  ;;  %v15496_v29 = vpack.c.bf16 %v25287_v23, %v25286_v54  ;;  %v25288_v27 = vld [vmem:[#allocation102_spill] sm:$0xff] }
 0x200   : > { %v15498_v15 = vpack.c.bf16 %v25288_v27, %v19065_v28 }
 0x202   : > { %15487 = vmatpush1.bf16.msra.mxu0 %v15486_v61  ;;  %v25290_v61 = vpack.c.bf16 %v19225_v30, %v19200_v60  ;;  %v25299_v30 = vld [vmem:[#allocation51_spill] sm:$0xff]  ;;  %v25300_v60 = vld [vmem:[#allocation52_spill] sm:$0xff] }
 0x203   : > { %15489 = vmatprep.subr.bf16.mxu0 %v15488_v47  ;;  %v25289_v47 = vpack.c.bf16 %v19194_v10, %v19178_v18  ;;  %v25303_v10 = vld [vmem:[#allocation63_spill] sm:$0xff] }
 0x206   : > { %15491 = vmatpush1.bf16.msra.mxu0 %v15490_v17  ;;  %v25291_v17 = vld [vmem:[#allocation28_spill] sm:$0xff] }
 0x207   : > { %15493 = vmatprep.subr.bf16.mxu0 %v15492_v33  ;;  %v25292_v33 = vld [vmem:[#allocation31_spill] sm:$0xff] }
 0x20a   : > { %15495 = vmatpush1.bf16.msra.mxu0 %v15494_v58  ;;  %v25293_v58 = vld [vmem:[#allocation36_spill] sm:$0xff] }
 0x20b   : > { %15497 = vmatprep.subr.bf16.mxu0 %v15496_v29  ;;  %v25294_v29 = vld [vmem:[#allocation39_spill] sm:$0xff] }
 0x20e   : > { %15499 = vmatpush1.bf16.msra.mxu0 %v15498_v15  ;;  %v25295_v15 = vand.u32 4294901760, %v19290_v6  ;;  %v25305_v6 = vld [vmem:[#allocation67_spill] sm:$0xff] }
 0x20f   : > { %15501 = vmatprep.subr.bf16.mxu0 %v25289_v47  ;;  %v25296_v47 = vld [vmem:[#allocation40_spill] sm:$0xff] }
 0x212   : > { %15503 = vmatpush1.bf16.msra.mxu0 %v25290_v61  ;;  %v25297_v61 = vld [vmem:[#allocation43_spill] sm:$0xff] }
 0x213   : > { %15505 = vmatprep.subr.bf16.mxu0 %v25291_v17  ;;  %v25298_v17 = vld [vmem:[#allocation46_spill] sm:$0xff] }
 0x215   : > { %1800 = vmatmul.mubr.f32.vlgmr.msra.gmra.mrb[0].mxu0 %v19316_v13 }
 0x216   : > { %1807 = vmatprep.mubr.f32.mxu0 %v19339_v50  ;;  %15507 = vmatpush1.bf16.msra.mxu0 %v25292_v33  ;;  %v25301_v33 = vld [vmem:[#allocation55_spill] sm:$0xff] }
 0x217   : > { %15509 = vmatprep.subr.bf16.mxu0 %v25293_v58  ;;  %v25302_v58 = vld [vmem:[#allocation58_spill] sm:$0xff] }
 0x219   : > { %1810 = vmatmul.mubr.f32.gmra.mrb[2].mxu0 %v19345_v21 }
 0x21a   : > { %15511 = vmatpush1.bf16.msra.mxu0 %v25294_v29  ;;  %1947 = vmatprep.mubr.f32.mxu0 %v25295_v15  ;;  %v25304_v29 = vld [vmem:[#allocation64_spill] sm:$0xff]  ;;  %v25306_v15 = vld [vmem:[#allocation70_spill] sm:$0xff] }
 0x21b   : > { %15513 = vmatprep.subr.bf16.mxu0 %v25296_v47  ;;  %v25307_v47 = vld [vmem:[#allocation75_spill] sm:$0xff] }
 0x21e   : > { %15515 = vmatpush1.bf16.msra.mxu0 %v25297_v61  ;;  %v25308_v61 = vld [vmem:[#allocation76_spill] sm:$0xff] }
 0x21f   : > { %15517 = vmatprep.subr.bf16.mxu0 %v25298_v17  ;;  %v25309_v17 = vld [vmem:[#allocation79_spill] sm:$0xff] }
 0x222   : > { %15519 = vmatpush1.bf16.msra.mxu0 %v25299_v30  ;;  %v25310_v30 = vld [vmem:[#allocation82_spill] sm:$0xff] }
 0x223   : > { %15521 = vmatprep.subr.bf16.mxu0 %v25300_v60  ;;  %v25311_v60 = vld [vmem:[#allocation87_spill] sm:$0xff] }
 0x226   : > { %15523 = vmatpush1.bf16.msra.mxu0 %v25301_v33  ;;  %v25312_v33 = vld [vmem:[#allocation88_spill] sm:$0xff] }
 0x227   : > { %15525 = vmatprep.subr.bf16.mxu0 %v25302_v58  ;;  %v25313_v58 = vld [vmem:[#allocation91_spill] sm:$0xff] }
 0x22a   : > { %15527 = vmatpush1.bf16.msra.mxu0 %v25303_v10  ;;  %v25314_v10 = vld [vmem:[#allocation94_spill] sm:$0xff] }
 0x22b   : > { %15529 = vmatprep.subr.bf16.mxu0 %v25304_v29  ;;  %v25315_v29 = vld [vmem:[#allocation103_spill] sm:$0xff] }
 0x22e   : > { %15531 = vmatpush1.bf16.msra.mxu0 %v25305_v6 }
 0x22f   : > { %15533 = vmatprep.subr.bf16.mxu0 %v25306_v15 }
 0x232   : > { %15535 = vmatpush1.bf16.msra.mxu0 %v25307_v47 }
 0x233   : > { %15537 = vmatprep.subr.bf16.mxu0 %v25308_v61 }
 0x236   : > { %15539 = vmatpush1.bf16.msra.mxu0 %v25309_v17 }
 0x237   : > { %15541 = vmatprep.subr.bf16.mxu0 %v25310_v30 }
 0x23a   : > { %15543 = vmatpush1.bf16.msra.mxu0 %v25311_v60 }
 0x23b   : > { %15545 = vmatprep.subr.bf16.mxu0 %v25312_v33 }
 0x23e   : > { %15547 = vmatpush1.bf16.msra.mxu0 %v25313_v58  ;;  %v25316_v58 = vand.u32 4294901760, %v18205_v34  ;;  %v25323_v34 = vand.u32 4294901760, %v19339_v50 }
 0x23f   : > { %15549 = vmatprep.subr.bf16.mxu0 %v25314_v10  ;;  %v25317_v10 = vand.u32 4294901760, %v18207_v35  ;;  %v25324_v35 = vand.u32 4294901760, %v18235_v45 }
 0x241   : > { %v15568_v33 = vpack.c.bf16 %v25317_v10, %v25316_v58 }
 0x242   : > { %15551 = vmatpush1.bf16.msra.mxu0 %v25315_v29 }
 0x243   : > { %15553 = vmatprep.subr.bf16.mxu0 %v19130_v41  ;;  %v25318_v41 = vand.u32 4294901760, %v18212_v36  ;;  %v25325_v36 = vand.u32 4294901760, %v18243_v49  ;;  %v25331_v49 = vand.u32 4294901760, %v25242_v25  ;;  %v25339_v25 = vand.u32 4294901760, %v25250_v20 }
 0x244   : > { %v25346_v20 = vand.u32 4294901760, %v25257_v43  ;;  %v25359_v43 = vld [vmem:[#allocation68_spill] sm:$0xff] }
 0x245   : > { %v15574_v10 = vpack.c.bf16 %v25325_v36, %v25324_v35  ;;  %v25349_v36 = vld [vmem:[#allocation60_spill] sm:$0xff] }
 0x246   : > { %15555 = vmatpush1.bf16.msra.mxu0 %v19142_v24  ;;  %v25319_v24 = vand.u32 4294901760, %v18216_v38  ;;  %v25326_v38 = vand.u32 4294901760, %v25232_v0 }
 0x247   : > { %15557 = vmatprep.subr.bf16.mxu0 %v19187_v59 }
 0x248   : > { %v15570_v59 = vpack.c.bf16 %v25319_v24, %v25318_v41  ;;  %v25329_v24 = vand.u32 4294901760, %v25240_v55  ;;  %v25338_v55 = vand.u32 4294901760, %v25249_v31  ;;  %v25345_v31 = vand.u32 4294901760, %v25256_v52 }
 0x24a   : > { %15559 = vmatpush1.bf16.msra.mxu0 %v19206_v12  ;;  %v25320_v12 = vand.u32 4294901760, %v18221_v39  ;;  %v25327_v39 = vand.u32 4294901760, %v25233_v5  ;;  %v25335_v5 = vand.u32 4294901760, %v25246_v46  ;;  %v25342_v46 = vand.u32 4294901760, %v25253_v44  ;;  %v25351_v44 = vld [vmem:[#allocation61_spill] sm:$0xff] }
 0x24b   : > { %15561 = vmatprep.subr.bf16.mxu0 %v19219_v14  ;;  %v25321_v14 = vand.u32 4294901760, %v18226_v40  ;;  %v25328_v40 = vand.u32 4294901760, %v19345_v21  ;;  %v25337_v21 = vand.u32 4294901760, %v25248_v1  ;;  %v25344_v1 = vand.u32 4294901760, %v25255_v37  ;;  %v25355_v37 = vld [vmem:[#allocation65_spill] sm:$0xff] }
 0x24c   : > { %v15576_v41 = vpack.c.bf16 %v25327_v39, %v25326_v38  ;;  %v25352_v38 = vand.u32 4294901760, %v25351_v44  ;;  %v25353_v39 = vld [vmem:[#allocation62_spill] sm:$0xff] }
 0x24d   : > { %v25384_v44 = vld [vmem:[#allocation86_spill] sm:$0xff] }
 0x24e   : > { %15563 = vmatpush1.bf16.msra.mxu0 %v19239_v42  ;;  %v15572_v42 = vpack.c.bf16 %v25321_v14, %v25320_v12  ;;  %v25332_v12 = vand.u32 4294901760, %v25243_v16  ;;  %v25340_v16 = vand.u32 4294901760, %v25251_v3  ;;  %v25347_v3 = vld [vmem:[#allocation59_spill] sm:$0xff] }
 0x24f   : > { %15565 = vmatprep.subr.bf16.mxu0 %v19248_v57  ;;  %v25322_v57 = vand.u32 4294901760, %v19316_v13  ;;  %v25336_v13 = vand.u32 4294901760, %v25247_v51  ;;  %v25343_v51 = vand.u32 4294901760, %v25254_v53  ;;  %v25348_v35 = vand.u32 4294901760, %v25347_v3 }
 0x250   : > { %v15580_v14 = vpack.c.bf16 %v25332_v12, %v25331_v49  ;;  %v25354_v53 = vand.u32 4294901760, %v25353_v39  ;;  %v25361_v49 = vld [vmem:[#allocation69_spill] sm:$0xff] }
 0x251   : > { %v15584_v50 = vpack.c.bf16 %v25336_v13, %v25335_v5  ;;  %v15592_v58 = vpack.c.bf16 %v25344_v1, %v25343_v51  ;;  %v25362_v12 = vand.u32 4294901760, %v25361_v49  ;;  %v25375_v51 = vld [vmem:[#allocation80_spill] sm:$0xff]  ;;  %v25393_v49 = vand.u32 4294901760, %v25284_v4 }
 0x252   : > { %15567 = vmatpush1.bf16.msra.mxu0 %v19256_v48  ;;  %v25376_v1 = vand.u32 4294901760, %v25375_v51  ;;  %v25418_v51 = vld [vmem:[#allocation55_spill] sm:$0xff] }
 0x253   : > { %15569 = vmatprep.subr.bf16.mxu0 %v15568_v33 }
 0x255   : > { %1951 = vmatmul.mubr.f32.vlgmr.msra.gmra.mrb[0].mxu0 %v25322_v57  ;;  %v25334_v57 = vand.u32 4294901760, %v25245_v32  ;;  %v25341_v32 = vand.u32 4294901760, %v25252_v8  ;;  %v25350_v8 = vand.u32 4294901760, %v25349_v36 }
 0x256   : > { %1959 = vmatprep.mubr.f32.mxu0 %v25323_v34  ;;  %15571 = vmatpush1.bf16.msra.mxu0 %v15570_v59  ;;  %v25330_v59 = vand.u32 4294901760, %v25241_v22  ;;  %v15586_v22 = vpack.c.bf16 %v25338_v55, %v25337_v21  ;;  %v15594_v34 = vpack.c.bf16 %v25346_v20, %v25345_v31  ;;  %v25369_v55 = vld [vmem:[#allocation74_spill] sm:$0xff] }
 0x257   : > { %15573 = vmatprep.subr.bf16.mxu0 %v15572_v42  ;;  %v25333_v42 = vand.u32 4294901760, %v25244_v19  ;;  %v15588_v19 = vpack.c.bf16 %v25340_v16, %v25339_v25  ;;  %v15590_v33 = vpack.c.bf16 %v25342_v46, %v25341_v32  ;;  %v25371_v16 = vld [vmem:[#allocation77_spill] sm:$0xff]  ;;  %v25373_v32 = vld [vmem:[#allocation78_spill] sm:$0xff] }
 0x258   : > { %v15578_v45 = vpack.c.bf16 %v25330_v59, %v25329_v24  ;;  %v25357_v24 = vld [vmem:[#allocation66_spill] sm:$0xff]  ;;  %v25374_v46 = vand.u32 4294901760, %v25373_v32 }
 0x259   : > { %1963 = vmatmul.mubr.f32.gmra.mrb[2].mxu0 %v25328_v40  ;;  %v15582_v0 = vpack.c.bf16 %v25334_v57, %v25333_v42  ;;  %v25356_v40 = vand.u32 4294901760, %v25355_v37  ;;  %v25358_v52 = vand.u32 4294901760, %v25357_v24  ;;  %v25363_v42 = vld [vmem:[#allocation71_spill] sm:$0xff]  ;;  %v25389_v24 = vand.u32 4294901760, %v25280_v7  ;;  %v25415_v32 = vld [vmem:[#allocation46_spill] sm:$0xff] }
 0x25a   : > { %15575 = vmatpush1.bf16.msra.mxu0 %v15574_v10  ;;  %2226 = vmatprep.mubr.f32.mxu0 %v19282_v56  ;;  %v15596_v10 = vpack.c.bf16 %v25350_v8, %v25348_v35  ;;  %v25364_v57 = vand.u32 4294901760, %v25363_v42  ;;  %v25381_v35 = vld [vmem:[#allocation84_spill] sm:$0xff]  ;;  %v25396_v7 = vand.u32 4294901760, %v25287_v23 }
 0x25b   : > { %15577 = vmatprep.subr.bf16.mxu0 %v15576_v41  ;;  %v15598_v41 = vpack.c.bf16 %v25354_v53, %v25352_v38  ;;  %v15600_v59 = vpack.c.bf16 %v25358_v52, %v25356_v40  ;;  %v25382_v36 = vand.u32 4294901760, %v25381_v35  ;;  %v25385_v38 = vand.u32 4294901760, %v25384_v44  ;;  %v25406_v23 = vld [vmem:[#allocation28_spill] sm:$0xff]  ;;  %v25430_v35 = vld [vmem:[#allocation119_spill] sm:$0xff] }
 0x25c   : > { %v25386_v53 = vand.u32 4294901760, %v25278_v26  ;;  %v25390_v52 = vand.u32 4294901760, %v25281_v2  ;;  %v25394_v26 = vand.u32 4294901760, %v25285_v62  ;;  %v25397_v2 = vand.u32 4294901760, %v19065_v28  ;;  %v25402_v62 = vld [vmem:[#allocation110_spill] sm:$0xff] }
 0x25d   : > { %v25407_v28 = vld [vmem:[#allocation118_spill] sm:$0xff] }
 0x25e   : > { %15579 = vmatpush1.bf16.msra.mxu0 %v15578_v45  ;;  %v25360_v45 = vand.u32 4294901760, %v25359_v43  ;;  %v25391_v43 = vand.u32 4294901760, %v25282_v11  ;;  %v25398_v11 = vand.u32 4294901760, %v25288_v27  ;;  %v25408_v27 = vld [vmem:[#allocation29_spill] sm:$0xff] }
 0x25f   : > { %15581 = vmatprep.subr.bf16.mxu0 %v15580_v14 }
 0x260   : > { %v15602_v14 = vpack.c.bf16 %v25362_v12, %v25360_v45  ;;  %v15622_v12 = vpack.c.bf16 %v25394_v26, %v25393_v49  ;;  %v25440_v49 = vld [vmem:[#allocation117_spill] sm:$0xff] }
 0x262   : > { %15583 = vmatpush1.bf16.msra.mxu0 %v15582_v0  ;;  %v25365_v0 = vld [vmem:[#allocation72_spill] sm:$0xff] }
 0x263   : > { %15585 = vmatprep.subr.bf16.mxu0 %v15584_v50  ;;  %v25366_v5 = vand.u32 4294901760, %v25365_v0  ;;  %v25367_v50 = vld [vmem:[#allocation73_spill] sm:$0xff] }
 0x264   : > { %v25368_v21 = vand.u32 4294901760, %v25367_v50  ;;  %v25400_v0 = vld [vmem:[#allocation109_spill] sm:$0xff]  ;;  %v25404_v50 = vld [vmem:[#allocation115_spill] sm:$0xff] }
 0x265   : > { %v15604_v13 = vpack.c.bf16 %v25366_v5, %v25364_v57  ;;  %v15626_v57 = vpack.c.bf16 %v25398_v11, %v25397_v2  ;;  %v25401_v4 = vand.u32 4294901760, %v25400_v0  ;;  %v19669_v11 = vld [vmem:[#allocation2 + $0x248] sm:$0xff] }
 0x266   : > { %15587 = vmatpush1.bf16.msra.mxu0 %v15586_v22  ;;  %v25370_v22 = vand.u32 4294901760, %v25369_v55  ;;  %v25409_v55 = vld [vmem:[#allocation31_spill] sm:$0xff] }
 0x267   : > { %15589 = vmatprep.subr.bf16.mxu0 %v15588_v19  ;;  %v25372_v19 = vand.u32 4294901760, %v25371_v16  ;;  %v25413_v16 = vld [vmem:[#allocation40_spill] sm:$0xff] }
 0x268   : > { %v15606_v25 = vpack.c.bf16 %v25370_v22, %v25368_v21  ;;  %v25411_v22 = vld [vmem:[#allocation120_spill] sm:$0xff] }
 0x26a   : > { %15591 = vmatpush1.bf16.msra.mxu0 %v15590_v33  ;;  %v15608_v33 = vpack.c.bf16 %v25374_v46, %v25372_v19  ;;  %v25414_v19 = vld [vmem:[#allocation43_spill] sm:$0xff] }
 0x26b   : > { %15593 = vmatprep.subr.bf16.mxu0 %v15592_v58  ;;  %v25377_v58 = vld [vmem:[#allocation81_spill] sm:$0xff]  ;;  %v25416_v46 = vld [vmem:[#allocation51_spill] sm:$0xff] }
 0x26c   : > { %v25378_v31 = vand.u32 4294901760, %v25377_v58  ;;  %v25420_v58 = vld [vmem:[#allocation63_spill] sm:$0xff] }
 0x26e   : > { %15595 = vmatpush1.bf16.msra.mxu0 %v15594_v34  ;;  %v15610_v20 = vpack.c.bf16 %v25378_v31, %v25376_v1  ;;  %v25379_v34 = vld [vmem:[#allocation83_spill] sm:$0xff]  ;;  %v25419_v1 = vld [vmem:[#allocation58_spill] sm:$0xff]  ;;  %v25421_v31 = vld [vmem:[#allocation64_spill] sm:$0xff] }
 0x26f   : > { %15597 = vmatprep.subr.bf16.mxu0 %v15596_v10  ;;  %v25380_v3 = vand.u32 4294901760, %v25379_v34  ;;  %v25383_v10 = vand.u32 4294901760, %v25276_v63  ;;  %v25392_v63 = vand.u32 4294901760, %v25283_v9  ;;  %v25399_v9 = vand.u32 4294901760, %v19178_v18  ;;  %v25410_v18 = vld [vmem:[#allocation36_spill] sm:$0xff] }
 0x271   : > { %v15612_v8 = vpack.c.bf16 %v25382_v36, %v25380_v3  ;;  %v15614_v39 = vpack.c.bf16 %v25385_v38, %v25383_v10  ;;  %v15620_v45 = vpack.c.bf16 %v25392_v63, %v25391_v43  ;;  %v15628_v5 = vpack.c.bf16 %v25401_v4, %v25399_v9  ;;  %v25433_v10 = vld [vmem:[#allocation105_spill] sm:$0xff]  ;;  %v25439_v43 = vld [vmem:[#allocation116_spill] sm:$0xff] }
 0x272   : > { %15599 = vmatpush1.bf16.msra.mxu0 %v15598_v41  ;;  %v25387_v41 = vld [vmem:[#allocation90_spill] sm:$0xff]  ;;  %v19635_v38 = vld [vmem:[#allocation2 + $0x218] sm:$0xff] }
 0x273   : > { %15601 = vmatprep.subr.bf16.mxu0 %v15600_v59  ;;  %v25388_v37 = vand.u32 4294901760, %v25387_v41  ;;  %v15618_v59 = vpack.c.bf16 %v25390_v52, %v25389_v24  ;;  %v24583_v41 = vand.u32 4294901760, %v19635_v38  ;;  %v19648_v52 = vld [vmem:[#allocation2 + $0x228] sm:$0xff] }
 0x275   : > { %v15616_v40 = vpack.c.bf16 %v25388_v37, %v25386_v53  ;;  %v25437_v53 = vld [vmem:[#allocation113_spill] sm:$0xff]  ;;  %v19641_v37 = vld [vmem:[#allocation2 + $0x200] sm:$0xff] }
 0x276   : > { %15603 = vmatpush1.bf16.msra.mxu0 %v15602_v14  ;;  %v25395_v14 = vand.u32 4294901760, %v25286_v54  ;;  %v25405_v54 = vand.u32 4294901760, %v25404_v50  ;;  %v24582_v63 = vand.u32 4294901760, %v19641_v37  ;;  %v19693_v50 = vld [vmem:[#allocation2 + $0x250] sm:$0xff] }
 0x277   : > { %15605 = vmatprep.subr.bf16.mxu0 %v15604_v13  ;;  %v25403_v13 = vand.u32 4294901760, %v25402_v62 }
 0x278   : > { %v15624_v42 = vpack.c.bf16 %v25396_v7, %v25395_v14  ;;  %v19664_v7 = vld [vmem:[#allocation2 + $0x220] sm:$0xff] }
 0x279   : > { %v15630_v21 = vpack.c.bf16 %v25405_v54, %v25403_v13  ;;  %v24576_v0 = vand.u32 4294901760, %v19664_v7  ;;  %v19691_v13 = vld [vmem:[#allocation2 + $0x240] sm:$0xff] }
 0x27a   : > { %15607 = vmatpush1.bf16.msra.mxu0 %v15606_v25  ;;  %v25412_v25 = vld [vmem:[#allocation39_spill] sm:$0xff] }
 0x27b   : > { %15609 = vmatprep.subr.bf16.mxu0 %v15608_v33  ;;  %v25417_v33 = vld [vmem:[#allocation52_spill] sm:$0xff] }
 0x27e   : > { %15611 = vmatpush1.bf16.msra.mxu0 %v15610_v20 }
 0x27f   : > { %15613 = vmatprep.subr.bf16.mxu0 %v15612_v8 }
 0x282   : > { %15615 = vmatpush1.bf16.msra.mxu0 %v15614_v39  ;;  %v25436_v39 = vld [vmem:[#allocation111_spill] sm:$0xff] }
 0x283   : > { %15617 = vmatprep.subr.bf16.mxu0 %v15616_v40  ;;  %v19643_v40 = vld [vmem:[#allocation2 + $0x210] sm:$0xff] }
 0x286   : > { %15619 = vmatpush1.bf16.msra.mxu0 %v15618_v59  ;;  %v19650_v59 = vld [vmem:[#allocation2 + $0x238] sm:$0xff] }
 0x287   : > { %15621 = vmatprep.subr.bf16.mxu0 %v15620_v45  ;;  %v24581_v45 = vand.u32 4294901760, %v19643_v40  ;;  %v24577_v14 = vand.u32 4294901760, %v19650_v59 }
 0x289   : > { %v19678_v9 = vpack.c.bf16 %v24581_v45, %v24582_v63  ;;  %v19849_v63 = vld [vmem:[#allocation2 + $0x308] sm:$0xff]  ;;  %v19851_v45 = vld [vmem:[#allocation2 + $0x318] sm:$0xff] }
 0x28a   : > { %15623 = vmatpush1.bf16.msra.mxu0 %v15622_v12  ;;  %v24578_v12 = vand.u32 4294901760, %v19648_v52 }
 0x28b   : > { %15625 = vmatprep.subr.bf16.mxu0 %v15624_v42  ;;  %v19666_v42 = vld [vmem:[#allocation2 + $0x230] sm:$0xff]  ;;  %25442 = vst [vmem:[#allocation42_spill] sm:$0xff] %v19678_v9 }
 0x28c   : > { %v24575_v4 = vand.u32 4294901760, %v19666_v42 }
 0x28e   : > { %15627 = vmatpush1.bf16.msra.mxu0 %v15626_v57  ;;  %v19671_v57 = vld [vmem:[#allocation2 + $0x258] sm:$0xff] }
 0x28f   : > { %15629 = vmatprep.subr.bf16.mxu0 %v15628_v5  ;;  %v19687_v5 = vpack.c.bf16 %v24577_v14, %v24578_v12  ;;  %v24571_v62 = vand.u32 4294901760, %v19671_v57  ;;  %v19816_v14 = vld [vmem:[#allocation2 + $0x2e8] sm:$0xff]  ;;  %v19818_v12 = vld [vmem:[#allocation2 + $0x2f8] sm:$0xff] }
 0x291   : > { %25443 = vst [vmem:[#allocation44_spill] sm:$0xff] %v19687_v5 }
 0x292   : > { %15631 = vmatpush1.bf16.msra.mxu0 %v15630_v21  ;;  %v19698_v21 = vld [vmem:[#allocation2 + $0x268] sm:$0xff] }
 0x293   : > { %15633 = vmatprep.subr.bf16.mxu0 %v25406_v23  ;;  %v19700_v23 = vld [vmem:[#allocation2 + $0x278] sm:$0xff] }
 0x295   : > { %2228 = vmatmul.mubr.f32.vlgmr.msra.gmra.mrb[0].mxu0 %v25407_v28 }
 0x296   : > { %2234 = vmatprep.mubr.f32.mxu0 %v25408_v27  ;;  %15635 = vmatpush1.bf16.msra.mxu0 %v25409_v55  ;;  %v19709_v55 = vpack.c.bf16 %v24575_v4, %v24576_v0 }
 0x297   : > { %15637 = vmatprep.subr.bf16.mxu0 %v25410_v18  ;;  %v24570_v18 = vand.u32 4294901760, %v19691_v13 }
 0x298   : > { %25444 = vst [vmem:[#allocation45_spill] sm:$0xff] %v19709_v55 }
 0x299   : > { %2236 = vmatmul.mubr.f32.gmra.mrb[2].mxu0 %v25411_v22 }
 0x29a   : > { %15639 = vmatpush1.bf16.msra.mxu0 %v25412_v25  ;;  %2371 = vmatprep.mubr.f32.mxu0 %v19282_v56  ;;  %v24567_v25 = vand.u32 4294901760, %v19693_v50 }
 0x29b   : > { %15641 = vmatprep.subr.bf16.mxu0 %v25413_v16  ;;  %v24565_v16 = vand.u32 4294901760, %v19700_v23 }
 0x29e   : > { %15643 = vmatpush1.bf16.msra.mxu0 %v25414_v19  ;;  %v19722_v19 = vld [vmem:[#allocation2 + $0x260] sm:$0xff] }
 0x29f   : > { %15645 = vmatprep.subr.bf16.mxu0 %v25415_v32  ;;  %v19724_v32 = vld [vmem:[#allocation2 + $0x270] sm:$0xff] }
 0x2a2   : > { %15647 = vmatpush1.bf16.msra.mxu0 %v25416_v46 }
 0x2a3   : > { %15649 = vmatprep.subr.bf16.mxu0 %v25417_v33  ;;  %v19726_v33 = vld [vmem:[#allocation2 + $0x288] sm:$0xff] }
 0x2a6   : > { %15651 = vmatpush1.bf16.msra.mxu0 %v25418_v51  ;;  %v19728_v51 = vld [vmem:[#allocation2 + $0x298] sm:$0xff] }
 0x2a7   : > { %15653 = vmatprep.subr.bf16.mxu0 %v25419_v1  ;;  %v19736_v1 = vpack.c.bf16 %v24567_v25, %v24570_v18  ;;  %v25454_v25 = vld [vmem:[#allocation114_spill] sm:$0xff] }
 0x2a9   : > { %25446 = vst [vmem:[#allocation48_spill] sm:$0xff] %v19736_v1 }
 0x2aa   : > { %15655 = vmatpush1.bf16.msra.mxu0 %v25420_v58  ;;  %v24564_v58 = vand.u32 4294901760, %v19722_v19 }
 0x2ab   : > { %15657 = vmatprep.subr.bf16.mxu0 %v25421_v31  ;;  %v24563_v31 = vand.u32 4294901760, %v19724_v32 }
 0x2ae   : > { %15659 = vmatpush1.bf16.msra.mxu0 %v25305_v6  ;;  %v25426_v6 = vld [vmem:[#allocation88_spill] sm:$0xff] }
 0x2af   : > { %15661 = vmatprep.subr.bf16.mxu0 %v25306_v15  ;;  %v25427_v15 = vld [vmem:[#allocation91_spill] sm:$0xff] }
 0x2b2   : > { %15663 = vmatpush1.bf16.msra.mxu0 %v25307_v47  ;;  %v19609_v56 = vpop.f32.mrb[0].mxu1  ;;  %v25428_v47 = vld [vmem:[#allocation94_spill] sm:$0xff] }
 0x2b3   : > { %25422 = vst [vmem:[#allocation32_spill] sm:$0xff] %v19609_v56  ;;  %15665 = vmatprep.subr.bf16.mxu0 %v25308_v61  ;;  %v19612_v20 = vpop.f32.mrb[1].mxu1  ;;  %v25429_v61 = vld [vmem:[#allocation104_spill] sm:$0xff] }
 0x2b4   : > { %25423 = vst [vmem:[#allocation33_spill] sm:$0xff] %v19612_v20  ;;  %v25472_v20 = vand.u32 4294901760, %v19818_v12 }
 0x2b6   : > { %15667 = vmatpush1.bf16.msra.mxu0 %v25309_v17  ;;  %v19615_v34 = vpop.f32.mrb[2].mxu1  ;;  %v25431_v17 = vld [vmem:[#allocation112_spill] sm:$0xff] }
 0x2b7   : > { %25424 = vst [vmem:[#allocation34_spill] sm:$0xff] %v19615_v34  ;;  %15669 = vmatprep.subr.bf16.mxu0 %v25310_v30  ;;  %v19618_v3 = vpop.f32.mrb[3].mxu1  ;;  %v25432_v36 = vmax.f32 %v25431_v17, 0.0  ;;  %v25434_v30 = vld [vmem:[#allocation108_spill] sm:$0xff]  ;;  %v19755_v17 = vld [vmem:[#allocation2 + $0x2b8] sm:$0xff]  ;;  %v25471_v34 = vand.u32 4294901760, %v19816_v14 }
 0x2b8   : > { %25425 = vst [vmem:[#allocation35_spill] sm:$0xff] %v19618_v3 }
 0x2b9   : > { %v908_v8 = vmax.f32 %v25432_v36, %v25430_v35  ;;  %v19753_v35 = vld [vmem:[#allocation2 + $0x2a8] sm:$0xff]  ;;  %v19762_v36 = vpack.c.bf16 %v24563_v31, %v24564_v58 }
 0x2ba   : > { %15671 = vmatpush1.bf16.msra.mxu0 %v25311_v60  ;;  %v19633_v60 = vld [vmem:[#allocation2 + $0x208] sm:$0xff] }
 0x2bb   : > { %15673 = vmatprep.subr.bf16.mxu0 %v25426_v6  ;;  %v19631_v44 = vand.u32 4294901760, %v908_v8  ;;  %v24569_v6 = vand.u32 4294901760, %v19726_v33  ;;  %25448 = vst [vmem:[#allocation50_spill] sm:$0xff] %v19762_v36  ;;  %v19782_v58 = vld [vmem:[#allocation2 + $0x2c8] sm:$0xff] }
 0x2bd   : > { %25435 = vst [vmem:[#allocation37_spill] sm:$0xff] %v19631_v44  ;;  %v19646_v24 = vsub.f32 %v908_v8, %v19631_v44  ;;  %v25527_v44 = vand.u32 4294901760, %v19700_v23 }
 0x2be   : > { %15675 = vmatpush1.bf16.msra.mxu0 %v25427_v15  ;;  %v24568_v15 = vand.u32 4294901760, %v19728_v51 }
 0x2bf   : > { %15677 = vmatprep.subr.bf16.mxu0 %v25428_v47  ;;  %25438 = vst [vmem:[#allocation38_spill] sm:$0xff] %v19646_v24  ;;  %v24562_v2 = vand.u32 4294901760, %v19646_v24  ;;  %v19749_v47 = vld [vmem:[#allocation2 + $0x280] sm:$0xff] }
 0x2c0   : > { %v24573_v8 = vand.u32 4294901760, %v19749_v47 }
 0x2c1   : > { %v2518_v54 = vsub.f32 %v19646_v24, %v24562_v2 }
 0x2c2   : > { %15679 = vmatpush1.bf16.msra.mxu0 %v25315_v29  ;;  %v24586_v29 = vand.u32 4294901760, %v19633_v60 }
 0x2c3   : > { %15681 = vmatprep.subr.bf16.mxu0 %v25429_v61  ;;  %v2519_v46 = vand.u32 4294901760, %v2518_v54  ;;  %v19751_v61 = vld [vmem:[#allocation2 + $0x290] sm:$0xff]  ;;  %v25450_v54 = vld [vmem:[#allocation30_spill] sm:$0xff] }
 0x2c4   : > { %v19660_v26 = vpack.c.bf16 %v24583_v41, %v24586_v29  ;;  %v19840_v41 = vld [vmem:[#allocation2 + $0x2e0] sm:$0xff] }
 0x2c6   : > { %15683 = vmatpush1.bf16.msra.mxu0 %v25433_v10  ;;  %25441 = vst [vmem:[#allocation41_spill] sm:$0xff] %v19660_v26  ;;  %v24572_v10 = vand.u32 4294901760, %v19751_v61 }
 0x2c7   : > { %15685 = vmatprep.subr.bf16.mxu0 %v25434_v30  ;;  %v19771_v30 = vpack.c.bf16 %v24568_v15, %v24569_v6  ;;  %v25455_v15 = vmax.f32 %v25454_v25, 0.0 }
 0x2c8   : > { %v19794_v18 = vpack.c.bf16 %v24572_v10, %v24573_v8  ;;  %v25459_v8 = vld [vmem:[#allocation121_spill] sm:$0xff] }
 0x2c9   : > { %25449 = vst [vmem:[#allocation53_spill] sm:$0xff] %v19771_v30 }
 0x2ca   : > { %15687 = vmatpush1.bf16.msra.mxu0 %v25436_v39  ;;  %v24580_v39 = vand.u32 4294901760, %v19753_v35  ;;  %25456 = vst [vmem:[#allocation54_spill] sm:$0xff] %v19794_v18 }
 0x2cb   : > { %15689 = vmatprep.subr.bf16.mxu0 %v25437_v53  ;;  %v24579_v53 = vand.u32 4294901760, %v19755_v17 }
 0x2cd   : > { %v19803_v25 = vpack.c.bf16 %v24579_v53, %v24580_v39 }
 0x2ce   : > { %15691 = vmatpush1.bf16.msra.mxu0 %v25439_v43  ;;  %v19775_v43 = vld [vmem:[#allocation2 + $0x2a0] sm:$0xff] }
 0x2cf   : > { %15693 = vmatprep.subr.bf16.mxu0 %v25440_v49  ;;  %v19777_v49 = vld [vmem:[#allocation2 + $0x2b0] sm:$0xff]  ;;  %25457 = vst [vmem:[#allocation56_spill] sm:$0xff] %v19803_v25 }
 0x2d2   : > { %15695 = vmatpush1.bf16.msra.mxu0 %v19256_v48  ;;  %v24574_v48 = vand.u32 4294901760, %v19669_v11 }
 0x2d3   : > { %15697 = vmatprep.subr.bf16.mxu0 %v19660_v26 }
 0x2d5   : > { %2373 = vmatmul.mubr.f32.vlgmr.msra.gmra.mrb[0].mxu0 %v25407_v28  ;;  %v19718_v28 = vpack.c.bf16 %v24571_v62, %v24574_v48  ;;  %v24585_v62 = vand.u32 4294901760, %v19775_v43  ;;  %v25460_v48 = vld [vmem:[#allocation107_spill] sm:$0xff] }
 0x2d6   : > { %2379 = vmatprep.mubr.f32.mxu0 %v25408_v27  ;;  %15699 = vmatpush1.bf16.msra.mxu0 %v19678_v9  ;;  %v24566_v27 = vand.u32 4294901760, %v19698_v21  ;;  %v25461_v4 = vmax.f32 %v25460_v48, 0.0  ;;  %v25497_v9 = vand.u32 4294901760, %v19635_v38 }
 0x2d7   : > { %15701 = vmatprep.subr.bf16.mxu0 %v19687_v5  ;;  %25445 = vst [vmem:[#allocation47_spill] sm:$0xff] %v19718_v28 }
 0x2d8   : > { %v911_v0 = vmax.f32 %v25461_v4, %v25459_v8 }
 0x2d9   : > { %2381 = vmatmul.mubr.f32.gmra.mrb[2].mxu0 %v25411_v22  ;;  %v19745_v22 = vpack.c.bf16 %v24565_v16, %v24566_v27  ;;  %v19784_v16 = vld [vmem:[#allocation2 + $0x2d8] sm:$0xff]  ;;  %v25453_v27 = vld [vmem:[#allocation122_spill] sm:$0xff] }
 0x2da   : > { %15703 = vmatpush1.bf16.msra.mxu0 %v19709_v55  ;;  %2520 = vmatprep.mubr.f32.mxu0 %v2519_v46  ;;  %v25451_v46 = vld [vmem:[#allocation106_spill] sm:$0xff]  ;;  %v912_v6 = vmax.f32 %v25455_v15, %v25453_v27  ;;  %v24588_v27 = vand.u32 4294901760, %v19782_v58  ;;  %v24587_v15 = vand.u32 4294901760, %v19784_v16  ;;  %v19847_v29 = vand.u32 4294901760, %v911_v0  ;;  %v19949_v55 = vld [vmem:[#allocation2 + $0x378] sm:$0xff] }
 0x2db   : > { %15705 = vmatprep.subr.bf16.mxu0 %v19718_v28  ;;  %25447 = vst [vmem:[#allocation49_spill] sm:$0xff] %v19745_v22  ;;  %v25452_v2 = vmax.f32 %v25451_v46, 0.0  ;;  %v19809_v46 = vld [vmem:[#allocation2 + $0x2d0] sm:$0xff]  ;;  %25492 = vst [vmem:[#allocation82_spill] sm:$0xff] %v19949_v55 }
 0x2dc   : > { %v19820_v53 = vand.u32 4294901760, %v912_v6  ;;  %v19836_v4 = vpack.c.bf16 %v24587_v15, %v24588_v27  ;;  %25466 = vst [vmem:[#allocation95_spill] sm:$0xff] %v19847_v29  ;;  %v25469_v8 = vand.u32 4294901760, %v19809_v46  ;;  %v19880_v3 = vsub.f32 %v911_v0, %v19847_v29 }
 0x2dd   : > { %v907_v31 = vmax.f32 %v25452_v2, %v25450_v54  ;;  %v24584_v2 = vand.u32 4294901760, %v19777_v49  ;;  %v19807_v54 = vld [vmem:[#allocation2 + $0x2c0] sm:$0xff]  ;;  %v25478_v0 = vand.u32 4294901760, %v19849_v63  ;;  %v25511_v29 = vand.u32 4294901760, %v19650_v59 }
 0x2de   : > { %15707 = vmatpush1.bf16.msra.mxu0 %v19736_v1  ;;  %25462 = vst [vmem:[#allocation85_spill] sm:$0xff] %v19820_v53  ;;  %25464 = vst [vmem:[#allocation92_spill] sm:$0xff] %v19836_v4  ;;  %v19854_v15 = vsub.f32 %v912_v6, %v19820_v53  ;;  %v25468_v27 = vand.u32 4294901760, %v19807_v54  ;;  %v19870_v6 = vpack.c.bf16 %v25472_v20, %v25471_v34  ;;  %v25475_v34 = vand.u32 4294901760, %v19840_v41  ;;  %v20024_v53 = vld [vmem:[#allocation2 + $0x388] sm:$0xff] }
 0x2df   : > { %15709 = vmatprep.subr.bf16.mxu0 %v19745_v22  ;;  %v19811_v10 = vand.u32 4294901760, %v907_v31  ;;  %v19827_v39 = vpack.c.bf16 %v24584_v2, %v24585_v62  ;;  %v19842_v2 = vld [vmem:[#allocation2 + $0x2f0] sm:$0xff]  ;;  %25474 = vst [vmem:[#allocation100_spill] sm:$0xff] %v19880_v3  ;;  %v19905_v22 = vld [vmem:[#allocation2 + $0x320] sm:$0xff]  ;;  %25519 = vst [vmem:[#allocation73_spill] sm:$0xff] %v20024_v53 }
 0x2e0   : > { %25467 = vst [vmem:[#allocation96_spill] sm:$0xff] %v19854_v15  ;;  %v19861_v48 = vpack.c.bf16 %v25469_v8, %v25468_v27  ;;  %25473 = vst [vmem:[#allocation98_spill] sm:$0xff] %v19870_v6  ;;  %v19876_v27 = vld [vmem:[#allocation2 + $0x310] sm:$0xff] }
 0x2e1   : > { %25458 = vst [vmem:[#allocation57_spill] sm:$0xff] %v19811_v10  ;;  %25463 = vst [vmem:[#allocation89_spill] sm:$0xff] %v19827_v39  ;;  %v19845_v62 = vsub.f32 %v907_v31, %v19811_v10  ;;  %v19882_v31 = vld [vmem:[#allocation2 + $0x328] sm:$0xff]  ;;  %v25485_v1 = vand.u32 4294901760, %v19876_v27  ;;  %v20026_v10 = vld [vmem:[#allocation2 + $0x398] sm:$0xff] }
 0x2e2   : > { %15711 = vmatpush1.bf16.msra.mxu0 %v19762_v36  ;;  %25470 = vst [vmem:[#allocation97_spill] sm:$0xff] %v19861_v48  ;;  %25520 = vst [vmem:[#allocation74_spill] sm:$0xff] %v20026_v10 }
 0x2e3   : > { %15713 = vmatprep.subr.bf16.mxu0 %v19771_v30  ;;  %25465 = vst [vmem:[#allocation93_spill] sm:$0xff] %v19845_v62  ;;  %v25479_v30 = vand.u32 4294901760, %v19851_v45 }
 0x2e5   : > { %v19901_v36 = vpack.c.bf16 %v25479_v30, %v25478_v0  ;;  %v25482_v0 = vand.u32 4294901760, %v19854_v15  ;;  %v25487_v30 = vand.u32 4294901760, %v19882_v31 }
 0x2e6   : > { %15715 = vmatpush1.bf16.msra.mxu0 %v19794_v18  ;;  %v19914_v18 = vld [vmem:[#allocation2 + $0x348] sm:$0xff] }
 0x2e7   : > { %15717 = vmatprep.subr.bf16.mxu0 %v19803_v25  ;;  %v19874_v25 = vld [vmem:[#allocation2 + $0x300] sm:$0xff]  ;;  %25480 = vst [vmem:[#allocation102_spill] sm:$0xff] %v19901_v36  ;;  %v19922_v20 = vsub.f32 %v19854_v15, %v25482_v0 }
 0x2e8   : > { %v19942_v15 = vld [vmem:[#allocation2 + $0x340] sm:$0xff] }
 0x2e9   : > { %25483 = vst [vmem:[#allocation67_spill] sm:$0xff] %v19922_v20  ;;  %v20138_v20 = vld [vmem:[#allocation2 + $0x3a0] sm:$0xff] }
 0x2ea   : > { %15719 = vmatpush1.bf16.msra.mxu0 %v19827_v39  ;;  %v25476_v39 = vand.u32 4294901760, %v19842_v2  ;;  %25554 = vst [vmem:[#allocation118_spill] sm:$0xff] %v20138_v20 }
 0x2eb   : > { %15721 = vmatprep.subr.bf16.mxu0 %v19836_v4  ;;  %v19884_v4 = vld [vmem:[#allocation2 + $0x338] sm:$0xff] }
 0x2ec   : > { %v19892_v56 = vpack.c.bf16 %v25476_v39, %v25475_v34  ;;  %v19907_v39 = vld [vmem:[#allocation2 + $0x330] sm:$0xff]  ;;  %v25481_v34 = vand.u32 4294901760, %v19845_v62  ;;  %v25488_v5 = vand.u32 4294901760, %v19884_v4 }
 0x2ee   : > { %15723 = vmatpush1.bf16.msra.mxu0 %v19861_v48  ;;  %25477 = vst [vmem:[#allocation101_spill] sm:$0xff] %v19892_v56  ;;  %v19912_v8 = vsub.f32 %v19845_v62, %v25481_v34  ;;  %v25484_v48 = vand.u32 4294901760, %v19874_v25  ;;  %v19938_v0 = vpack.c.bf16 %v25488_v5, %v25487_v30  ;;  %v19947_v34 = vld [vmem:[#allocation2 + $0x368] sm:$0xff]  ;;  %v25495_v5 = vand.u32 4294901760, %v19633_v60 }
 0x2ef   : > { %15725 = vmatprep.subr.bf16.mxu0 %v19870_v6  ;;  %v19916_v6 = vld [vmem:[#allocation2 + $0x358] sm:$0xff]  ;;  %25491 = vst [vmem:[#allocation79_spill] sm:$0xff] %v19947_v34 }
 0x2f0   : > { %v19929_v28 = vpack.c.bf16 %v25485_v1, %v25484_v48  ;;  %25489 = vst [vmem:[#allocation75_spill] sm:$0xff] %v19938_v0  ;;  %v19944_v1 = vld [vmem:[#allocation2 + $0x350] sm:$0xff]  ;;  %v19959_v30 = vsub.f32 %v19633_v60, %v25495_v5  ;;  %v25499_v48 = vand.u32 4294901760, %v19641_v37  ;;  %v25502_v60 = vand.u32 4294901760, %v19905_v22 }
 0x2f1   : > { %25490 = vst [vmem:[#allocation76_spill] sm:$0xff] %v19944_v1  ;;  %v25503_v5 = vand.u32 4294901760, %v19907_v39 }
 0x2f2   : > { %15727 = vmatpush1.bf16.msra.mxu0 %v19892_v56  ;;  %25486 = vst [vmem:[#allocation70_spill] sm:$0xff] %v19929_v28  ;;  %25496 = vst [vmem:[#allocation103_spill] sm:$0xff] %v19959_v30  ;;  %v19964_v56 = vsub.f32 %v19635_v38, %v25497_v9  ;;  %v19969_v26 = vsub.f32 %v19641_v37, %v25499_v48  ;;  %v25505_v48 = vand.u32 4294901760, %v19648_v52  ;;  %v20000_v9 = vld [vmem:[#allocation2 + $0x360] sm:$0xff]  ;;  %v20002_v37 = vld [vmem:[#allocation2 + $0x370] sm:$0xff] }
 0x2f3   : > { %15729 = vmatprep.subr.bf16.mxu0 %v19901_v36  ;;  %v25493_v36 = vand.u32 4294901760, %v19880_v3  ;;  %v19982_v38 = vpack.c.bf16 %v25503_v5, %v25502_v60  ;;  %25510 = vst [vmem:[#allocation66_spill] sm:$0xff] %v20002_v37  ;;  %v25517_v5 = vand.u32 4294901760, %v19669_v11 }
 0x2f4   : > { %25498 = vst [vmem:[#allocation59_spill] sm:$0xff] %v19964_v56  ;;  %25500 = vst [vmem:[#allocation60_spill] sm:$0xff] %v19969_v26  ;;  %v19989_v24 = vsub.f32 %v19648_v52, %v25505_v48  ;;  %v20007_v52 = vsub.f32 %v19650_v59, %v25511_v29  ;;  %v25513_v48 = vand.u32 4294901760, %v19664_v7  ;;  %v25521_v29 = vand.u32 4294901760, %v19671_v57 }
 0x2f5   : > { %v19954_v62 = vsub.f32 %v19880_v3, %v25493_v36  ;;  %v25501_v36 = vand.u32 4294901760, %v19643_v40  ;;  %25504 = vst [vmem:[#allocation61_spill] sm:$0xff] %v19982_v38  ;;  %v20022_v60 = vsub.f32 %v19669_v11, %v25517_v5  ;;  %v25526_v11 = vand.u32 4294901760, %v19698_v21 }
 0x2f6   : > { %15731 = vmatpush1.bf16.msra.mxu0 %v19929_v28  ;;  %25506 = vst [vmem:[#allocation62_spill] sm:$0xff] %v19989_v24  ;;  %25512 = vst [vmem:[#allocation68_spill] sm:$0xff] %v20007_v52  ;;  %v20031_v59 = vsub.f32 %v19671_v57, %v25521_v29  ;;  %v20051_v57 = vsub.f32 %v19700_v23, %v25527_v44  ;;  %v25529_v29 = vand.u32 4294901760, %v19944_v1  ;;  %v25532_v44 = vand.u32 4294901760, %v19947_v34  ;;  %v20102_v34 = vld [vmem:[#allocation2 + $0x3b8] sm:$0xff] }
 0x2f7   : > { %25494 = vst [vmem:[#allocation87_spill] sm:$0xff] %v19954_v62  ;;  %v19975_v3 = vsub.f32 %v19643_v40, %v25501_v36  ;;  %15733 = vmatprep.subr.bf16.mxu0 %v19938_v0  ;;  %v25507_v40 = vand.u32 4294901760, %v19914_v18  ;;  %v25508_v36 = vand.u32 4294901760, %v19916_v6  ;;  %v20012_v0 = vsub.f32 %v19664_v7, %v25513_v48  ;;  %25518 = vst [vmem:[#allocation72_spill] sm:$0xff] %v20022_v60 }
 0x2f8   : > { %25522 = vst [vmem:[#allocation77_spill] sm:$0xff] %v20031_v59  ;;  %v25523_v7 = vand.u32 4294901760, %v19691_v13  ;;  %v20046_v5 = vsub.f32 %v19698_v21, %v25526_v11  ;;  %v25531_v21 = vand.u32 4294901760, %v19722_v19  ;;  %v25533_v23 = vand.u32 4294901760, %v19949_v55  ;;  %v20100_v55 = vld [vmem:[#allocation2 + $0x3a8] sm:$0xff]  ;;  %25543 = vst [vmem:[#allocation109_spill] sm:$0xff] %v20102_v34 }
 0x2f9   : > { %v19996_v28 = vpack.c.bf16 %v25508_v36, %v25507_v40  ;;  %25514 = vst [vmem:[#allocation69_spill] sm:$0xff] %v20012_v0  ;;  %v25515_v40 = vand.u32 4294901760, %v19666_v42  ;;  %v25536_v1 = vand.u32 4294901760, %v19724_v32  ;;  %25542 = vst [vmem:[#allocation90_spill] sm:$0xff] %v20100_v55  ;;  %v25549_v62 = vand.u32 4294901760, %v19777_v49 }
 0x2fa   : > { %v20036_v48 = vsub.f32 %v19691_v13, %v25523_v7  ;;  %15735 = vmatpush1.bf16.msra.mxu0 %v19982_v38  ;;  %v25528_v13 = vand.u32 4294901760, %v19942_v15  ;;  %v20065_v11 = vsub.f32 %v19722_v19, %v25531_v21  ;;  %v20072_v38 = vpack.c.bf16 %v25533_v23, %v25532_v44 }
 0x2fb   : > { %25509 = vst [vmem:[#allocation65_spill] sm:$0xff] %v19996_v28  ;;  %v20017_v36 = vsub.f32 %v19666_v42, %v25515_v40  ;;  %v25525_v42 = vand.u32 4294901760, %v19693_v50  ;;  %15737 = vmatprep.subr.bf16.mxu0 %v19996_v28  ;;  %v20083_v19 = vsub.f32 %v19724_v32, %v25536_v1  ;;  %v25537_v21 = vand.u32 4294901760, %v19726_v33 }
 0x2fc   : > { %25524 = vst [vmem:[#allocation78_spill] sm:$0xff] %v20036_v48  ;;  %v20058_v7 = vpack.c.bf16 %v25529_v29, %v25528_v13  ;;  %25534 = vst [vmem:[#allocation81_spill] sm:$0xff] %v20072_v38  ;;  %v25539_v44 = vand.u32 4294901760, %v19728_v51  ;;  %v25541_v29 = vand.u32 4294901760, %v19749_v47  ;;  %v25544_v32 = vand.u32 4294901760, %v19751_v61 }
 0x2fd   : > { %25516 = vst [vmem:[#allocation71_spill] sm:$0xff] %v20017_v36  ;;  %v20041_v40 = vsub.f32 %v19693_v50, %v25525_v42  ;;  %v20076_v50 = vld [vmem:[#allocation2 + $0x380] sm:$0xff]  ;;  %v20078_v42 = vld [vmem:[#allocation2 + $0x390] sm:$0xff]  ;;  %v20088_v28 = vsub.f32 %v19726_v33, %v25537_v21  ;;  %v25545_v33 = vand.u32 4294901760, %v19753_v35 }
 0x2fe   : > { %25530 = vst [vmem:[#allocation80_spill] sm:$0xff] %v20058_v7  ;;  %25535 = vst [vmem:[#allocation83_spill] sm:$0xff] %v20078_v42  ;;  %v20093_v23 = vsub.f32 %v19728_v51, %v25539_v44  ;;  %v20098_v13 = vsub.f32 %v19749_v47, %v25541_v29  ;;  %v20107_v1 = vsub.f32 %v19751_v61, %v25544_v32  ;;  %v25546_v51 = vand.u32 4294901760, %v19755_v17 }
 0x2ff   : > { %25538 = vst [vmem:[#allocation84_spill] sm:$0xff] %v20088_v28  ;;  %v20112_v21 = vsub.f32 %v19753_v35, %v25545_v33  ;;  %v25548_v47 = vand.u32 4294901760, %v19775_v43  ;;  %v20127_v61 = vsub.f32 %v19777_v49, %v25549_v62  ;;  %15739 = vmatpush1.bf16.msra.mxu0 %v20058_v7  ;;  %v25551_v35 = vand.u32 4294901760, %v20000_v9 }
 0x300   : > { %25540 = vst [vmem:[#allocation86_spill] sm:$0xff] %v20093_v23  ;;  %v20117_v44 = vsub.f32 %v19755_v17, %v25546_v51  ;;  %v25552_v32 = vand.u32 4294901760, %v20002_v37  ;;  %15741 = vmatprep.subr.bf16.mxu0 %v20072_v38  ;;  %v25558_v49 = vand.u32 4294901760, %v20024_v53  ;;  %v25561_v7 = vand.u32 4294901760, %v19784_v16  ;;  %v20176_v51 = vld [vmem:[#allocation2 + $0x3c8] sm:$0xff]  ;;  %v20178_v17 = vld [vmem:[#allocation2 + $0x3d8] sm:$0xff] }
 0x301   : > { %v20122_v29 = vsub.f32 %v19775_v43, %v25548_v47  ;;  %25550 = vst [vmem:[#allocation115_spill] sm:$0xff] %v20127_v61  ;;  %v20140_v43 = vld [vmem:[#allocation2 + $0x3b0] sm:$0xff]  ;;  %v25556_v47 = vand.u32 4294901760, %v19782_v58  ;;  %v25565_v38 = vand.u32 4294901760, %v19809_v46  ;;  %25569 = vst [vmem:[#allocation46_spill] sm:$0xff] %v20178_v17  ;;  %v25574_v53 = vand.u32 4294901760, %v19842_v2 }
 0x302   : > { %25547 = vst [vmem:[#allocation110_spill] sm:$0xff] %v20117_v44  ;;  %v20134_v33 = vpack.c.bf16 %v25552_v32, %v25551_v35  ;;  %25555 = vst [vmem:[#allocation29_spill] sm:$0xff] %v20140_v43  ;;  %v25559_v35 = vand.u32 4294901760, %v20026_v10  ;;  %v20159_v37 = vsub.f32 %v19784_v16, %v25561_v7  ;;  %v25570_v16 = vand.u32 4294901760, %v19818_v12 }
 0x303   : > { %v20145_v62 = vsub.f32 %v19782_v58, %v25556_v47  ;;  %v25563_v58 = vand.u32 4294901760, %v19807_v54  ;;  %v20169_v10 = vsub.f32 %v19809_v46, %v25565_v38  ;;  %v25579_v46 = vand.u32 4294901760, %v19849_v63 }
 0x304   : > { %25553 = vst [vmem:[#allocation28_spill] sm:$0xff] %v20134_v33  ;;  %v20152_v32 = vpack.c.bf16 %v25559_v35, %v25558_v49  ;;  %25562 = vst [vmem:[#allocation120_spill] sm:$0xff] %v20159_v37  ;;  %v25567_v49 = vand.u32 4294901760, %v19816_v14  ;;  %v20183_v7 = vsub.f32 %v19818_v12, %v25570_v16  ;;  %15743 = vmatpush1.bf16.msra.mxu0 %v20134_v33  ;;  %v25576_v12 = vand.u32 4294901760, %v20076_v50 }
 0x305   : > { %25557 = vst [vmem:[#allocation31_spill] sm:$0xff] %v20145_v62  ;;  %v20164_v47 = vsub.f32 %v19807_v54, %v25563_v58  ;;  %25566 = vst [vmem:[#allocation40_spill] sm:$0xff] %v20169_v10  ;;  %v25571_v54 = vand.u32 4294901760, %v19840_v41 }
 0x306   : > { %25560 = vst [vmem:[#allocation36_spill] sm:$0xff] %v20152_v32  ;;  %v20174_v35 = vsub.f32 %v19816_v14, %v25567_v49  ;;  %v20192_v14 = vld [vmem:[#allocation2 + $0x3c0] sm:$0xff]  ;;  %v20194_v49 = vld [vmem:[#allocation2 + $0x3d0] sm:$0xff]  ;;  %15745 = vmatprep.subr.bf16.mxu0 %v20152_v32  ;;  %v25595_v32 = vand.u32 4294901760, %v20176_v51 }
 0x307   : > { %25564 = vst [vmem:[#allocation39_spill] sm:$0xff] %v20164_v47  ;;  %v20188_v58 = vsub.f32 %v19840_v41, %v25571_v54  ;;  %25573 = vst [vmem:[#allocation52_spill] sm:$0xff] %v20194_v49  ;;  %v25577_v41 = vand.u32 4294901760, %v20078_v42  ;;  %v25584_v54 = vand.u32 4294901760, %v19851_v45  ;;  %v25591_v42 = vand.u32 4294901760, %v19959_v30 }
 0x308   : > { %25568 = vst [vmem:[#allocation43_spill] sm:$0xff] %v20174_v35  ;;  %v20199_v35 = vsub.f32 %v19842_v2, %v25574_v53  ;;  %v25581_v53 = vand.u32 4294901760, %v20100_v55  ;;  %v25582_v2 = vand.u32 4294901760, %v20102_v34 }
 0x309   : > { %25572 = vst [vmem:[#allocation51_spill] sm:$0xff] %v20188_v58  ;;  %v20206_v16 = vpack.c.bf16 %v25577_v41, %v25576_v12  ;;  %v20213_v58 = vsub.f32 %v19849_v63, %v25579_v46  ;;  %v20227_v38 = vsub.f32 %v19851_v45, %v25584_v54  ;;  %v25586_v63 = vand.u32 4294901760, %v19874_v25 }
 0x30a   : > { %25575 = vst [vmem:[#allocation55_spill] sm:$0xff] %v20199_v35  ;;  %v20220_v33 = vpack.c.bf16 %v25582_v2, %v25581_v53  ;;  %v20236_v53 = vld [vmem:[#allocation2 + $0x3e8] sm:$0xff]  ;;  %v20238_v2 = vld [vmem:[#allocation2 + $0x3f8] sm:$0xff]  ;;  %v25587_v41 = vand.u32 4294901760, %v19876_v27  ;;  %v25588_v45 = vand.u32 4294901760, %v20138_v20  ;;  %v25589_v54 = vand.u32 4294901760, %v20140_v43 }
 0x30b   : > { %25578 = vst [vmem:[#allocation58_spill] sm:$0xff] %v20206_v16  ;;  %25580 = vst [vmem:[#allocation63_spill] sm:$0xff] %v20213_v58  ;;  %v20232_v46 = vsub.f32 %v19874_v25, %v25586_v63  ;;  %v20251_v25 = vld [vmem:[#allocation2 + $0x3e0] sm:$0xff]  ;;  %v20253_v63 = vld [vmem:[#allocation2 + $0x3f0] sm:$0xff]  ;;  %15747 = vmatpush1.bf16.msra.mxu0 %v20206_v16  ;;  %v25593_v20 = vand.u32 4294901760, %v19882_v31  ;;  %v25596_v16 = vand.u32 4294901760, %v20178_v17 }
 0x30c   : > { %25583 = vst [vmem:[#allocation64_spill] sm:$0xff] %v20220_v33  ;;  %25585 = vst [vmem:[#allocation88_spill] sm:$0xff] %v20227_v38  ;;  %v20243_v12 = vsub.f32 %v19876_v27, %v25587_v41  ;;  %v20249_v55 = vpack.c.bf16 %v25589_v54, %v25588_v45  ;;  %v2551_v27 = vsub.f32 %v19959_v30, %v25591_v42  ;;  %v25592_v41 = vand.u32 4294901760, %v19964_v56 }
 0x30d   : > { %v20269_v34 = vsub.f32 %v19882_v31, %v25593_v20  ;;  %15749 = vmatprep.subr.bf16.mxu0 %v20220_v33  ;;  %v20276_v42 = vpack.c.bf16 %v25596_v16, %v25595_v32  ;;  %v25598_v45 = vand.u32 4294901760, %v19884_v4  ;;  %v25600_v31 = vand.u32 4294901760, %v20192_v14 }
 0x30e   : > { %25590 = vst [vmem:[#allocation91_spill] sm:$0xff] %v20249_v55  ;;  %v2563_v43 = vsub.f32 %v19964_v56, %v25592_v41  ;;  %v25601_v20 = vand.u32 4294901760, %v20194_v49  ;;  %v25603_v16 = vand.u32 4294901760, %v19969_v26  ;;  %v25604_v41 = vand.u32 4294901760, %v19975_v3 }
 0x30f   : > { %25594 = vst [vmem:[#allocation94_spill] sm:$0xff] %v20269_v34  ;;  %25597 = vst [vmem:[#allocation104_spill] sm:$0xff] %v20276_v42  ;;  %v20283_v54 = vsub.f32 %v19884_v4, %v25598_v45  ;;  %15751 = vmatpush1.bf16.msra.mxu0 %v20249_v55  ;;  %v25605_v56 = vand.u32 4294901760, %v19989_v24  ;;  %v25606_v49 = vand.u32 4294901760, %v20007_v52  ;;  %v25608_v45 = vand.u32 4294901760, %v20236_v53 }
 0x310   : > { %v20289_v33 = vpack.c.bf16 %v25601_v20, %v25600_v31  ;;  %v2557_v30 = vsub.f32 %v19969_v26, %v25603_v16  ;;  %v2569_v17 = vsub.f32 %v19975_v3, %v25604_v41  ;;  %v2552_v31 = vand.u32 4294901760, %v2551_v27  ;;  %15753 = vmatprep.subr.bf16.mxu0 %v20276_v42 }
 0x311   : > { %25599 = vst [vmem:[#allocation119_spill] sm:$0xff] %v20283_v54  ;;  %v2564_v20 = vand.u32 4294901760, %v2563_v43  ;;  %v2575_v32 = vsub.f32 %v19989_v24, %v25605_v56  ;;  %v2587_v16 = vsub.f32 %v20007_v52, %v25606_v49  ;;  %v25607_v26 = vand.u32 4294901760, %v19905_v22 }
 0x312   : > { %25602 = vst [vmem:[#allocation112_spill] sm:$0xff] %v20289_v33  ;;  %v25609_v27 = vand.u32 4294901760, %v20238_v2  ;;  %v25611_v55 = vand.u32 4294901760, %v19907_v39  ;;  %v25614_v4 = vand.u32 4294901760, %v20012_v0  ;;  %v25615_v24 = vand.u32 4294901760, %v20017_v36 }
 0x313   : > { %v20311_v41 = vsub.f32 %v19905_v22, %v25607_v26  ;;  %v25613_v26 = vand.u32 4294901760, %v19914_v18  ;;  %15755 = vmatpush1.bf16.msra.mxu0 %v20289_v33  ;;  %v15760_v42 = vpack.c.bf16 %v2564_v20, %v2552_v31  ;;  %v2576_v52 = vand.u32 4294901760, %v2575_v32 }
 0x314   : > { %v20318_v43 = vpack.c.bf16 %v25609_v27, %v25608_v45  ;;  %v20325_v49 = vsub.f32 %v19907_v39, %v25611_v55  ;;  %v2558_v45 = vand.u32 4294901760, %v2557_v30  ;;  %v2570_v27 = vand.u32 4294901760, %v2569_v17 }
 0x315   : > { %v20330_v22 = vsub.f32 %v19914_v18, %v25613_v26  ;;  %v2581_v56 = vsub.f32 %v20012_v0, %v25614_v4  ;;  %v2593_v55 = vsub.f32 %v20017_v36, %v25615_v24  ;;  %v25616_v39 = vand.u32 4294901760, %v20251_v25 }
 0x316   : > { %25610 = vst [vmem:[#allocation105_spill] sm:$0xff] %v20318_v43  ;;  %25612 = vst [vmem:[#allocation108_spill] sm:$0xff] %v20325_v49  ;;  %v25617_v18 = vand.u32 4294901760, %v20253_v63  ;;  %v2588_v30 = vand.u32 4294901760, %v2587_v16  ;;  %15757 = vmatprep.subr.bf16.mxu0 %v20318_v43  ;;  %v25619_v17 = vand.u32 4294901760, %v20022_v60  ;;  %v25620_v0 = vand.u32 4294901760, %v20031_v59 }
 0x317   : > { %v25623_v32 = vand.u32 4294901760, %v19942_v15  ;;  %v25625_v16 = vand.u32 4294901760, %v20036_v48  ;;  %v15762_v33 = vpack.c.bf16 %v2570_v27, %v2558_v45  ;;  %v2582_v36 = vand.u32 4294901760, %v2581_v56 }
 0x318   : > { %v20345_v26 = vpack.c.bf16 %v25617_v18, %v25616_v39  ;;  %v2599_v4 = vsub.f32 %v20022_v60, %v25619_v17  ;;  %v2611_v24 = vsub.f32 %v20031_v59, %v25620_v0  ;;  %v25621_v39 = vand.u32 4294901760, %v19916_v6 }
 0x319   : > { %v20364_v20 = vsub.f32 %v19942_v15, %v25623_v32  ;;  %v2605_v18 = vsub.f32 %v20036_v48, %v25625_v16  ;;  %v25626_v0 = vand.u32 4294901760, %v20041_v40  ;;  %v2594_v43 = vand.u32 4294901760, %v2593_v55  ;;  %v25630_v32 = vld [vmem:[#allocation67_spill] sm:$0xff] }
 0x31a   : > { %25618 = vst [vmem:[#allocation111_spill] sm:$0xff] %v20345_v26  ;;  %v20359_v31 = vsub.f32 %v19916_v6, %v25621_v39  ;;  %v24716_v59 = vand.u32 4294901760, %v20065_v11  ;;  %15759 = vmatpush1.bf16.msra.mxu0 %v20345_v26  ;;  %v15764_v6 = vpack.c.bf16 %v2588_v30, %v2576_v52  ;;  %v24717_v39 = vand.u32 4294901760, %v20083_v19  ;;  %v25637_v30 = vld [vmem:[#allocation79_spill] sm:$0xff] }
 0x31b   : > { %25624 = vst [vmem:[#allocation116_spill] sm:$0xff] %v20364_v20  ;;  %v2617_v17 = vsub.f32 %v20041_v40, %v25626_v0  ;;  %15761 = vmatprep.subr.bf16.mxu0 %v15760_v42  ;;  %v2600_v16 = vand.u32 4294901760, %v2599_v4  ;;  %v2612_v48 = vand.u32 4294901760, %v2611_v24  ;;  %v25627_v60 = vand.u32 4294901760, %v20046_v5 }
 0x31c   : > { %25622 = vst [vmem:[#allocation113_spill] sm:$0xff] %v20359_v31  ;;  %v25628_v56 = vand.u32 4294901760, %v20051_v57  ;;  %v2606_v55 = vand.u32 4294901760, %v2605_v18  ;;  %v25629_v15 = vand.u32 4294901760, %v19912_v8  ;;  %v15766_v42 = vpack.c.bf16 %v2594_v43, %v2582_v36  ;;  %v25632_v18 = vld [vmem:[#allocation87_spill] sm:$0xff] }
 0x31d   : > { %v2623_v45 = vsub.f32 %v20046_v5, %v25627_v60  ;;  %v2618_v0 = vand.u32 4294901760, %v2617_v17  ;;  %v2629_v4 = vsub.f32 %v20065_v11, %v24716_v59  ;;  %v2541_v17 = vand.u32 4294901760, %v25632_v18  ;;  %v25635_v60 = vld [vmem:[#allocation76_spill] sm:$0xff] }
 0x31e   : > { %v2635_v27 = vsub.f32 %v20051_v57, %v25628_v56  ;;  %2526 = vmatmul.mubr.f32.vlgmr.msra.gmra.mrb[0].mxu0 %v25629_v15  ;;  %v25631_v56 = vand.u32 4294901760, %v25630_v32  ;;  %v2641_v8 = vsub.f32 %v20083_v19, %v24717_v39  ;;  %v25633_v36 = vand.u32 4294901760, %v20088_v28 }
 0x31f   : > { %15763 = vmatpush1.bf16.msra.mxu0 %v15762_v33  ;;  %v25634_v15 = vand.u32 4294901760, %v20093_v23  ;;  %v25636_v24 = vand.u32 4294901760, %v25635_v60  ;;  %v15768_v33 = vpack.c.bf16 %v2612_v48, %v2600_v16  ;;  %v25638_v52 = vand.u32 4294901760, %v25637_v30 }
 0x320   : > { %2536 = vmatprep.mubr.f32.mxu0 %v25631_v56  ;;  %v2647_v43 = vsub.f32 %v20088_v28, %v25633_v36  ;;  %15765 = vmatprep.subr.bf16.mxu0 %v15764_v6  ;;  %v2624_v56 = vand.u32 4294901760, %v2623_v45  ;;  %v2636_v18 = vand.u32 4294901760, %v2635_v27  ;;  %v15770_v26 = vpack.c.bf16 %v2618_v0, %v2606_v55  ;;  %v25643_v0 = vld [vmem:[#allocation37_spill] sm:$0xff] }
 0x321   : > { %v2659_v59 = vsub.f32 %v20093_v23, %v25634_v15  ;;  %v20407_v32 = vsub.f32 %v25635_v60, %v25636_v24  ;;  %v20412_v39 = vsub.f32 %v25637_v30, %v25638_v52  ;;  %v25639_v36 = vand.u32 4294901760, %v20098_v13 }
 0x322   : > { %v25640_v15 = vand.u32 4294901760, %v20107_v1  ;;  %2542 = vmatmul.mubr.f32.gmra.mrb[2].mxu0 %v2541_v17  ;;  %v25641_v6 = vand.u32 4294901760, %v20112_v21  ;;  %v25642_v16 = vand.u32 4294901760, %v20117_v44  ;;  %v2630_v52 = vand.u32 4294901760, %v2629_v4  ;;  %v25644_v17 = vld [vmem:[#allocation82_spill] sm:$0xff]  ;;  %v25651_v4 = vld [vmem:[#allocation43_spill] sm:$0xff] }
 0x323   : > { %v2653_v28 = vsub.f32 %v20098_v13, %v25639_v36  ;;  %15767 = vmatpush1.bf16.msra.mxu0 %v15766_v42  ;;  %2933 = vmatprep.mubr.f32.mxu0 %v25643_v0  ;;  %v2642_v30 = vand.u32 4294901760, %v2641_v8  ;;  %v2648_v60 = vand.u32 4294901760, %v2647_v43  ;;  %v2660_v24 = vand.u32 4294901760, %v2659_v59  ;;  %v25652_v42 = vld [vmem:[#allocation73_spill] sm:$0xff] }
 0x324   : > { %v2665_v23 = vsub.f32 %v20107_v1, %v25640_v15  ;;  %v2671_v48 = vsub.f32 %v20112_v21, %v25641_v6  ;;  %v2683_v45 = vsub.f32 %v20117_v44, %v25642_v16  ;;  %v25645_v36 = vand.u32 4294901760, %v25644_v17  ;;  %15769 = vmatprep.subr.bf16.mxu0 %v15768_v33 }
 0x325   : > { %v15772_v6 = vpack.c.bf16 %v2636_v18, %v2624_v56  ;;  %v24729_v16 = vand.u32 4294901760, %v20145_v62  ;;  %v24728_v27 = vand.u32 4294901760, %v20159_v37  ;;  %v2654_v44 = vand.u32 4294901760, %v2653_v28  ;;  %v25649_v28 = vld [vmem:[#allocation66_spill] sm:$0xff] }
 0x326   : > { %v20432_v15 = vsub.f32 %v25644_v17, %v25645_v36  ;;  %v2666_v55 = vand.u32 4294901760, %v2665_v23  ;;  %v2672_v8 = vand.u32 4294901760, %v2671_v48  ;;  %v2684_v43 = vand.u32 4294901760, %v2683_v45 }
 0x327   : > { %v25646_v59 = vand.u32 4294901760, %v20122_v29  ;;  %v25647_v17 = vand.u32 4294901760, %v20127_v61  ;;  %v25648_v56 = vand.u32 4294901760, %v20000_v9  ;;  %v25650_v23 = vand.u32 4294901760, %v25649_v28  ;;  %15771 = vmatpush1.bf16.msra.mxu0 %v15770_v26  ;;  %v25654_v26 = vld [vmem:[#allocation74_spill] sm:$0xff] }
 0x328   : > { %v15774_v48 = vpack.c.bf16 %v2642_v30, %v2630_v52  ;;  %v15776_v45 = vpack.c.bf16 %v2660_v24, %v2648_v60  ;;  %15773 = vmatprep.subr.bf16.mxu0 %v15772_v6  ;;  %v25655_v52 = vand.u32 4294901760, %v25654_v26  ;;  %v25657_v60 = vand.u32 4294901760, %v20164_v47 }
 0x329   : > { %v2677_v0 = vsub.f32 %v20122_v29, %v25646_v59  ;;  %v2689_v33 = vsub.f32 %v20127_v61, %v25647_v17  ;;  %v20447_v18 = vsub.f32 %v20000_v9, %v25648_v56  ;;  %v20452_v36 = vsub.f32 %v25649_v28, %v25650_v23 }
 0x32a   : > { %v2695_v59 = vsub.f32 %v20145_v62, %v24729_v16  ;;  %v2707_v17 = vsub.f32 %v20159_v37, %v24728_v27  ;;  %v25653_v61 = vand.u32 4294901760, %v25652_v42  ;;  %v20470_v30 = vsub.f32 %v25654_v26, %v25655_v52 }
 0x32b   : > { %v2701_v24 = vsub.f32 %v20164_v47, %v25657_v60  ;;  %v25658_v6 = vand.u32 4294901760, %v20169_v10  ;;  %v15778_v27 = vpack.c.bf16 %v2666_v55, %v2654_v44  ;;  %v15780_v16 = vpack.c.bf16 %v2684_v43, %v2672_v8  ;;  %15775 = vmatpush1.bf16.msra.mxu0 %v15774_v48 }
 0x32c   : > { %v20465_v28 = vsub.f32 %v25652_v42, %v25653_v61  ;;  %25656 = vst [vmem:[#allocation117_spill] sm:$0xff] %v20470_v30  ;;  %v2678_v56 = vand.u32 4294901760, %v2677_v0  ;;  %v2690_v9 = vand.u32 4294901760, %v2689_v33  ;;  %v25659_v61 = vld [vmem:[#allocation51_spill] sm:$0xff]  ;;  %v24737_v37 = vand.u32 4294901760, %v20199_v35  ;;  %15777 = vmatprep.subr.bf16.mxu0 %v15776_v45 }
 0x32d   : > { %v2713_v23 = vsub.f32 %v20169_v10, %v25658_v6  ;;  %v24736_v42 = vand.u32 4294901760, %v25659_v61  ;;  %v24738_v26 = vand.u32 4294901760, %v20213_v58  ;;  %v24741_v52 = vand.u32 4294901760, %v20227_v38 }
 0x32e   : > { %v2696_v62 = vand.u32 4294901760, %v2695_v59  ;;  %v2708_v60 = vand.u32 4294901760, %v2707_v17  ;;  %v25660_v47 = vand.u32 4294901760, %v25651_v4  ;;  %v25661_v44 = vand.u32 4294901760, %v20183_v7  ;;  %v25665_v17 = vld [vmem:[#allocation90_spill] sm:$0xff] }
 0x32f   : > { %v2702_v0 = vand.u32 4294901760, %v2701_v24  ;;  %v2714_v8 = vand.u32 4294901760, %v2713_v23  ;;  %v25662_v48 = vand.u32 4294901760, %v20076_v50  ;;  %v15782_v59 = vpack.c.bf16 %v2690_v9, %v2678_v56  ;;  %15779 = vmatpush1.bf16.msra.mxu0 %v15778_v27  ;;  %v25663_v9 = vld [vmem:[#allocation83_spill] sm:$0xff] }
 0x330   : > { %v2719_v6 = vsub.f32 %v25651_v4, %v25660_v47  ;;  %v2731_v55 = vsub.f32 %v20183_v7, %v25661_v44  ;;  %v2725_v24 = vsub.f32 %v25659_v61, %v24736_v42  ;;  %v2737_v23 = vsub.f32 %v20199_v35, %v24737_v37  ;;  %15781 = vmatprep.subr.bf16.mxu0 %v15780_v16 }
 0x331   : > { %v20493_v45 = vsub.f32 %v20076_v50, %v25662_v48  ;;  %v2743_v44 = vsub.f32 %v20213_v58, %v24738_v26  ;;  %v2755_v50 = vsub.f32 %v20227_v38, %v24741_v52  ;;  %v25664_v56 = vand.u32 4294901760, %v25663_v9 }
 0x332   : > { %v15784_v48 = vpack.c.bf16 %v2708_v60, %v2696_v62  ;;  %v2720_v42 = vand.u32 4294901760, %v2719_v6  ;;  %v2732_v47 = vand.u32 4294901760, %v2731_v55  ;;  %v25666_v33 = vand.u32 4294901760, %v25665_v17 }
 0x333   : > { %v20512_v27 = vsub.f32 %v25663_v9, %v25664_v56  ;;  %v15786_v43 = vpack.c.bf16 %v2714_v8, %v2702_v0  ;;  %v25667_v26 = vand.u32 4294901760, %v20232_v46  ;;  %v25668_v52 = vand.u32 4294901760, %v20243_v12  ;;  %15783 = vmatpush1.bf16.msra.mxu0 %v15782_v59 }
 0x334   : > { %v20517_v37 = vsub.f32 %v25665_v17, %v25666_v33  ;;  %v25669_v9 = vand.u32 4294901760, %v20269_v34  ;;  %v25670_v16 = vand.u32 4294901760, %v20283_v54  ;;  %v2726_v0 = vand.u32 4294901760, %v2725_v24  ;;  %v25671_v17 = vld [vmem:[#allocation109_spill] sm:$0xff]  ;;  %15785 = vmatprep.subr.bf16.mxu0 %v15784_v48 }
 0x335   : > { %v2749_v58 = vsub.f32 %v20232_v46, %v25667_v26  ;;  %v2761_v38 = vsub.f32 %v20243_v12, %v25668_v52  ;;  %v2738_v8 = vand.u32 4294901760, %v2737_v23  ;;  %v2744_v26 = vand.u32 4294901760, %v2743_v44 }
 0x336   : > { %v2767_v62 = vsub.f32 %v20269_v34, %v25669_v9  ;;  %v2779_v60 = vsub.f32 %v20283_v54, %v25670_v16  ;;  %v2756_v33 = vand.u32 4294901760, %v2755_v50  ;;  %v25672_v56 = vand.u32 4294901760, %v25671_v17 }
 0x337   : > { %v15788_v9 = vpack.c.bf16 %v2732_v47, %v2720_v42  ;;  %v24749_v34 = vand.u32 4294901760, %v20330_v22  ;;  %v24748_v16 = vand.u32 4294901760, %v20359_v31  ;;  %v2750_v54 = vand.u32 4294901760, %v2749_v58  ;;  %v25675_v47 = vld [vmem:[#allocation118_spill] sm:$0xff]  ;;  %v25677_v58 = vld [vmem:[#allocation29_spill] sm:$0xff]  ;;  %15787 = vmatpush1.bf16.msra.mxu0 %v15786_v43 }
 0x338   : > { %v20536_v52 = vsub.f32 %v25671_v17, %v25672_v56  ;;  %v2762_v6 = vand.u32 4294901760, %v2761_v38  ;;  %v2768_v24 = vand.u32 4294901760, %v2767_v62  ;;  %v2780_v23 = vand.u32 4294901760, %v2779_v60  ;;  %v25681_v43 = vld [vmem:[#allocation46_spill] sm:$0xff] }
 0x339   : > { %v25673_v44 = vand.u32 4294901760, %v20311_v41  ;;  %v25674_v17 = vand.u32 4294901760, %v20325_v49  ;;  %v25676_v48 = vand.u32 4294901760, %v25675_v47  ;;  %v25678_v38 = vand.u32 4294901760, %v25677_v58  ;;  %15789 = vmatprep.subr.bf16.mxu0 %v15788_v9 }
 0x33a   : > { %v15790_v62 = vpack.c.bf16 %v2738_v8, %v2726_v0  ;;  %v15792_v60 = vpack.c.bf16 %v2756_v33, %v2744_v26  ;;  %v25680_v59 = vand.u32 4294901760, %v20176_v51  ;;  %v25682_v0 = vand.u32 4294901760, %v25681_v43 }
 0x33b   : > { %v2773_v50 = vsub.f32 %v20311_v41, %v25673_v44  ;;  %v2785_v42 = vsub.f32 %v20325_v49, %v25674_v17  ;;  %v20551_v56 = vsub.f32 %v25675_v47, %v25676_v48  ;;  %v20556_v55 = vsub.f32 %v25677_v58, %v25678_v38 }
 0x33c   : > { %v2791_v44 = vsub.f32 %v20330_v22, %v24749_v34  ;;  %v2803_v17 = vsub.f32 %v20359_v31, %v24748_v16  ;;  %v20569_v58 = vsub.f32 %v20176_v51, %v25680_v59  ;;  %v20574_v8 = vsub.f32 %v25681_v43, %v25682_v0  ;;  %15791 = vmatpush1.bf16.msra.mxu0 %v15790_v62 }
 0x33d   : > { %25679 = vst [vmem:[#allocation30_spill] sm:$0xff] %v20556_v55  ;;  %v25684_v26 = vand.u32 4294901760, %v20364_v20  ;;  %v25685_v9 = vand.u32 4294901760, %v20407_v32  ;;  %v15794_v16 = vpack.c.bf16 %v2762_v6, %v2750_v54  ;;  %v15796_v34 = vpack.c.bf16 %v2780_v23, %v2768_v24  ;;  %15793 = vmatprep.subr.bf16.mxu0 %v15792_v60 }
 0x33e   : > { %25683 = vst [vmem:[#allocation106_spill] sm:$0xff] %v20574_v8  ;;  %v2774_v48 = vand.u32 4294901760, %v2773_v50  ;;  %v2786_v47 = vand.u32 4294901760, %v2785_v42  ;;  %v24754_v51 = vand.u32 4294901760, %v20447_v18  ;;  %v24755_v59 = vand.u32 4294901760, %v20452_v36 }
 0x33f   : > { %v2797_v33 = vsub.f32 %v20364_v20, %v25684_v26  ;;  %v2809_v38 = vsub.f32 %v20407_v32, %v25685_v9  ;;  %v24756_v43 = vand.u32 4294901760, %v20465_v28  ;;  %v24757_v0 = vand.u32 4294901760, %v20470_v30 }
 0x340   : > { %v2792_v31 = vand.u32 4294901760, %v2791_v44  ;;  %v2804_v26 = vand.u32 4294901760, %v2803_v17  ;;  %v25686_v20 = vand.u32 4294901760, %v20412_v39  ;;  %v25687_v54 = vand.u32 4294901760, %v20432_v15  ;;  %15795 = vmatpush1.bf16.msra.mxu0 %v15794_v16 }
 0x341   : > { %v2798_v24 = vand.u32 4294901760, %v2797_v33  ;;  %v2810_v23 = vand.u32 4294901760, %v2809_v38  ;;  %v24760_v50 = vand.u32 4294901760, %v20493_v45  ;;  %v25688_v62 = vand.u32 4294901760, %v20192_v14  ;;  %15797 = vmatprep.subr.bf16.mxu0 %v15796_v34 }
 0x342   : > { %v2815_v9 = vsub.f32 %v20412_v39, %v25686_v20  ;;  %v2827_v6 = vsub.f32 %v20432_v15, %v25687_v54  ;;  %v15798_v44 = vpack.c.bf16 %v2786_v47, %v2774_v48  ;;  %v2821_v33 = vsub.f32 %v20447_v18, %v24754_v51  ;;  %v25689_v47 = vld [vmem:[#allocation52_spill] sm:$0xff] }
 0x343   : > { %v20597_v60 = vsub.f32 %v20192_v14, %v25688_v62  ;;  %v2833_v38 = vsub.f32 %v20452_v36, %v24755_v59  ;;  %v2839_v54 = vsub.f32 %v20465_v28, %v24756_v43  ;;  %v2851_v14 = vsub.f32 %v20470_v30, %v24757_v0 }
 0x344   : > { %v25690_v48 = vand.u32 4294901760, %v25689_v47  ;;  %v15800_v62 = vpack.c.bf16 %v2804_v26, %v2792_v31  ;;  %v2816_v51 = vand.u32 4294901760, %v2815_v9  ;;  %v2828_v20 = vand.u32 4294901760, %v2827_v6  ;;  %15799 = vmatpush1.bf16.msra.mxu0 %v15798_v44 }
 0x345   : > { %v25692_v17 = vand.u32 4294901760, %v20236_v53  ;;  %v15802_v42 = vpack.c.bf16 %v2810_v23, %v2798_v24  ;;  %v2845_v43 = vsub.f32 %v20493_v45, %v24760_v50  ;;  %v25693_v0 = vand.u32 4294901760, %v20512_v27 }
 0x346   : > { %v20616_v16 = vsub.f32 %v25689_v47, %v25690_v48  ;;  %v25694_v47 = vand.u32 4294901760, %v20517_v37  ;;  %v25695_v31 = vand.u32 4294901760, %v20536_v52  ;;  %v2822_v6 = vand.u32 4294901760, %v2821_v33  ;;  %15801 = vmatprep.subr.bf16.mxu0 %v15800_v62 }
 0x347   : > { %v20621_v59 = vsub.f32 %v20236_v53, %v25692_v17  ;;  %v2857_v30 = vsub.f32 %v20512_v27, %v25693_v0  ;;  %v2834_v24 = vand.u32 4294901760, %v2833_v38  ;;  %v2840_v23 = vand.u32 4294901760, %v2839_v54 }
 0x348   : > { %25691 = vst [vmem:[#allocation122_spill] sm:$0xff] %v20616_v16  ;;  %v2863_v34 = vsub.f32 %v20517_v37, %v25694_v47  ;;  %v2875_v26 = vsub.f32 %v20536_v52, %v25695_v31  ;;  %v2852_v17 = vand.u32 4294901760, %v2851_v14  ;;  %v25696_v48 = vand.u32 4294901760, %v20238_v2  ;;  %15803 = vmatpush1.bf16.msra.mxu0 %v15802_v42 }
 0x349   : > { %v15804_v47 = vpack.c.bf16 %v2828_v20, %v2816_v51  ;;  %v24761_v50 = vand.u32 4294901760, %v20569_v58  ;;  %v25698_v53 = vand.u32 4294901760, %v20251_v25  ;;  %v25700_v44 = vand.u32 4294901760, %v20253_v63 }
 0x34a   : > { %v20640_v0 = vsub.f32 %v20238_v2, %v25696_v48  ;;  %v2846_v38 = vand.u32 4294901760, %v2845_v43  ;;  %v2858_v54 = vand.u32 4294901760, %v2857_v30  ;;  %v2864_v2 = vand.u32 4294901760, %v2863_v34 }
 0x34b   : > { %v20647_v9 = vsub.f32 %v20251_v25, %v25698_v53  ;;  %v20652_v33 = vsub.f32 %v20253_v63, %v25700_v44  ;;  %v2876_v14 = vand.u32 4294901760, %v2875_v26  ;;  %v25702_v51 = vand.u32 4294901760, %v20551_v56  ;;  %15805 = vmatprep.subr.bf16.mxu0 %v15804_v47 }
 0x34c   : > { %25697 = vst [vmem:[#allocation114_spill] sm:$0xff] %v20640_v0  ;;  %v25703_v62 = vand.u32 4294901760, %v20556_v55  ;;  %v15806_v25 = vpack.c.bf16 %v2834_v24, %v2822_v6  ;;  %v15808_v53 = vpack.c.bf16 %v2852_v17, %v2840_v23  ;;  %v24767_v31 = vand.u32 4294901760, %v20597_v60 }
 0x34d   : > { %25699 = vst [vmem:[#allocation121_spill] sm:$0xff] %v20647_v9  ;;  %25701 = vst [vmem:[#allocation107_spill] sm:$0xff] %v20652_v33  ;;  %v2869_v20 = vsub.f32 %v20551_v56, %v25702_v51  ;;  %v24763_v63 = vand.u32 4294901760, %v20616_v16  ;;  %v2887_v30 = vsub.f32 %v20569_v58, %v24761_v50  ;;  %v25704_v43 = vand.u32 4294901760, %v20574_v8 }
 0x34e   : > { %v2881_v48 = vsub.f32 %v20556_v55, %v25703_v62  ;;  %v24762_v26 = vand.u32 4294901760, %v20621_v59  ;;  %v24764_v44 = vand.u32 4294901760, %v20640_v0  ;;  %v15810_v42 = vpack.c.bf16 %v2858_v54, %v2846_v38  ;;  %15807 = vmatpush1.bf16.msra.mxu0 %v15806_v25 }
 0x34f   : > { %v2899_v34 = vsub.f32 %v20574_v8, %v25704_v43  ;;  %v15812_v6 = vpack.c.bf16 %v2876_v14, %v2864_v2  ;;  %v2870_v24 = vand.u32 4294901760, %v2869_v20  ;;  %v2893_v17 = vsub.f32 %v20597_v60, %v24767_v31  ;;  %15809 = vmatprep.subr.bf16.mxu0 %v15808_v53 }
 0x350   : > { %v2882_v23 = vand.u32 4294901760, %v2881_v48  ;;  %v2905_v47 = vsub.f32 %v20616_v16, %v24763_v63  ;;  %v24765_v51 = vand.u32 4294901760, %v20647_v9  ;;  %v24766_v62 = vand.u32 4294901760, %v20652_v33 }
 0x351   : > { %v2888_v43 = vand.u32 4294901760, %v2887_v30  ;;  %v2900_v50 = vand.u32 4294901760, %v2899_v34  ;;  %v2911_v38 = vsub.f32 %v20621_v59, %v24762_v26  ;;  %v2923_v54 = vsub.f32 %v20640_v0, %v24764_v44 }
 0x352   : > { %v15814_v2 = vpack.c.bf16 %v2882_v23, %v2870_v24  ;;  %15811 = vmatpush1.bf16.msra.mxu0 %v15810_v42  ;;  %v2894_v14 = vand.u32 4294901760, %v2893_v17  ;;  %v2906_v20 = vand.u32 4294901760, %v2905_v47  ;;  %v2917_v48 = vsub.f32 %v20647_v9, %v24765_v51  ;;  %v25705_v23 = vld [vmem:[#allocation103_spill] sm:$0xff]  ;;  %v25707_v51 = vld [vmem:[#allocation60_spill] sm:$0xff] }
 0x353   : > { %v2929_v25 = vsub.f32 %v20652_v33, %v24766_v62  ;;  %15813 = vmatprep.subr.bf16.mxu0 %v15812_v6  ;;  %v15816_v53 = vpack.c.bf16 %v2900_v50, %v2888_v43  ;;  %v2912_v30 = vand.u32 4294901760, %v2911_v38  ;;  %v2924_v34 = vand.u32 4294901760, %v2923_v54  ;;  %v25706_v17 = vld [vmem:[#allocation59_spill] sm:$0xff]  ;;  %v25708_v50 = vld [vmem:[#allocation62_spill] sm:$0xff]  ;;  %v25709_v6 = vld [vmem:[#allocation68_spill] sm:$0xff] }
 0x354   : > { %v15818_v26 = vpack.c.bf16 %v2906_v20, %v2894_v14  ;;  %v2918_v63 = vand.u32 4294901760, %v2917_v48  ;;  %v15824_v47 = vpack.c.bf16 %v25706_v17, %v25705_v23  ;;  %v15826_v62 = vpack.c.bf16 %v19975_v3, %v25707_v51  ;;  %v25710_v38 = vld [vmem:[#allocation57_spill] sm:$0xff]  ;;  %v25716_v48 = vld [vmem:[#allocation95_spill] sm:$0xff] }
 0x355   : > { %v2930_v44 = vand.u32 4294901760, %v2929_v25  ;;  %v15820_v42 = vpack.c.bf16 %v2924_v34, %v2912_v30  ;;  %v15828_v43 = vpack.c.bf16 %v25709_v6, %v25708_v50  ;;  %v25711_v54 = vld [vmem:[#allocation85_spill] sm:$0xff]  ;;  %v25717_v25 = vld [vmem:[#allocation38_spill] sm:$0xff]  ;;  %v15836_v34 = vpack.c.bf16 %v20051_v57, %v20046_v5 }
 0x356   : > { %15815 = vmatpush1.bf16.msra.mxu0 %v15814_v2  ;;  %v25712_v2 = vld [vmem:[#allocation69_spill] sm:$0xff] }
 0x357   : > { %15817 = vmatprep.subr.bf16.mxu0 %v15816_v53  ;;  %v15822_v24 = vpack.c.bf16 %v2930_v44, %v2918_v63  ;;  %v25714_v44 = vld [vmem:[#allocation72_spill] sm:$0xff]  ;;  %v25715_v14 = vld [vmem:[#allocation77_spill] sm:$0xff]  ;;  %v25718_v53 = vld [vmem:[#allocation78_spill] sm:$0xff] }
 0x358   : > { %v15832_v20 = vpack.c.bf16 %v25715_v14, %v25714_v44  ;;  %v15834_v30 = vpack.c.bf16 %v20041_v40, %v25718_v53 }
 0x35a   : > { %15819 = vmatpush1.bf16.msra.mxu0 %v15818_v26  ;;  %v25713_v26 = vld [vmem:[#allocation71_spill] sm:$0xff] }
 0x35b   : > { %15821 = vmatprep.subr.bf16.mxu0 %v15820_v42  ;;  %v15830_v63 = vpack.c.bf16 %v25713_v26, %v25712_v2  ;;  %v25719_v42 = vld [vmem:[#allocation84_spill] sm:$0xff] }
 0x35e   : > { %15823 = vmatpush1.bf16.msra.mxu0 %v15822_v24  ;;  %v25720_v24 = vld [vmem:[#allocation86_spill] sm:$0xff] }
 0x35f   : > { %15825 = vmatprep.subr.bf16.mxu0 %v15824_v47  ;;  %v15840_v47 = vpack.c.bf16 %v25720_v24, %v25719_v42 }
 0x361   : > { %2935 = vmatmul.mubr.f32.vlgmr.msra.gmra.mrb[0].mxu0 %v25710_v38 }
 0x362   : > { %2941 = vmatprep.mubr.f32.mxu0 %v25711_v54  ;;  %15827 = vmatpush1.bf16.msra.mxu0 %v15826_v62  ;;  %v15838_v62 = vpack.c.bf16 %v20083_v19, %v20065_v11  ;;  %v25724_v54 = vld [vmem:[#allocation120_spill] sm:$0xff] }
 0x363   : > { %15829 = vmatprep.subr.bf16.mxu0 %v15828_v43  ;;  %v15842_v43 = vpack.c.bf16 %v20107_v1, %v20098_v13 }
 0x365   : > { %2943 = vmatmul.mubr.f32.gmra.mrb[2].mxu0 %v25716_v48 }
 0x366   : > { %15831 = vmatpush1.bf16.msra.mxu0 %v15830_v63  ;;  %3143 = vmatprep.mubr.f32.mxu0 %v25717_v25  ;;  %v25721_v63 = vld [vmem:[#allocation110_spill] sm:$0xff] }
 0x367   : > { %15833 = vmatprep.subr.bf16.mxu0 %v15832_v20  ;;  %v15844_v31 = vpack.c.bf16 %v25721_v63, %v20112_v21  ;;  %v25722_v20 = vld [vmem:[#allocation115_spill] sm:$0xff]  ;;  %v25727_v63 = vld [vmem:[#allocation88_spill] sm:$0xff] }
 0x368   : > { %v15846_v48 = vpack.c.bf16 %v25722_v20, %v20122_v29 }
 0x36a   : > { %15835 = vmatpush1.bf16.msra.mxu0 %v15834_v30  ;;  %v25723_v30 = vld [vmem:[#allocation31_spill] sm:$0xff] }
 0x36b   : > { %15837 = vmatprep.subr.bf16.mxu0 %v15836_v34  ;;  %v15848_v38 = vpack.c.bf16 %v25724_v54, %v25723_v30  ;;  %v25725_v34 = vld [vmem:[#allocation39_spill] sm:$0xff] }
 0x36c   : > { %v15850_v24 = vpack.c.bf16 %v20169_v10, %v25725_v34  ;;  %v25729_v54 = vld [vmem:[#allocation119_spill] sm:$0xff] }
 0x36e   : > { %15839 = vmatpush1.bf16.msra.mxu0 %v15838_v62  ;;  %v15852_v62 = vpack.c.bf16 %v20183_v7, %v25651_v4 }
 0x36f   : > { %15841 = vmatprep.subr.bf16.mxu0 %v15840_v47  ;;  %v15854_v47 = vpack.c.bf16 %v20199_v35, %v25659_v61 }
 0x372   : > { %15843 = vmatpush1.bf16.msra.mxu0 %v15842_v43  ;;  %v25726_v43 = vld [vmem:[#allocation63_spill] sm:$0xff] }
 0x373   : > { %15845 = vmatprep.subr.bf16.mxu0 %v15844_v31  ;;  %v15856_v20 = vpack.c.bf16 %v25727_v63, %v25726_v43  ;;  %v15858_v31 = vpack.c.bf16 %v20243_v12, %v20232_v46 }
 0x376   : > { %15847 = vmatpush1.bf16.msra.mxu0 %v15846_v48  ;;  %v25728_v48 = vld [vmem:[#allocation94_spill] sm:$0xff] }
 0x377   : > { %15849 = vmatprep.subr.bf16.mxu0 %v15848_v38  ;;  %v15860_v10 = vpack.c.bf16 %v25729_v54, %v25728_v48  ;;  %v15862_v38 = vpack.c.bf16 %v20325_v49, %v20311_v41 }
 0x37a   : > { %15851 = vmatpush1.bf16.msra.mxu0 %v15850_v24  ;;  %v25730_v24 = vld [vmem:[#allocation113_spill] sm:$0xff] }
 0x37b   : > { %15853 = vmatprep.subr.bf16.mxu0 %v15852_v62  ;;  %v15864_v35 = vpack.c.bf16 %v25730_v24, %v20330_v22  ;;  %v25731_v62 = vld [vmem:[#allocation116_spill] sm:$0xff] }
 0x37c   : > { %v15866_v63 = vpack.c.bf16 %v20407_v32, %v25731_v62 }
 0x37e   : > { %15855 = vmatpush1.bf16.msra.mxu0 %v15854_v47  ;;  %v15868_v47 = vpack.c.bf16 %v20432_v15, %v20412_v39 }
 0x37f   : > { %15857 = vmatprep.subr.bf16.mxu0 %v15856_v20  ;;  %v15870_v20 = vpack.c.bf16 %v20452_v36, %v20447_v18 }
 0x382   : > { %15859 = vmatpush1.bf16.msra.mxu0 %v15858_v31  ;;  %v25732_v31 = vld [vmem:[#allocation117_spill] sm:$0xff] }
 0x383   : > { %15861 = vmatprep.subr.bf16.mxu0 %v15860_v10  ;;  %v15872_v49 = vpack.c.bf16 %v25732_v31, %v20465_v28  ;;  %v15874_v10 = vpack.c.bf16 %v20512_v27, %v20493_v45 }
 0x386   : > { %15863 = vmatpush1.bf16.msra.mxu0 %v15862_v38  ;;  %v15876_v38 = vpack.c.bf16 %v20536_v52, %v20517_v37 }
 0x387   : > { %15865 = vmatprep.subr.bf16.mxu0 %v15864_v35  ;;  %v15878_v35 = vpack.c.bf16 %v20556_v55, %v20551_v56  ;;  %v25735_v55 = vld [vmem:[#allocation96_spill] sm:$0xff] }
 0x38a   : > { %15867 = vmatpush1.bf16.msra.mxu0 %v15866_v63  ;;  %v15880_v63 = vpack.c.bf16 %v20574_v8, %v20569_v58  ;;  %v25737_v8 = vld [vmem:[#allocation44_spill] sm:$0xff] }
 0x38b   : > { %15869 = vmatprep.subr.bf16.mxu0 %v15868_v47  ;;  %v15882_v47 = vpack.c.bf16 %v20616_v16, %v20597_v60  ;;  %v25739_v16 = vld [vmem:[#allocation45_spill] sm:$0xff] }
 0x38e   : > { %15871 = vmatpush1.bf16.msra.mxu0 %v15870_v20  ;;  %v15884_v20 = vpack.c.bf16 %v20640_v0, %v20621_v59  ;;  %v25748_v0 = vld [vmem:[#allocation89_spill] sm:$0xff] }
 0x38f   : > { %15873 = vmatprep.subr.bf16.mxu0 %v15872_v49  ;;  %v15886_v49 = vpack.c.bf16 %v20652_v33, %v20647_v9  ;;  %v25741_v33 = vld [vmem:[#allocation47_spill] sm:$0xff]  ;;  %v25745_v9 = vld [vmem:[#allocation53_spill] sm:$0xff] }
 0x392   : > { %15875 = vmatpush1.bf16.msra.mxu0 %v15874_v10  ;;  %v25733_v10 = vld [vmem:[#allocation41_spill] sm:$0xff] }
 0x393   : > { %15877 = vmatprep.subr.bf16.mxu0 %v15876_v38  ;;  %v25734_v38 = vld [vmem:[#allocation93_spill] sm:$0xff] }
 0x396   : > { %15879 = vmatpush1.bf16.msra.mxu0 %v15878_v35  ;;  %v25736_v35 = vld [vmem:[#allocation42_spill] sm:$0xff] }
 0x397   : > { %15881 = vmatprep.subr.bf16.mxu0 %v15880_v63  ;;  %v25738_v63 = vld [vmem:[#allocation100_spill] sm:$0xff] }
 0x39a   : > { %15883 = vmatpush1.bf16.msra.mxu0 %v15882_v47  ;;  %v25740_v47 = vand.u32 4294901760, %v25717_v25  ;;  %v25750_v25 = vld [vmem:[#allocation97_spill] sm:$0xff] }
 0x39b   : > { %15885 = vmatprep.subr.bf16.mxu0 %v15884_v20  ;;  %v25742_v20 = vld [vmem:[#allocation48_spill] sm:$0xff] }
 0x39e   : > { %15887 = vmatpush1.bf16.msra.mxu0 %v15886_v49  ;;  %v25743_v49 = vld [vmem:[#allocation49_spill] sm:$0xff] }
 0x39f   : > { %15889 = vmatprep.subr.bf16.mxu0 %v25733_v10  ;;  %v25744_v10 = vld [vmem:[#allocation50_spill] sm:$0xff] }
 0x3a1   : > { %3146 = vmatmul.mubr.f32.vlgmr.msra.gmra.mrb[0].mxu0 %v25734_v38 }
 0x3a2   : > { %3153 = vmatprep.mubr.f32.mxu0 %v25735_v55  ;;  %15891 = vmatpush1.bf16.msra.mxu0 %v25736_v35  ;;  %v25746_v35 = vld [vmem:[#allocation54_spill] sm:$0xff] }
 0x3a3   : > { %15893 = vmatprep.subr.bf16.mxu0 %v25737_v8  ;;  %v25747_v8 = vld [vmem:[#allocation56_spill] sm:$0xff] }
 0x3a5   : > { %3156 = vmatmul.mubr.f32.gmra.mrb[2].mxu0 %v25738_v63 }
 0x3a6   : > { %15895 = vmatpush1.bf16.msra.mxu0 %v25739_v16  ;;  %3293 = vmatprep.mubr.f32.mxu0 %v25740_v47  ;;  %v25749_v16 = vld [vmem:[#allocation92_spill] sm:$0xff]  ;;  %v25751_v47 = vld [vmem:[#allocation98_spill] sm:$0xff] }
 0x3a7   : > { %15897 = vmatprep.subr.bf16.mxu0 %v25741_v33  ;;  %v25752_v33 = vld [vmem:[#allocation101_spill] sm:$0xff] }
 0x3aa   : > { %15899 = vmatpush1.bf16.msra.mxu0 %v25742_v20  ;;  %v25753_v20 = vld [vmem:[#allocation102_spill] sm:$0xff] }
 0x3ab   : > { %15901 = vmatprep.subr.bf16.mxu0 %v25743_v49  ;;  %v25754_v49 = vld [vmem:[#allocation70_spill] sm:$0xff] }
 0x3ae   : > { %15903 = vmatpush1.bf16.msra.mxu0 %v25744_v10  ;;  %v25755_v10 = vld [vmem:[#allocation75_spill] sm:$0xff] }
 0x3af   : > { %15905 = vmatprep.subr.bf16.mxu0 %v25745_v9  ;;  %v25756_v9 = vld [vmem:[#allocation61_spill] sm:$0xff] }
 0x3b2   : > { %15907 = vmatpush1.bf16.msra.mxu0 %v25746_v35  ;;  %v25757_v35 = vld [vmem:[#allocation65_spill] sm:$0xff] }
 0x3b3   : > { %15909 = vmatprep.subr.bf16.mxu0 %v25747_v8  ;;  %v25758_v8 = vld [vmem:[#allocation80_spill] sm:$0xff] }
 0x3b6   : > { %15911 = vmatpush1.bf16.msra.mxu0 %v25748_v0  ;;  %v25759_v0 = vld [vmem:[#allocation81_spill] sm:$0xff] }
 0x3b7   : > { %15913 = vmatprep.subr.bf16.mxu0 %v25749_v16  ;;  %v25760_v16 = vld [vmem:[#allocation28_spill] sm:$0xff] }
 0x3ba   : > { %15915 = vmatpush1.bf16.msra.mxu0 %v25750_v25  ;;  %v25761_v25 = vld [vmem:[#allocation36_spill] sm:$0xff] }
 0x3bb   : > { %15917 = vmatprep.subr.bf16.mxu0 %v25751_v47  ;;  %v25762_v47 = vld [vmem:[#allocation58_spill] sm:$0xff] }
 0x3be   : > { %15919 = vmatpush1.bf16.msra.mxu0 %v25752_v33  ;;  %v25763_v33 = vld [vmem:[#allocation64_spill] sm:$0xff] }
 0x3bf   : > { %15921 = vmatprep.subr.bf16.mxu0 %v25753_v20  ;;  %v25764_v20 = vld [vmem:[#allocation91_spill] sm:$0xff] }
 0x3c2   : > { %15923 = vmatpush1.bf16.msra.mxu0 %v25754_v49  ;;  %v25765_v49 = vld [vmem:[#allocation104_spill] sm:$0xff] }
 0x3c3   : > { %15925 = vmatprep.subr.bf16.mxu0 %v25755_v10  ;;  %v25766_v10 = vld [vmem:[#allocation112_spill] sm:$0xff] }
 0x3c6   : > { %15927 = vmatpush1.bf16.msra.mxu0 %v25756_v9  ;;  %v25767_v9 = vld [vmem:[#allocation105_spill] sm:$0xff] }
 0x3c7   : > { %15929 = vmatprep.subr.bf16.mxu0 %v25757_v35 }
 0x3ca   : > { %15931 = vmatpush1.bf16.msra.mxu0 %v25758_v8  ;;  %v25768_v8 = vand.u32 4294901760, %v25705_v23  ;;  %v25776_v23 = vand.u32 4294901760, %v25735_v55  ;;  %v25783_v55 = vand.u32 4294901760, %v25718_v53 }
 0x3cb   : > { %15933 = vmatprep.subr.bf16.mxu0 %v25759_v0  ;;  %v25769_v0 = vand.u32 4294901760, %v25706_v17  ;;  %v25780_v17 = vand.u32 4294901760, %v25715_v14  ;;  %v25787_v14 = vand.u32 4294901760, %v20065_v11 }
 0x3cd   : > { %v15952_v35 = vpack.c.bf16 %v25769_v0, %v25768_v8  ;;  %v25777_v8 = vand.u32 4294901760, %v25712_v2  ;;  %v25778_v0 = vand.u32 4294901760, %v25713_v26  ;;  %v25785_v26 = vand.u32 4294901760, %v20046_v5 }
 0x3ce   : > { %15935 = vmatpush1.bf16.msra.mxu0 %v25760_v16  ;;  %v25770_v16 = vld [vmem:[#allocation111_spill] sm:$0xff]  ;;  %v25793_v5 = vand.u32 4294901760, %v20107_v1  ;;  %v25803_v1 = vand.u32 4294901760, %v25725_v34 }
 0x3cf   : > { %15937 = vmatprep.subr.bf16.mxu0 %v25761_v25  ;;  %v25771_v25 = vand.u32 4294901760, %v25707_v51  ;;  %v15958_v51 = vpack.c.bf16 %v25778_v0, %v25777_v8  ;;  %v25798_v8 = vld [vmem:[#allocation115_spill] sm:$0xff] }
 0x3d2   : > { %15939 = vmatpush1.bf16.msra.mxu0 %v25762_v47  ;;  %v25772_v47 = vand.u32 4294901760, %v19975_v3  ;;  %v25779_v3 = vand.u32 4294901760, %v25714_v44 }
 0x3d3   : > { %15941 = vmatprep.subr.bf16.mxu0 %v25763_v33 }
 0x3d4   : > { %v15954_v33 = vpack.c.bf16 %v25772_v47, %v25771_v25  ;;  %v25795_v47 = vld [vmem:[#allocation110_spill] sm:$0xff] }
 0x3d5   : > { %v25796_v11 = vand.u32 4294901760, %v25795_v47 }
 0x3d6   : > { %15943 = vmatpush1.bf16.msra.mxu0 %v25764_v20  ;;  %v25773_v20 = vand.u32 4294901760, %v25708_v50  ;;  %v15960_v50 = vpack.c.bf16 %v25780_v17, %v25779_v3  ;;  %v25801_v3 = vld [vmem:[#allocation120_spill] sm:$0xff] }
 0x3d7   : > { %15945 = vmatprep.subr.bf16.mxu0 %v25765_v49  ;;  %v25774_v49 = vand.u32 4294901760, %v25709_v6  ;;  %v25781_v6 = vand.u32 4294901760, %v25738_v63  ;;  %v25789_v63 = vand.u32 4294901760, %v25719_v42  ;;  %v25799_v42 = vand.u32 4294901760, %v25798_v8 }
 0x3da   : > { %15947 = vmatpush1.bf16.msra.mxu0 %v25766_v10  ;;  %v15956_v10 = vpack.c.bf16 %v25774_v49, %v25773_v20  ;;  %v25790_v20 = vld [vmem:[#allocation86_spill] sm:$0xff] }
 0x3db   : > { %15949 = vmatprep.subr.bf16.mxu0 %v25767_v9  ;;  %v25775_v9 = vand.u32 4294901760, %v25734_v38  ;;  %v25788_v38 = vand.u32 4294901760, %v20083_v19  ;;  %v25791_v53 = vand.u32 4294901760, %v25790_v20  ;;  %v25797_v19 = vand.u32 4294901760, %v20122_v29 }
 0x3dc   : > { %v25807_v29 = vand.u32 4294901760, %v20183_v7  ;;  %v25816_v7 = vand.u32 4294901760, %v25728_v48  ;;  %v25824_v48 = vand.u32 4294901760, %v20407_v32  ;;  %v25831_v32 = vand.u32 4294901760, %v20493_v45 }
 0x3dd   : > { %v15968_v49 = vpack.c.bf16 %v25791_v53, %v25789_v63  ;;  %v15974_v0 = vpack.c.bf16 %v25799_v42, %v25797_v19  ;;  %v25818_v53 = vand.u32 4294901760, %v20311_v41  ;;  %v25826_v41 = vand.u32 4294901760, %v20432_v15 }
 0x3de   : > { %15951 = vmatpush1.bf16.msra.mxu0 %v25770_v16  ;;  %v25833_v15 = vand.u32 4294901760, %v20517_v37 }
 0x3df   : > { %15953 = vmatprep.subr.bf16.mxu0 %v15952_v35  ;;  %v15966_v35 = vpack.c.bf16 %v25788_v38, %v25787_v14  ;;  %v25812_v14 = vld [vmem:[#allocation88_spill] sm:$0xff] }
 0x3e0   : > { %v25813_v34 = vand.u32 4294901760, %v25812_v14  ;;  %v25858_v14 = vld [vmem:[#allocation47_spill] sm:$0xff] }
 0x3e1   : > { %3297 = vmatmul.mubr.f32.vlgmr.msra.gmra.mrb[0].mxu0 %v25775_v9  ;;  %v25782_v9 = vld [vmem:[#allocation37_spill] sm:$0xff] }
 0x3e2   : > { %3305 = vmatprep.mubr.f32.mxu0 %v25776_v23  ;;  %15955 = vmatpush1.bf16.msra.mxu0 %v15954_v33  ;;  %v25784_v33 = vand.u32 4294901760, %v20041_v40  ;;  %v25792_v40 = vand.u32 4294901760, %v20098_v13  ;;  %v25802_v13 = vand.u32 4294901760, %v25801_v3  ;;  %v25839_v3 = vld [vmem:[#allocation106_spill] sm:$0xff] }
 0x3e3   : > { %15957 = vmatprep.subr.bf16.mxu0 %v15956_v10  ;;  %v25786_v10 = vand.u32 4294901760, %v20051_v57  ;;  %v25794_v57 = vand.u32 4294901760, %v20112_v21  ;;  %v25840_v45 = vand.u32 4294901760, %v25839_v3 }
 0x3e4   : > { %v15962_v2 = vpack.c.bf16 %v25784_v33, %v25783_v55  ;;  %v15970_v25 = vpack.c.bf16 %v25793_v5, %v25792_v40  ;;  %v25806_v55 = vand.u32 4294901760, %v25651_v4  ;;  %v25815_v4 = vand.u32 4294901760, %v20243_v12 }
 0x3e5   : > { %3309 = vmatmul.mubr.f32.gmra.mrb[2].mxu0 %v25781_v6  ;;  %v15964_v44 = vpack.c.bf16 %v25786_v10, %v25785_v26  ;;  %v15972_v23 = vpack.c.bf16 %v25796_v11, %v25794_v57  ;;  %v25809_v26 = vld [vmem:[#allocation55_spill] sm:$0xff]  ;;  %v25821_v5 = vand.u32 4294901760, %v20330_v22  ;;  %v25823_v12 = vand.u32 4294901760, %v25731_v62 }
 0x3e6   : > { %15959 = vmatpush1.bf16.msra.mxu0 %v15958_v51  ;;  %3572 = vmatprep.mubr.f32.mxu0 %v25782_v9  ;;  %v25800_v51 = vand.u32 4294901760, %v25723_v30  ;;  %v15980_v33 = vpack.c.bf16 %v25807_v29, %v25806_v55  ;;  %v25810_v30 = vand.u32 4294901760, %v25809_v26  ;;  %v25827_v11 = vand.u32 4294901760, %v20447_v18  ;;  %v25849_v29 = vld [vmem:[#allocation107_spill] sm:$0xff]  ;;  %v25853_v26 = vld [vmem:[#allocation85_spill] sm:$0xff] }
 0x3e7   : > { %15961 = vmatprep.subr.bf16.mxu0 %v15960_v50  ;;  %v25804_v50 = vld [vmem:[#allocation40_spill] sm:$0xff]  ;;  %v15994_v57 = vpack.c.bf16 %v25824_v48, %v25823_v12  ;;  %v25828_v22 = vand.u32 4294901760, %v20452_v36  ;;  %v25830_v62 = vand.u32 4294901760, %v25732_v31  ;;  %v25834_v18 = vand.u32 4294901760, %v20536_v52  ;;  %v25876_v48 = vld [vmem:[#allocation81_spill] sm:$0xff] }
 0x3e8   : > { %v15976_v17 = vpack.c.bf16 %v25802_v13, %v25800_v51  ;;  %v25805_v21 = vand.u32 4294901760, %v25804_v50  ;;  %v25835_v36 = vand.u32 4294901760, %v20551_v56  ;;  %v25838_v31 = vand.u32 4294901760, %v20569_v58  ;;  %v25845_v50 = vld [vmem:[#allocation114_spill] sm:$0xff]  ;;  %v25875_v12 = vld [vmem:[#allocation80_spill] sm:$0xff] }
 0x3e9   : > { %v16004_v42 = vpack.c.bf16 %v25834_v18, %v25833_v15  ;;  %v25844_v52 = vand.u32 4294901760, %v20621_v59  ;;  %v25846_v56 = vand.u32 4294901760, %v25845_v50  ;;  %v25850_v58 = vand.u32 4294901760, %v25849_v29  ;;  %v25855_v59 = vld [vmem:[#allocation44_spill] sm:$0xff] }
 0x3ea   : > { %15963 = vmatpush1.bf16.msra.mxu0 %v15962_v2  ;;  %v15978_v6 = vpack.c.bf16 %v25805_v21, %v25803_v1  ;;  %v25808_v2 = vand.u32 4294901760, %v25659_v61  ;;  %v25817_v61 = vand.u32 4294901760, %v25729_v54  ;;  %v25825_v54 = vand.u32 4294901760, %v20412_v39 }
 0x3eb   : > { %15965 = vmatprep.subr.bf16.mxu0 %v15964_v44  ;;  %v25811_v44 = vand.u32 4294901760, %v25726_v43  ;;  %v25832_v39 = vand.u32 4294901760, %v20512_v27  ;;  %v16008_v13 = vpack.c.bf16 %v25840_v45, %v25838_v31  ;;  %v25841_v27 = vand.u32 4294901760, %v20597_v60  ;;  %v25852_v60 = vld [vmem:[#allocation57_spill] sm:$0xff]  ;;  %v25888_v31 = vld [vmem:[#allocation35_spill] sm:$0xff] }
 0x3ec   : > { %v15982_v10 = vpack.c.bf16 %v25810_v30, %v25808_v2  ;;  %v15988_v20 = vpack.c.bf16 %v25817_v61, %v25816_v7  ;;  %v15996_v47 = vpack.c.bf16 %v25826_v41, %v25825_v54  ;;  %v16012_v21 = vpack.c.bf16 %v25846_v56, %v25844_v52  ;;  %v25851_v2 = vld [vmem:[#allocation41_spill] sm:$0xff]  ;;  %v25854_v30 = vld [vmem:[#allocation42_spill] sm:$0xff]  ;;  %v25864_v7 = vld [vmem:[#allocation56_spill] sm:$0xff] }
 0x3ed   : > { %v15984_v38 = vpack.c.bf16 %v25813_v34, %v25811_v44  ;;  %v16002_v8 = vpack.c.bf16 %v25832_v39, %v25831_v32  ;;  %v25857_v44 = vld [vmem:[#allocation45_spill] sm:$0xff]  ;;  %v25859_v34 = vld [vmem:[#allocation48_spill] sm:$0xff]  ;;  %v25879_v41 = vld [vmem:[#allocation58_spill] sm:$0xff] }
 0x3ee   : > { %15967 = vmatpush1.bf16.msra.mxu0 %v15966_v35  ;;  %v25814_v35 = vand.u32 4294901760, %v20232_v46  ;;  %v25822_v46 = vand.u32 4294901760, %v25730_v24  ;;  %v25829_v24 = vand.u32 4294901760, %v20465_v28  ;;  %v25865_v61 = vld [vmem:[#allocation89_spill] sm:$0xff]  ;;  %v25878_v54 = vld [vmem:[#allocation36_spill] sm:$0xff] }
 0x3ef   : > { %15969 = vmatprep.subr.bf16.mxu0 %v15968_v49  ;;  %v25819_v49 = vld [vmem:[#allocation108_spill] sm:$0xff] }
 0x3f0   : > { %v15986_v63 = vpack.c.bf16 %v25815_v4, %v25814_v35  ;;  %v25820_v43 = vand.u32 4294901760, %v25819_v49  ;;  %v16000_v19 = vpack.c.bf16 %v25830_v62, %v25829_v24  ;;  %v25861_v35 = vld [vmem:[#allocation50_spill] sm:$0xff]  ;;  %v25862_v4 = vld [vmem:[#allocation53_spill] sm:$0xff] }
 0x3f1   : > { %v25869_v49 = vld [vmem:[#allocation101_spill] sm:$0xff] }
 0x3f2   : > { %15971 = vmatpush1.bf16.msra.mxu0 %v15970_v25  ;;  %v15990_v40 = vpack.c.bf16 %v25820_v43, %v25818_v53  ;;  %v15992_v25 = vpack.c.bf16 %v25822_v46, %v25821_v5  ;;  %v25867_v53 = vld [vmem:[#allocation97_spill] sm:$0xff]  ;;  %v25870_v43 = vld [vmem:[#allocation102_spill] sm:$0xff]  ;;  %v25872_v5 = vld [vmem:[#allocation75_spill] sm:$0xff] }
 0x3f3   : > { %15973 = vmatprep.subr.bf16.mxu0 %v15972_v23  ;;  %v15998_v23 = vpack.c.bf16 %v25828_v22, %v25827_v11  ;;  %v25873_v46 = vld [vmem:[#allocation61_spill] sm:$0xff]  ;;  %v25881_v11 = vld [vmem:[#allocation91_spill] sm:$0xff]  ;;  %v25882_v22 = vld [vmem:[#allocation104_spill] sm:$0xff] }
 0x3f4   : > { %v25884_v24 = vld [vmem:[#allocation105_spill] sm:$0xff] }
 0x3f6   : > { %15975 = vmatpush1.bf16.msra.mxu0 %v15974_v0  ;;  %v25836_v0 = vld [vmem:[#allocation30_spill] sm:$0xff] }
 0x3f7   : > { %15977 = vmatprep.subr.bf16.mxu0 %v15976_v17  ;;  %v25837_v28 = vand.u32 4294901760, %v25836_v0  ;;  %v25842_v17 = vld [vmem:[#allocation122_spill] sm:$0xff] }
 0x3f8   : > { %v25843_v37 = vand.u32 4294901760, %v25842_v17 }
 0x3f9   : > { %v16006_v51 = vpack.c.bf16 %v25837_v28, %v25835_v36 }
 0x3fa   : > { %15979 = vmatpush1.bf16.msra.mxu0 %v15978_v6  ;;  %v16010_v1 = vpack.c.bf16 %v25843_v37, %v25841_v27  ;;  %v25847_v6 = vld [vmem:[#allocation121_spill] sm:$0xff] }
 0x3fb   : > { %15981 = vmatprep.subr.bf16.mxu0 %v15980_v33  ;;  %v25848_v55 = vand.u32 4294901760, %v25847_v6 }
 0x3fd   : > { %v16014_v33 = vpack.c.bf16 %v25850_v58, %v25848_v55 }
 0x3fe   : > { %15983 = vmatpush1.bf16.msra.mxu0 %v15982_v10  ;;  %v25856_v10 = vld [vmem:[#allocation95_spill] sm:$0xff] }
 0x3ff   : > { %15985 = vmatprep.subr.bf16.mxu0 %v15984_v38  ;;  %v25860_v38 = vld [vmem:[#allocation49_spill] sm:$0xff] }
 0x402   : > { %15987 = vmatpush1.bf16.msra.mxu0 %v15986_v63  ;;  %v25863_v63 = vld [vmem:[#allocation54_spill] sm:$0xff] }
 0x403   : > { %15989 = vmatprep.subr.bf16.mxu0 %v15988_v20  ;;  %v25866_v20 = vld [vmem:[#allocation92_spill] sm:$0xff] }
 0x406   : > { %15991 = vmatpush1.bf16.msra.mxu0 %v15990_v40  ;;  %v25871_v40 = vld [vmem:[#allocation70_spill] sm:$0xff] }
 0x407   : > { %15993 = vmatprep.subr.bf16.mxu0 %v15992_v25  ;;  %v25874_v25 = vld [vmem:[#allocation65_spill] sm:$0xff] }
 0x40a   : > { %15995 = vmatpush1.bf16.msra.mxu0 %v15994_v57  ;;  %v25877_v57 = vld [vmem:[#allocation28_spill] sm:$0xff] }
 0x40b   : > { %15997 = vmatprep.subr.bf16.mxu0 %v15996_v47  ;;  %v25880_v47 = vld [vmem:[#allocation64_spill] sm:$0xff] }
 0x40e   : > { %15999 = vmatpush1.bf16.msra.mxu0 %v15998_v23  ;;  %v25883_v23 = vld [vmem:[#allocation112_spill] sm:$0xff] }
 0x40f   : > { %16001 = vmatprep.subr.bf16.mxu0 %v16000_v19  ;;  %v25885_v19 = vld [vmem:[#allocation32_spill] sm:$0xff] }
 0x412   : > { %16003 = vmatpush1.bf16.msra.mxu0 %v16002_v8  ;;  %v25886_v8 = vld [vmem:[#allocation33_spill] sm:$0xff] }
 0x413   : > { %16005 = vmatprep.subr.bf16.mxu0 %v16004_v42 }
 0x416   : > { %16007 = vmatpush1.bf16.msra.mxu0 %v16006_v51 }
 0x417   : > { %16009 = vmatprep.subr.bf16.mxu0 %v16008_v13 }
 0x41a   : > { %16011 = vmatpush1.bf16.msra.mxu0 %v16010_v1 }
 0x41b   : > { %16013 = vmatprep.subr.bf16.mxu0 %v16012_v21 }
 0x41e   : > { %16015 = vmatpush1.bf16.msra.mxu0 %v16014_v33 }
 0x41f   : > { %16017 = vmatprep.subr.bf16.mxu0 %v25851_v2 }
 0x421   : > { %3574 = vmatmul.mubr.f32.vlgmr.msra.gmra.mrb[0].mxu0 %v25852_v60 }
 0x422   : > { %3580 = vmatprep.mubr.f32.mxu0 %v25853_v26  ;;  %16019 = vmatpush1.bf16.msra.mxu0 %v25854_v30 }
 0x423   : > { %16021 = vmatprep.subr.bf16.mxu0 %v25855_v59 }
 0x425   : > { %3582 = vmatmul.mubr.f32.gmra.mrb[2].mxu0 %v25856_v10 }
 0x426   : > { %16023 = vmatpush1.bf16.msra.mxu0 %v25857_v44  ;;  %3717 = vmatprep.mubr.f32.mxu0 %v25782_v9  ;;  %v25868_v9 = vld [vmem:[#allocation98_spill] sm:$0xff] }
 0x427   : > { %16025 = vmatprep.subr.bf16.mxu0 %v25858_v14  ;;  %v3737_v44 = vld [vmem:[%s24261_s6] sm:$0xff] }
 0x42a   : > { %16027 = vmatpush1.bf16.msra.mxu0 %v25859_v34 }
 0x42b   : > { %16029 = vmatprep.subr.bf16.mxu0 %v25860_v38  ;;  %v24777_v38 = vmov 0.0  }
 0x42c   : > { %3919 = vmatprep.mubr.f32.mxu1 %v24777_v38 }
 0x42e   : > { %16031 = vmatpush1.bf16.msra.mxu0 %v25861_v35 }
 0x42f   : > { %16033 = vmatprep.subr.bf16.mxu0 %v25862_v4 }
 0x432   : > { %16035 = vmatpush1.bf16.msra.mxu0 %v25863_v63  ;;  %v3738_v63 = vld [vmem:[%s24261_s6 + $0x8] sm:$0xff] }
 0x433   : > { %16037 = vmatprep.subr.bf16.mxu0 %v25864_v7  ;;  %v3739_v7 = vld [vmem:[%s24261_s6 + $0x10] sm:$0xff] }
 0x436   : > { %16039 = vmatpush1.bf16.msra.mxu0 %v25865_v61  ;;  %v3740_v61 = vld [vmem:[%s24261_s6 + $0x18] sm:$0xff] }
 0x437   : > { %16041 = vmatprep.subr.bf16.mxu0 %v25866_v20  ;;  %v620_v20 = vld [vmem:[%s24262_s7] sm:$0xf] }
 0x43a   : > { %16043 = vmatpush1.bf16.msra.mxu0 %v25867_v53  ;;  %v25889_v53 = vld [vmem:[#allocation24_spill] sm:$0xff] }
 0x43b   : > { %16045 = vmatprep.subr.bf16.mxu0 %v25868_v9  ;;  %v3757_v9 = vrot.slane %v620_v20, %v25889_v53 }
 0x43e   : > { %16047 = vmatpush1.bf16.msra.mxu0 %v25869_v49  ;;  %v25890_v49 = vld [vmem:[#allocation25_spill] sm:$0xff] }
 0x43f   : > { %16049 = vmatprep.subr.bf16.mxu0 %v25870_v43  ;;  %v3761_v43 = vrot.slane %v620_v20, %v25890_v49 }
 0x442   : > { %16051 = vmatpush1.bf16.msra.mxu0 %v25871_v40  ;;  %v3733_v40 = vld [vmem:[#allocation5] sm:$0xff] }
 0x443   : > { %16053 = vmatprep.subr.bf16.mxu0 %v25872_v5 }
 0x446   : > { %16055 = vmatpush1.bf16.msra.mxu0 %v25873_v46  ;;  %v3767_v46 = vrot.slane %v3757_v9, %v25889_v53 }
 0x447   : > { %16057 = vmatprep.subr.bf16.mxu0 %v25874_v25  ;;  %v3771_v25 = vrot.slane %v3761_v43, %v25889_v53 }
 0x44a   : > { %16059 = vmatpush1.bf16.msra.mxu0 %v25875_v12  ;;  %v3832_v12 = vsel %vm3830_vm2, %v3733_v40, 0  ;;  %v3736_v40 = vld [vmem:[#allocation5 + $0x18] sm:$0xff] }
 0x44b   : > { %16061 = vmatprep.subr.bf16.mxu0 %v25876_v48 }
 0x44e   : > { %16063 = vmatpush1.bf16.msra.mxu0 %v25877_v57 }
 0x44f   : > { %16065 = vmatprep.subr.bf16.mxu0 %v25878_v54  ;;  %v3734_v54 = vld [vmem:[#allocation5 + $0x8] sm:$0xff] }
 0x452   : > { %16067 = vmatpush1.bf16.msra.mxu0 %v25879_v41 }
 0x453   : > { %16069 = vmatprep.subr.bf16.mxu0 %v25880_v47 }
 0x456   : > { %16071 = vmatpush1.bf16.msra.mxu0 %v25881_v11 }
 0x457   : > { %16073 = vmatprep.subr.bf16.mxu0 %v25882_v22  ;;  %v21038_v22 = vand.u32 4294901760, %v3832_v12 }
 0x45a   : > { %16075 = vmatpush1.bf16.msra.mxu0 %v25883_v23 }
 0x45b   : > { %16077 = vmatprep.subr.bf16.mxu0 %v25884_v24 }
 0x45e   : > { %16079 = vmatpush1.bf16.msra.mxu0 %v25770_v16  ;;  %v25887_v16 = vld [vmem:[#allocation34_spill] sm:$0xff] }
 0x461   : > { %3719 = vmatmul.mubr.f32.vlgmr.msra.gmra.mrb[0].mxu0 %v25852_v60 }
 0x462   : > { %3725 = vmatprep.mubr.f32.mxu0 %v25853_v26 }
 0x465   : > { %3727 = vmatmul.mubr.f32.gmra.mrb[2].mxu0 %v25856_v10 }
 0x534   : > { %v3720_v62 = vpop.f32.mrb[0].mxu0 }
 0x535   : > { %v17304_v32 = vadd.f32 %v3720_v62, %v25885_v19  ;;  %v3722_v39 = vpop.f32.mrb[1].mxu0  ;;  %v25892_v62 = vld [vmem:[#allocation26_spill] sm:$0xff] }
 0x536   : > { %v17305_v15 = vadd.f32 %v3722_v39, %v25886_v8  ;;  %v3791_v19 = vrot.slane %v620_v20, %v25892_v62  ;;  %v3835_v8 = vsel %vm3830_vm2, %v3734_v54, 0 }
 0x537   : > { %v3853_v18 = vand.u32 4294901760, %v17304_v32  ;;  %3741 = vrot.lane.b32.xlu0 %v17304_v32, %s17822_s25 }
 0x538   : > { %v3728_v42 = vpop.f32.mrb[2].mxu0  ;;  %v3851_v36 = vand.u32 4294901760, %v17305_v15 }
 0x539   : > { %v20972_v0 = vsub.f32 %v17304_v32, %v3853_v18  ;;  %v17306_v28 = vadd.f32 %v3728_v42, %v25887_v16  ;;  %v3730_v51 = vpop.f32.mrb[3].mxu0 }
 0x53a   : > { %v17307_v3 = vadd.f32 %v3730_v51, %v25888_v31  ;;  %v20976_v45 = vsub.f32 %v17305_v15, %v3851_v36  ;;  %v21048_v51 = vsub.f32 %v3832_v12, %v21038_v22 }
 0x53b   : > { %v3857_v13 = vand.u32 4294901760, %v17306_v28  ;;  %3743 = vrot.lane.b32.xlu1 %v17306_v28, %s17822_s25  ;;  %3745 = vrot.lane.b32.xlu0 %v17305_v15, %s17822_s25  ;;  %v3996_v27 = vand.u32 4294901760, %v20972_v0 }
 0x53c   : > { %v3855_v17 = vand.u32 4294901760, %v17307_v3  ;;  %v3990_v37 = vand.u32 4294901760, %v20976_v45 }
 0x53d   : > { %v20982_v1 = vsub.f32 %v17306_v28, %v3857_v13  ;;  %v20984_v52 = vpack.c.bf16 %v3857_v13, %v3853_v18  ;;  %v3997_v21 = vsub.f32 %v20972_v0, %v3996_v27  ;;  %v21050_v13 = vand.u32 4294901760, %v3835_v8 }
 0x53e   : > { %v20986_v50 = vpack.c.bf16 %v3855_v17, %v3851_v36  ;;  %v20988_v56 = vsub.f32 %v17307_v3, %v3855_v17  ;;  %v3991_v29 = vsub.f32 %v20976_v45, %v3990_v37  ;;  %v21053_v17 = vrot.slane %v3791_v19, %v25892_v62 }
 0x53f   : > { %3747 = vrot.lane.b32.xlu1 %v17307_v3, %s17822_s25  ;;  %3776 = vrot.lane.b32.xlu0 %v17304_v32, %s17823_s1  ;;  %v4008_v6 = vand.u32 4294901760, %v20982_v1  ;;  %v16110_v55 = vpack.c.bf16 %v20982_v1, %v20972_v0  ;;  %v3998_v59 = vand.u32 4294901760, %v3997_v21  ;;  %v25893_v32 = vld [vmem:[#allocation27_spill] sm:$0xff] }
 0x540   : > { %v4002_v58 = vand.u32 4294901760, %v20988_v56  ;;  %v16108_v33 = vpack.c.bf16 %v20988_v56, %v20976_v45  ;;  %v3992_v14 = vand.u32 4294901760, %v3991_v29  ;;  %v3795_v39 = vrot.slane %v620_v20, %v25893_v32  ;;  %25894 = vst [vmem:[#allocation67_spill] sm:$0xff] %v21053_v17 }
 0x541   : > { %v4009_v2 = vsub.f32 %v20982_v1, %v4008_v6  ;;  %v21001_v60 = vpack.c.bf16 %v4008_v6, %v3996_v27  ;;  %v3735_v27 = vld [vmem:[#allocation5 + $0x10] sm:$0xff]  ;;  %v3841_v32 = vsel %vm3830_vm2, %v3736_v40, 0 }
 0x542   : > { %v4003_v26 = vsub.f32 %v20988_v56, %v4002_v58  ;;  %v21004_v30 = vpack.c.bf16 %v4002_v58, %v3990_v37  ;;  %v21056_v37 = vrot.slane %v3795_v39, %v25892_v62 }
 0x543   : > { %3778 = vrot.lane.b32.xlu1 %v17306_v28, %s17823_s1  ;;  %3780 = vrot.lane.b32.xlu0 %v17305_v15, %s17823_s1  ;;  %v4010_v10 = vand.u32 4294901760, %v4009_v2 }
 0x544   : > { %v4004_v34 = vand.u32 4294901760, %v4003_v26  ;;  %25895 = vst [vmem:[#allocation87_spill] sm:$0xff] %v21056_v37 }
 0x545   : > { %v21012_v35 = vpack.c.bf16 %v4010_v10, %v3998_v59 }
 0x546   : > { %v21014_v4 = vpack.c.bf16 %v4004_v34, %v3992_v14  ;;  %v3838_v14 = vsel %vm3830_vm2, %v3735_v27, 0 }
 0x547   : > { %3782 = vrot.lane.b32.xlu1 %v17307_v3, %s17823_s1  ;;  %3812 = vperm.xlu0 %17594, %v3737_v44   ;;  %v3922_v44 = vand.u32 4294901760, %v21048_v51 }
 0x549   : > { %v3923_v19 = vsub.f32 %v21048_v51, %v3922_v44 }
 0x54b   : > { %3817 = vperm.xlu1 %17595, %v3738_v63   ;;  %3822 = vperm.xlu0 %17594, %v3739_v7  }
 0x54f   : > { %3827 = vperm.xlu1 %17595, %v3740_v61   ;;  %v21075_v61 = vsub.f32 %v3835_v8, %v21050_v13 }
 0x5a9   : > { %v3742_v5 = vpop.permute.xlu0 %3741 }
 0x5ad   : > { %v3744_v48 = vpop.permute.xlu1 %3743  ;;  %v3746_v57 = vpop.permute.xlu0 %3745 }
 0x5ae   : > { %v3749_v47 = vsel %vm660_vm0, %v3742_v5, %v3746_v57  ;;  %v3751_v11 = vsel %vm660_vm0, %v3746_v57, %v3742_v5 }
 0x5af   : > { %v3772_v23 = vmul.f32 %v3767_v46, %v3751_v11  ;;  %v3773_v24 = vmul.f32 %v3771_v25, %v3749_v47 }
 0x5b1   : > { %v3843_v15 = vand.u32 4294901760, %v3773_v24  ;;  %v3845_v18 = vand.u32 4294901760, %v3772_v23  ;;  %v3748_v42 = vpop.permute.xlu1 %3747  ;;  %v3777_v36 = vpop.permute.xlu0 %3776 }
 0x5b2   : > { %v3750_v16 = vsel %vm660_vm0, %v3744_v48, %v3748_v42  ;;  %v3752_v28 = vsel %vm660_vm0, %v3748_v42, %v3744_v48  ;;  %v21085_v48 = vand.u32 4294901760, %v3838_v14 }
 0x5b3   : > { %v3774_v31 = vmul.f32 %v3767_v46, %v3752_v28  ;;  %v3775_v3 = vmul.f32 %v3771_v25, %v3750_v16  ;;  %v21058_v21 = vsub.f32 %v3773_v24, %v3843_v15  ;;  %v21060_v6 = vsub.f32 %v3772_v23, %v3845_v18 }
 0x5b4   : > { %v21113_v28 = vsub.f32 %v3838_v14, %v21085_v48 }
 0x5b5   : > { %v3847_v29 = vand.u32 4294901760, %v3775_v3  ;;  %v3849_v58 = vand.u32 4294901760, %v3774_v31  ;;  %v3779_v2 = vpop.permute.xlu1 %3778  ;;  %v3781_v26 = vpop.permute.xlu0 %3780  ;;  %v3966_v43 = vand.u32 4294901760, %v21058_v21  ;;  %v3972_v5 = vand.u32 4294901760, %v21060_v6 }
 0x5b6   : > { %v3784_v59 = vsel %vm758_vm1, %v3777_v36, %v3781_v26  ;;  %v3786_v10 = vsel %vm758_vm1, %v3781_v26, %v3777_v36 }
 0x5b7   : > { %v21068_v34 = vpack.c.bf16 %v3849_v58, %v3845_v18  ;;  %v21070_v63 = vsub.f32 %v3775_v3, %v3847_v29  ;;  %v21072_v7 = vsub.f32 %v3774_v31, %v3849_v58  ;;  %v3806_v20 = vmul.f32 %v21053_v17, %v3784_v59 }
 0x5b8   : > { %v3807_v9 = vmul.f32 %v21056_v37, %v3786_v10  ;;  %v21079_v49 = vpack.c.bf16 %v3847_v29, %v3843_v15  ;;  %v3967_v8 = vsub.f32 %v21058_v21, %v3966_v43  ;;  %v3933_v18 = vand.u32 4294901760, %v21075_v61 }
 0x5b9   : > { %v3984_v46 = vand.u32 4294901760, %v21072_v7  ;;  %v3783_v25 = vpop.permute.xlu1 %3782  ;;  %v3978_v12 = vand.u32 4294901760, %v21070_v63  ;;  %v3861_v54 = vand.u32 4294901760, %v3806_v20  ;;  %v3973_v31 = vsub.f32 %v21060_v6, %v3972_v5 }
 0x5ba   : > { %v3859_v57 = vand.u32 4294901760, %v3807_v9  ;;  %v3785_v47 = vsel %vm758_vm1, %v3779_v2, %v3783_v25  ;;  %v3787_v11 = vsel %vm758_vm1, %v3783_v25, %v3779_v2  ;;  %16081 = vmatprep.subr.bf16.mxu1 %v21079_v49  ;;  %v21120_v29 = vand.u32 4294901760, %v3841_v32 }
 0x5bb   : > { %v3808_v23 = vmul.f32 %v21053_v17, %v3785_v47  ;;  %v3809_v24 = vmul.f32 %v21056_v37, %v3787_v11  ;;  %16083 = vmatpush1.bf16.msra.mxu1 %v21068_v34  ;;  %v3979_v15 = vsub.f32 %v21070_v63, %v3978_v12  ;;  %v3985_v42 = vsub.f32 %v21072_v7, %v3984_v46 }
 0x5bc   : > { %v21099_v39 = vsub.f32 %v3807_v9, %v3859_v57  ;;  %16085 = vmatprep.subr.bf16.mxu1 %v20986_v50  ;;  %v21118_v3 = vsub.f32 %v3806_v20, %v3861_v54  ;;  %v3968_v10 = vand.u32 4294901760, %v3967_v8  ;;  %v3924_v20 = vand.u32 4294901760, %v3923_v19 }
 0x5bd   : > { %v3863_v36 = vand.u32 4294901760, %v3809_v24  ;;  %v3865_v16 = vand.u32 4294901760, %v3808_v23  ;;  %v3980_v27 = vand.u32 4294901760, %v3979_v15  ;;  %v3986_v40 = vand.u32 4294901760, %v3985_v42 }
 0x5be   : > { %v4014_v14 = vand.u32 4294901760, %v21099_v39  ;;  %v3934_v47 = vsub.f32 %v21075_v61, %v3933_v18  ;;  %v3944_v11 = vand.u32 4294901760, %v21113_v28  ;;  %v16128_v0 = vpack.c.bf16 %v3978_v12, %v3966_v43  ;;  %v4637_v12 = vld [vmem:[#allocation7 + $0x20] sm:$0xff] }
 0x5bf   : > { %v21122_v58 = vpack.c.bf16 %v3865_v16, %v3861_v54  ;;  %v21124_v2 = vsub.f32 %v3809_v24, %v3863_v36  ;;  %v21126_v26 = vsub.f32 %v3808_v23, %v3865_v16  ;;  %16087 = vmatpush1.bf16.msra.mxu1 %v20984_v52  ;;  %v21129_v59 = vpack.c.bf16 %v3863_v36, %v3859_v57 }
 0x5c0   : > { %v16092_v54 = vpack.c.bf16 %v3980_v27, %v3968_v10  ;;  %v21140_v57 = vsub.f32 %v3841_v32, %v21120_v29  ;;  %v4020_v23 = vand.u32 4294901760, %v21118_v3  ;;  %v3974_v24 = vand.u32 4294901760, %v3973_v31 }
 0x5c1   : > { %v4032_v9 = vand.u32 4294901760, %v21126_v26  ;;  %16089 = vmatprep.subr.bf16.mxu1 %v21129_v59  ;;  %v4026_v25 = vand.u32 4294901760, %v21124_v2  ;;  %v4015_v8 = vsub.f32 %v21099_v39, %v4014_v14  ;;  %v3935_v42 = vand.u32 4294901760, %v3934_v47 }
 0x5c2   : > { %v16094_v32 = vpack.c.bf16 %v3986_v40, %v3974_v24  ;;  %v3945_v16 = vsub.f32 %v21113_v28, %v3944_v11  ;;  %v3955_v31 = vand.u32 4294901760, %v21140_v57  ;;  %v4021_v27 = vsub.f32 %v21118_v3, %v4020_v23 }
 0x5c3   : > { %16091 = vmatpush1.bf16.msra.mxu1 %v21122_v58  ;;  %v4027_v19 = vsub.f32 %v21124_v2, %v4026_v25  ;;  %v4033_v15 = vsub.f32 %v21126_v26, %v4032_v9  ;;  %v4016_v10 = vand.u32 4294901760, %v4015_v8  ;;  %v16130_v45 = vpack.c.bf16 %v3984_v46, %v3972_v5  ;;  %v4654_v46 = vld [vmem:[#allocation7 + $0xa8] sm:$0xff] }
 0x5c4   : > { %16093 = vmatprep.subr.bf16.mxu1 %v16092_v54  ;;  %v3946_v54 = vand.u32 4294901760, %v3945_v16  ;;  %v3956_v47 = vsub.f32 %v21140_v57, %v3955_v31  ;;  %v4022_v24 = vand.u32 4294901760, %v4021_v27  ;;  %v16136_v1 = vpack.c.bf16 %v4026_v25, %v4014_v14  ;;  %v4640_v27 = vld [vmem:[#allocation7 + $0x38] sm:$0xff] }
 0x5c5   : > { %v4028_v36 = vand.u32 4294901760, %v4027_v19  ;;  %v4034_v40 = vand.u32 4294901760, %v4033_v15  ;;  %v16112_v15 = vpack.c.bf16 %v21124_v2, %v21099_v39  ;;  %v16138_v56 = vpack.c.bf16 %v4032_v9, %v4020_v23  ;;  %v4639_v23 = vld [vmem:[#allocation7 + $0x30] sm:$0xff] }
 0x5c6   : > { %3925 = vmatmul.mubr.f32.vlgmr.msra.gmra.mrb[4].mxu1 %v3924_v20  ;;  %v3957_v8 = vand.u32 4294901760, %v3956_v47  ;;  %v4729_v14 = vand.u32 4294901760, %v4654_v46  ;;  %v4678_v9 = vand.u32 4294901760, %v4637_v12 }
 0x5c7   : > { %16095 = vmatpush1.bf16.msra.mxu1 %v16094_v32  ;;  %3930 = vmatprep.mubr.f32.mxu1 %v24777_v38  ;;  %v16100_v20 = vpack.c.bf16 %v4028_v36, %v4016_v10  ;;  %v16102_v19 = vpack.c.bf16 %v4034_v40, %v4022_v24  ;;  %v16114_v32 = vpack.c.bf16 %v21126_v26, %v21118_v3 }
 0x5c8   : > { %16097 = vmatprep.subr.bf16.mxu1 %v21014_v4  ;;  %v16104_v4 = vpack.c.bf16 %v21070_v63, %v21058_v21  ;;  %v4652_v21 = vld [vmem:[#allocation7 + $0x98] sm:$0xff]  ;;  %v21287_v40 = vsub.f32 %v4654_v46, %v4729_v14 }
 0x5c9   : > { %v4636_v63 = vld [vmem:[#allocation7 + $0x18] sm:$0xff] }
 0x5ca   : > { %3936 = vmatmul.mubr.f32.gmra.mrb[6].mxu1 %v3935_v42  ;;  %v4675_v26 = vand.u32 4294901760, %v4636_v63  ;;  %v4644_v46 = vld [vmem:[#allocation7 + $0x58] sm:$0xff] }
 0x5cb   : > { %16099 = vmatpush1.bf16.msra.mxu1 %v21012_v35  ;;  %3941 = vmatprep.mubr.f32.mxu1 %v24777_v38  ;;  %v16106_v35 = vpack.c.bf16 %v21072_v7, %v21060_v6  ;;  %v4653_v7 = vld [vmem:[#allocation7 + $0xa0] sm:$0xff] }
 0x5cc   : > { %16101 = vmatprep.subr.bf16.mxu1 %v16100_v20  ;;  %v21281_v16 = vsub.f32 %v4636_v63, %v4675_v26  ;;  %v21289_v20 = vsub.f32 %v4637_v12, %v4678_v9 }
 0x5ce   : > { %3947 = vmatmul.mubr.f32.gmra.mrb[8].mxu1 %v3946_v54 }
 0x5cf   : > { %16103 = vmatpush1.bf16.msra.mxu1 %v16102_v19  ;;  %3952 = vmatprep.mubr.f32.mxu1 %v24777_v38  ;;  %v4684_v19 = vand.u32 4294901760, %v4639_v23 }
 0x5d0   : > { %16105 = vmatprep.subr.bf16.mxu1 %v16104_v4 }
 0x5d2   : > { %3958 = vmatmul.mubr.f32.gmra.mrb[10].mxu1 %v3957_v8  ;;  %v4687_v8 = vand.u32 4294901760, %v4640_v27 }
 0x5d3   : > { %4088 = vmatprep.mubr.f32.mxu1 %v24777_v38 }
 0x5d6   : > { %4090 = vmatmul.mubr.f32.vlgmr.msra.gmra.mrb[4].mxu1 %v21038_v22 }
 0x5d7   : > { %16107 = vmatpush1.bf16.msra.mxu1 %v16106_v35  ;;  %4095 = vmatprep.mubr.f32.mxu1 %v24777_v38 }
 0x5d8   : > { %16109 = vmatprep.subr.bf16.mxu1 %v16108_v33 }
 0x5da   : > { %4097 = vmatmul.mubr.f32.gmra.mrb[6].mxu1 %v21050_v13 }
 0x5db   : > { %16111 = vmatpush1.bf16.msra.mxu1 %v16110_v55  ;;  %4102 = vmatprep.mubr.f32.mxu1 %v24777_v38  ;;  %v4633_v55 = vld [vmem:[#allocation7] sm:$0xff] }
 0x5dc   : > { %16113 = vmatprep.subr.bf16.mxu1 %v16112_v15 }
 0x5de   : > { %4104 = vmatmul.mubr.f32.gmra.mrb[8].mxu1 %v21085_v48 }
 0x5df   : > { %16115 = vmatpush1.bf16.msra.mxu1 %v16114_v32  ;;  %4109 = vmatprep.mubr.f32.mxu1 %v24777_v38  ;;  %v21303_v32 = vsub.f32 %v4639_v23, %v4684_v19 }
 0x5e0   : > { %16117 = vmatprep.subr.bf16.mxu1 %v21079_v49 }
 0x5e2   : > { %4111 = vmatmul.mubr.f32.gmra.mrb[10].mxu1 %v21120_v29 }
 0x5e3   : > { %4205 = vmatprep.mubr.f32.mxu1 %v24777_v38 }
 0x5e6   : > { %4208 = vmatmul.mubr.f32.vlgmr.msra.gmra.mrb[4].mxu1 %v21048_v51  ;;  %v4666_v51 = vand.u32 4294901760, %v4633_v55 }
 0x5e7   : > { %16119 = vmatpush1.bf16.msra.mxu1 %v21068_v34  ;;  %4213 = vmatprep.mubr.f32.mxu1 %v24777_v38 }
 0x5e8   : > { %16121 = vmatprep.subr.bf16.mxu1 %v20986_v50  ;;  %v21262_v5 = vsub.f32 %v4633_v55, %v4666_v51  ;;  %v21312_v55 = vld [vmem:[#allocation7 + $0x40] sm:$0xff] }
 0x5ea   : > { %4216 = vmatmul.mubr.f32.gmra.mrb[6].mxu1 %v21075_v61 }
 0x5eb   : > { %16123 = vmatpush1.bf16.msra.mxu1 %v20984_v52  ;;  %4221 = vmatprep.mubr.f32.mxu1 %v24777_v38 }
 0x5ec   : > { %16125 = vmatprep.subr.bf16.mxu1 %v21129_v59 }
 0x5ee   : > { %4224 = vmatmul.mubr.f32.gmra.mrb[8].mxu1 %v21113_v28 }
 0x5ef   : > { %16127 = vmatpush1.bf16.msra.mxu1 %v21122_v58  ;;  %4229 = vmatprep.mubr.f32.mxu1 %v24777_v38 }
 0x5f0   : > { %16129 = vmatprep.subr.bf16.mxu1 %v16128_v0  ;;  %v21305_v0 = vsub.f32 %v4640_v27, %v4687_v8  ;;  %v3813_v27 = vpop.permute.xlu0 %3812 }
 0x5f2   : > { %4232 = vmatmul.mubr.f32.gmra.mrb[10].mxu1 %v21140_v57 }
 0x5f3   : > { %4314 = vmatprep.mubr.f32.mxu1 %v24777_v38 }
 0x5f6   : > { %4318 = vmatmul.mubr.f32.vlgmr.msra.gmra.mrb[4].mxu1 %v3922_v44 }
 0x5f7   : > { %16131 = vmatpush1.bf16.msra.mxu1 %v16130_v45  ;;  %4323 = vmatprep.mubr.f32.mxu1 %v24777_v38  ;;  %v21308_v45 = vpack.c.bf16 %v4687_v8, %v4684_v19 }
 0x5f8   : > { %16133 = vmatprep.subr.bf16.mxu1 %v21004_v30  ;;  %v4634_v30 = vld [vmem:[#allocation7 + $0x8] sm:$0xff] }
 0x5f9   : > { %v4669_v6 = vand.u32 4294901760, %v4634_v30  ;;  %25903 = vst [vmem:[#allocation51_spill] sm:$0xff] %v21308_v45 }
 0x5fa   : > { %4327 = vmatmul.mubr.f32.gmra.mrb[6].mxu1 %v3933_v18 }
 0x5fb   : > { %16135 = vmatpush1.bf16.msra.mxu1 %v21001_v60  ;;  %4332 = vmatprep.mubr.f32.mxu1 %v24777_v38  ;;  %v21264_v39 = vpack.c.bf16 %v4669_v6, %v4666_v51  ;;  %v21266_v18 = vsub.f32 %v4634_v30, %v4669_v6 }
 0x5fc   : > { %16137 = vmatprep.subr.bf16.mxu1 %v16136_v1  ;;  %v4657_v1 = vld [vmem:[#allocation7 + $0xc0] sm:$0xff] }
 0x5fd   : > { %25897 = vst [vmem:[#allocation79_spill] sm:$0xff] %v21264_v39 }
 0x5fe   : > { %4336 = vmatmul.mubr.f32.gmra.mrb[8].mxu1 %v3944_v11  ;;  %v4656_v11 = vld [vmem:[#allocation7 + $0xb8] sm:$0xff] }
 0x5ff   : > { %16139 = vmatpush1.bf16.msra.mxu1 %v16138_v56  ;;  %4341 = vmatprep.mubr.f32.mxu1 %v24777_v38  ;;  %v4735_v47 = vand.u32 4294901760, %v4656_v11  ;;  %v4658_v56 = vld [vmem:[#allocation7 + $0xc8] sm:$0xff] }
 0x600   : > { %16141 = vmatprep.subr.bf16.mxu1 %v21079_v49 }
 0x601   : > { %v21301_v15 = vsub.f32 %v4656_v11, %v4735_v47  ;;  %v4646_v11 = vld [vmem:[#allocation7 + $0x68] sm:$0xff] }
 0x602   : > { %4345 = vmatmul.mubr.f32.gmra.mrb[10].mxu1 %v3955_v31  ;;  %v4705_v23 = vand.u32 4294901760, %v4646_v11 }
 0x603   : > { %4451 = vmatprep.mubr.f32.mxu1 %v24777_v38 }
 0x606   : > { %4453 = vmatmul.mubr.f32.vlgmr.msra.gmra.mrb[4].mxu1 %v21038_v22 }
 0x607   : > { %16143 = vmatpush1.bf16.msra.mxu1 %v21068_v34  ;;  %4458 = vmatprep.mubr.f32.mxu1 %v24777_v38  ;;  %v4635_v34 = vld [vmem:[#allocation7 + $0x10] sm:$0xff] }
 0x608   : > { %16145 = vmatprep.subr.bf16.mxu1 %v20986_v50  ;;  %v4650_v50 = vld [vmem:[#allocation7 + $0x88] sm:$0xff]  ;;  %v4672_v2 = vand.u32 4294901760, %v4635_v34 }
 0x609   : > { %v4717_v60 = vand.u32 4294901760, %v4650_v50 }
 0x60a   : > { %4460 = vmatmul.mubr.f32.gmra.mrb[6].mxu1 %v21050_v13  ;;  %v21277_v42 = vpack.c.bf16 %v4675_v26, %v4672_v2  ;;  %v21279_v36 = vsub.f32 %v4635_v34, %v4672_v2  ;;  %v4661_v26 = vld [vmem:[#allocation7 + $0xe0] sm:$0xff] }
 0x60b   : > { %16147 = vmatpush1.bf16.msra.mxu1 %v20984_v52  ;;  %4465 = vmatprep.mubr.f32.mxu1 %v24777_v38  ;;  %v4649_v52 = vld [vmem:[#allocation7 + $0x80] sm:$0xff]  ;;  %v21260_v43 = vsub.f32 %v4650_v50, %v4717_v60  ;;  %v4741_v50 = vand.u32 4294901760, %v4658_v56 }
 0x60c   : > { %16149 = vmatprep.subr.bf16.mxu1 %v21129_v59  ;;  %v4714_v33 = vand.u32 4294901760, %v4649_v52  ;;  %v4726_v59 = vand.u32 4294901760, %v4653_v7  ;;  %25899 = vst [vmem:[#allocation66_spill] sm:$0xff] %v21277_v42 }
 0x60e   : > { %4467 = vmatmul.mubr.f32.gmra.mrb[8].mxu1 %v21085_v48  ;;  %v21256_v61 = vpack.c.bf16 %v4717_v60, %v4714_v33  ;;  %v21258_v49 = vsub.f32 %v4649_v52, %v4714_v33  ;;  %v21283_v31 = vsub.f32 %v4653_v7, %v4726_v59  ;;  %v21285_v10 = vpack.c.bf16 %v4729_v14, %v4726_v59  ;;  %v21314_v33 = vld [vmem:[#allocation7 + $0x48] sm:$0xff]  ;;  %v4643_v7 = vld [vmem:[#allocation7 + $0x50] sm:$0xff] }
 0x60f   : > { %16151 = vmatpush1.bf16.msra.mxu1 %v21122_v58  ;;  %4472 = vmatprep.mubr.f32.mxu1 %v24777_v38  ;;  %v4738_v52 = vand.u32 4294901760, %v4657_v1  ;;  %v4690_v60 = vand.u32 4294901760, %v21312_v55  ;;  %v4693_v30 = vand.u32 4294901760, %v21314_v33  ;;  %v4696_v12 = vand.u32 4294901760, %v4643_v7  ;;  %v4662_v59 = vld [vmem:[#allocation7 + $0xe8] sm:$0xff] }
 0x610   : > { %25896 = vst [vmem:[#allocation76_spill] sm:$0xff] %v21256_v61  ;;  %16153 = vmatprep.subr.bf16.mxu1 %v21256_v61  ;;  %25900 = vst [vmem:[#allocation43_spill] sm:$0xff] %v21285_v10  ;;  %v4750_v14 = vand.u32 4294901760, %v4661_v26  ;;  %v24820_v61 = vand.u32 4294901760, %v21266_v18 }
 0x611   : > { %v21318_v51 = vpack.c.bf16 %v4741_v50, %v4738_v52  ;;  %v21324_v6 = vpack.c.bf16 %v4693_v30, %v4690_v60 }
 0x612   : > { %4474 = vmatmul.mubr.f32.gmra.mrb[10].mxu1 %v21120_v29 }
 0x613   : > { %4556 = vmatprep.mubr.f32.mxu1 %v24777_v38  ;;  %25904 = vst [vmem:[#allocation83_spill] sm:$0xff] %v21318_v51  ;;  %25905 = vst [vmem:[#allocation90_spill] sm:$0xff] %v21324_v6 }
 0x616   : > { %4558 = vmatmul.mubr.f32.vlgmr.msra.gmra.mrb[4].mxu1 %v21038_v22  ;;  %v4651_v22 = vld [vmem:[#allocation7 + $0x90] sm:$0xff] }
 0x617   : > { %4563 = vmatprep.mubr.f32.mxu1 %v24777_v38  ;;  %v4720_v44 = vand.u32 4294901760, %v4651_v22  ;;  %16155 = vmatpush3.bf16.msra.mxu1 %v21264_v39 }
 0x619   : > { %v21270_v3 = vsub.f32 %v4651_v22, %v4720_v44  ;;  %v21320_v22 = vsub.f32 %v4657_v1, %v4738_v52  ;;  %v4663_v52 = vld [vmem:[#allocation7 + $0xf0] sm:$0xff] }
 0x61a   : > { %4565 = vmatmul.mubr.f32.gmra.mrb[6].mxu1 %v21050_v13  ;;  %v4723_v13 = vand.u32 4294901760, %v4652_v21  ;;  %v4756_v62 = vand.u32 4294901760, %v4663_v52 }
 0x61b   : > { %4570 = vmatprep.mubr.f32.mxu1 %v24777_v38 }
 0x61c   : > { %v21268_v28 = vpack.c.bf16 %v4723_v13, %v4720_v44  ;;  %v21273_v58 = vsub.f32 %v4652_v21, %v4723_v13  ;;  %v21322_v21 = vsub.f32 %v4658_v56, %v4741_v50  ;;  %v4659_v44 = vld [vmem:[#allocation7 + $0xd0] sm:$0xff]  ;;  %v4660_v13 = vld [vmem:[#allocation7 + $0xd8] sm:$0xff] }
 0x61d   : > { %v4744_v34 = vand.u32 4294901760, %v4659_v44  ;;  %v4747_v63 = vand.u32 4294901760, %v4660_v13  ;;  %v4664_v50 = vld [vmem:[#allocation7 + $0xf8] sm:$0xff] }
 0x61e   : > { %4572 = vmatmul.mubr.f32.gmra.mrb[8].mxu1 %v21085_v48  ;;  %v4638_v48 = vld [vmem:[#allocation7 + $0x28] sm:$0xff]  ;;  %25898 = vst [vmem:[#allocation82_spill] sm:$0xff] %v21268_v28  ;;  %16157 = vmatprep.subr.bf16.mxu1 %v21268_v28  ;;  %v4759_v53 = vand.u32 4294901760, %v4664_v50 }
 0x61f   : > { %4577 = vmatprep.mubr.f32.mxu1 %v24777_v38  ;;  %v4681_v25 = vand.u32 4294901760, %v4638_v48  ;;  %16159 = vmatpush3.bf16.msra.mxu1 %v21277_v42  ;;  %v21374_v42 = vsub.f32 %v21314_v33, %v4693_v30  ;;  %v21379_v17 = vsub.f32 %v4660_v13, %v4747_v63 }
 0x620   : > { %16161 = vmatprep.subr.bf16.mxu1 %v21285_v10  ;;  %v21348_v10 = vpack.c.bf16 %v4759_v53, %v4756_v62 }
 0x621   : > { %v21291_v54 = vsub.f32 %v4638_v48, %v4681_v25  ;;  %v21296_v4 = vpack.c.bf16 %v4681_v25, %v4678_v9  ;;  %v4699_v48 = vand.u32 4294901760, %v4644_v46  ;;  %v4753_v9 = vand.u32 4294901760, %v4662_v59  ;;  %v4645_v25 = vld [vmem:[#allocation7 + $0x60] sm:$0xff] }
 0x622   : > { %4579 = vmatmul.mubr.f32.gmra.mrb[10].mxu1 %v21120_v29  ;;  %v4655_v29 = vld [vmem:[#allocation7 + $0xb0] sm:$0xff]  ;;  %25911 = vst [vmem:[#allocation103_spill] sm:$0xff] %v21348_v10 }
 0x623   : > { %v4732_v57 = vand.u32 4294901760, %v4655_v29  ;;  %25901 = vst [vmem:[#allocation73_spill] sm:$0xff] %v21296_v4  ;;  %16163 = vmatpush3.bf16.msra.mxu1 %v21296_v4  ;;  %v21330_v2 = vpack.c.bf16 %v4699_v48, %v4696_v12  ;;  %v21334_v19 = vpack.c.bf16 %v4753_v9, %v4750_v14  ;;  %v3818_v4 = vpop.permute.xlu1 %3817  ;;  %v21389_v33 = vsub.f32 %v4662_v59, %v4753_v9 }
 0x624   : > { %v24818_v9 = vand.u32 4294901760, %v21270_v3 }
 0x625   : > { %v21293_v24 = vsub.f32 %v4655_v29, %v4732_v57  ;;  %v21299_v35 = vpack.c.bf16 %v4735_v47, %v4732_v57  ;;  %v21328_v29 = vpack.c.bf16 %v4747_v63, %v4744_v34  ;;  %25907 = vst [vmem:[#allocation118_spill] sm:$0xff] %v21330_v2  ;;  %v4702_v57 = vand.u32 4294901760, %v4645_v25  ;;  %25908 = vst [vmem:[#allocation29_spill] sm:$0xff] %v21334_v19 }
 0x626   : > { %25917 = vst [vmem:[#allocation62_spill] sm:$0xff] %v21389_v33  ;;  %v21399_v63 = vsub.f32 %v4646_v11, %v4705_v23 }
 0x627   : > { %25902 = vst [vmem:[#allocation74_spill] sm:$0xff] %v21299_v35  ;;  %16165 = vmatprep.subr.bf16.mxu1 %v21299_v35  ;;  %25906 = vst [vmem:[#allocation109_spill] sm:$0xff] %v21328_v29  ;;  %v21338_v56 = vpack.c.bf16 %v4705_v23, %v4702_v57  ;;  %v3828_v11 = vpop.permute.xlu1 %3827 }
 0x628   : > { %16167 = vmatpush3.bf16.msra.mxu1 %v21308_v45  ;;  %25919 = vst [vmem:[#allocation69_spill] sm:$0xff] %v21399_v63 }
 0x629   : > { %16169 = vmatprep.subr.bf16.mxu1 %v21318_v51  ;;  %25910 = vst [vmem:[#allocation52_spill] sm:$0xff] %v21338_v56 }
 0x62c   : > { %16171 = vmatpush3.bf16.msra.mxu1 %v21324_v6  ;;  %v24811_v6 = vand.u32 4294901760, %v21258_v49 }
 0x62d   : > { %16173 = vmatprep.subr.bf16.mxu1 %v21328_v29  ;;  %v4648_v29 = vld [vmem:[#allocation7 + $0x78] sm:$0xff] }
 0x62e   : > { %v4711_v45 = vand.u32 4294901760, %v4648_v29 }
 0x630   : > { %16175 = vmatpush3.bf16.msra.mxu1 %v21330_v2  ;;  %v4647_v2 = vld [vmem:[#allocation7 + $0x70] sm:$0xff] }
 0x631   : > { %16177 = vmatprep.subr.bf16.mxu1 %v21334_v19  ;;  %v4938_v19 = vsub.f32 %v21258_v49, %v24811_v6 }
 0x633   : > { %v4939_v30 = vand.u32 4294901760, %v4938_v19 }
 0x634   : > { %16179 = vmatpush3.bf16.msra.mxu1 %v21338_v56 }
 0x635   : > { %16181 = vmatprep.subr.bf16.mxu1 %v21348_v10 }
 0x6e9   : > { %v4559_v47 = vpop.f32.mrb[4].mxu1 }
 0x6ea   : > { %v21336_v8 = vadd.f32 %v4559_v47, %v3813_v27  ;;  %v4561_v1 = vpop.f32.mrb[5].mxu1  ;;  %v4708_v47 = vand.u32 4294901760, %v4647_v2 }
 0x6eb   : > { %v21340_v38 = vadd.f32 %v4561_v1, %v3813_v27  ;;  %v25914_v27 = vand.u32 4294901760, %v21260_v43 }
 0x6ec   : > { %25909 = vst [vmem:[#allocation46_spill] sm:$0xff] %v21336_v8  ;;  %v25912_v56 = vmax.f32 %v21336_v8, 0.0  ;;  %v21359_v35 = vpack.c.bf16 %v4711_v45, %v4708_v47  ;;  %v21420_v23 = vsub.f32 %v4647_v2, %v4708_v47  ;;  %v24815_v2 = vand.u32 4294901760, %v21281_v16 }
 0x6ed   : > { %v4566_v1 = vpop.f32.mrb[6].mxu1  ;;  %v4945_v39 = vsub.f32 %v21260_v43, %v25914_v27  ;;  %v25915_v6 = vmax.f32 %v21340_v38, 0.0  ;;  %v21381_v27 = vsub.f32 %v4643_v7, %v4696_v12  ;;  %v21401_v7 = vsub.f32 %v4663_v52, %v4756_v62 }
 0x6ee   : > { %v21354_v28 = vadd.f32 %v4566_v1, %v3818_v4  ;;  %v4568_v51 = vpop.f32.mrb[7].mxu1  ;;  %4593 = vrot.lane.b32.xlu0 %v25912_v56, %s17823_s1  ;;  %25913 = vst [vmem:[#allocation59_spill] sm:$0xff] %v21359_v35  ;;  %v21371_v1 = vsub.f32 %v21312_v55, %v4690_v60  ;;  %v21376_v56 = vsub.f32 %v4659_v44, %v4744_v34  ;;  %25923 = vst [vmem:[#allocation77_spill] sm:$0xff] %v21420_v23 }
 0x6ef   : > { %v21365_v37 = vadd.f32 %v4568_v51, %v3818_v4  ;;  %4601 = vrot.lane.b32.xlu1 %v25915_v6, %s17823_s1  ;;  %v21383_v4 = vsub.f32 %v4644_v46, %v4699_v48  ;;  %v3823_v51 = vpop.permute.xlu0 %3822  ;;  %v21387_v60 = vsub.f32 %v4661_v26, %v4750_v14  ;;  %16183 = vmatpush3.bf16.msra.mxu1 %v21359_v35  ;;  %v4946_v48 = vand.u32 4294901760, %v4945_v39 }
 0x6f0   : > { %v24835_v8 = vmax.f32 %v21354_v28, 0.0  ;;  %v21397_v34 = vsub.f32 %v4645_v25, %v4702_v57  ;;  %25920 = vst [vmem:[#allocation71_spill] sm:$0xff] %v21401_v7  ;;  %v21408_v12 = vsub.f32 %v4664_v50, %v4759_v53  ;;  %v25922_v26 = vand.u32 4294901760, %v21262_v5 }
 0x6f1   : > { %v24831_v6 = vmax.f32 %v21365_v37, 0.0  ;;  %v4573_v55 = vpop.f32.mrb[8].mxu1  ;;  %25916 = vst [vmem:[#allocation60_spill] sm:$0xff] %v21387_v60  ;;  %v4833_v62 = vsub.f32 %v21266_v18, %v24820_v61  ;;  %v24817_v25 = vand.u32 4294901760, %v21273_v58  ;;  %v21422_v39 = vsub.f32 %v4648_v29, %v4711_v45 }
 0x6f2   : > { %v21392_v44 = vadd.f32 %v4573_v55, %v3823_v51  ;;  %v4575_v13 = vpop.f32.mrb[9].mxu1  ;;  %4595 = vrot.lane.b32.xlu0 %v24835_v8, %s17823_s1  ;;  %25918 = vst [vmem:[#allocation68_spill] sm:$0xff] %v21397_v34  ;;  %25921 = vst [vmem:[#allocation72_spill] sm:$0xff] %v21408_v12  ;;  %v4826_v59 = vsub.f32 %v21262_v5, %v25922_v26  ;;  %v16184_v19 = vpack.c.bf16 %v4946_v48, %v4939_v30 }
 0x6f3   : > { %v21403_v46 = vadd.f32 %v4575_v13, %v3823_v51  ;;  %4603 = vrot.lane.b32.xlu1 %v24831_v6, %s17823_s1  ;;  %25924 = vst [vmem:[#allocation38_spill] sm:$0xff] %v21422_v39  ;;  %v4834_v55 = vand.u32 4294901760, %v4833_v62  ;;  %v4952_v13 = vsub.f32 %v21270_v3, %v24818_v9  ;;  %v4959_v45 = vsub.f32 %v21273_v58, %v24817_v25 }
 0x6f4   : > { %v24828_v14 = vmax.f32 %v21392_v44, 0.0  ;;  %v4827_v51 = vand.u32 4294901760, %v4826_v59  ;;  %16185 = vmatprep.subr.bf16.mxu1 %v16184_v19  ;;  %v24816_v29 = vand.u32 4294901760, %v21279_v36  ;;  %v24819_v59 = vand.u32 4294901760, %v21283_v31 }
 0x6f5   : > { %v24824_v57 = vmax.f32 %v21403_v46, 0.0  ;;  %v4580_v53 = vpop.f32.mrb[10].mxu1  ;;  %v4953_v48 = vand.u32 4294901760, %v4952_v13  ;;  %v4847_v19 = vsub.f32 %v21281_v16, %v24815_v2  ;;  %v24826_v13 = vand.u32 4294901760, %v21291_v54 }
 0x6f6   : > { %v21424_v52 = vadd.f32 %v4580_v53, %v3828_v11  ;;  %v4582_v50 = vpop.f32.mrb[11].mxu1  ;;  %4597 = vrot.lane.b32.xlu0 %v24828_v14, %s17823_s1  ;;  %v21443_v30 = vpack.c.bf16 %v4834_v55, %v4827_v51  ;;  %v4840_v53 = vsub.f32 %v21279_v36, %v24816_v29  ;;  %v24823_v51 = vand.u32 4294901760, %v21287_v40 }
 0x6f7   : > { %v21432_v26 = vadd.f32 %v4582_v50, %v3828_v11  ;;  %4605 = vrot.lane.b32.xlu1 %v24824_v57, %s17823_s1  ;;  %v4960_v11 = vand.u32 4294901760, %v4959_v45  ;;  %v4966_v50 = vsub.f32 %v21283_v31, %v24819_v59  ;;  %v24825_v55 = vand.u32 4294901760, %v21289_v20 }
 0x6f8   : > { %v24821_v47 = vmax.f32 %v21424_v52, 0.0  ;;  %v4841_v2 = vand.u32 4294901760, %v4840_v53  ;;  %v4848_v29 = vand.u32 4294901760, %v4847_v19  ;;  %v24827_v25 = vand.u32 4294901760, %v21293_v24 }
 0x6f9   : > { %v24822_v62 = vmax.f32 %v21432_v26, 0.0  ;;  %v21465_v45 = vpack.c.bf16 %v4960_v11, %v4953_v48  ;;  %v4967_v9 = vand.u32 4294901760, %v4966_v50  ;;  %v4973_v59 = vsub.f32 %v21287_v40, %v24823_v51 }
 0x6fa   : > { %4599 = vrot.lane.b32.xlu0 %v24821_v47, %s17823_s1  ;;  %v4854_v61 = vsub.f32 %v21289_v20, %v24825_v55  ;;  %v4861_v47 = vsub.f32 %v21291_v54, %v24826_v13  ;;  %v4980_v48 = vsub.f32 %v21293_v24, %v24827_v25  ;;  %v24829_v11 = vand.u32 4294901760, %v21301_v15 }
 0x6fb   : > { %4607 = vrot.lane.b32.xlu1 %v24822_v62, %s17823_s1  ;;  %v21477_v62 = vpack.c.bf16 %v4848_v29, %v4841_v2  ;;  %v24830_v53 = vand.u32 4294901760, %v21303_v32  ;;  %v4974_v19 = vand.u32 4294901760, %v4973_v59  ;;  %v24832_v57 = vand.u32 4294901760, %v21305_v0 }
 0x6fc   : > { %v4855_v50 = vand.u32 4294901760, %v4854_v61  ;;  %v4862_v51 = vand.u32 4294901760, %v4861_v47  ;;  %v4981_v55 = vand.u32 4294901760, %v4980_v48  ;;  %v4987_v13 = vsub.f32 %v21301_v15, %v24829_v11 }
 0x6fd   : > { %v4868_v29 = vsub.f32 %v21303_v32, %v24830_v53  ;;  %v24833_v2 = vand.u32 4294901760, %v21320_v22  ;;  %v21492_v25 = vpack.c.bf16 %v4974_v19, %v4967_v9  ;;  %v4875_v61 = vsub.f32 %v21305_v0, %v24832_v57 }
 0x6fe   : > { %v21494_v14 = vpack.c.bf16 %v4862_v51, %v4855_v50  ;;  %v24834_v47 = vand.u32 4294901760, %v21322_v21  ;;  %v4988_v59 = vand.u32 4294901760, %v4987_v13  ;;  %v24836_v53 = vand.u32 4294901760, %v21371_v1 }
 0x6ff   : > { %v4869_v48 = vand.u32 4294901760, %v4868_v29  ;;  %v4994_v11 = vsub.f32 %v21320_v22, %v24833_v2  ;;  %v4876_v6 = vand.u32 4294901760, %v4875_v61  ;;  %v24839_v51 = vand.u32 4294901760, %v21374_v42 }
 0x700   : > { %v5001_v9 = vsub.f32 %v21322_v21, %v24834_v47  ;;  %v24840_v19 = vand.u32 4294901760, %v21376_v56  ;;  %v21509_v50 = vpack.c.bf16 %v4988_v59, %v4981_v55  ;;  %v4882_v13 = vsub.f32 %v21371_v1, %v24836_v53 }
 0x701   : > { %v4995_v57 = vand.u32 4294901760, %v4994_v11  ;;  %v24841_v29 = vand.u32 4294901760, %v21379_v17  ;;  %v21515_v2 = vpack.c.bf16 %v4876_v6, %v4869_v48  ;;  %v4889_v47 = vsub.f32 %v21374_v42, %v24839_v51 }
 0x702   : > { %v5002_v61 = vand.u32 4294901760, %v5001_v9  ;;  %v5008_v8 = vsub.f32 %v21376_v56, %v24840_v19  ;;  %v4883_v55 = vand.u32 4294901760, %v4882_v13  ;;  %v24844_v59 = vand.u32 4294901760, %v21381_v27 }
 0x703   : > { %v5015_v11 = vsub.f32 %v21379_v17, %v24841_v29  ;;  %v24845_v53 = vand.u32 4294901760, %v21383_v4  ;;  %v4890_v48 = vand.u32 4294901760, %v4889_v47  ;;  %v24846_v35 = vand.u32 4294901760, %v21387_v60 }
 0x704   : > { %v21528_v6 = vpack.c.bf16 %v5002_v61, %v4995_v57  ;;  %v5009_v9 = vand.u32 4294901760, %v5008_v8  ;;  %v4896_v19 = vsub.f32 %v21381_v27, %v24844_v59  ;;  %v24847_v29 = vand.u32 4294901760, %v21389_v33 }
 0x705   : > { %v5016_v51 = vand.u32 4294901760, %v5015_v11  ;;  %v4903_v13 = vsub.f32 %v21383_v4, %v24845_v53  ;;  %v21538_v10 = vpack.c.bf16 %v4890_v48, %v4883_v55  ;;  %v5022_v57 = vsub.f32 %v21387_v60, %v24846_v35 }
 0x706   : > { %25925 = vst [vmem:[#allocation78_spill] sm:$0xff] %v21528_v6  ;;  %v24848_v8 = vand.u32 4294901760, %v21397_v34  ;;  %v24850_v47 = vand.u32 4294901760, %v21399_v63  ;;  %v4897_v11 = vand.u32 4294901760, %v4896_v19  ;;  %v5029_v53 = vsub.f32 %v21389_v33, %v24847_v29 }
 0x707   : > { %25926 = vst [vmem:[#allocation84_spill] sm:$0xff] %v21538_v10  ;;  %v21545_v61 = vpack.c.bf16 %v5016_v51, %v5009_v9  ;;  %v4904_v59 = vand.u32 4294901760, %v4903_v13  ;;  %v5023_v6 = vand.u32 4294901760, %v5022_v57  ;;  %v24849_v35 = vand.u32 4294901760, %v21401_v7 }
 0x708   : > { %v4910_v55 = vsub.f32 %v21397_v34, %v24848_v8  ;;  %v4917_v48 = vsub.f32 %v21399_v63, %v24850_v47  ;;  %v5030_v51 = vand.u32 4294901760, %v5029_v53  ;;  %v24851_v19 = vand.u32 4294901760, %v21408_v12 }
 0x709   : > { %25927 = vst [vmem:[#allocation31_spill] sm:$0xff] %v21545_v61  ;;  %v21557_v10 = vpack.c.bf16 %v4904_v59, %v4897_v11  ;;  %v24852_v9 = vand.u32 4294901760, %v21420_v23  ;;  %v5036_v57 = vsub.f32 %v21401_v7, %v24849_v35  ;;  %v24853_v8 = vand.u32 4294901760, %v21422_v39 }
 0x70a   : > { %v4911_v13 = vand.u32 4294901760, %v4910_v55  ;;  %v4918_v29 = vand.u32 4294901760, %v4917_v48  ;;  %v21565_v61 = vpack.c.bf16 %v5030_v51, %v5023_v6  ;;  %v5043_v59 = vsub.f32 %v21408_v12, %v24851_v19 }
 0x70b   : > { %25928 = vst [vmem:[#allocation39_spill] sm:$0xff] %v21557_v10  ;;  %v4924_v53 = vsub.f32 %v21420_v23, %v24852_v9  ;;  %v5037_v55 = vand.u32 4294901760, %v5036_v57  ;;  %v4931_v48 = vsub.f32 %v21422_v39, %v24853_v8  ;;  %v25929_v57 = vld [vmem:[#allocation67_spill] sm:$0xff] }
 0x70c   : > { %v21573_v11 = vpack.c.bf16 %v4918_v29, %v4911_v13  ;;  %v5044_v35 = vand.u32 4294901760, %v5043_v59  ;;  %v25930_v8 = vld [vmem:[#allocation87_spill] sm:$0xff]  ;;  %v25931_v59 = vld [vmem:[#allocation46_spill] sm:$0xff] }
 0x70d   : > { %v4925_v47 = vand.u32 4294901760, %v4924_v53  ;;  %v4932_v10 = vand.u32 4294901760, %v4931_v48  ;;  %v25932_v51 = vmax.f32 %v25931_v59, 0.0 }
 0x70e   : > { %v21578_v6 = vpack.c.bf16 %v5044_v35, %v5037_v55 }
 0x70f   : > { %v21582_v19 = vpack.c.bf16 %v4932_v10, %v4925_v47  ;;  %v25933_v10 = vmax.f32 %v21340_v38, 0.0 }
 0x760   : > { %v4594_v35 = vpop.permute.xlu0 %4593 }
 0x761   : > { %v4602_v53 = vpop.permute.xlu1 %4601 }
 0x762   : > { %v4609_v55 = vsel %vm758_vm1, %v4594_v35, %v4602_v53  ;;  %v4613_v48 = vsel %vm758_vm1, %v4602_v53, %v4594_v35 }
 0x763   : > { %v4617_v13 = vmul.f32 %v4609_v55, %v25929_v57  ;;  %v4618_v29 = vmul.f32 %v4613_v48, %v25930_v8 }
 0x764   : > { %v4596_v9 = vpop.permute.xlu0 %4595 }
 0x765   : > { %v4625_v34 = vmax.f32 %v25932_v51, %v4617_v13  ;;  %v4626_v7 = vmax.f32 %v25933_v10, %v4618_v29  ;;  %v4604_v47 = vpop.permute.xlu1 %4603  ;;  %v25935_v29 = vmax.f32 %v21354_v28, 0.0 }
 0x766   : > { %v4610_v23 = vsel %vm758_vm1, %v4596_v9, %v4604_v47  ;;  %v4614_v39 = vsel %vm758_vm1, %v4604_v47, %v4596_v9  ;;  %v25936_v9 = vmax.f32 %v21365_v37, 0.0 }
 0x767   : > { %v21628_v12 = vand.u32 4294901760, %v4626_v7  ;;  %v21630_v35 = vand.u32 4294901760, %v4625_v34  ;;  %v4619_v53 = vmul.f32 %v4610_v23, %v25929_v57  ;;  %v4620_v55 = vmul.f32 %v4614_v39, %v25930_v8 }
 0x768   : > { %v4598_v59 = vpop.permute.xlu0 %4597 }
 0x769   : > { %v21635_v51 = vsub.f32 %v4626_v7, %v21628_v12  ;;  %v21638_v38 = vsub.f32 %v4625_v34, %v21630_v35  ;;  %v4627_v13 = vmax.f32 %v25935_v29, %v4619_v53  ;;  %v4628_v10 = vmax.f32 %v25936_v9, %v4620_v55  ;;  %v4606_v47 = vpop.permute.xlu1 %4605 }
 0x76a   : > { %v4611_v48 = vsel %vm758_vm1, %v4598_v59, %v4606_v47  ;;  %v4615_v23 = vsel %vm758_vm1, %v4606_v47, %v4598_v59  ;;  %v25937_v9 = vmax.f32 %v21392_v44, 0.0 }
 0x76b   : > { %25934 = vst [vmem:[#allocation63_spill] sm:$0xff] %v21638_v38  ;;  %v24870_v39 = vand.u32 4294901760, %v21638_v38  ;;  %v21649_v7 = vand.u32 4294901760, %v4628_v10  ;;  %v21651_v63 = vand.u32 4294901760, %v4627_v13  ;;  %v4621_v34 = vmul.f32 %v4611_v48, %v25929_v57 }
 0x76c   : > { %v4622_v28 = vmul.f32 %v4615_v23, %v25930_v8  ;;  %v4600_v53 = vpop.permute.xlu0 %4599  ;;  %v25938_v48 = vmax.f32 %v21403_v46, 0.0 }
 0x76d   : > { %v4770_v55 = vsub.f32 %v21638_v38, %v24870_v39  ;;  %v21660_v29 = vsub.f32 %v4628_v10, %v21649_v7  ;;  %v21663_v59 = vsub.f32 %v4627_v13, %v21651_v63  ;;  %v4629_v47 = vmax.f32 %v25937_v9, %v4621_v34  ;;  %v4608_v60 = vpop.permute.xlu1 %4607 }
 0x76e   : > { %v4630_v23 = vmax.f32 %v25938_v48, %v4622_v28  ;;  %v4612_v37 = vsel %vm758_vm1, %v4600_v53, %v4608_v60  ;;  %v4616_v33 = vsel %vm758_vm1, %v4608_v60, %v4600_v53  ;;  %v25939_v39 = vand.u32 4294901760, %v21635_v51 }
 0x76f   : > { %v4771_v38 = vand.u32 4294901760, %v4770_v55  ;;  %v21676_v13 = vand.u32 4294901760, %v4629_v47  ;;  %v4623_v44 = vmul.f32 %v4612_v37, %v25929_v57  ;;  %v4624_v34 = vmul.f32 %v4616_v33, %v25930_v8 }
 0x770   : > { %v4764_v10 = vsub.f32 %v21635_v51, %v25939_v39  ;;  %v21680_v9 = vand.u32 4294901760, %v4630_v23  ;;  %v24878_v28 = vand.u32 4294901760, %v21660_v29  ;;  %v24877_v48 = vand.u32 4294901760, %v21663_v59 }
 0x771   : > { %v21685_v41 = vsub.f32 %v4629_v47, %v21676_v13  ;;  %v25940_v60 = vmax.f32 %v21424_v52, 0.0  ;;  %v25941_v53 = vmax.f32 %v21432_v26, 0.0 }
 0x772   : > { %v4765_v46 = vand.u32 4294901760, %v4764_v10  ;;  %v21692_v57 = vsub.f32 %v4630_v23, %v21680_v9  ;;  %v4779_v33 = vsub.f32 %v21660_v29, %v24878_v28  ;;  %v4785_v8 = vsub.f32 %v21663_v59, %v24877_v48  ;;  %v25986_v48 = vld [vmem:[#allocation52_spill] sm:$0xff]  ;;  %v25987_v28 = vld [vmem:[#allocation103_spill] sm:$0xff] }
 0x773   : > { %v4631_v39 = vmax.f32 %v25940_v60, %v4623_v44  ;;  %v4632_v55 = vmax.f32 %v25941_v53, %v4624_v34  ;;  %v24875_v52 = vand.u32 4294901760, %v21685_v41 }
 0x774   : > { %4766 = vmatprep.mubr.f32.mxu1 %v4765_v46  ;;  %v4780_v26 = vand.u32 4294901760, %v4779_v33  ;;  %v4786_v23 = vand.u32 4294901760, %v4785_v8  ;;  %v24876_v10 = vand.u32 4294901760, %v21692_v57 }
 0x775   : > { %v21700_v37 = vand.u32 4294901760, %v4632_v55  ;;  %v21702_v47 = vand.u32 4294901760, %v4631_v39  ;;  %4772 = vmatmul.mubr.f32.vlgmr.msra.gmra.mrb[12].mxu1 %v4771_v38  ;;  %v4800_v38 = vsub.f32 %v21685_v41, %v24875_v52  ;;  %v25984_v52 = vld [vmem:[#allocation118_spill] sm:$0xff] }
 0x776   : > { %16187 = vmatpush3.bf16.msra.mxu1 %v21443_v30  ;;  %4781 = vmatprep.mubr.f32.mxu1 %v4780_v26  ;;  %v4794_v30 = vsub.f32 %v21692_v57, %v24876_v10  ;;  %v25945_v26 = vld [vmem:[#allocation31_spill] sm:$0xff]  ;;  %v25985_v10 = vld [vmem:[#allocation29_spill] sm:$0xff] }
 0x777   : > { %25942 = vst [vmem:[#allocation94_spill] sm:$0xff] %v21702_v47  ;;  %v21708_v44 = vsub.f32 %v4632_v55, %v21700_v37  ;;  %v21711_v34 = vsub.f32 %v4631_v39, %v21702_v47  ;;  %16189 = vmatprep.subr.bf16.mxu1 %v21465_v45  ;;  %v4801_v46 = vand.u32 4294901760, %v4800_v38  ;;  %v25954_v38 = vpack.c.bf16 %v21305_v0, %v21303_v32 }
 0x778   : > { %v4795_v39 = vand.u32 4294901760, %v4794_v30  ;;  %v25955_v30 = vpack.c.bf16 %v21322_v21, %v21320_v22 }
 0x779   : > { %4787 = vmatmul.mubr.f32.gmra.mrb[14].mxu1 %v4786_v23  ;;  %v24874_v60 = vand.u32 4294901760, %v21708_v44  ;;  %v24873_v53 = vand.u32 4294901760, %v21711_v34  ;;  %v25946_v23 = vld [vmem:[#allocation39_spill] sm:$0xff] }
 0x77a   : > { %16191 = vmatpush3.bf16.msra.mxu1 %v21477_v62  ;;  %4796 = vmatprep.mubr.f32.mxu1 %v4795_v39  ;;  %v25944_v62 = vld [vmem:[#allocation84_spill] sm:$0xff]  ;;  %v25957_v39 = vpack.c.bf16 %v21379_v17, %v21376_v56 }
 0x77b   : > { %16193 = vmatprep.subr.bf16.mxu1 %v21492_v25  ;;  %v4809_v45 = vsub.f32 %v21708_v44, %v24874_v60  ;;  %v4815_v55 = vsub.f32 %v21711_v34, %v24873_v53  ;;  %v25943_v25 = vld [vmem:[#allocation78_spill] sm:$0xff]  ;;  %v25983_v60 = vld [vmem:[#allocation109_spill] sm:$0xff] }
 0x77c   : > { %v25982_v53 = vld [vmem:[#allocation90_spill] sm:$0xff] }
 0x77d   : > { %4802 = vmatmul.mubr.f32.gmra.mrb[16].mxu1 %v4801_v46  ;;  %v4810_v33 = vand.u32 4294901760, %v4809_v45  ;;  %v4816_v8 = vand.u32 4294901760, %v4815_v55  ;;  %v25956_v46 = vpack.c.bf16 %v21374_v42, %v21371_v1  ;;  %v25958_v45 = vpack.c.bf16 %v21383_v4, %v21381_v27  ;;  %v25959_v55 = vld [vmem:[#allocation62_spill] sm:$0xff] }
 0x77e   : > { %16195 = vmatpush3.bf16.msra.mxu1 %v21494_v14  ;;  %v25947_v14 = vpack.c.bf16 %v21260_v43, %v21258_v49 }
 0x77f   : > { %4811 = vmatprep.mubr.f32.mxu1 %v4810_v33  ;;  %16197 = vmatprep.subr.bf16.mxu1 %v21509_v50  ;;  %v25949_v50 = vpack.c.bf16 %v21273_v58, %v21270_v3  ;;  %v25960_v33 = vld [vmem:[#allocation60_spill] sm:$0xff] }
 0x781   : > { %4817 = vmatmul.mubr.f32.gmra.mrb[18].mxu1 %v4816_v8  ;;  %v25961_v8 = vpack.c.bf16 %v25959_v55, %v25960_v33 }
 0x782   : > { %16199 = vmatpush3.bf16.msra.mxu1 %v21515_v2  ;;  %5047 = vmatprep.mubr.f32.mxu1 %v21628_v12  ;;  %v25948_v2 = vpack.c.bf16 %v21266_v18, %v21262_v5 }
 0x783   : > { %16201 = vmatprep.subr.bf16.mxu1 %v25943_v25  ;;  %v25962_v25 = vld [vmem:[#allocation69_spill] sm:$0xff] }
 0x786   : > { %16203 = vmatpush3.bf16.msra.mxu1 %v25944_v62  ;;  %v25963_v62 = vld [vmem:[#allocation68_spill] sm:$0xff] }
 0x787   : > { %16205 = vmatprep.subr.bf16.mxu1 %v25945_v26  ;;  %v25964_v26 = vpack.c.bf16 %v25962_v25, %v25963_v62 }
 0x78a   : > { %16207 = vmatpush3.bf16.msra.mxu1 %v25946_v23  ;;  %v25965_v23 = vld [vmem:[#allocation72_spill] sm:$0xff] }
 0x78b   : > { %16209 = vmatprep.subr.bf16.mxu1 %v21565_v61  ;;  %v25950_v61 = vpack.c.bf16 %v21281_v16, %v21279_v36 }
 0x78e   : > { %16211 = vmatpush3.bf16.msra.mxu1 %v21573_v11  ;;  %v25952_v11 = vpack.c.bf16 %v21291_v54, %v21289_v20 }
 0x78f   : > { %16213 = vmatprep.subr.bf16.mxu1 %v21578_v6  ;;  %v25953_v6 = vpack.c.bf16 %v21301_v15, %v21293_v24 }
 0x792   : > { %16215 = vmatpush3.bf16.msra.mxu1 %v21582_v19  ;;  %v25951_v19 = vpack.c.bf16 %v21287_v40, %v21283_v31 }
 0x793   : > { %16217 = vmatprep.subr.bf16.mxu1 %v25947_v14  ;;  %v25966_v14 = vld [vmem:[#allocation71_spill] sm:$0xff] }
 0x795   : > { %5049 = vmatmul.mubr.f32.vlgmr.msra.gmra.mrb[20].mxu1 %v21630_v35 }
 0x796   : > { %5054 = vmatprep.mubr.f32.mxu1 %v21649_v7  ;;  %16219 = vmatpush3.bf16.msra.mxu1 %v25948_v2  ;;  %v25967_v2 = vpack.c.bf16 %v25965_v23, %v25966_v14 }
 0x797   : > { %16221 = vmatprep.subr.bf16.mxu1 %v25949_v50  ;;  %v25968_v50 = vld [vmem:[#allocation38_spill] sm:$0xff] }
 0x799   : > { %5056 = vmatmul.mubr.f32.gmra.mrb[22].mxu1 %v21651_v63 }
 0x79a   : > { %5061 = vmatprep.mubr.f32.mxu1 %v21680_v9  ;;  %16223 = vmatpush3.bf16.msra.mxu1 %v25950_v61  ;;  %v25969_v61 = vld [vmem:[#allocation77_spill] sm:$0xff] }
 0x79b   : > { %16225 = vmatprep.subr.bf16.mxu1 %v25951_v19  ;;  %v25970_v19 = vpack.c.bf16 %v25968_v50, %v25969_v61 }
 0x79d   : > { %5063 = vmatmul.mubr.f32.gmra.mrb[24].mxu1 %v21676_v13 }
 0x79e   : > { %5068 = vmatprep.mubr.f32.mxu1 %v21700_v37  ;;  %16227 = vmatpush3.bf16.msra.mxu1 %v25952_v11  ;;  %v25971_v11 = vld [vmem:[#allocation76_spill] sm:$0xff] }
 0x79f   : > { %16229 = vmatprep.subr.bf16.mxu1 %v25953_v6  ;;  %v25972_v6 = vld [vmem:[#allocation63_spill] sm:$0xff] }
 0x7a1   : > { %5070 = vmatmul.mubr.f32.gmra.mrb[26].mxu1 %v21702_v47  ;;  %v25988_v47 = vand.u32 4294901760, %v21258_v49  ;;  %v25996_v49 = vand.u32 4294901760, %v21660_v29 }
 0x7a2   : > { %16231 = vmatpush3.bf16.msra.mxu1 %v25954_v38  ;;  %5205 = vmatprep.mubr.f32.mxu1 %v21635_v51  ;;  %v25973_v38 = vld [vmem:[#allocation79_spill] sm:$0xff] }
 0x7a3   : > { %16233 = vmatprep.subr.bf16.mxu1 %v25955_v30  ;;  %v25974_v30 = vld [vmem:[#allocation82_spill] sm:$0xff] }
 0x7a6   : > { %16235 = vmatpush3.bf16.msra.mxu1 %v25956_v46  ;;  %v25975_v46 = vld [vmem:[#allocation66_spill] sm:$0xff] }
 0x7a7   : > { %16237 = vmatprep.subr.bf16.mxu1 %v25957_v39  ;;  %v25976_v39 = vld [vmem:[#allocation43_spill] sm:$0xff] }
 0x7aa   : > { %16239 = vmatpush3.bf16.msra.mxu1 %v25958_v45  ;;  %v25977_v45 = vld [vmem:[#allocation73_spill] sm:$0xff] }
 0x7ab   : > { %16241 = vmatprep.subr.bf16.mxu1 %v25961_v8  ;;  %v25978_v8 = vld [vmem:[#allocation74_spill] sm:$0xff] }
 0x7ae   : > { %16243 = vmatpush3.bf16.msra.mxu1 %v25964_v26  ;;  %v25979_v26 = vld [vmem:[#allocation51_spill] sm:$0xff] }
 0x7af   : > { %16245 = vmatprep.subr.bf16.mxu1 %v25967_v2  ;;  %v25980_v2 = vand.u32 4294901760, %v21635_v51 }
 0x7b2   : > { %16247 = vmatpush3.bf16.msra.mxu1 %v25970_v19  ;;  %v25981_v19 = vld [vmem:[#allocation83_spill] sm:$0xff] }
 0x7b3   : > { %16249 = vmatprep.subr.bf16.mxu1 %v25971_v11 }
 0x7b5   : > { %5208 = vmatmul.mubr.f32.vlgmr.msra.gmra.mrb[28].mxu1 %v25972_v6 }
 0x7b6   : > { %5214 = vmatprep.mubr.f32.mxu1 %v21660_v29  ;;  %16251 = vmatpush3.bf16.msra.mxu1 %v25973_v38  ;;  %v26003_v29 = vand.u32 4294901760, %v21289_v20  ;;  %v26010_v20 = vand.u32 4294901760, %v21305_v0  ;;  %v26016_v0 = vand.u32 4294901760, %v21376_v56  ;;  %v26023_v56 = vand.u32 4294901760, %v25962_v25  ;;  %v26029_v25 = vld [vmem:[#allocation51_spill] sm:$0xff] }
 0x7b7   : > { %16253 = vmatprep.subr.bf16.mxu1 %v25974_v30 }
 0x7b9   : > { %5217 = vmatmul.mubr.f32.gmra.mrb[30].mxu1 %v21663_v59 }
 0x7ba   : > { %5223 = vmatprep.mubr.f32.mxu1 %v21692_v57  ;;  %16255 = vmatpush3.bf16.msra.mxu1 %v25975_v46 }
 0x7bb   : > { %16257 = vmatprep.subr.bf16.mxu1 %v25976_v39 }
 0x7bd   : > { %5226 = vmatmul.mubr.f32.gmra.mrb[32].mxu1 %v21685_v41 }
 0x7be   : > { %5232 = vmatprep.mubr.f32.mxu1 %v21708_v44  ;;  %16259 = vmatpush3.bf16.msra.mxu1 %v25977_v45 }
 0x7bf   : > { %16261 = vmatprep.subr.bf16.mxu1 %v25978_v8 }
 0x7c1   : > { %5235 = vmatmul.mubr.f32.gmra.mrb[34].mxu1 %v21711_v34 }
 0x7c2   : > { %16263 = vmatpush3.bf16.msra.mxu1 %v25979_v26  ;;  %5339 = vmatprep.mubr.f32.mxu1 %v25980_v2  ;;  %v25989_v26 = vand.u32 4294901760, %v21260_v43  ;;  %v25990_v2 = vld [vmem:[#allocation59_spill] sm:$0xff]  ;;  %v25997_v43 = vand.u32 4294901760, %v21279_v36  ;;  %v26004_v36 = vand.u32 4294901760, %v21291_v54  ;;  %v26011_v54 = vand.u32 4294901760, %v21320_v22 }
 0x7c3   : > { %16265 = vmatprep.subr.bf16.mxu1 %v25981_v19  ;;  %v25991_v19 = vand.u32 4294901760, %v21262_v5  ;;  %v25998_v5 = vand.u32 4294901760, %v21281_v16  ;;  %v26005_v16 = vand.u32 4294901760, %v21293_v24  ;;  %v26012_v24 = vand.u32 4294901760, %v21322_v21 }
 0x7c4   : > { %v16280_v51 = vpack.c.bf16 %v25989_v26, %v25988_v47  ;;  %v26018_v21 = vand.u32 4294901760, %v21381_v27  ;;  %v26025_v27 = vand.u32 4294901760, %v25965_v23  ;;  %v26031_v23 = vld [vmem:[#allocation90_spill] sm:$0xff] }
 0x7c5   : > { %v16286_v47 = vpack.c.bf16 %v25998_v5, %v25997_v43 }
 0x7c6   : > { %16267 = vmatpush3.bf16.msra.mxu1 %v25982_v53  ;;  %v25992_v53 = vand.u32 4294901760, %v21266_v18  ;;  %v25999_v18 = vand.u32 4294901760, %v21283_v31  ;;  %v26006_v31 = vand.u32 4294901760, %v21301_v15  ;;  %v26013_v15 = vand.u32 4294901760, %v21711_v34 }
 0x7c7   : > { %16269 = vmatprep.subr.bf16.mxu1 %v25983_v60  ;;  %v26019_v34 = vand.u32 4294901760, %v21383_v4  ;;  %v26026_v4 = vand.u32 4294901760, %v25969_v61  ;;  %v26034_v61 = vld [vmem:[#allocation29_spill] sm:$0xff] }
 0x7c8   : > { %v16282_v60 = vpack.c.bf16 %v25992_v53, %v25991_v19  ;;  %v26020_v19 = vand.u32 4294901760, %v25960_v33  ;;  %v26027_v33 = vand.u32 4294901760, %v25968_v50  ;;  %v26033_v50 = vld [vmem:[#allocation118_spill] sm:$0xff] }
 0x7c9   : > { %v16302_v26 = vpack.c.bf16 %v26019_v34, %v26018_v21 }
 0x7ca   : > { %16271 = vmatpush3.bf16.msra.mxu1 %v25984_v52  ;;  %v25993_v52 = vand.u32 4294901760, %v21270_v3  ;;  %v26000_v3 = vand.u32 4294901760, %v21287_v40  ;;  %v26007_v40 = vand.u32 4294901760, %v21685_v41  ;;  %v26014_v41 = vand.u32 4294901760, %v21371_v1 }
 0x7cb   : > { %16273 = vmatprep.subr.bf16.mxu1 %v25985_v10  ;;  %v25994_v10 = vand.u32 4294901760, %v21273_v58  ;;  %v26001_v58 = vand.u32 4294901760, %v21663_v59  ;;  %v26008_v59 = vand.u32 4294901760, %v21708_v44  ;;  %v26015_v44 = vand.u32 4294901760, %v21374_v42 }
 0x7cc   : > { %v16288_v53 = vpack.c.bf16 %v26000_v3, %v25999_v18  ;;  %v26021_v1 = vand.u32 4294901760, %v25959_v55  ;;  %v26022_v42 = vand.u32 4294901760, %v25963_v62  ;;  %v16310_v5 = vpack.c.bf16 %v26027_v33, %v26026_v4  ;;  %v26028_v55 = vld [vmem:[#allocation94_spill] sm:$0xff]  ;;  %v26030_v62 = vld [vmem:[#allocation83_spill] sm:$0xff] }
 0x7ce   : > { %16275 = vmatpush3.bf16.msra.mxu1 %v25986_v48  ;;  %v16284_v48 = vpack.c.bf16 %v25994_v10, %v25993_v52  ;;  %v16290_v52 = vpack.c.bf16 %v26004_v36, %v26003_v29 }
 0x7cf   : > { %16277 = vmatprep.subr.bf16.mxu1 %v25987_v28  ;;  %v25995_v28 = vand.u32 4294901760, %v25972_v6  ;;  %v26017_v6 = vand.u32 4294901760, %v21379_v17  ;;  %v26024_v17 = vand.u32 4294901760, %v25966_v14  ;;  %v26032_v14 = vld [vmem:[#allocation109_spill] sm:$0xff] }
 0x7d1   : > { %v16300_v22 = vpack.c.bf16 %v26017_v6, %v26016_v0  ;;  %v16308_v43 = vpack.c.bf16 %v26025_v27, %v26024_v17 }
 0x7d2   : > { %16279 = vmatpush3.bf16.msra.mxu1 %v25990_v2 }
 0x7d3   : > { %16281 = vmatprep.subr.bf16.mxu1 %v16280_v51  ;;  %v16304_v51 = vpack.c.bf16 %v26021_v1, %v26020_v19 }
 0x7d5   : > { %5343 = vmatmul.mubr.f32.vlgmr.msra.gmra.mrb[36].mxu1 %v25995_v28  ;;  %v26002_v28 = vand.u32 4294901760, %v21692_v57  ;;  %v26009_v57 = vand.u32 4294901760, %v21303_v32  ;;  %v16298_v32 = vpack.c.bf16 %v26015_v44, %v26014_v41 }
 0x7d6   : > { %5350 = vmatprep.mubr.f32.mxu1 %v25996_v49  ;;  %16283 = vmatpush3.bf16.msra.mxu1 %v16282_v60  ;;  %v16296_v60 = vpack.c.bf16 %v26012_v24, %v26011_v54  ;;  %v16306_v49 = vpack.c.bf16 %v26023_v56, %v26022_v42 }
 0x7d7   : > { %16285 = vmatprep.subr.bf16.mxu1 %v16284_v48  ;;  %v16292_v48 = vpack.c.bf16 %v26006_v31, %v26005_v16  ;;  %v16294_v10 = vpack.c.bf16 %v26010_v20, %v26009_v57 }
 0x7d9   : > { %5354 = vmatmul.mubr.f32.gmra.mrb[38].mxu1 %v26001_v58 }
 0x7da   : > { %5361 = vmatprep.mubr.f32.mxu1 %v26002_v28  ;;  %16287 = vmatpush3.bf16.msra.mxu1 %v16286_v47 }
 0x7db   : > { %16289 = vmatprep.subr.bf16.mxu1 %v16288_v53 }
 0x7dd   : > { %5365 = vmatmul.mubr.f32.gmra.mrb[40].mxu1 %v26007_v40 }
 0x7de   : > { %5372 = vmatprep.mubr.f32.mxu1 %v26008_v59  ;;  %16291 = vmatpush3.bf16.msra.mxu1 %v16290_v52 }
 0x7df   : > { %16293 = vmatprep.subr.bf16.mxu1 %v16292_v48 }
 0x7e1   : > { %5376 = vmatmul.mubr.f32.gmra.mrb[42].mxu1 %v26013_v15 }
 0x7e2   : > { %16295 = vmatpush3.bf16.msra.mxu1 %v16294_v10  ;;  %5542 = vmatprep.mubr.f32.mxu1 %v21628_v12 }
 0x7e3   : > { %16297 = vmatprep.subr.bf16.mxu1 %v16296_v60 }
 0x7e6   : > { %16299 = vmatpush3.bf16.msra.mxu1 %v16298_v32 }
 0x7e7   : > { %16301 = vmatprep.subr.bf16.mxu1 %v16300_v22 }
 0x7ea   : > { %16303 = vmatpush3.bf16.msra.mxu1 %v16302_v26 }
 0x7eb   : > { %16305 = vmatprep.subr.bf16.mxu1 %v16304_v51 }
 0x7ee   : > { %16307 = vmatpush3.bf16.msra.mxu1 %v16306_v49 }
 0x7ef   : > { %16309 = vmatprep.subr.bf16.mxu1 %v16308_v43 }
 0x7f2   : > { %16311 = vmatpush3.bf16.msra.mxu1 %v16310_v5 }
 0x7f3   : > { %16313 = vmatprep.subr.bf16.mxu1 %v25971_v11  ;;  %v26035_v11 = vld [vmem:[#allocation52_spill] sm:$0xff] }
 0x7f5   : > { %5544 = vmatmul.mubr.f32.vlgmr.msra.gmra.mrb[44].mxu1 %v21630_v35 }
 0x7f6   : > { %5549 = vmatprep.mubr.f32.mxu1 %v21649_v7  ;;  %16315 = vmatpush3.bf16.msra.mxu1 %v25973_v38  ;;  %v26036_v38 = vld [vmem:[#allocation103_spill] sm:$0xff] }
 0x7f7   : > { %16317 = vmatprep.subr.bf16.mxu1 %v25974_v30 }
 0x7f9   : > { %5551 = vmatmul.mubr.f32.gmra.mrb[46].mxu1 %v21651_v63 }
 0x7fa   : > { %5556 = vmatprep.mubr.f32.mxu1 %v21680_v9  ;;  %16319 = vmatpush3.bf16.msra.mxu1 %v25975_v46 }
 0x7fb   : > { %16321 = vmatprep.subr.bf16.mxu1 %v25976_v39 }
 0x7fd   : > { %5558 = vmatmul.mubr.f32.gmra.mrb[48].mxu1 %v21676_v13 }
 0x7fe   : > { %5563 = vmatprep.mubr.f32.mxu1 %v21700_v37  ;;  %16323 = vmatpush3.bf16.msra.mxu1 %v25977_v45 }
 0x7ff   : > { %16325 = vmatprep.subr.bf16.mxu1 %v25978_v8 }
 0x801   : > { %5565 = vmatmul.mubr.f32.gmra.mrb[50].mxu1 %v26028_v55 }
 0x802   : > { %16327 = vmatpush3.bf16.msra.mxu1 %v26029_v25  ;;  %5667 = vmatprep.mubr.f32.mxu1 %v21628_v12 }
 0x803   : > { %16329 = vmatprep.subr.bf16.mxu1 %v26030_v62 }
 0x806   : > { %16331 = vmatpush3.bf16.msra.mxu1 %v26031_v23 }
 0x807   : > { %16333 = vmatprep.subr.bf16.mxu1 %v26032_v14 }
 0x80a   : > { %16335 = vmatpush3.bf16.msra.mxu1 %v26033_v50 }
 0x80b   : > { %16337 = vmatprep.subr.bf16.mxu1 %v26034_v61 }
 0x80e   : > { %16339 = vmatpush3.bf16.msra.mxu1 %v26035_v11 }
 0x80f   : > { %16341 = vmatprep.subr.bf16.mxu1 %v26036_v38 }
 0x812   : > { %16343 = vmatpush3.bf16.msra.mxu1 %v25990_v2 }
 0x815   : > { %5669 = vmatmul.mubr.f32.vlgmr.msra.gmra.mrb[52].mxu1 %v21630_v35 }
 0x816   : > { %5674 = vmatprep.mubr.f32.mxu1 %v21649_v7 }
 0x819   : > { %5676 = vmatmul.mubr.f32.gmra.mrb[54].mxu1 %v21651_v63 }
 0x81a   : > { %5681 = vmatprep.mubr.f32.mxu1 %v21680_v9 }
 0x81d   : > { %5683 = vmatmul.mubr.f32.gmra.mrb[56].mxu1 %v21676_v13 }
 0x81e   : > { %5688 = vmatprep.mubr.f32.mxu1 %v21700_v37 }
 0x821   : > { %5690 = vmatmul.mubr.f32.gmra.mrb[58].mxu1 %v26028_v55 }
 0x848   : > { %v12824_v12 = vpop.f32.mrb[12].mxu1 }
 0x849   : > { %v12825_v30 = vpop.f32.mrb[13].mxu1 }
 0x84a   : > { %v12826_v46 = vadd.f32 %v12825_v30, %v12824_v12 }
 0x84c   : > { %v12827_v39 = vpop.f32.mrb[14].mxu1 }
 0x84d   : > { %v12828_v45 = vpop.f32.mrb[15].mxu1 }
 0x84e   : > { %v12829_v8 = vadd.f32 %v12828_v45, %v12827_v39 }
 0x850   : > { %v12830_v2 = vpop.f32.mrb[16].mxu1 }
 0x851   : > { %v12831_v35 = vpop.f32.mrb[17].mxu1 }
 0x852   : > { %v12832_v47 = vadd.f32 %v12831_v35, %v12830_v2 }
 0x854   : > { %v12833_v7 = vpop.f32.mrb[18].mxu1 }
 0x855   : > { %v12834_v18 = vpop.f32.mrb[19].mxu1 }
 0x856   : > { %v12835_v63 = vadd.f32 %v12834_v18, %v12833_v7 }
 0x868   : > { %v12868_v3 = vpop.f32.mrb[20].mxu1 }
 0x869   : > { %v12869_v9 = vpop.f32.mrb[21].mxu1 }
 0x86a   : > { %v12870_v53 = vadd.f32 %v12869_v9, %v12868_v3 }
 0x86c   : > { %v5051_v13 = vadd.f32 %v12870_v53, %v12826_v46  ;;  %v12871_v58 = vpop.f32.mrb[22].mxu1 }
 0x86d   : > { %v12872_v37 = vpop.f32.mrb[23].mxu1 }
 0x86e   : > { %v12873_v28 = vadd.f32 %v12872_v37, %v12871_v58 }
 0x870   : > { %v5058_v29 = vadd.f32 %v12873_v28, %v12829_v8  ;;  %v12874_v36 = vpop.f32.mrb[24].mxu1 }
 0x871   : > { %v12875_v52 = vpop.f32.mrb[25].mxu1 }
 0x872   : > { %v12876_v16 = vadd.f32 %v12875_v52, %v12874_v36 }
 0x874   : > { %v5065_v31 = vadd.f32 %v12876_v16, %v12832_v47  ;;  %v12877_v48 = vpop.f32.mrb[26].mxu1 }
 0x875   : > { %v12878_v40 = vpop.f32.mrb[27].mxu1 }
 0x876   : > { %v12879_v59 = vadd.f32 %v12878_v40, %v12877_v48 }
 0x878   : > { %v5072_v57 = vadd.f32 %v12879_v59, %v12835_v63 }
 0x888   : > { %v12912_v20 = vpop.f32.mrb[28].mxu1 }
 0x889   : > { %v12913_v10 = vpop.f32.mrb[29].mxu1 }
 0x88a   : > { %v12914_v54 = vadd.f32 %v12913_v10, %v12912_v20 }
 0x88c   : > { %v5210_v24 = vadd.f32 %v12914_v54, %v5051_v13  ;;  %v12915_v60 = vpop.f32.mrb[30].mxu1 }
 0x88d   : > { %v12916_v15 = vpop.f32.mrb[31].mxu1 }
 0x88e   : > { %v12917_v41 = vadd.f32 %v12916_v15, %v12915_v60 }
 0x890   : > { %v5219_v44 = vadd.f32 %v12917_v41, %v5058_v29  ;;  %v12918_v32 = vpop.f32.mrb[32].mxu1 }
 0x891   : > { %v12919_v0 = vpop.f32.mrb[33].mxu1 }
 0x892   : > { %v12920_v6 = vadd.f32 %v12919_v0, %v12918_v32 }
 0x894   : > { %v5228_v22 = vadd.f32 %v12920_v6, %v5065_v31  ;;  %v12921_v21 = vpop.f32.mrb[34].mxu1 }
 0x895   : > { %v12922_v34 = vpop.f32.mrb[35].mxu1 }
 0x896   : > { %v12923_v26 = vadd.f32 %v12922_v34, %v12921_v21 }
 0x898   : > { %v5237_v19 = vadd.f32 %v12923_v26, %v5072_v57 }
 0x8a8   : > { %v12956_v1 = vpop.f32.mrb[36].mxu1 }
 0x8a9   : > { %v12957_v51 = vpop.f32.mrb[37].mxu1 }
 0x8aa   : > { %v12958_v42 = vadd.f32 %v12957_v51, %v12956_v1 }
 0x8ac   : > { %v5345_v56 = vadd.f32 %v12958_v42, %v5210_v24  ;;  %v12959_v49 = vpop.f32.mrb[38].mxu1 }
 0x8ad   : > { %v12960_v17 = vpop.f32.mrb[39].mxu1 }
 0x8ae   : > { %v12961_v27 = vadd.f32 %v12960_v17, %v12959_v49 }
 0x8b0   : > { %v5356_v43 = vadd.f32 %v12961_v27, %v5219_v44  ;;  %v12962_v4 = vpop.f32.mrb[40].mxu1 }
 0x8b1   : > { %v12963_v33 = vpop.f32.mrb[41].mxu1 }
 0x8b2   : > { %v12964_v5 = vadd.f32 %v12963_v33, %v12962_v4 }
 0x8b4   : > { %v5367_v55 = vadd.f32 %v12964_v5, %v5228_v22  ;;  %v12965_v25 = vpop.f32.mrb[42].mxu1  ;;  %v5703_v5 = vld [vmem:[%s24265_s10] sm:$0xff] }
 0x8b5   : > { %v12966_v62 = vpop.f32.mrb[43].mxu1 }
 0x8b6   : > { %v12967_v23 = vadd.f32 %v12966_v62, %v12965_v25 }
 0x8b8   : > { %v5378_v14 = vadd.f32 %v12967_v23, %v5237_v19 }
 0x8c8   : > { %v13000_v50 = vpop.f32.mrb[44].mxu1 }
 0x8c9   : > { %v13001_v61 = vpop.f32.mrb[45].mxu1 }
 0x8ca   : > { %v13002_v11 = vadd.f32 %v13001_v61, %v13000_v50  ;;  %v5705_v61 = vld [vmem:[%s24265_s10 + $0x10] sm:$0xff] }
 0x8cc   : > { %v5546_v38 = vadd.f32 %v13002_v11, %v5345_v56  ;;  %v13003_v12 = vpop.f32.mrb[46].mxu1  ;;  %v5695_v56 = vld [vmem:[%s24264_s9] sm:$0xff]  ;;  %v5704_v11 = vld [vmem:[%s24265_s10 + $0x8] sm:$0xff] }
 0x8cd   : > { %v13004_v30 = vpop.f32.mrb[47].mxu1  ;;  %v5785_v17 = vsel %vm5783_vm3, %v5695_v56, 0 }
 0x8ce   : > { %v13005_v46 = vadd.f32 %v13004_v30, %v13003_v12  ;;  %v21954_v27 = vand.u32 4294901760, %v5785_v17 }
 0x8d0   : > { %v5553_v39 = vadd.f32 %v13005_v46, %v5356_v43  ;;  %v13006_v45 = vpop.f32.mrb[48].mxu1  ;;  %v5707_v46 = vld [vmem:[%s24265_s10 + $0x20] sm:$0xff] }
 0x8d1   : > { %v13007_v8 = vpop.f32.mrb[49].mxu1 }
 0x8d2   : > { %v13008_v2 = vadd.f32 %v13007_v8, %v13006_v45  ;;  %v5709_v45 = vld [vmem:[%s24265_s10 + $0x30] sm:$0xff]  ;;  %v5708_v8 = vld [vmem:[%s24265_s10 + $0x28] sm:$0xff] }
 0x8d4   : > { %v5560_v35 = vadd.f32 %v13008_v2, %v5367_v55  ;;  %v13009_v47 = vpop.f32.mrb[50].mxu1  ;;  %v21962_v55 = vsub.f32 %v5785_v17, %v21954_v27  ;;  %v5710_v2 = vld [vmem:[%s24265_s10 + $0x38] sm:$0xff] }
 0x8d5   : > { %v13010_v7 = vpop.f32.mrb[51].mxu1 }
 0x8d6   : > { %v13011_v18 = vadd.f32 %v13010_v7, %v13009_v47  ;;  %v5887_v23 = vand.u32 4294901760, %v21962_v55  ;;  %v26037_v47 = vld [vmem:[#allocation24_spill] sm:$0xff] }
 0x8d8   : > { %v5567_v63 = vadd.f32 %v13011_v18, %v5378_v14 }
 0x8e8   : > { %v13044_v3 = vpop.f32.mrb[52].mxu1 }
 0x8e9   : > { %v13045_v9 = vpop.f32.mrb[53].mxu1 }
 0x8ea   : > { %v13046_v53 = vadd.f32 %v13045_v9, %v13044_v3 }
 0x8ec   : > { %v5671_v13 = vadd.f32 %v13046_v53, %v5546_v38  ;;  %v13047_v58 = vpop.f32.mrb[54].mxu1  ;;  %v5888_v38 = vsub.f32 %v21962_v55, %v5887_v23 }
 0x8ed   : > { %v13048_v37 = vpop.f32.mrb[55].mxu1 }
 0x8ee   : > { %v5821_v28 = vand.u32 4294901760, %v5671_v13  ;;  %v13049_v29 = vadd.f32 %v13048_v37, %v13047_v58  ;;  %5711 = vrot.lane.b32.xlu0 %v5671_v13, %s17822_s25  ;;  %v5889_v30 = vand.u32 4294901760, %v5888_v38 }
 0x8f0   : > { %v5995_v36 = vsub.f32 %v5671_v13, %v5821_v28  ;;  %v5678_v52 = vadd.f32 %v13049_v29, %v5553_v39  ;;  %v13050_v16 = vpop.f32.mrb[56].mxu1  ;;  %v5706_v39 = vld [vmem:[%s24265_s10 + $0x18] sm:$0xff]  ;;  %13830 = vmatprep.mubr.f32.mxu1 %v5889_v30 }
 0x8f1   : > { %v13051_v31 = vpop.f32.mrb[57].mxu1 }
 0x8f2   : > { %v5824_v48 = vand.u32 4294901760, %v5678_v52  ;;  %v13052_v40 = vadd.f32 %v13051_v31, %v13050_v16  ;;  %5713 = vrot.lane.b32.xlu1 %v5678_v52, %s17822_s25  ;;  %v5996_v59 = vand.u32 4294901760, %v5995_v36 }
 0x8f4   : > { %v21935_v57 = vpack.c.bf16 %v5824_v48, %v5821_v28  ;;  %v6002_v20 = vsub.f32 %v5678_v52, %v5824_v48  ;;  %v5685_v10 = vadd.f32 %v13052_v40, %v5560_v35  ;;  %v13053_v54 = vpop.f32.mrb[58].mxu1  ;;  %v5997_v41 = vsub.f32 %v5995_v36, %v5996_v59  ;;  %v621_v35 = vld [vmem:[%s24266_s11] sm:$0x3] }
 0x8f5   : > { %v13054_v24 = vpop.f32.mrb[59].mxu1  ;;  %v5722_v7 = vrot.slane %v621_v35, %v26037_v47  ;;  %v26038_v28 = vld [vmem:[#allocation26_spill] sm:$0xff]  ;;  %v5701_v47 = vld [vmem:[%s24264_s9 + $0x30] sm:$0xff] }
 0x8f6   : > { %v5827_v60 = vand.u32 4294901760, %v5685_v10  ;;  %v13055_v15 = vadd.f32 %v13054_v24, %v13053_v54  ;;  %5715 = vrot.lane.b32.xlu0 %v5685_v10, %s17822_s25  ;;  %v6003_v44 = vand.u32 4294901760, %v6002_v20  ;;  %v21938_v32 = vpack.c.bf16 %v6002_v20, %v5995_v36 }
 0x8f7   : > { %v5998_v26 = vand.u32 4294901760, %v5997_v41  ;;  %v22001_v29 = vrot.slane %v621_v35, %v26038_v28 }
 0x8f8   : > { %v6009_v0 = vsub.f32 %v5685_v10, %v5827_v60  ;;  %v5692_v6 = vadd.f32 %v13055_v15, %v5567_v63  ;;  %v6004_v22 = vsub.f32 %v6002_v20, %v6003_v44  ;;  %v21940_v21 = vpack.c.bf16 %v6003_v44, %v5996_v59 }
 0x8fa   : > { %v5830_v34 = vand.u32 4294901760, %v5692_v6  ;;  %5727 = vrot.lane.b32.xlu0 %v5671_v13, %s17823_s1  ;;  %5717 = vrot.lane.b32.xlu1 %v5692_v6, %s17822_s25  ;;  %v6005_v19 = vand.u32 4294901760, %v6004_v22  ;;  %v6010_v1 = vand.u32 4294901760, %v6009_v0 }
 0x8fc   : > { %v21944_v51 = vpack.c.bf16 %v5830_v34, %v5827_v60  ;;  %v6016_v42 = vsub.f32 %v5692_v6, %v5830_v34  ;;  %v21949_v49 = vpack.c.bf16 %v6005_v19, %v5998_v26  ;;  %v6011_v43 = vsub.f32 %v6009_v0, %v6010_v1  ;;  %v5697_v60 = vld [vmem:[%s24264_s9 + $0x10] sm:$0xff]  ;;  %v5698_v26 = vld [vmem:[%s24264_s9 + $0x18] sm:$0xff] }
 0x8fd   : > { %v5791_v56 = vsel %vm5783_vm3, %v5697_v60, 0 }
 0x8fe   : > { %5731 = vrot.lane.b32.xlu0 %v5685_v10, %s17823_s1  ;;  %5729 = vrot.lane.b32.xlu1 %v5678_v52, %s17823_s1  ;;  %v6017_v4 = vand.u32 4294901760, %v6016_v42  ;;  %v21956_v33 = vpack.c.bf16 %v6016_v42, %v6009_v0  ;;  %v6012_v14 = vand.u32 4294901760, %v6011_v43  ;;  %v5696_v10 = vld [vmem:[%s24264_s9 + $0x8] sm:$0xff]  ;;  %v22049_v30 = vand.u32 4294901760, %v5791_v56 }
 0x8ff   : > { %v5788_v44 = vsel %vm5783_vm3, %v5696_v10, 0 }
 0x900   : > { %v6018_v25 = vsub.f32 %v6016_v42, %v6017_v4  ;;  %v21964_v62 = vpack.c.bf16 %v6017_v4, %v6010_v1  ;;  %v22037_v43 = vand.u32 4294901760, %v5788_v44  ;;  %v5699_v4 = vld [vmem:[%s24264_s9 + $0x20] sm:$0xff] }
 0x902   : > { %5745 = vperm.xlu0 %17594, %v5703_v5   ;;  %5733 = vrot.lane.b32.xlu1 %v5692_v6, %s17823_s1  ;;  %v6019_v50 = vand.u32 4294901760, %v6018_v25 }
 0x904   : > { %v21977_v12 = vpack.c.bf16 %v6019_v50, %v6012_v14  ;;  %v5794_v14 = vsel %vm5783_vm3, %v5698_v26, 0 }
 0x905   : > { %v22062_v35 = vand.u32 4294901760, %v5794_v14 }
 0x906   : > { %5755 = vperm.xlu0 %17594, %v5705_v61   ;;  %5750 = vperm.xlu1 %17595, %v5704_v11  }
 0x90a   : > { %5765 = vperm.xlu0 %17594, %v5707_v46   ;;  %5760 = vperm.xlu1 %17595, %v5706_v39   ;;  %v5700_v46 = vld [vmem:[%s24264_s9 + $0x28] sm:$0xff] }
 0x90e   : > { %5775 = vperm.xlu0 %17594, %v5709_v45   ;;  %5770 = vperm.xlu1 %17595, %v5708_v8   ;;  %v5797_v45 = vsel %vm5783_vm3, %v5699_v4, 0 }
 0x912   : > { %5780 = vperm.xlu1 %17595, %v5710_v2   ;;  %v22060_v2 = vsub.f32 %v5788_v44, %v22037_v43 }
 0x960   : > { %v5712_v18 = vpop.permute.xlu0 %5711 }
 0x961   : > { %v5723_v63 = vmul.f32 %v5722_v7, %v5712_v18 }
 0x963   : > { %v5809_v3 = vand.u32 4294901760, %v5723_v63 }
 0x964   : > { %v5714_v9 = vpop.permute.xlu1 %5713 }
 0x965   : > { %v5724_v53 = vmul.f32 %v5722_v7, %v5714_v9  ;;  %v21998_v58 = vsub.f32 %v5723_v63, %v5809_v3 }
 0x967   : > { %v5812_v13 = vand.u32 4294901760, %v5724_v53  ;;  %v5968_v48 = vand.u32 4294901760, %v21998_v58 }
 0x968   : > { %v5716_v37 = vpop.permute.xlu0 %5715 }
 0x969   : > { %v22003_v36 = vpack.c.bf16 %v5812_v13, %v5809_v3  ;;  %v22005_v52 = vsub.f32 %v5724_v53, %v5812_v13  ;;  %v5725_v16 = vmul.f32 %v5722_v7, %v5716_v37  ;;  %v5800_v3 = vsel %vm5783_vm3, %v5700_v46, 0 }
 0x96a   : > { %v22076_v13 = vsub.f32 %v5791_v56, %v22049_v30  ;;  %v22078_v37 = vand.u32 4294901760, %v5797_v45  ;;  %v22091_v10 = vand.u32 4294901760, %v5800_v3 }
 0x96b   : > { %v5975_v31 = vand.u32 4294901760, %v22005_v52  ;;  %16345 = vmatprep.subr.bf16.mxu1 %v22003_v36  ;;  %v5815_v40 = vand.u32 4294901760, %v5725_v16 }
 0x96c   : > { %16347 = vmatpush3.bf16.msra.mxu1 %v22003_v36  ;;  %v5728_v59 = vpop.permute.xlu0 %5727  ;;  %v5718_v20 = vpop.permute.xlu1 %5717  ;;  %v22125_v4 = vsub.f32 %v5800_v3, %v22091_v10 }
 0x96d   : > { %v5739_v54 = vmul.f32 %v22001_v29, %v5728_v59  ;;  %v5726_v24 = vmul.f32 %v5722_v7, %v5718_v20  ;;  %v22022_v15 = vpack.c.bf16 %v5975_v31, %v5968_v48  ;;  %v22025_v0 = vsub.f32 %v5725_v16, %v5815_v40 }
 0x96e   : > { %v5803_v16 = vsel %vm5783_vm3, %v5701_v47, 0  ;;  %v5897_v59 = vand.u32 4294901760, %v22060_v2  ;;  %v22089_v20 = vsub.f32 %v5794_v14, %v22062_v35  ;;  %v5976_v44 = vsub.f32 %v22005_v52, %v5975_v31 }
 0x96f   : > { %v5818_v41 = vand.u32 4294901760, %v5726_v24  ;;  %v5833_v6 = vand.u32 4294901760, %v5739_v54  ;;  %v5982_v50 = vand.u32 4294901760, %v22025_v0  ;;  %v22109_v26 = vand.u32 4294901760, %v5803_v16 }
 0x970   : > { %v5732_v22 = vpop.permute.xlu0 %5731  ;;  %v5730_v34 = vpop.permute.xlu1 %5729  ;;  %v5898_v56 = vsub.f32 %v22060_v2, %v5897_v59 }
 0x971   : > { %v22030_v19 = vpack.c.bf16 %v5818_v41, %v5815_v40  ;;  %v22032_v1 = vsub.f32 %v5726_v24, %v5818_v41  ;;  %v5741_v42 = vmul.f32 %v22001_v29, %v5732_v22  ;;  %v5740_v17 = vmul.f32 %v22001_v29, %v5730_v34  ;;  %v5702_v40 = vld [vmem:[%s24264_s9 + $0x38] sm:$0xff] }
 0x972   : > { %v22046_v61 = vsub.f32 %v5739_v54, %v5833_v6  ;;  %v24881_v22 = vand.u32 4294901760, %v22076_v13  ;;  %v22107_v34 = vsub.f32 %v5797_v45, %v22078_v37  ;;  %v22138_v45 = vsub.f32 %v5803_v16, %v22109_v26 }
 0x973   : > { %v5989_v5 = vand.u32 4294901760, %v22032_v1  ;;  %v5839_v25 = vand.u32 4294901760, %v5741_v42  ;;  %16349 = vmatprep.subr.bf16.mxu1 %v22030_v19  ;;  %v5836_v11 = vand.u32 4294901760, %v5740_v17  ;;  %v5983_v47 = vsub.f32 %v22025_v0, %v5982_v50 }
 0x974   : > { %16351 = vmatpush3.bf16.msra.mxu1 %v22030_v19  ;;  %v5734_v38 = vpop.permute.xlu1 %5733  ;;  %v6024_v9 = vand.u32 4294901760, %v22046_v61 }
 0x975   : > { %v5742_v39 = vmul.f32 %v22001_v29, %v5734_v38  ;;  %16353 = vmatprep.subr.bf16.mxu1 %v21935_v57  ;;  %v22057_v8 = vsub.f32 %v5740_v17, %v5836_v11  ;;  %v22067_v7 = vpack.c.bf16 %v5989_v5, %v5982_v50  ;;  %v22069_v18 = vsub.f32 %v5741_v42, %v5839_v25 }
 0x976   : > { %v22098_v60 = vpack.c.bf16 %v5836_v11, %v5833_v6  ;;  %v5806_v42 = vsel %vm5783_vm3, %v5702_v40, 0  ;;  %v5969_v6 = vsub.f32 %v21998_v58, %v5968_v48  ;;  %v24882_v17 = vand.u32 4294901760, %v22089_v20 }
 0x977   : > { %v5842_v63 = vand.u32 4294901760, %v5742_v39  ;;  %v6031_v53 = vand.u32 4294901760, %v22057_v8  ;;  %v6038_v24 = vand.u32 4294901760, %v22069_v18  ;;  %v5977_v11 = vand.u32 4294901760, %v5976_v44 }
 0x978   : > { %16355 = vmatpush3.bf16.msra.mxu1 %v21935_v57  ;;  %v5990_v38 = vsub.f32 %v22032_v1, %v5989_v5  ;;  %v22130_v46 = vand.u32 4294901760, %v5806_v42  ;;  %v5908_v48 = vsub.f32 %v22076_v13, %v24881_v22  ;;  %v5918_v5 = vsub.f32 %v22089_v20, %v24882_v17 }
 0x979   : > { %v22080_v28 = vsub.f32 %v5742_v39, %v5842_v63  ;;  %16357 = vmatprep.subr.bf16.mxu1 %v21944_v51  ;;  %v22095_v54 = vpack.c.bf16 %v6031_v53, %v6024_v9  ;;  %v22127_v14 = vpack.c.bf16 %v5842_v63, %v5839_v25  ;;  %v5927_v39 = vand.u32 4294901760, %v22107_v34 }
 0x97a   : > { %v5970_v25 = vand.u32 4294901760, %v5969_v6  ;;  %v5899_v63 = vand.u32 4294901760, %v5898_v56  ;;  %v5991_v40 = vand.u32 4294901760, %v5990_v38  ;;  %v5937_v44 = vand.u32 4294901760, %v22125_v4 }
 0x97b   : > { %v6045_v41 = vand.u32 4294901760, %v22080_v28  ;;  %v22147_v22 = vsub.f32 %v5806_v42, %v22130_v46  ;;  %v5909_v16 = vand.u32 4294901760, %v5908_v48  ;;  %v5928_v6 = vsub.f32 %v22107_v34, %v5927_v39 }
 0x97c   : > { %16359 = vmatpush3.bf16.msra.mxu1 %v21944_v51  ;;  %v16368_v3 = vpack.c.bf16 %v5977_v11, %v5970_v25  ;;  %v5947_v50 = vand.u32 4294901760, %v22138_v45  ;;  %v5984_v56 = vand.u32 4294901760, %v5983_v47  ;;  %v5919_v11 = vand.u32 4294901760, %v5918_v5 }
 0x97d   : > { %16361 = vmatprep.subr.bf16.mxu1 %v22098_v60  ;;  %v22118_v31 = vpack.c.bf16 %v6045_v41, %v6038_v24  ;;  %v5938_v38 = vsub.f32 %v22125_v4, %v5937_v44  ;;  %v5957_v42 = vand.u32 4294901760, %v22147_v22  ;;  %v5929_v48 = vand.u32 4294901760, %v5928_v6 }
 0x97e   : > { %v16372_v17 = vpack.c.bf16 %v5991_v40, %v5984_v56  ;;  %v5948_v25 = vsub.f32 %v22138_v45, %v5947_v50  ;;  %v6032_v47 = vsub.f32 %v22057_v8, %v6031_v53  ;;  %v6046_v6 = vsub.f32 %v22080_v28, %v6045_v41 }
 0x97f   : > { %v5958_v5 = vsub.f32 %v22147_v22, %v5957_v42 }
 0x980   : > { %16363 = vmatpush3.bf16.msra.mxu1 %v22098_v60  ;;  %v5949_v40 = vand.u32 4294901760, %v5948_v25 }
 0x981   : > { %16365 = vmatprep.subr.bf16.mxu1 %v22127_v14  ;;  %v5959_v56 = vand.u32 4294901760, %v5958_v5 }
 0x984   : > { %16367 = vmatpush3.bf16.msra.mxu1 %v22127_v14 }
 0x985   : > { %16369 = vmatprep.subr.bf16.mxu1 %v16368_v3 }
 0x987   : > { %13831 = vmatmul.mubr.f32.vlgmr.msra.gmra.mrb[60].mxu1 %v5899_v63  ;;  %v5939_v63 = vand.u32 4294901760, %v5938_v38  ;;  %v6047_v38 = vand.u32 4294901760, %v6046_v6 }
 0x988   : > { %16371 = vmatpush3.bf16.msra.mxu1 %v16368_v3  ;;  %13833 = vmatprep.mubr.f32.mxu1 %v5909_v16  ;;  %v6025_v3 = vsub.f32 %v22046_v61, %v6024_v9  ;;  %v6033_v16 = vand.u32 4294901760, %v6032_v47 }
 0x989   : > { %16373 = vmatprep.subr.bf16.mxu1 %v16372_v17 }
 0x98a   : > { %v6026_v53 = vand.u32 4294901760, %v6025_v3 }
 0x98b   : > { %13834 = vmatmul.mubr.f32.gmra.mrb[62].mxu1 %v5919_v11 }
 0x98c   : > { %16375 = vmatpush3.bf16.msra.mxu1 %v16372_v17  ;;  %13836 = vmatprep.mubr.f32.mxu1 %v5929_v48  ;;  %v6039_v17 = vsub.f32 %v22069_v18, %v6038_v24  ;;  %v16384_v11 = vpack.c.bf16 %v6033_v16, %v6026_v53  ;;  %v16396_v24 = vpack.c.bf16 %v22032_v1, %v22025_v0 }
 0x98d   : > { %16377 = vmatprep.subr.bf16.mxu1 %v21949_v49 }
 0x98e   : > { %v6040_v9 = vand.u32 4294901760, %v6039_v17 }
 0x98f   : > { %13837 = vmatmul.mubr.f32.gmra.mrb[64].mxu1 %v5939_v63 }
 0x990   : > { %16379 = vmatpush3.bf16.msra.mxu1 %v21949_v49  ;;  %13839 = vmatprep.mubr.f32.mxu1 %v5949_v40  ;;  %v16388_v41 = vpack.c.bf16 %v6047_v38, %v6040_v9  ;;  %v16392_v49 = vpack.c.bf16 %v22005_v52, %v21998_v58  ;;  %v16412_v58 = vpack.c.bf16 %v22080_v28, %v22069_v18 }
 0x991   : > { %16381 = vmatprep.subr.bf16.mxu1 %v21977_v12 }
 0x993   : > { %13840 = vmatmul.mubr.f32.gmra.mrb[66].mxu1 %v5959_v56 }
 0x994   : > { %16383 = vmatpush3.bf16.msra.mxu1 %v21977_v12  ;;  %13866 = vmatprep.mubr.f32.mxu1 %v21954_v27  ;;  %v16408_v12 = vpack.c.bf16 %v22057_v8, %v22046_v61 }
 0x995   : > { %16385 = vmatprep.subr.bf16.mxu1 %v16384_v11 }
 0x998   : > { %16387 = vmatpush3.bf16.msra.mxu1 %v16384_v11 }
 0x999   : > { %16389 = vmatprep.subr.bf16.mxu1 %v16388_v41 }
 0x99c   : > { %16391 = vmatpush3.bf16.msra.mxu1 %v16388_v41 }
 0x99d   : > { %16393 = vmatprep.subr.bf16.mxu1 %v16392_v49 }
 0x99f   : > { %13867 = vmatmul.mubr.f32.vlgmr.msra.gmra.mrb[60].mxu1 %v22037_v43 }
 0x9a0   : > { %16395 = vmatpush3.bf16.msra.mxu1 %v16392_v49  ;;  %13869 = vmatprep.mubr.f32.mxu1 %v22049_v30 }
 0x9a1   : > { %16397 = vmatprep.subr.bf16.mxu1 %v16396_v24 }
 0x9a3   : > { %13870 = vmatmul.mubr.f32.gmra.mrb[62].mxu1 %v22062_v35 }
 0x9a4   : > { %16399 = vmatpush3.bf16.msra.mxu1 %v16396_v24  ;;  %13872 = vmatprep.mubr.f32.mxu1 %v22078_v37 }
 0x9a5   : > { %16401 = vmatprep.subr.bf16.mxu1 %v21938_v32 }
 0x9a7   : > { %13873 = vmatmul.mubr.f32.gmra.mrb[64].mxu1 %v22091_v10 }
 0x9a8   : > { %16403 = vmatpush3.bf16.msra.mxu1 %v21938_v32  ;;  %13875 = vmatprep.mubr.f32.mxu1 %v22109_v26  ;;  %v26039_v32 = vand.u32 4294901760, %v22076_v13 }
 0x9a9   : > { %16405 = vmatprep.subr.bf16.mxu1 %v21956_v33 }
 0x9ab   : > { %13876 = vmatmul.mubr.f32.gmra.mrb[66].mxu1 %v22130_v46 }
 0x9ac   : > { %16407 = vmatpush3.bf16.msra.mxu1 %v21956_v33  ;;  %13902 = vmatprep.mubr.f32.mxu1 %v21962_v55  ;;  %v26040_v33 = vand.u32 4294901760, %v22089_v20 }
 0x9ad   : > { %16409 = vmatprep.subr.bf16.mxu1 %v16408_v12 }
 0x9b0   : > { %16411 = vmatpush3.bf16.msra.mxu1 %v16408_v12 }
 0x9b1   : > { %16413 = vmatprep.subr.bf16.mxu1 %v16412_v58 }
 0x9b4   : > { %16415 = vmatpush3.bf16.msra.mxu1 %v16412_v58 }
 0x9b5   : > { %16417 = vmatprep.subr.bf16.mxu1 %v22003_v36 }
 0x9b7   : > { %13903 = vmatmul.mubr.f32.vlgmr.msra.gmra.mrb[60].mxu1 %v22060_v2 }
 0x9b8   : > { %16419 = vmatpush3.bf16.msra.mxu1 %v22003_v36  ;;  %13905 = vmatprep.mubr.f32.mxu1 %v22076_v13 }
 0x9b9   : > { %16421 = vmatprep.subr.bf16.mxu1 %v22030_v19 }
 0x9bb   : > { %13906 = vmatmul.mubr.f32.gmra.mrb[62].mxu1 %v22089_v20 }
 0x9bc   : > { %16423 = vmatpush3.bf16.msra.mxu1 %v22030_v19  ;;  %13908 = vmatprep.mubr.f32.mxu1 %v22107_v34 }
 0x9bd   : > { %16425 = vmatprep.subr.bf16.mxu1 %v21935_v57 }
 0x9bf   : > { %13909 = vmatmul.mubr.f32.gmra.mrb[64].mxu1 %v22125_v4 }
 0x9c0   : > { %16427 = vmatpush3.bf16.msra.mxu1 %v21935_v57  ;;  %13911 = vmatprep.mubr.f32.mxu1 %v22138_v45 }
 0x9c1   : > { %16429 = vmatprep.subr.bf16.mxu1 %v21944_v51 }
 0x9c3   : > { %13912 = vmatmul.mubr.f32.gmra.mrb[66].mxu1 %v22147_v22 }
 0x9c4   : > { %16431 = vmatpush3.bf16.msra.mxu1 %v21944_v51  ;;  %13938 = vmatprep.mubr.f32.mxu1 %v5887_v23 }
 0x9c5   : > { %16433 = vmatprep.subr.bf16.mxu1 %v22098_v60 }
 0x9c8   : > { %16435 = vmatpush3.bf16.msra.mxu1 %v22098_v60 }
 0x9c9   : > { %16437 = vmatprep.subr.bf16.mxu1 %v22127_v14 }
 0x9cc   : > { %16439 = vmatpush3.bf16.msra.mxu1 %v22127_v14 }
 0x9cd   : > { %16441 = vmatprep.subr.bf16.mxu1 %v22022_v15 }
 0x9cf   : > { %13939 = vmatmul.mubr.f32.vlgmr.msra.gmra.mrb[60].mxu1 %v5897_v59 }
 0x9d0   : > { %16443 = vmatpush3.bf16.msra.mxu1 %v22022_v15  ;;  %13941 = vmatprep.mubr.f32.mxu1 %v26039_v32 }
 0x9d1   : > { %16445 = vmatprep.subr.bf16.mxu1 %v22067_v7 }
 0x9d3   : > { %13942 = vmatmul.mubr.f32.gmra.mrb[62].mxu1 %v26040_v33 }
 0x9d4   : > { %16447 = vmatpush3.bf16.msra.mxu1 %v22067_v7  ;;  %13944 = vmatprep.mubr.f32.mxu1 %v5927_v39 }
 0x9d5   : > { %16449 = vmatprep.subr.bf16.mxu1 %v21940_v21 }
 0x9d7   : > { %13945 = vmatmul.mubr.f32.gmra.mrb[64].mxu1 %v5937_v44 }
 0x9d8   : > { %16451 = vmatpush3.bf16.msra.mxu1 %v21940_v21  ;;  %13947 = vmatprep.mubr.f32.mxu1 %v5947_v50  ;;  %v5746_v21 = vpop.permute.xlu0 %5745 }
 0x9d9   : > { %16453 = vmatprep.subr.bf16.mxu1 %v21964_v62 }
 0x9db   : > { %13948 = vmatmul.mubr.f32.gmra.mrb[66].mxu1 %v5957_v42 }
 0x9dc   : > { %16455 = vmatpush3.bf16.msra.mxu1 %v21964_v62  ;;  %13974 = vmatprep.mubr.f32.mxu1 %v21954_v27  ;;  %v5756_v55 = vpop.permute.xlu0 %5755 }
 0x9dd   : > { %16457 = vmatprep.subr.bf16.mxu1 %v22095_v54 }
 0x9e0   : > { %16459 = vmatpush3.bf16.msra.mxu1 %v22095_v54 }
 0x9e1   : > { %16461 = vmatprep.subr.bf16.mxu1 %v22118_v31 }
 0x9e4   : > { %16463 = vmatpush3.bf16.msra.mxu1 %v22118_v31  ;;  %v6738_v31 = vld [vmem:[#allocation8] sm:$0xff] }
 0x9e5   : > { %16465 = vmatprep.subr.bf16.mxu1 %v22003_v36  ;;  %v22280_v4 = vand.u32 4294901760, %v6738_v31 }
 0x9e7   : > { %13975 = vmatmul.mubr.f32.vlgmr.msra.gmra.mrb[60].mxu1 %v22037_v43 }
 0x9e8   : > { %16467 = vmatpush3.bf16.msra.mxu1 %v22003_v36  ;;  %13977 = vmatprep.mubr.f32.mxu1 %v22049_v30 }
 0x9e9   : > { %16469 = vmatprep.subr.bf16.mxu1 %v22030_v19 }
 0x9eb   : > { %13978 = vmatmul.mubr.f32.gmra.mrb[62].mxu1 %v22062_v35 }
 0x9ec   : > { %16471 = vmatpush3.bf16.msra.mxu1 %v22030_v19  ;;  %13980 = vmatprep.mubr.f32.mxu1 %v22078_v37 }
 0x9ed   : > { %16473 = vmatprep.subr.bf16.mxu1 %v21935_v57 }
 0x9ef   : > { %13981 = vmatmul.mubr.f32.gmra.mrb[64].mxu1 %v22091_v10 }
 0x9f0   : > { %16475 = vmatpush3.bf16.msra.mxu1 %v21935_v57  ;;  %13983 = vmatprep.mubr.f32.mxu1 %v22109_v26  ;;  %v5751_v57 = vpop.permute.xlu1 %5750 }
 0x9f1   : > { %16477 = vmatprep.subr.bf16.mxu1 %v21944_v51 }
 0x9f3   : > { %13984 = vmatmul.mubr.f32.gmra.mrb[66].mxu1 %v22130_v46 }
 0x9f4   : > { %16479 = vmatpush3.bf16.msra.mxu1 %v21944_v51  ;;  %14010 = vmatprep.mubr.f32.mxu1 %v21954_v27  ;;  %v5761_v51 = vpop.permute.xlu1 %5760 }
 0x9f5   : > { %16481 = vmatprep.subr.bf16.mxu1 %v22098_v60 }
 0x9f8   : > { %16483 = vmatpush3.bf16.msra.mxu1 %v22098_v60 }
 0x9f9   : > { %16485 = vmatprep.subr.bf16.mxu1 %v22127_v14 }
 0x9fc   : > { %16487 = vmatpush3.bf16.msra.mxu1 %v22127_v14  ;;  %v22283_v14 = vsub.f32 %v6738_v31, %v22280_v4 }
 0x9ff   : > { %14011 = vmatmul.mubr.f32.vlgmr.msra.gmra.mrb[60].mxu1 %v22037_v43  ;;  %v5771_v43 = vpop.permute.xlu1 %5770 }
 0xa00   : > { %14013 = vmatprep.mubr.f32.mxu1 %v22049_v30  ;;  %v5766_v30 = vpop.permute.xlu0 %5765 }
 0xa03   : > { %14014 = vmatmul.mubr.f32.gmra.mrb[62].mxu1 %v22062_v35  ;;  %v5781_v28 = vpop.permute.xlu1 %5780 }
 0xa04   : > { %14016 = vmatprep.mubr.f32.mxu1 %v22078_v37 }
 0xa07   : > { %14017 = vmatmul.mubr.f32.gmra.mrb[64].mxu1 %v22091_v10  ;;  %v5776_v10 = vpop.permute.xlu0 %5775 }
 0xa08   : > { %14019 = vmatprep.mubr.f32.mxu1 %v22109_v26 }
 0xa0b   : > { %14020 = vmatmul.mubr.f32.gmra.mrb[66].mxu1 %v22130_v46  ;;  %v6821_v46 = vand.u32 4294901760, %v22283_v14 }
 0xa0d   : > { %v6822_v39 = vsub.f32 %v22283_v14, %v6821_v46 }
 0xa0f   : > { %v6823_v45 = vand.u32 4294901760, %v6822_v39  ;;  %v6742_v39 = vld [vmem:[#allocation8 + $0x20] sm:$0xff] }
 0xa11   : > { %14038 = vmatprep.mubr.f32.mxu1 %v6823_v45 }
 0xad2   : > { %v14012_v27 = vpop.f32.mrb[60].mxu1 }
 0xad3   : > { %v17316_v62 = vadd.f32 %v14012_v27, %v5751_v57  ;;  %v6652_v23 = vpop.f32.mrb[61].mxu1 }
 0xad4   : > { %v17317_v36 = vadd.f32 %v6652_v23, %v5746_v21 }
 0xad5   : > { %v6699_v52 = vmax.f32 %v17316_v62, 0.0 }
 0xad6   : > { %v6698_v15 = vmax.f32 %v17317_v36, 0.0  ;;  %v14015_v0 = vpop.f32.mrb[62].mxu1 }
 0xad7   : > { %v17318_v19 = vadd.f32 %v14015_v0, %v5761_v51  ;;  %6708 = vrot.lane.b32.xlu1 %v6699_v52, %s17823_s1  ;;  %v6664_v1 = vpop.f32.mrb[63].mxu1 }
 0xad8   : > { %v17319_v61 = vadd.f32 %v6664_v1, %v5756_v55  ;;  %6706 = vrot.lane.b32.xlu0 %v6698_v15, %s17823_s1 }
 0xad9   : > { %v6701_v8 = vmax.f32 %v17318_v19, 0.0 }
 0xada   : > { %v6700_v2 = vmax.f32 %v17319_v61, 0.0  ;;  %v14018_v35 = vpop.f32.mrb[64].mxu1 }
 0xadb   : > { %v17320_v7 = vadd.f32 %v14018_v35, %v5771_v43  ;;  %6712 = vrot.lane.b32.xlu1 %v6701_v8, %s17823_s1  ;;  %v6676_v18 = vpop.f32.mrb[65].mxu1 }
 0xadc   : > { %v17321_v13 = vadd.f32 %v6676_v18, %v5766_v30  ;;  %6710 = vrot.lane.b32.xlu0 %v6700_v2, %s17823_s1  ;;  %v6739_v18 = vld [vmem:[#allocation8 + $0x8] sm:$0xff] }
 0xadd   : > { %v6703_v37 = vmax.f32 %v17320_v7, 0.0 }
 0xade   : > { %v6702_v59 = vmax.f32 %v17321_v13, 0.0  ;;  %v14021_v20 = vpop.f32.mrb[66].mxu1 }
 0xadf   : > { %v17322_v54 = vadd.f32 %v14021_v20, %v5781_v28  ;;  %6716 = vrot.lane.b32.xlu1 %v6703_v37, %s17823_s1  ;;  %v6688_v60 = vpop.f32.mrb[67].mxu1 }
 0xae0   : > { %v17323_v22 = vadd.f32 %v6688_v60, %v5776_v10  ;;  %6714 = vrot.lane.b32.xlu0 %v6702_v59, %s17823_s1  ;;  %v6740_v10 = vld [vmem:[#allocation8 + $0x10] sm:$0xff]  ;;  %v22338_v60 = vand.u32 4294901760, %v6739_v18 }
 0xae1   : > { %v6705_v34 = vmax.f32 %v17322_v54, 0.0  ;;  %v22342_v31 = vand.u32 4294901760, %v6740_v10 }
 0xae2   : > { %v6704_v26 = vmax.f32 %v17323_v22, 0.0 }
 0xae3   : > { %6720 = vrot.lane.b32.xlu1 %v6705_v34, %s17823_s1 }
 0xae4   : > { %6718 = vrot.lane.b32.xlu0 %v6704_v26, %s17823_s1  ;;  %s611_s1 = sand.u32 1, %s26208_s17  }
 0xae5   : > { %s12784_s29 = sshll.u32 %s611_s1, 3  ;;  %s12651_s19 = scalar_lea.sflag [#allocation4], %s611_s1 }
 0xae6   : > { %s613_s0 = scalar_lea.vmem [#allocation11], %s12784_s29 }
 0xae7   : > { %s12664_s12 = sshll.u32 %s613_s0, 4  ;;  %s24215_s12 = int_to_ptr.vmem [resolvable:$true] %s12664_s12 }
 0xae8   : > { %s17736_s24 = scalar_lea.vmem %s24215_s12, 128  ;;  %p17743_p6 = scmp.lt.s32.totalorder %s24215_s12, %s17741_s20 }
 0xae9   : > { %p17737_p8 = scmp.ne.s32.totalorder %s24215_s12, %s17736_s24 }
 0xaeb   : > { %p17738_p13 = pnand %p17737_p8, %p26212_p11 }
 0xaed   : > { %p17739_p1 = pneg %p17738_p13 }
 0xb49   : > { %v6709_v44 = vpop.permute.xlu1 %6708 }
 0xb4a   : > { %v6723_v50 = vmul.f32 %v6709_v44, %v22001_v29  ;;  %v6707_v42 = vpop.permute.xlu0 %6706  ;;  %v22351_v44 = vsub.f32 %v6739_v18, %v22338_v60 }
 0xb4b   : > { %v6722_v48 = vmul.f32 %v6707_v42, %v22001_v29 }
 0xb4c   : > { %v6731_v25 = vmax.f32 %v6699_v52, %v6723_v50 }
 0xb4d   : > { %v6730_v47 = vmax.f32 %v6698_v15, %v6722_v48  ;;  %v6713_v63 = vpop.permute.xlu1 %6712 }
 0xb4e   : > { %v6750_v5 = vand.u32 4294901760, %v6731_v25  ;;  %v6725_v40 = vmul.f32 %v6713_v63, %v22001_v29  ;;  %v6711_v3 = vpop.permute.xlu0 %6710  ;;  %v22361_v63 = vsub.f32 %v6740_v10, %v22342_v31 }
 0xb4f   : > { %v6747_v16 = vand.u32 4294901760, %v6730_v47  ;;  %v6724_v6 = vmul.f32 %v6711_v3, %v22001_v29  ;;  %v6831_v3 = vand.u32 4294901760, %v22351_v44 }
 0xb50   : > { %v6733_v56 = vmax.f32 %v6701_v8, %v6725_v40  ;;  %v22296_v49 = vsub.f32 %v6731_v25, %v6750_v5  ;;  %v6744_v40 = vld [vmem:[#allocation8 + $0x30] sm:$0xff] }
 0xb51   : > { %v22293_v53 = vpack.c.bf16 %v6750_v5, %v6747_v16  ;;  %v6732_v17 = vmax.f32 %v6700_v2, %v6724_v6  ;;  %v6717_v11 = vpop.permute.xlu1 %6716  ;;  %v22298_v24 = vsub.f32 %v6730_v47, %v6747_v16  ;;  %v6743_v47 = vld [vmem:[#allocation8 + $0x28] sm:$0xff]  ;;  %v22363_v5 = vand.u32 4294901760, %v6742_v39 }
 0xb52   : > { %v6756_v38 = vand.u32 4294901760, %v6733_v56  ;;  %v6727_v9 = vmul.f32 %v6717_v11, %v22001_v29  ;;  %v6715_v41 = vpop.permute.xlu0 %6714  ;;  %v6909_v0 = vand.u32 4294901760, %v22296_v49  ;;  %v22370_v6 = vand.u32 4294901760, %v6743_v47 }
 0xb53   : > { %v6753_v12 = vand.u32 4294901760, %v6732_v17  ;;  %v6726_v58 = vmul.f32 %v6715_v41, %v22001_v29  ;;  %16489 = vmatprep.subr.bf16.mxu1 %v22293_v53  ;;  %v6902_v15 = vand.u32 4294901760, %v22298_v24  ;;  %v6841_v11 = vand.u32 4294901760, %v22361_v63  ;;  %v6745_v41 = vld [vmem:[#allocation8 + $0x38] sm:$0xff] }
 0xb54   : > { %v22302_v32 = vsub.f32 %v6733_v56, %v6756_v38  ;;  %v6735_v33 = vmax.f32 %v6703_v37, %v6727_v9  ;;  %16491 = vmatpush3.bf16.xpose.msra.mxu1 %v22293_v53  ;;  %v6910_v25 = vsub.f32 %v22296_v49, %v6909_v0  ;;  %v22376_v9 = vand.u32 4294901760, %v6744_v40 }
 0xb55   : > { %v22305_v57 = vpack.c.bf16 %v6756_v38, %v6753_v12  ;;  %v22307_v21 = vsub.f32 %v6732_v17, %v6753_v12  ;;  %v6734_v51 = vmax.f32 %v6702_v59, %v6726_v58  ;;  %v6721_v27 = vpop.permute.xlu1 %6720  ;;  %v22324_v37 = vpack.c.bf16 %v6909_v0, %v6902_v15 }
 0xb56   : > { %v6762_v55 = vand.u32 4294901760, %v6735_v33  ;;  %v6729_v62 = vmul.f32 %v6721_v27, %v22001_v29  ;;  %v6719_v23 = vpop.permute.xlu0 %6718  ;;  %v6923_v61 = vand.u32 4294901760, %v22302_v32  ;;  %v6903_v48 = vsub.f32 %v22298_v24, %v6902_v15 }
 0xb57   : > { %v6759_v36 = vand.u32 4294901760, %v6734_v51  ;;  %v6728_v52 = vmul.f32 %v6719_v23, %v22001_v29  ;;  %16493 = vmatprep.subr.bf16.mxu1 %v22305_v57  ;;  %v6916_v43 = vand.u32 4294901760, %v22307_v21  ;;  %v6911_v17 = vand.u32 4294901760, %v6910_v25 }
 0xb58   : > { %v22314_v19 = vsub.f32 %v6735_v33, %v6762_v55  ;;  %v6737_v1 = vmax.f32 %v6705_v34, %v6729_v62  ;;  %v6904_v56 = vand.u32 4294901760, %v6903_v48  ;;  %v22374_v38 = vsub.f32 %v6742_v39, %v22363_v5 }
 0xb59   : > { %v22318_v30 = vsub.f32 %v6734_v51, %v6759_v36  ;;  %v6736_v8 = vmax.f32 %v6704_v26, %v6728_v52  ;;  %v22321_v29 = vpack.c.bf16 %v6762_v55, %v6759_v36  ;;  %v22329_v59 = vpack.c.bf16 %v6923_v61, %v6916_v43  ;;  %v6741_v26 = vld [vmem:[#allocation8 + $0x18] sm:$0xff] }
 0xb5a   : > { %v6768_v2 = vand.u32 4294901760, %v6737_v1  ;;  %v6937_v35 = vand.u32 4294901760, %v22314_v19  ;;  %v22353_v50 = vand.u32 4294901760, %v6741_v26  ;;  %v6832_v12 = vsub.f32 %v22351_v44, %v6831_v3 }
 0xb5b   : > { %v6765_v7 = vand.u32 4294901760, %v6736_v8  ;;  %v6930_v13 = vand.u32 4294901760, %v22318_v30  ;;  %v22383_v33 = vsub.f32 %v6743_v47, %v22370_v6  ;;  %v16504_v51 = vpack.c.bf16 %v6911_v17, %v6904_v56 }
 0xb5c   : > { %v22326_v28 = vsub.f32 %v6737_v1, %v6768_v2  ;;  %16495 = vmatpush3.bf16.xpose.msra.mxu1 %v22305_v57  ;;  %v22368_v16 = vsub.f32 %v6741_v26, %v22353_v50  ;;  %v6917_v27 = vsub.f32 %v22307_v21, %v6916_v43  ;;  %v6924_v55 = vsub.f32 %v22302_v32, %v6923_v61 }
 0xb5d   : > { %v22331_v20 = vsub.f32 %v6736_v8, %v6765_v7  ;;  %16497 = vmatprep.subr.bf16.mxu1 %v22321_v29  ;;  %v22336_v54 = vpack.c.bf16 %v6937_v35, %v6930_v13  ;;  %v22355_v42 = vpack.c.bf16 %v6768_v2, %v6765_v7  ;;  %v22387_v62 = vand.u32 4294901760, %v6745_v41 }
 0xb5e   : > { %v6951_v22 = vand.u32 4294901760, %v22326_v28  ;;  %v6851_v58 = vand.u32 4294901760, %v22368_v16  ;;  %v6842_v23 = vsub.f32 %v22361_v63, %v6841_v11  ;;  %v6861_v36 = vand.u32 4294901760, %v22374_v38 }
 0xb5f   : > { %v6944_v34 = vand.u32 4294901760, %v22331_v20  ;;  %v22395_v52 = vsub.f32 %v6744_v40, %v22376_v9  ;;  %v6871_v0 = vand.u32 4294901760, %v22383_v33  ;;  %v6833_v1 = vand.u32 4294901760, %v6832_v12 }
 0xb60   : > { %v6852_v15 = vsub.f32 %v22368_v16, %v6851_v58  ;;  %v6918_v43 = vand.u32 4294901760, %v6917_v27  ;;  %v6925_v61 = vand.u32 4294901760, %v6924_v55  ;;  %v22402_v8 = vsub.f32 %v6745_v41, %v22387_v62 }
 0xb61   : > { %v22348_v45 = vpack.c.bf16 %v6951_v22, %v6944_v34  ;;  %v6843_v2 = vand.u32 4294901760, %v6842_v23  ;;  %v6862_v7 = vsub.f32 %v22374_v38, %v6861_v36  ;;  %v6881_v18 = vand.u32 4294901760, %v22395_v52 }
 0xb62   : > { %v6853_v10 = vand.u32 4294901760, %v6852_v15  ;;  %v6872_v26 = vsub.f32 %v22383_v33, %v6871_v0  ;;  %v16508_v39 = vpack.c.bf16 %v6925_v61, %v6918_v43  ;;  %v6931_v48 = vsub.f32 %v22318_v30, %v6930_v13 }
 0xb63   : > { %v6938_v25 = vsub.f32 %v22314_v19, %v6937_v35  ;;  %v6891_v47 = vand.u32 4294901760, %v22402_v8  ;;  %v6863_v40 = vand.u32 4294901760, %v6862_v7  ;;  %v6882_v56 = vsub.f32 %v22395_v52, %v6881_v18 }
 0xb64   : > { %16499 = vmatpush3.bf16.xpose.msra.mxu1 %v22321_v29  ;;  %v6932_v17 = vand.u32 4294901760, %v6931_v48  ;;  %v6873_v12 = vand.u32 4294901760, %v6872_v26  ;;  %v6952_v55 = vsub.f32 %v22326_v28, %v6951_v22  ;;  %v16524_v22 = vpack.c.bf16 %v22302_v32, %v22307_v21  ;;  %v22446_v32 = vld [vmem:[#allocation10 + $0x50] sm:$0xff]  ;;  %v22457_v26 = vld [vmem:[#allocation10 + $0x68] sm:$0xff] }
 0xb65   : > { %16501 = vmatprep.subr.bf16.mxu1 %v22355_v42  ;;  %v6939_v41 = vand.u32 4294901760, %v6938_v25  ;;  %v6892_v13 = vsub.f32 %v22402_v8, %v6891_v47  ;;  %v6883_v35 = vand.u32 4294901760, %v6882_v56  ;;  %v16528_v61 = vpack.c.bf16 %v22314_v19, %v22318_v30  ;;  %v22464_v56 = vld [vmem:[#allocation10] sm:$0xff] }
 0xb66   : > { %v24907_v21 = vmov 0.0|0.0   ;;  %v24896_v7 = vand.u32 4294901760, %v22446_v32 }
 0xb67   : > { %v16512_v27 = vpack.c.bf16 %v6939_v41, %v6932_v17  ;;  %v6893_v23 = vand.u32 4294901760, %v6892_v13  ;;  %16704 = vmatprep.subr.bf16.mxu0 %v24907_v21  ;;  %v22466_v17 = vld [vmem:[#allocation10 + $0x8] sm:$0xff] }
 0xb6c   : > { %16503 = vmatpush3.bf16.xpose.msra.mxu1 %v22355_v42 }
 0xb6d   : > { %16505 = vmatprep.subr.bf16.mxu1 %v16504_v51 }
 0xb73   : > { %14039 = vmatmul.mubr.f32.vlgmr.msra.gmra.mrb[68].mxu1 %v6833_v1  ;;  %v6953_v1 = vand.u32 4294901760, %v6952_v55 }
 0xb74   : > { %16507 = vmatpush3.bf16.xpose.msra.mxu1 %v16504_v51  ;;  %14041 = vmatprep.mubr.f32.mxu1 %v6843_v2  ;;  %v6945_v51 = vsub.f32 %v22331_v20, %v6944_v34  ;;  %v16520_v34 = vpack.c.bf16 %v22296_v49, %v22298_v24  ;;  %v22442_v49 = vld [vmem:[#allocation10 + $0x40] sm:$0xff]  ;;  %v22444_v24 = vld [vmem:[#allocation10 + $0x48] sm:$0xff]  ;;  %v22452_v2 = vld [vmem:[#allocation10 + $0x58] sm:$0xff] }
 0xb75   : > { %16509 = vmatprep.subr.bf16.mxu1 %v16508_v39  ;;  %v24898_v19 = vand.u32 4294901760, %v22442_v49  ;;  %v24897_v30 = vand.u32 4294901760, %v22444_v24  ;;  %v24895_v48 = vand.u32 4294901760, %v22452_v2 }
 0xb76   : > { %v6946_v15 = vand.u32 4294901760, %v6945_v51  ;;  %v7656_v51 = vand.u32 4294901760, %v22466_v17 }
 0xb77   : > { %14042 = vmatmul.mubr.f32.gmra.mrb[70].mxu1 %v6853_v10  ;;  %v22455_v10 = vld [vmem:[#allocation10 + $0x60] sm:$0xff]  ;;  %v22471_v41 = vsub.f32 %v22442_v49, %v24898_v19  ;;  %v22487_v13 = vsub.f32 %v22452_v2, %v24895_v48 }
 0xb78   : > { %14044 = vmatprep.mubr.f32.mxu1 %v6863_v40  ;;  %v16516_v43 = vpack.c.bf16 %v6953_v1, %v6946_v15  ;;  %v24884_v25 = vand.u32 4294901760, %v22455_v10  ;;  %v24883_v40 = vand.u32 4294901760, %v22457_v26 }
 0xb79   : > { %26043 = vst [vmem:[#allocation116_spill] sm:$0xff] %v22487_v13  ;;  %v24894_v55 = vand.u32 4294901760, %v22471_v41 }
 0xb7b   : > { %14045 = vmatmul.mubr.f32.gmra.mrb[72].mxu1 %v6873_v12  ;;  %v22476_v12 = vsub.f32 %v22444_v24, %v24897_v30 }
 0xb7c   : > { %16511 = vmatpush3.bf16.xpose.msra.mxu1 %v16508_v39  ;;  %14047 = vmatprep.mubr.f32.mxu1 %v6883_v35  ;;  %v16532_v39 = vpack.c.bf16 %v22326_v28, %v22331_v20  ;;  %v22481_v28 = vsub.f32 %v22446_v32, %v24896_v7  ;;  %v7653_v20 = vand.u32 4294901760, %v22464_v56  ;;  %v22492_v35 = vsub.f32 %v22455_v10, %v24884_v25 }
 0xb7d   : > { %16513 = vmatprep.subr.bf16.mxu1 %v16512_v27  ;;  %26041 = vst [vmem:[#allocation119_spill] sm:$0xff] %v22476_v12 }
 0xb7e   : > { %26042 = vst [vmem:[#allocation113_spill] sm:$0xff] %v22481_v28  ;;  %26044 = vst [vmem:[#allocation117_spill] sm:$0xff] %v22492_v35  ;;  %v24893_v15 = vand.u32 4294901760, %v22481_v28  ;;  %v22506_v1 = vsub.f32 %v22464_v56, %v7653_v20 }
 0xb7f   : > { %14048 = vmatmul.mubr.f32.gmra.mrb[74].mxu1 %v6893_v23  ;;  %v24885_v23 = vand.u32 4294901760, %v22476_v12 }
 0xb80   : > { %14066 = vmatprep.mubr.f32.mxu1 %v22280_v4 }
 0xb84   : > { %16515 = vmatpush3.bf16.xpose.msra.mxu1 %v16512_v27  ;;  %v22497_v27 = vsub.f32 %v22457_v26, %v24883_v40  ;;  %v24889_v40 = vand.u32 4294901760, %v22492_v35 }
 0xb85   : > { %16517 = vmatprep.subr.bf16.mxu1 %v16516_v43 }
 0xb86   : > { %26045 = vst [vmem:[#allocation93_spill] sm:$0xff] %v22497_v27  ;;  %v24888_v25 = vand.u32 4294901760, %v22497_v27 }
 0xb8c   : > { %16519 = vmatpush3.bf16.xpose.msra.mxu1 %v16516_v43  ;;  %v24892_v43 = vand.u32 4294901760, %v22487_v13 }
 0xb8d   : > { %16521 = vmatprep.subr.bf16.mxu1 %v16520_v34 }
 0xb93   : > { %14067 = vmatmul.mubr.f32.vlgmr.msra.gmra.mrb[68].mxu1 %v22338_v60 }
 0xb94   : > { %16523 = vmatpush3.bf16.xpose.msra.mxu1 %v16520_v34  ;;  %14069 = vmatprep.mubr.f32.mxu1 %v22342_v31  ;;  %v16705_v34 = vpack.c.bf16 %v24885_v23, %v24894_v55  ;;  %v16711_v23 = vpack.c.bf16 %v24888_v25, %v24889_v40  ;;  %v7602_v40 = vld [vmem:[#allocation10 + $0x90] sm:$0xff] }
 0xb95   : > { %16525 = vmatprep.subr.bf16.mxu1 %v16524_v22 }
 0xb96   : > { %16706 = vmatpush3.bf16.msra.mxu0 %v16705_v34 }
 0xb97   : > { %14070 = vmatmul.mubr.f32.gmra.mrb[70].mxu1 %v22353_v50  ;;  %16707 = vmatprep.subr.bf16.mxu0 %v24907_v21 }
 0xb98   : > { %14072 = vmatprep.mubr.f32.mxu1 %v22363_v5 }
 0xb9b   : > { %14073 = vmatmul.mubr.f32.gmra.mrb[72].mxu1 %v22370_v6 }
 0xb9c   : > { %16527 = vmatpush3.bf16.xpose.msra.mxu1 %v16524_v22  ;;  %14075 = vmatprep.mubr.f32.mxu1 %v22376_v9  ;;  %v22516_v22 = vsub.f32 %v22466_v17, %v7656_v51 }
 0xb9d   : > { %16529 = vmatprep.subr.bf16.mxu1 %v16528_v61 }
 0xb9f   : > { %14076 = vmatmul.mubr.f32.gmra.mrb[74].mxu1 %v22387_v62 }
 0xba0   : > { %14094 = vmatprep.mubr.f32.mxu1 %v22283_v14  ;;  %v22592_v14 = vpack.c.bf16 %v7656_v51, %v7653_v20 }
 0xba4   : > { %16531 = vmatpush3.bf16.xpose.msra.mxu1 %v16528_v61  ;;  %v16708_v61 = vpack.c.bf16 %v24892_v43, %v24893_v15 }
 0xba5   : > { %16533 = vmatprep.subr.bf16.mxu1 %v16532_v39 }
 0xba6   : > { %16709 = vmatpush3.bf16.msra.mxu0 %v16708_v61 }
 0xba7   : > { %16710 = vmatprep.subr.bf16.mxu0 %v24907_v21 }
 0xbaa   : > { %16712 = vmatpush3.bf16.msra.mxu0 %v16711_v23 }
 0xbab   : > { %16713 = vmatprep.subr.bf16.mxu0 %v24907_v21 }
 0xbac   : > { %16535 = vmatpush3.bf16.xpose.msra.mxu1 %v16532_v39 }
 0xbad   : > { %16537 = vmatprep.subr.bf16.mxu1 %v22293_v53 }
 0xbb3   : > { %14095 = vmatmul.mubr.f32.vlgmr.msra.gmra.mrb[68].mxu1 %v22351_v44 }
 0xbb4   : > { %16539 = vmatpush3.bf16.xpose.msra.mxu1 %v22293_v53  ;;  %14097 = vmatprep.mubr.f32.mxu1 %v22361_v63  ;;  %v7588_v63 = vld [vmem:[#allocation10 + $0x20] sm:$0xff] }
 0xbb5   : > { %16541 = vmatprep.subr.bf16.mxu1 %v22305_v57 }
 0xbb7   : > { %14098 = vmatmul.mubr.f32.gmra.mrb[70].mxu1 %v22368_v16 }
 0xbb8   : > { %14100 = vmatprep.mubr.f32.mxu1 %v22374_v38  ;;  %v7590_v38 = vld [vmem:[#allocation10 + $0x30] sm:$0xff] }
 0xbbb   : > { %14101 = vmatmul.mubr.f32.gmra.mrb[72].mxu1 %v22383_v33 }
 0xbbc   : > { %16543 = vmatpush3.bf16.xpose.msra.mxu1 %v22305_v57  ;;  %14103 = vmatprep.mubr.f32.mxu1 %v22395_v52  ;;  %v7738_v52 = vand.u32 4294901760, %v22506_v1 }
 0xbbd   : > { %16545 = vmatprep.subr.bf16.mxu1 %v22321_v29 }
 0xbbe   : > { %v7739_v39 = vsub.f32 %v22506_v1, %v7738_v52 }
 0xbbf   : > { %14104 = vmatmul.mubr.f32.gmra.mrb[74].mxu1 %v22402_v8 }
 0xbc0   : > { %14122 = vmatprep.mubr.f32.mxu1 %v6821_v46  ;;  %v22605_v46 = vld [vmem:[#allocation10 + $0x78] sm:$0xff]  ;;  %v7740_v51 = vand.u32 4294901760, %v7739_v39 }
 0xbc1   : > { %26047 = vst [vmem:[#allocation100_spill] sm:$0xff] %v22605_v46 }
 0xbc4   : > { %16547 = vmatpush3.bf16.xpose.msra.mxu1 %v22321_v29 }
 0xbc5   : > { %16549 = vmatprep.subr.bf16.mxu1 %v22355_v42 }
 0xbcc   : > { %16551 = vmatpush3.bf16.xpose.msra.mxu1 %v22355_v42 }
 0xbcd   : > { %16553 = vmatprep.subr.bf16.mxu1 %v22324_v37 }
 0xbd3   : > { %14123 = vmatmul.mubr.f32.vlgmr.msra.gmra.mrb[68].mxu1 %v6831_v3  ;;  %v7665_v3 = vand.u32 4294901760, %v7588_v63 }
 0xbd4   : > { %16555 = vmatpush3.bf16.xpose.msra.mxu1 %v22324_v37  ;;  %14125 = vmatprep.mubr.f32.mxu1 %v6841_v11 }
 0xbd5   : > { %16557 = vmatprep.subr.bf16.mxu1 %v22329_v59 }
 0xbd7   : > { %14126 = vmatmul.mubr.f32.gmra.mrb[70].mxu1 %v6851_v58 }
 0xbd8   : > { %14128 = vmatprep.mubr.f32.mxu1 %v6861_v36 }
 0xbdb   : > { %14129 = vmatmul.mubr.f32.gmra.mrb[72].mxu1 %v6871_v0  ;;  %v7745_v0 = vand.u32 4294901760, %v22516_v22 }
 0xbdc   : > { %16559 = vmatpush3.bf16.xpose.msra.mxu1 %v22329_v59  ;;  %14131 = vmatprep.mubr.f32.mxu1 %v6881_v18  ;;  %v22646_v18 = vsub.f32 %v7588_v63, %v7665_v3 }
 0xbdd   : > { %16561 = vmatprep.subr.bf16.mxu1 %v22336_v54  ;;  %v7746_v56 = vsub.f32 %v22516_v22, %v7745_v0 }
 0xbdf   : > { %14132 = vmatmul.mubr.f32.gmra.mrb[74].mxu1 %v6891_v47  ;;  %v7747_v23 = vand.u32 4294901760, %v7746_v56 }
 0xbe0   : > { %14150 = vmatprep.mubr.f32.mxu1 %v22280_v4 }
 0xbe4   : > { %16563 = vmatpush3.bf16.xpose.msra.mxu1 %v22336_v54 }
 0xbe5   : > { %16565 = vmatprep.subr.bf16.mxu1 %v22348_v45 }
 0xbec   : > { %16567 = vmatpush3.bf16.xpose.msra.mxu1 %v22348_v45 }
 0xbed   : > { %16569 = vmatprep.subr.bf16.mxu1 %v22293_v53 }
 0xbf3   : > { %14151 = vmatmul.mubr.f32.vlgmr.msra.gmra.mrb[68].mxu1 %v22338_v60 }
 0xbf4   : > { %16571 = vmatpush3.bf16.xpose.msra.mxu1 %v22293_v53  ;;  %14153 = vmatprep.mubr.f32.mxu1 %v22342_v31 }
 0xbf5   : > { %16573 = vmatprep.subr.bf16.mxu1 %v22305_v57 }
 0xbf7   : > { %14154 = vmatmul.mubr.f32.gmra.mrb[70].mxu1 %v22353_v50 }
 0xbf8   : > { %14156 = vmatprep.mubr.f32.mxu1 %v22363_v5 }
 0xbfb   : > { %14157 = vmatmul.mubr.f32.gmra.mrb[72].mxu1 %v22370_v6 }
 0xbfc   : > { %16575 = vmatpush3.bf16.xpose.msra.mxu1 %v22305_v57  ;;  %14159 = vmatprep.mubr.f32.mxu1 %v22376_v9  ;;  %v24890_v57 = vand.u32 4294901760, %v22605_v46 }
 0xbfd   : > { %16577 = vmatprep.subr.bf16.mxu1 %v22321_v29 }
 0xbfe   : > { %v22617_v37 = vsub.f32 %v22605_v46, %v24890_v57  ;;  %v7603_v57 = vld [vmem:[#allocation10 + $0x98] sm:$0xff] }
 0xbff   : > { %14160 = vmatmul.mubr.f32.gmra.mrb[74].mxu1 %v22387_v62 }
 0xc00   : > { %14178 = vmatprep.mubr.f32.mxu1 %v22280_v4  ;;  %v22603_v4 = vld [vmem:[#allocation10 + $0x70] sm:$0xff]  ;;  %26049 = vst [vmem:[#allocation37_spill] sm:$0xff] %v22617_v37  ;;  %v24886_v54 = vand.u32 4294901760, %v22617_v37 }
 0xc01   : > { %26046 = vst [vmem:[#allocation96_spill] sm:$0xff] %v22603_v4  ;;  %v24891_v53 = vand.u32 4294901760, %v22603_v4 }
 0xc04   : > { %16579 = vmatpush3.bf16.xpose.msra.mxu1 %v22321_v29  ;;  %v22612_v29 = vsub.f32 %v22603_v4, %v24891_v53  ;;  %v26054_v4 = vmov 0.0|0.0  }
 0xc05   : > { %16581 = vmatprep.subr.bf16.mxu1 %v22355_v42 }
 0xc06   : > { %26048 = vst [vmem:[#allocation111_spill] sm:$0xff] %v22612_v29  ;;  %v24887_v59 = vand.u32 4294901760, %v22612_v29 }
 0xc0c   : > { %16583 = vmatpush3.bf16.xpose.msra.mxu1 %v22355_v42 }
 0xc0d   : > { %16584 = vmatprep.subr.bf16.mxu1 %v24907_v21 }
 0xc13   : > { %14179 = vmatmul.mubr.f32.vlgmr.msra.gmra.mrb[68].mxu1 %v22338_v60  ;;  %v7586_v60 = vld [vmem:[#allocation10 + $0x10] sm:$0xff] }
 0xc14   : > { %14181 = vmatprep.mubr.f32.mxu1 %v22342_v31  ;;  %16586 = vmatpush3.bf16.msra.mxu1 %v22592_v14  ;;  %v7587_v31 = vld [vmem:[#allocation10 + $0x18] sm:$0xff]  ;;  %v7659_v45 = vand.u32 4294901760, %v7586_v60 }
 0xc15   : > { %16587 = vmatprep.subr.bf16.mxu1 %v24907_v21  ;;  %v7662_v44 = vand.u32 4294901760, %v7587_v31 }
 0xc16   : > { %v22636_v58 = vsub.f32 %v7586_v60, %v7659_v45  ;;  %v22660_v60 = vpack.c.bf16 %v7747_v23, %v7740_v51 }
 0xc17   : > { %14182 = vmatmul.mubr.f32.gmra.mrb[70].mxu1 %v22353_v50  ;;  %v16714_v50 = vpack.c.bf16 %v24886_v54, %v24887_v59  ;;  %v22625_v42 = vpack.c.bf16 %v7662_v44, %v7659_v45  ;;  %v22638_v33 = vsub.f32 %v7587_v31, %v7662_v44  ;;  %v7766_v44 = vand.u32 4294901760, %v22646_v18 }
 0xc18   : > { %14184 = vmatprep.mubr.f32.mxu1 %v22363_v5  ;;  %v7589_v5 = vld [vmem:[#allocation10 + $0x28] sm:$0xff]  ;;  %v7752_v17 = vand.u32 4294901760, %v22636_v58 }
 0xc19   : > { %16715 = vmatpush3.bf16.msra.mxu0 %v16714_v50  ;;  %16589 = vmatpush3.bf16.msra.mxu1 %v22625_v42  ;;  %v7668_v16 = vand.u32 4294901760, %v7589_v5  ;;  %v7759_v20 = vand.u32 4294901760, %v22638_v33 }
 0xc1a   : > { %16728 = vmatprep.subr.bf16.mxu0 %v24907_v21  ;;  %16590 = vmatprep.subr.bf16.mxu1 %v24907_v21  ;;  %v7753_v31 = vsub.f32 %v22636_v58, %v7752_v17 }
 0xc1b   : > { %14185 = vmatmul.mubr.f32.gmra.mrb[72].mxu1 %v22370_v6  ;;  %v26050_v6 = vmov 0.0   ;;  %v22632_v11 = vpack.c.bf16 %v7668_v16, %v7665_v3  ;;  %v22648_v47 = vsub.f32 %v7589_v5, %v7668_v16  ;;  %v7760_v45 = vsub.f32 %v22638_v33, %v7759_v20 }
 0xc1c   : > { %14187 = vmatprep.mubr.f32.mxu1 %v22376_v9  ;;  %14396 = vmatprep.mubr.msk.f32.mxu0 %vm17826_vm4, %v26050_v6  ;;  %v7591_v9 = vld [vmem:[#allocation10 + $0x38] sm:$0xff]  ;;  %v7754_v63 = vand.u32 4294901760, %v7753_v31  ;;  %v7767_v3 = vsub.f32 %v22646_v18, %v7766_v44 }
 0xc1d   : > { %16592 = vmatpush3.bf16.msra.mxu1 %v22632_v11  ;;  %v7674_v36 = vand.u32 4294901760, %v7591_v9  ;;  %v7773_v50 = vand.u32 4294901760, %v22648_v47  ;;  %v7761_v5 = vand.u32 4294901760, %v7760_v45 }
 0xc1e   : > { %16593 = vmatprep.subr.bf16.mxu1 %v24907_v21 }
 0xc1f   : > { %14188 = vmatmul.mubr.f32.gmra.mrb[74].mxu1 %v22387_v62  ;;  %v7671_v62 = vand.u32 4294901760, %v7590_v38  ;;  %v22658_v61 = vsub.f32 %v7591_v9, %v7674_v36  ;;  %v7774_v16 = vsub.f32 %v22648_v47, %v7773_v50  ;;  %v7768_v9 = vand.u32 4294901760, %v7767_v3  ;;  %v7606_v3 = vld [vmem:[#allocation10 + $0xb0] sm:$0xff] }
 0xc20   : > { %14206 = vmatprep.mubr.msk.f32.mxu1 %vm17826_vm4, %v26050_v6 }
 0xc21   : > { %v22644_v8 = vpack.c.bf16 %v7674_v36, %v7671_v62  ;;  %v22656_v34 = vsub.f32 %v7590_v38, %v7671_v62  ;;  %v22668_v38 = vpack.c.bf16 %v7761_v5, %v7754_v63  ;;  %v7775_v36 = vand.u32 4294901760, %v7774_v16  ;;  %v7607_v5 = vld [vmem:[#allocation10 + $0xb8] sm:$0xff] }
 0xc22   : > { %v7787_v39 = vand.u32 4294901760, %v22658_v61  ;;  %v22686_v16 = vpack.c.bf16 %v7745_v0, %v7738_v52  ;;  %v8739_v0 = vand.u32 4294901760, %v7602_v40  ;;  %v8754_v35 = vand.u32 4294901760, %v7607_v5 }
 0xc23   : > { %16595 = vmatpush3.bf16.msra.mxu1 %v22644_v8  ;;  %v7780_v62 = vand.u32 4294901760, %v22656_v34  ;;  %v22673_v51 = vpack.c.bf16 %v7775_v36, %v7768_v9  ;;  %v22688_v9 = vpack.c.bf16 %v7759_v20, %v7752_v17  ;;  %v22690_v36 = vpack.c.bf16 %v7773_v50, %v7766_v44  ;;  %v7604_v20 = vld [vmem:[#allocation10 + $0xa0] sm:$0xff]  ;;  %v7605_v44 = vld [vmem:[#allocation10 + $0xa8] sm:$0xff] }
 0xc24   : > { %16596 = vmatprep.subr.bf16.mxu1 %v24907_v21  ;;  %v7788_v23 = vsub.f32 %v22658_v61, %v7787_v39  ;;  %v8742_v17 = vand.u32 4294901760, %v7603_v57  ;;  %v8748_v48 = vand.u32 4294901760, %v7605_v44 }
 0xc25   : > { %v7781_v56 = vsub.f32 %v22656_v34, %v7780_v62 }
 0xc26   : > { %v7789_v45 = vand.u32 4294901760, %v7788_v23  ;;  %v7600_v23 = vld [vmem:[#allocation10 + $0x80] sm:$0xff]  ;;  %v22712_v19 = vpack.c.bf16 %v8742_v17, %v8739_v0 }
 0xc27   : > { %v7782_v31 = vand.u32 4294901760, %v7781_v56  ;;  %v22692_v56 = vpack.c.bf16 %v7787_v39, %v7780_v62 }
 0xc28   : > { %26052 = vst [vmem:[#allocation110_spill] sm:$0xff] %v22712_v19 }
 0xc29   : > { %v22678_v59 = vpack.c.bf16 %v7789_v45, %v7782_v31  ;;  %v7601_v31 = vld [vmem:[#allocation10 + $0x88] sm:$0xff]  ;;  %v8733_v45 = vand.u32 4294901760, %v7600_v23 }
 0xc2a   : > { %v8736_v25 = vand.u32 4294901760, %v7601_v31 }
 0xc2c   : > { %v22697_v52 = vpack.c.bf16 %v8736_v25, %v8733_v45 }
 0xc2e   : > { %26051 = vst [vmem:[#allocation86_spill] sm:$0xff] %v22697_v52 }
 0xce6   : > { %v14180_v53 = vpop.f32.mrb[68].mxu1 }
 0xce7   : > { %v22695_v43 = vsel %vm7648_vm5, %v14180_v53, 0  ;;  %v7538_v15 = vpop.f32.mrb[69].mxu1  ;;  %v8745_v53 = vand.u32 4294901760, %v7604_v20 }
 0xce8   : > { %v22700_v50 = vand.u32 4294901760, %v22695_v43  ;;  %v7650_v62 = vsel %vm7648_vm5, %v7538_v15, 0 }
 0xce9   : > { %v22703_v39 = vand.u32 4294901760, %v7650_v62  ;;  %v22721_v37 = vpack.c.bf16 %v8748_v48, %v8745_v53 }
 0xcea   : > { %v22705_v55 = vpop.f32.mrb[70].mxu1  ;;  %14397 = vmatmul.mubr.f32.vlgmr.msra.gmra.mrb[4].mxu0 %v22700_v50 }
 0xceb   : > { %v22709_v7 = vsub.f32 %v7650_v62, %v22703_v39  ;;  %16730 = vmatpush3.bf16.msra.mxu0 %v22697_v52  ;;  %v7550_v30 = vpop.f32.mrb[71].mxu1  ;;  %14434 = vmatprep.mubr.msk.f32.mxu0 %vm17826_vm4, %v26050_v6  ;;  %v8751_v52 = vand.u32 4294901760, %v7606_v3 }
 0xcec   : > { %v8730_v15 = vsel %vm7648_vm5, %v7550_v30, 0  ;;  %16731 = vmatprep.subr.bf16.mxu0 %v24907_v21 }
 0xced   : > { %v24919_v63 = vand.u32 4294901760, %v22709_v7  ;;  %v22719_v54 = vand.u32 4294901760, %v8730_v15 }
 0xcee   : > { %v14186_v62 = vpop.f32.mrb[72].mxu1 }
 0xcef   : > { %v7728_v29 = vsub.f32 %v22709_v7, %v24919_v63  ;;  %v22727_v27 = vsub.f32 %v8730_v15, %v22719_v54  ;;  %v22730_v30 = vsel %vm7648_vm5, %v14186_v62, 0  ;;  %16733 = vmatpush3.bf16.msra.mxu0 %v22712_v19  ;;  %v7562_v21 = vpop.f32.mrb[73].mxu1  ;;  %v22738_v63 = vsub.f32 %v7600_v23, %v8733_v45 }
 0xcf0   : > { %26053 = vst [vmem:[#allocation115_spill] sm:$0xff] %v22730_v30  ;;  %v22734_v46 = vsel %vm7648_vm5, %v7562_v21, 0  ;;  %16734 = vmatprep.subr.bf16.mxu0 %v26054_v4  ;;  %v22740_v15 = vsub.f32 %v7601_v31, %v8736_v25  ;;  %v22746_v30 = vpack.c.bf16 %v8754_v35, %v8751_v52  ;;  %v22759_v25 = vsub.f32 %v7602_v40, %v8739_v0 }
 0xcf1   : > { %v7729_v13 = vand.u32 4294901760, %v7728_v29  ;;  %v24923_v28 = vand.u32 4294901760, %v22727_v27  ;;  %v22771_v23 = vsub.f32 %v7605_v44, %v8748_v48  ;;  %v26059_v44 = vpack.c.bf16 %v22658_v61, %v22656_v34  ;;  %v7610_v34 = vld [vmem:[#allocation10 + $0xd0] sm:$0xff]  ;;  %v7611_v61 = vld [vmem:[#allocation10 + $0xd8] sm:$0xff] }
 0xcf2   : > { %v14189_v12 = vpop.f32.mrb[74].mxu1  ;;  %v24929_v31 = vand.u32 4294901760, %v22759_v25 }
 0xcf3   : > { %v22743_v62 = vsel %vm7648_vm5, %v14189_v12, 0  ;;  %16736 = vmatpush3.bf16.msra.mxu0 %v22721_v37  ;;  %v7574_v19 = vpop.f32.mrb[75].mxu1  ;;  %14207 = vmatmul.mubr.f32.vlgmr.msra.gmra.mrb[76].mxu1 %v7729_v13  ;;  %v8808_v21 = vsub.f32 %v22727_v27, %v24923_v28  ;;  %v22761_v12 = vsub.f32 %v7603_v57, %v8742_v17  ;;  %v16753_v13 = vpack.c.bf16 %v22740_v15, %v22738_v63 }
 0xcf4   : > { %26055 = vst [vmem:[#allocation120_spill] sm:$0xff] %v22743_v62  ;;  %v22752_v29 = vsel %vm7648_vm5, %v7574_v19, 0  ;;  %16598 = vmatpush3.bf16.msra.mxu1 %v22660_v60  ;;  %16737 = vmatprep.subr.bf16.mxu0 %v26054_v4  ;;  %v22769_v60 = vsub.f32 %v7604_v20, %v8745_v53  ;;  %v22780_v57 = vsub.f32 %v7606_v3, %v8751_v52  ;;  %v24940_v3 = vand.u32 4294901760, %v22738_v63 }
 0xcf5   : > { %16599 = vmatprep.subr.bf16.mxu1 %v26054_v4  ;;  %14225 = vmatprep.mubr.msk.f32.mxu1 %vm17826_vm4, %v26050_v6  ;;  %v8809_v19 = vand.u32 4294901760, %v8808_v21  ;;  %v16756_v40 = vpack.c.bf16 %v22761_v12, %v22759_v25  ;;  %v24928_v45 = vand.u32 4294901760, %v22761_v12  ;;  %v24926_v0 = vand.u32 4294901760, %v22771_v23 }
 0xcf6   : > { %v16759_v48 = vpack.c.bf16 %v22771_v23, %v22769_v60  ;;  %v24927_v52 = vand.u32 4294901760, %v22769_v60  ;;  %v24925_v17 = vand.u32 4294901760, %v22780_v57 }
 0xcf7   : > { %16739 = vmatpush3.bf16.msra.mxu0 %v22746_v30 }
 0xcf8   : > { %16601 = vmatpush3.bf16.msra.mxu1 %v22668_v38  ;;  %16752 = vmatprep.subr.bf16.mxu0 %v26054_v4  ;;  %v22782_v38 = vsub.f32 %v7607_v5, %v8754_v35  ;;  %v24930_v35 = vand.u32 4294901760, %v22740_v15  ;;  %v26056_v5 = vpack.c.bf16 %v22516_v22, %v22506_v1  ;;  %v26057_v1 = vpack.c.bf16 %v22638_v33, %v22636_v58 }
 0xcf9   : > { %16602 = vmatprep.subr.bf16.mxu1 %v26054_v4  ;;  %v16780_v22 = vpack.c.bf16 %v24928_v45, %v24929_v31  ;;  %v26058_v58 = vpack.c.bf16 %v22648_v47, %v22646_v18  ;;  %v16783_v33 = vpack.c.bf16 %v24926_v0, %v24927_v52  ;;  %v7608_v18 = vld [vmem:[#allocation10 + $0xc0] sm:$0xff]  ;;  %v7609_v47 = vld [vmem:[#allocation10 + $0xc8] sm:$0xff]  ;;  %v26065_v45 = vand.u32 4294901760, %v22709_v7 }
 0xcfa   : > { %14435 = vmatmul.mubr.f32.vlgmr.msra.gmra.mrb[6].mxu0 %v8809_v19  ;;  %v24924_v20 = vand.u32 4294901760, %v22782_v38  ;;  %v9273_v21 = vand.u32 4294901760, %v7608_v18  ;;  %v9270_v19 = vsel %vm7648_vm5, %v22705_v55, 0 }
 0xcfb   : > { %16754 = vmatpush3.bf16.msra.mxu0 %v16753_v13  ;;  %14472 = vmatprep.mubr.msk.f32.mxu0 %vm17826_vm4, %v26050_v6  ;;  %v9276_v13 = vand.u32 4294901760, %v7609_v47 }
 0xcfc   : > { %16604 = vmatpush3.bf16.msra.mxu1 %v22673_v51  ;;  %16755 = vmatprep.subr.bf16.mxu0 %v26054_v4  ;;  %v16762_v51 = vpack.c.bf16 %v22782_v38, %v22780_v57  ;;  %v16786_v53 = vpack.c.bf16 %v24924_v20, %v24925_v17 }
 0xcfd   : > { %16605 = vmatprep.subr.bf16.mxu1 %v26054_v4  ;;  %v22877_v52 = vsub.f32 %v7609_v47, %v9276_v13 }
 0xcff   : > { %16757 = vmatpush3.bf16.msra.mxu0 %v16756_v40  ;;  %v22849_v40 = vpack.c.bf16 %v9276_v13, %v9273_v21 }
 0xd00   : > { %16607 = vmatpush3.bf16.msra.mxu1 %v22678_v59  ;;  %16758 = vmatprep.subr.bf16.mxu0 %v26054_v4  ;;  %v16777_v59 = vpack.c.bf16 %v24930_v35, %v24940_v3 }
 0xd01   : > { %16608 = vmatprep.subr.bf16.mxu1 %v26054_v4  ;;  %26060 = vst [vmem:[#allocation40_spill] sm:$0xff] %v22849_v40 }
 0xd03   : > { %14226 = vmatmul.mubr.f32.vlgmr.msra.gmra.mrb[78].mxu1 %v22703_v39  ;;  %16760 = vmatpush3.bf16.msra.mxu0 %v16759_v48  ;;  %v9279_v48 = vand.u32 4294901760, %v7610_v34 }
 0xd04   : > { %16610 = vmatpush3.bf16.msra.mxu1 %v26056_v5  ;;  %16761 = vmatprep.subr.bf16.mxu0 %v26054_v4  ;;  %v22851_v5 = vand.u32 4294901760, %v9270_v19 }
 0xd05   : > { %16611 = vmatprep.subr.bf16.mxu1 %v26054_v4  ;;  %14244 = vmatprep.mubr.msk.f32.mxu1 %vm17826_vm4, %v26050_v6 }
 0xd06   : > { %26061 = vst [vmem:[#allocation55_spill] sm:$0xff] %v22851_v5 }
 0xd07   : > { %16763 = vmatpush3.bf16.msra.mxu0 %v16762_v51  ;;  %v9282_v51 = vand.u32 4294901760, %v7611_v61 }
 0xd08   : > { %16613 = vmatpush3.bf16.msra.mxu1 %v26057_v1  ;;  %16776 = vmatprep.subr.bf16.mxu0 %v26054_v4  ;;  %v7613_v1 = vld [vmem:[#allocation10 + $0xe8] sm:$0xff] }
 0xd09   : > { %16614 = vmatprep.subr.bf16.mxu1 %v26054_v4  ;;  %v22858_v55 = vpack.c.bf16 %v9282_v51, %v9279_v48 }
 0xd0a   : > { %14473 = vmatmul.mubr.f32.vlgmr.msra.gmra.mrb[8].mxu0 %v22727_v27 }
 0xd0b   : > { %16778 = vmatpush3.bf16.msra.mxu0 %v16777_v59  ;;  %14510 = vmatprep.mubr.msk.f32.mxu0 %vm17826_vm4, %v26050_v6  ;;  %v7612_v59 = vld [vmem:[#allocation10 + $0xe0] sm:$0xff]  ;;  %26062 = vst [vmem:[#allocation88_spill] sm:$0xff] %v22858_v55 }
 0xd0c   : > { %16616 = vmatpush3.bf16.msra.mxu1 %v26058_v58  ;;  %16779 = vmatprep.subr.bf16.mxu0 %v26054_v4  ;;  %v9288_v58 = vand.u32 4294901760, %v7613_v1 }
 0xd0d   : > { %16617 = vmatprep.subr.bf16.mxu1 %v26054_v4 }
 0xd0f   : > { %16781 = vmatpush3.bf16.msra.mxu0 %v16780_v22  ;;  %v9285_v22 = vand.u32 4294901760, %v7612_v59 }
 0xd10   : > { %16619 = vmatpush3.bf16.msra.mxu1 %v26059_v44  ;;  %16782 = vmatprep.subr.bf16.mxu0 %v26054_v4  ;;  %v7614_v44 = vld [vmem:[#allocation10 + $0xf0] sm:$0xff] }
 0xd11   : > { %16620 = vmatprep.subr.bf16.mxu1 %v26054_v4  ;;  %v22869_v28 = vpack.c.bf16 %v9288_v58, %v9285_v22  ;;  %v9291_v20 = vand.u32 4294901760, %v7614_v44 }
 0xd13   : > { %14245 = vmatmul.mubr.f32.vlgmr.msra.gmra.mrb[80].mxu1 %v22709_v7  ;;  %16784 = vmatpush3.bf16.msra.mxu0 %v16783_v33  ;;  %v22863_v33 = vsub.f32 %v9270_v19, %v22851_v5  ;;  %26064 = vst [vmem:[#allocation30_spill] sm:$0xff] %v22869_v28  ;;  %v22875_v19 = vsub.f32 %v7608_v18, %v9273_v21 }
 0xd14   : > { %16622 = vmatpush3.bf16.msra.mxu1 %v22592_v14  ;;  %16785 = vmatprep.subr.bf16.mxu0 %v26054_v4  ;;  %v22892_v18 = vsub.f32 %v7610_v34, %v9279_v48  ;;  %v22894_v7 = vsub.f32 %v7611_v61, %v9282_v51  ;;  %v22904_v21 = vsub.f32 %v7613_v1, %v9288_v58  ;;  %v26073_v58 = vand.u32 4294901760, %v22444_v24 }
 0xd15   : > { %16623 = vmatprep.subr.bf16.mxu1 %v26054_v4  ;;  %14263 = vmatprep.mubr.msk.f32.mxu1 %vm17826_vm4, %v26050_v6  ;;  %26063 = vst [vmem:[#allocation108_spill] sm:$0xff] %v22863_v33  ;;  %v24931_v0 = vand.u32 4294901760, %v22863_v33  ;;  %v26075_v24 = vand.u32 4294901760, %v22452_v2 }
 0xd16   : > { %26067 = vst [vmem:[#allocation122_spill] sm:$0xff] %v22894_v7  ;;  %26069 = vst [vmem:[#allocation121_spill] sm:$0xff] %v22904_v21  ;;  %v16828_v13 = vpack.c.bf16 %v22894_v7, %v22892_v18  ;;  %v24937_v61 = vand.u32 4294901760, %v22892_v18  ;;  %v24936_v48 = vand.u32 4294901760, %v22894_v7 }
 0xd17   : > { %16787 = vmatpush3.bf16.msra.mxu0 %v16786_v53  ;;  %v7615_v53 = vld [vmem:[#allocation10 + $0xf8] sm:$0xff]  ;;  %v9348_v35 = vsub.f32 %v22863_v33, %v24931_v0 }
 0xd18   : > { %16625 = vmatpush3.bf16.msra.mxu1 %v22625_v42  ;;  %16800 = vmatprep.subr.bf16.mxu0 %v26054_v4  ;;  %v9294_v17 = vand.u32 4294901760, %v7615_v53 }
 0xd19   : > { %16626 = vmatprep.subr.bf16.mxu1 %v26054_v4  ;;  %v9349_v47 = vand.u32 4294901760, %v9348_v35 }
 0xd1a   : > { %14511 = vmatmul.mubr.f32.vlgmr.msra.gmra.mrb[10].mxu0 %v22719_v54  ;;  %v22882_v31 = vpack.c.bf16 %v9294_v17, %v9291_v20  ;;  %v22915_v35 = vsub.f32 %v7615_v53, %v9294_v17  ;;  %v24938_v17 = vand.u32 4294901760, %v22877_v52  ;;  %v7616_v53 = vld [vmem:[#allocation10 + $0x100] sm:$0xff] }
 0xd1b   : > { %16802 = vmatpush3.bf16.msra.mxu0 %v22849_v40  ;;  %14548 = vmatprep.mubr.msk.f32.mxu0 %vm17826_vm4, %v26050_v6 }
 0xd1c   : > { %16628 = vmatpush3.bf16.msra.mxu1 %v22632_v11  ;;  %16803 = vmatprep.subr.bf16.mxu0 %v26054_v4  ;;  %26066 = vst [vmem:[#allocation106_spill] sm:$0xff] %v22882_v31  ;;  %26071 = vst [vmem:[#allocation41_spill] sm:$0xff] %v22915_v35 }
 0xd1d   : > { %16629 = vmatprep.subr.bf16.mxu1 %v26054_v4 }
 0xd1f   : > { %16805 = vmatpush3.bf16.msra.mxu0 %v22858_v55 }
 0xd20   : > { %16631 = vmatpush3.bf16.msra.mxu1 %v22644_v8  ;;  %16806 = vmatprep.subr.bf16.mxu0 %v26054_v4 }
 0xd21   : > { %16632 = vmatprep.subr.bf16.mxu1 %v26054_v4 }
 0xd23   : > { %14264 = vmatmul.mubr.f32.vlgmr.msra.gmra.mrb[82].mxu1 %v26065_v45  ;;  %16808 = vmatpush3.bf16.msra.mxu0 %v22869_v28  ;;  %v16825_v45 = vpack.c.bf16 %v22877_v52, %v22875_v19 }
 0xd24   : > { %16634 = vmatpush3.bf16.msra.mxu1 %v22686_v16  ;;  %16809 = vmatprep.subr.bf16.mxu0 %v26054_v4  ;;  %v22902_v16 = vsub.f32 %v7612_v59, %v9285_v22  ;;  %v24934_v59 = vand.u32 4294901760, %v22904_v21  ;;  %v24932_v22 = vand.u32 4294901760, %v22915_v35 }
 0xd25   : > { %16635 = vmatprep.subr.bf16.mxu1 %v26054_v4  ;;  %14282 = vmatprep.mubr.msk.f32.mxu1 %vm17826_vm4, %v26050_v6 }
 0xd26   : > { %26068 = vst [vmem:[#allocation114_spill] sm:$0xff] %v22902_v16  ;;  %v16831_v34 = vpack.c.bf16 %v22904_v21, %v22902_v16  ;;  %v24935_v51 = vand.u32 4294901760, %v22902_v16 }
 0xd27   : > { %16811 = vmatpush3.bf16.msra.mxu0 %v22882_v31 }
 0xd28   : > { %16637 = vmatpush3.bf16.msra.mxu1 %v22688_v9  ;;  %16824 = vmatprep.subr.bf16.mxu0 %v26054_v4  ;;  %v22913_v9 = vsub.f32 %v7614_v44, %v9291_v20  ;;  %v24939_v20 = vand.u32 4294901760, %v22875_v19 }
 0xd29   : > { %16638 = vmatprep.subr.bf16.mxu1 %v26054_v4 }
 0xd2a   : > { %14549 = vmatmul.mubr.f32.vlgmr.msra.gmra.mrb[12].mxu0 %v9349_v47  ;;  %26070 = vst [vmem:[#allocation107_spill] sm:$0xff] %v22913_v9  ;;  %v24933_v1 = vand.u32 4294901760, %v22913_v9  ;;  %v9813_v47 = vand.u32 4294901760, %v7616_v53 }
 0xd2b   : > { %16826 = vmatpush3.bf16.msra.mxu0 %v16825_v45  ;;  %14586 = vmatprep.mubr.msk.f32.mxu0 %vm17826_vm4, %v26050_v6  ;;  %v7617_v45 = vld [vmem:[#allocation10 + $0x108] sm:$0xff] }
 0xd2c   : > { %16640 = vmatpush3.bf16.msra.mxu1 %v22690_v36  ;;  %16827 = vmatprep.subr.bf16.mxu0 %v26054_v4  ;;  %v16834_v36 = vpack.c.bf16 %v22915_v35, %v22913_v9  ;;  %v26094_v9 = vld [vmem:[#allocation93_spill] sm:$0xff] }
 0xd2d   : > { %16641 = vmatprep.subr.bf16.mxu1 %v26054_v4  ;;  %v26095_v21 = vand.u32 4294901760, %v26094_v9 }
 0xd2f   : > { %16829 = vmatpush3.bf16.msra.mxu0 %v16828_v13  ;;  %v9816_v13 = vand.u32 4294901760, %v7617_v45  ;;  %v8314_v16 = vsub.f32 %v26094_v9, %v26095_v21  ;;  %v26097_v21 = vld [vmem:[#allocation111_spill] sm:$0xff] }
 0xd30   : > { %16643 = vmatpush3.bf16.msra.mxu1 %v22692_v56  ;;  %16830 = vmatprep.subr.bf16.mxu0 %v26054_v4  ;;  %v16849_v56 = vpack.c.bf16 %v24938_v17, %v24939_v20 }
 0xd31   : > { %16644 = vmatprep.subr.bf16.mxu1 %v26054_v4 }
 0xd33   : > { %14283 = vmatmul.mubr.f32.vlgmr.msra.gmra.mrb[84].mxu1 %v22703_v39  ;;  %16832 = vmatpush3.bf16.msra.mxu0 %v16831_v34 }
 0xd34   : > { %16646 = vmatpush3.bf16.msra.mxu1 %v22592_v14  ;;  %16833 = vmatprep.subr.bf16.mxu0 %v26054_v4  ;;  %v16852_v14 = vpack.c.bf16 %v24936_v48, %v24937_v61  ;;  %v26085_v61 = vld [vmem:[#allocation116_spill] sm:$0xff] }
 0xd35   : > { %16647 = vmatprep.subr.bf16.mxu1 %v26054_v4  ;;  %14301 = vmatprep.mubr.msk.f32.mxu1 %vm17826_vm4, %v26050_v6  ;;  %v26086_v17 = vand.u32 4294901760, %v26085_v61 }
 0xd37   : > { %16835 = vmatpush3.bf16.msra.mxu0 %v16834_v36  ;;  %v22981_v36 = vld [vmem:[#allocation10 + $0x110] sm:$0xff]  ;;  %v8300_v20 = vsub.f32 %v26085_v61, %v26086_v17  ;;  %v7623_v17 = vld [vmem:[#allocation10 + $0x138] sm:$0xff] }
 0xd38   : > { %16649 = vmatpush3.bf16.msra.mxu1 %v22625_v42  ;;  %16848 = vmatprep.subr.bf16.mxu0 %v26054_v4  ;;  %v16855_v42 = vpack.c.bf16 %v24934_v59, %v24935_v51  ;;  %v26087_v51 = vld [vmem:[#allocation96_spill] sm:$0xff] }
 0xd39   : > { %16650 = vmatprep.subr.bf16.mxu1 %v26054_v4 }
 0xd3a   : > { %14587 = vmatmul.mubr.f32.vlgmr.msra.gmra.mrb[14].mxu0 %v22863_v33  ;;  %v26089_v33 = vld [vmem:[#allocation100_spill] sm:$0xff] }
 0xd3b   : > { %16850 = vmatpush3.bf16.msra.mxu0 %v16849_v56  ;;  %14624 = vmatprep.mubr.msk.f32.mxu0 %vm17826_vm4, %v26050_v6  ;;  %v22987_v56 = vsub.f32 %v22695_v43, %v22700_v50  ;;  %v26077_v43 = vand.u32 4294901760, %v22455_v10  ;;  %v26090_v31 = vand.u32 4294901760, %v26089_v33  ;;  %v8301_v33 = vand.u32 4294901760, %v8300_v20 }
 0xd3c   : > { %16652 = vmatpush3.bf16.msra.mxu1 %v22632_v11  ;;  %16851 = vmatprep.subr.bf16.mxu0 %v26054_v4  ;;  %v26072_v11 = vand.u32 4294901760, %v22442_v49  ;;  %v26074_v49 = vand.u32 4294901760, %v22446_v32  ;;  %v9819_v32 = vand.u32 4294901760, %v22981_v36  ;;  %v23067_v20 = vsub.f32 %v7617_v45, %v9816_v13 }
 0xd3d   : > { %16653 = vmatprep.subr.bf16.mxu1 %v26054_v4  ;;  %v26091_v62 = vand.u32 4294901760, %v22987_v56 }
 0xd3e   : > { %v22965_v44 = vpack.c.bf16 %v26073_v58, %v26072_v11  ;;  %v22979_v34 = vpack.c.bf16 %v26075_v24, %v26074_v49  ;;  %v22998_v11 = vld [vmem:[#allocation10 + $0x128] sm:$0xff]  ;;  %v23001_v58 = vand.u32 4294901760, %v22734_v46  ;;  %v26079_v24 = vand.u32 4294901760, %v22471_v41 }
 0xd3f   : > { %16853 = vmatpush3.bf16.msra.mxu0 %v16852_v14  ;;  %v22992_v14 = vpack.c.bf16 %v9816_v13, %v9813_v47  ;;  %v8268_v40 = vsub.f32 %v22987_v56, %v26091_v62 }
 0xd40   : > { %16655 = vmatpush3.bf16.msra.mxu1 %v22644_v8  ;;  %16854 = vmatprep.subr.bf16.mxu0 %v26054_v4  ;;  %v16858_v8 = vpack.c.bf16 %v24932_v22, %v24933_v1  ;;  %v8279_v0 = vsub.f32 %v22471_v41, %v26079_v24  ;;  %v26080_v22 = vld [vmem:[#allocation119_spill] sm:$0xff]  ;;  %v26083_v24 = vld [vmem:[#allocation113_spill] sm:$0xff]  ;;  %v23037_v3 = vsub.f32 %v22734_v46, %v23001_v58 }
 0xd41   : > { %16656 = vmatprep.subr.bf16.mxu1 %v26054_v4  ;;  %26076 = vst [vmem:[#allocation57_spill] sm:$0xff] %v22992_v14  ;;  %v26081_v1 = vand.u32 4294901760, %v26080_v22  ;;  %v26084_v48 = vand.u32 4294901760, %v26083_v24  ;;  %v8269_v7 = vand.u32 4294901760, %v8268_v40  ;;  %v8315_v40 = vand.u32 4294901760, %v8314_v16 }
 0xd42   : > { %v8280_v28 = vand.u32 4294901760, %v8279_v0 }
 0xd43   : > { %14302 = vmatmul.mubr.f32.vlgmr.msra.gmra.mrb[86].mxu1 %v22703_v39  ;;  %16856 = vmatpush3.bf16.msra.mxu0 %v16855_v42  ;;  %v22983_v39 = vld [vmem:[#allocation10 + $0x118] sm:$0xff]  ;;  %v22996_v42 = vld [vmem:[#allocation10 + $0x120] sm:$0xff]  ;;  %v8286_v59 = vsub.f32 %v26080_v22, %v26081_v1  ;;  %v8293_v1 = vsub.f32 %v26083_v24, %v26084_v48 }
 0xd44   : > { %16658 = vmatpush3.bf16.msra.mxu1 %v22965_v44  ;;  %16857 = vmatprep.subr.bf16.mxu0 %v26054_v4  ;;  %v9822_v2 = vand.u32 4294901760, %v22983_v39  ;;  %v9825_v10 = vand.u32 4294901760, %v22996_v42 }
 0xd45   : > { %16659 = vmatprep.subr.bf16.mxu1 %v26054_v4  ;;  %14320 = vmatprep.mubr.msk.f32.mxu1 %vm17826_vm4, %v26050_v6  ;;  %v8287_v55 = vand.u32 4294901760, %v8286_v59  ;;  %v8294_v35 = vand.u32 4294901760, %v8293_v1  ;;  %v23065_v1 = vsub.f32 %v7616_v53, %v9813_v47  ;;  %v26098_v53 = vand.u32 4294901760, %v26097_v21  ;;  %v26099_v47 = vld [vmem:[#allocation37_spill] sm:$0xff] }
 0xd47   : > { %16859 = vmatpush3.bf16.msra.mxu0 %v16858_v8  ;;  %v26078_v8 = vand.u32 4294901760, %v22457_v26  ;;  %v9828_v26 = vand.u32 4294901760, %v22998_v11  ;;  %v16669_v62 = vpack.c.bf16 %v8287_v55, %v8280_v28  ;;  %v16672_v59 = vpack.c.bf16 %v8301_v33, %v8294_v35 }
 0xd48   : > { %16661 = vmatpush3.bf16.msra.mxu1 %v22979_v34  ;;  %16872 = vmatprep.subr.bf16.mxu0 %v26054_v4  ;;  %v26096_v28 = vand.u32 4294901760, %v23037_v3  ;;  %v8321_v45 = vsub.f32 %v26097_v21, %v26098_v53  ;;  %v23086_v35 = vsub.f32 %v22981_v36, %v9819_v32  ;;  %v23089_v33 = vsub.f32 %v22983_v39, %v9822_v2 }
 0xd49   : > { %v23009_v49 = vpack.c.bf16 %v26078_v8, %v26077_v43  ;;  %16662 = vmatprep.subr.bf16.mxu1 %v26054_v4  ;;  %v23023_v43 = vpack.c.bf16 %v9822_v2, %v9819_v32  ;;  %v23025_v8 = vld [vmem:[#allocation10 + $0x130] sm:$0xff]  ;;  %v23051_v46 = vpack.c.bf16 %v9828_v26, %v9825_v10  ;;  %v16897_v16 = vpack.c.bf16 %v23067_v20, %v23065_v1 }
 0xd4a   : > { %14625 = vmatmul.mubr.f32.vlgmr.msra.gmra.mrb[16].mxu0 %v22851_v5  ;;  %v9831_v5 = vand.u32 4294901760, %v23025_v8  ;;  %v9888_v55 = vsub.f32 %v23037_v3, %v26096_v28  ;;  %v8322_v28 = vand.u32 4294901760, %v8321_v45  ;;  %v23097_v36 = vsub.f32 %v22996_v42, %v9825_v10 }
 0xd4b   : > { %16874 = vmatpush3.bf16.msra.mxu0 %v22992_v14  ;;  %26082 = vst [vmem:[#allocation85_spill] sm:$0xff] %v23023_v43  ;;  %14662 = vmatprep.mubr.msk.f32.mxu0 %vm17826_vm4, %v26050_v6  ;;  %v26088_v14 = vand.u32 4294901760, %v26087_v51  ;;  %v9834_v51 = vand.u32 4294901760, %v7623_v17  ;;  %v23100_v39 = vsub.f32 %v22998_v11, %v9828_v26  ;;  %v16900_v32 = vpack.c.bf16 %v23089_v33, %v23086_v35 }
 0xd4c   : > { %16664 = vmatpush3.bf16.msra.mxu1 %v23009_v49  ;;  %16875 = vmatprep.subr.bf16.mxu0 %v26054_v4  ;;  %v16681_v10 = vpack.c.bf16 %v26080_v22, %v22471_v41  ;;  %v24983_v26 = vand.u32 4294901760, %v23065_v1  ;;  %v24972_v22 = vand.u32 4294901760, %v23086_v35 }
 0xd4d   : > { %v23045_v48 = vpack.c.bf16 %v26090_v31, %v26088_v14  ;;  %16665 = vmatprep.subr.bf16.mxu1 %v26054_v4  ;;  %v26092_v31 = vld [vmem:[#allocation117_spill] sm:$0xff]  ;;  %v23111_v42 = vsub.f32 %v7623_v17, %v9834_v51  ;;  %v16903_v11 = vpack.c.bf16 %v23100_v39, %v23097_v36  ;;  %v16684_v17 = vpack.c.bf16 %v26085_v61, %v26083_v24 }
 0xd4e   : > { %v26093_v14 = vand.u32 4294901760, %v26092_v31  ;;  %v16687_v61 = vpack.c.bf16 %v26094_v9, %v26092_v31  ;;  %v16690_v9 = vpack.c.bf16 %v26099_v47, %v26097_v21 }
 0xd4f   : > { %16877 = vmatpush3.bf16.msra.mxu0 %v23023_v43  ;;  %v24967_v45 = vand.u32 4294901760, %v23111_v42 }
 0xd50   : > { %v8307_v0 = vsub.f32 %v26092_v31, %v26093_v14  ;;  %16667 = vmatpush3.bf16.msra.mxu1 %v23045_v48  ;;  %16878 = vmatprep.subr.bf16.mxu0 %v26054_v4  ;;  %v23070_v14 = vpack.c.bf16 %v9834_v51, %v9831_v5  ;;  %v24971_v51 = vand.u32 4294901760, %v23089_v33 }
 0xd51   : > { %16668 = vmatprep.subr.bf16.mxu1 %v26054_v4 }
 0xd52   : > { %v8308_v43 = vand.u32 4294901760, %v8307_v0  ;;  %v9889_v0 = vand.u32 4294901760, %v9888_v55  ;;  %v16924_v24 = vpack.c.bf16 %v24971_v51, %v24972_v22  ;;  %v24969_v55 = vand.u32 4294901760, %v23100_v39 }
 0xd53   : > { %14321 = vmatmul.mubr.f32.vlgmr.msra.gmra.mrb[88].mxu1 %v8269_v7  ;;  %16880 = vmatpush3.bf16.msra.mxu0 %v23051_v46  ;;  %v26100_v7 = vand.u32 4294901760, %v26099_v47  ;;  %v26102_v51 = vand.u32 4294901760, %v22987_v56 }
 0xd54   : > { %16670 = vmatpush3.bf16.msra.mxu1 %v16669_v62  ;;  %16881 = vmatprep.subr.bf16.mxu0 %v26054_v4  ;;  %v16675_v62 = vpack.c.bf16 %v8315_v40, %v8308_v43  ;;  %v23109_v43 = vsub.f32 %v23025_v8, %v9831_v5  ;;  %v24973_v8 = vand.u32 4294901760, %v23067_v20 }
 0xd55   : > { %v8328_v13 = vsub.f32 %v26099_v47, %v26100_v7  ;;  %16671 = vmatprep.subr.bf16.mxu1 %v26054_v4  ;;  %14339 = vmatprep.mubr.msk.f32.mxu1 %vm17826_vm4, %v26050_v6  ;;  %v7624_v7 = vld [vmem:[#allocation10 + $0x140] sm:$0xff] }
 0xd56   : > { %v16906_v5 = vpack.c.bf16 %v23111_v42, %v23109_v43  ;;  %v16921_v41 = vpack.c.bf16 %v24973_v8, %v24983_v26  ;;  %v24968_v40 = vand.u32 4294901760, %v23109_v43  ;;  %v10353_v47 = vand.u32 4294901760, %v7624_v7 }
 0xd57   : > { %16883 = vmatpush3.bf16.msra.mxu0 %v23070_v14  ;;  %v8329_v53 = vand.u32 4294901760, %v8328_v13  ;;  %v7625_v13 = vld [vmem:[#allocation10 + $0x148] sm:$0xff] }
 0xd58   : > { %16673 = vmatpush3.bf16.msra.mxu1 %v16672_v59  ;;  %16896 = vmatprep.subr.bf16.mxu0 %v26054_v4  ;;  %v24970_v59 = vand.u32 4294901760, %v23097_v36  ;;  %v16930_v21 = vpack.c.bf16 %v24967_v45, %v24968_v40 }
 0xd59   : > { %16674 = vmatprep.subr.bf16.mxu1 %v26054_v4  ;;  %v16678_v2 = vpack.c.bf16 %v8329_v53, %v8322_v28 }
 0xd5a   : > { %14663 = vmatmul.mubr.f32.vlgmr.msra.gmra.mrb[18].mxu0 %v9889_v0  ;;  %v16927_v31 = vpack.c.bf16 %v24969_v55, %v24970_v59  ;;  %v7626_v0 = vld [vmem:[#allocation10 + $0x150] sm:$0xff] }
 0xd5b   : > { %16898 = vmatpush3.bf16.msra.mxu0 %v16897_v16  ;;  %14700 = vmatprep.mubr.msk.f32.mxu0 %vm17826_vm4, %v26050_v6  ;;  %v10356_v16 = vand.u32 4294901760, %v7625_v13  ;;  %v10359_v53 = vand.u32 4294901760, %v7626_v0 }
 0xd5c   : > { %16676 = vmatpush3.bf16.msra.mxu1 %v16675_v62  ;;  %16899 = vmatprep.subr.bf16.mxu0 %v26054_v4  ;;  %v7627_v62 = vld [vmem:[#allocation10 + $0x158] sm:$0xff] }
 0xd5d   : > { %16677 = vmatprep.subr.bf16.mxu1 %v26054_v4  ;;  %v23171_v28 = vpack.c.bf16 %v10356_v16, %v10353_v47  ;;  %v23201_v59 = vsub.f32 %v7625_v13, %v10356_v16  ;;  %v26104_v16 = vand.u32 4294901760, %v22740_v15 }
 0xd5f   : > { %16901 = vmatpush3.bf16.msra.mxu0 %v16900_v32  ;;  %v10362_v32 = vand.u32 4294901760, %v7627_v62 }
 0xd60   : > { %16679 = vmatpush3.bf16.msra.mxu1 %v16678_v2  ;;  %16902 = vmatprep.subr.bf16.mxu0 %v26054_v4  ;;  %v26101_v2 = vld [vmem:[#allocation115_spill] sm:$0xff] }
 0xd61   : > { %16680 = vmatprep.subr.bf16.mxu1 %v26054_v4 }
 0xd63   : > { %14340 = vmatmul.mubr.f32.vlgmr.msra.gmra.mrb[90].mxu1 %v22700_v50  ;;  %16904 = vmatpush3.bf16.msra.mxu0 %v16903_v11  ;;  %v23174_v11 = vand.u32 4294901760, %v26101_v2 }
 0xd64   : > { %16682 = vmatpush3.bf16.msra.mxu1 %v16681_v10  ;;  %16905 = vmatprep.subr.bf16.mxu0 %v26054_v4  ;;  %v7628_v10 = vld [vmem:[#allocation10 + $0x160] sm:$0xff] }
 0xd65   : > { %16683 = vmatprep.subr.bf16.mxu1 %v26054_v4  ;;  %14358 = vmatprep.mubr.msk.f32.mxu1 %vm17826_vm4, %v26050_v6 }
 0xd67   : > { %16907 = vmatpush3.bf16.msra.mxu0 %v16906_v5  ;;  %v7629_v5 = vld [vmem:[#allocation10 + $0x168] sm:$0xff] }
 0xd68   : > { %16685 = vmatpush3.bf16.msra.mxu1 %v16684_v17  ;;  %16920 = vmatprep.subr.bf16.mxu0 %v26054_v4  ;;  %v23181_v17 = vpack.c.bf16 %v10362_v32, %v10359_v53 }
 0xd69   : > { %16686 = vmatprep.subr.bf16.mxu1 %v26054_v4 }
 0xd6a   : > { %14701 = vmatmul.mubr.f32.vlgmr.msra.gmra.mrb[20].mxu0 %v23037_v3 }
 0xd6b   : > { %16922 = vmatpush3.bf16.msra.mxu0 %v16921_v41  ;;  %14738 = vmatprep.mubr.msk.f32.mxu0 %vm17826_vm4, %v26050_v6  ;;  %v10365_v41 = vand.u32 4294901760, %v7628_v10 }
 0xd6c   : > { %16688 = vmatpush3.bf16.msra.mxu1 %v16687_v61  ;;  %16923 = vmatprep.subr.bf16.mxu0 %v26054_v4  ;;  %v10368_v61 = vand.u32 4294901760, %v7629_v5 }
 0xd6d   : > { %16689 = vmatprep.subr.bf16.mxu1 %v26054_v4 }
 0xd6f   : > { %16925 = vmatpush3.bf16.msra.mxu0 %v16924_v24  ;;  %v23187_v24 = vsub.f32 %v26101_v2, %v23174_v11  ;;  %v23199_v2 = vsub.f32 %v7624_v7, %v10353_v47  ;;  %v23216_v7 = vsub.f32 %v7626_v0, %v10359_v53  ;;  %v8826_v0 = vsub.f32 %v22740_v15, %v26104_v16 }
 0xd70   : > { %16691 = vmatpush3.bf16.msra.mxu1 %v16690_v9  ;;  %16926 = vmatprep.subr.bf16.mxu0 %v26054_v4  ;;  %v7630_v9 = vld [vmem:[#allocation10 + $0x170] sm:$0xff]  ;;  %v23234_v53 = vsub.f32 %v7629_v5, %v10368_v61 }
 0xd71   : > { %16692 = vmatprep.subr.bf16.mxu1 %v26054_v4  ;;  %v10371_v45 = vand.u32 4294901760, %v7630_v9  ;;  %v24974_v55 = vand.u32 4294901760, %v23187_v24 }
 0xd73   : > { %14359 = vmatmul.mubr.f32.vlgmr.msra.gmra.mrb[92].mxu1 %v22987_v56  ;;  %16928 = vmatpush3.bf16.msra.mxu0 %v16927_v31  ;;  %v7631_v31 = vld [vmem:[#allocation10 + $0x178] sm:$0xff]  ;;  %v10428_v8 = vsub.f32 %v23187_v24, %v24974_v55  ;;  %v23218_v56 = vsub.f32 %v7627_v62, %v10362_v32  ;;  %v23232_v62 = vsub.f32 %v7628_v10, %v10365_v41  ;;  %v8827_v10 = vand.u32 4294901760, %v8826_v0  ;;  %v7638_v55 = vld [vmem:[#allocation10 + $0x1b0] sm:$0xff] }
 0xd74   : > { %16694 = vmatpush3.bf16.msra.mxu1 %v22965_v44  ;;  %16929 = vmatprep.subr.bf16.mxu0 %v26054_v4  ;;  %v10374_v40 = vand.u32 4294901760, %v7631_v31  ;;  %v23249_v5 = vsub.f32 %v7630_v9, %v10371_v45 }
 0xd75   : > { %16695 = vmatprep.subr.bf16.mxu1 %v26054_v4  ;;  %14377 = vmatprep.mubr.msk.f32.mxu1 %vm17826_vm4, %v26050_v6  ;;  %v10429_v13 = vand.u32 4294901760, %v10428_v8  ;;  %v26105_v8 = vand.u32 4294901760, %v22759_v25 }
 0xd76   : > { %v23206_v22 = vpack.c.bf16 %v10374_v40, %v10371_v45  ;;  %v26108_v45 = vand.u32 4294901760, %v22771_v23 }
 0xd77   : > { %16931 = vmatpush3.bf16.msra.mxu0 %v16930_v21  ;;  %v23193_v21 = vpack.c.bf16 %v10368_v61, %v10365_v41  ;;  %v8833_v32 = vsub.f32 %v22759_v25, %v26105_v8  ;;  %v23251_v41 = vsub.f32 %v7631_v31, %v10374_v40  ;;  %v16975_v25 = vpack.c.bf16 %v23234_v53, %v23232_v62 }
 0xd78   : > { %16697 = vmatpush3.bf16.msra.mxu1 %v22979_v34  ;;  %16944 = vmatprep.subr.bf16.mxu0 %v26054_v4  ;;  %v8854_v40 = vsub.f32 %v22771_v23, %v26108_v45  ;;  %v24982_v31 = vand.u32 4294901760, %v23199_v2  ;;  %v26109_v23 = vand.u32 4294901760, %v22780_v57  ;;  %v7633_v45 = vld [vmem:[#allocation10 + $0x188] sm:$0xff] }
 0xd79   : > { %16698 = vmatprep.subr.bf16.mxu1 %v26054_v4  ;;  %v16978_v9 = vpack.c.bf16 %v23251_v41, %v23249_v5 }
 0xd7a   : > { %14739 = vmatmul.mubr.f32.vlgmr.msra.gmra.mrb[22].mxu0 %v23001_v58  ;;  %v8855_v16 = vand.u32 4294901760, %v8854_v40  ;;  %v8861_v0 = vsub.f32 %v22780_v57, %v26109_v23  ;;  %v7635_v23 = vld [vmem:[#allocation10 + $0x198] sm:$0xff] }
 0xd7b   : > { %16946 = vmatpush3.bf16.msra.mxu0 %v23171_v28  ;;  %14776 = vmatprep.mubr.msk.f32.mxu0 %vm17826_vm4, %v26050_v6 }
 0xd7c   : > { %16700 = vmatpush3.bf16.msra.mxu1 %v23009_v49  ;;  %16947 = vmatprep.subr.bf16.mxu0 %v26054_v4 }
 0xd7d   : > { %16701 = vmatprep.subr.bf16.mxu1 %v26054_v4 }
 0xd7f   : > { %16949 = vmatpush3.bf16.msra.mxu0 %v23181_v17 }
 0xd80   : > { %16703 = vmatpush3.bf16.msra.mxu1 %v23045_v48  ;;  %16950 = vmatprep.subr.bf16.mxu0 %v26054_v4 }
 0xd81   : > { %16716 = vmatprep.subr.bf16.mxu1 %v26054_v4 }
 0xd83   : > { %14378 = vmatmul.mubr.f32.vlgmr.msra.gmra.mrb[94].mxu1 %v26102_v51  ;;  %16952 = vmatpush3.bf16.msra.mxu0 %v23193_v21  ;;  %v16969_v51 = vpack.c.bf16 %v23201_v59, %v23199_v2 }
 0xd84   : > { %16718 = vmatpush3.bf16.msra.mxu1 %v22965_v44  ;;  %16953 = vmatprep.subr.bf16.mxu0 %v26054_v4  ;;  %v26103_v44 = vand.u32 4294901760, %v22738_v63 }
 0xd85   : > { %16719 = vmatprep.subr.bf16.mxu1 %v26054_v4  ;;  %14415 = vmatprep.mubr.msk.f32.mxu1 %vm17826_vm4, %v26050_v6 }
 0xd86   : > { %v8819_v47 = vsub.f32 %v22738_v63, %v26103_v44  ;;  %v26106_v63 = vand.u32 4294901760, %v22761_v12 }
 0xd87   : > { %16955 = vmatpush3.bf16.msra.mxu0 %v23206_v22 }
 0xd88   : > { %16721 = vmatpush3.bf16.msra.mxu1 %v22979_v34  ;;  %16968 = vmatprep.subr.bf16.mxu0 %v26054_v4  ;;  %v16972_v34 = vpack.c.bf16 %v23218_v56, %v23216_v7  ;;  %v8840_v44 = vsub.f32 %v22761_v12, %v26106_v63  ;;  %v8820_v15 = vand.u32 4294901760, %v8819_v47  ;;  %v8834_v12 = vand.u32 4294901760, %v8833_v32 }
 0xd89   : > { %16722 = vmatprep.subr.bf16.mxu1 %v26054_v4  ;;  %v24981_v47 = vand.u32 4294901760, %v23201_v59  ;;  %v24980_v32 = vand.u32 4294901760, %v23216_v7  ;;  %v24979_v63 = vand.u32 4294901760, %v23218_v56 }
 0xd8a   : > { %14777 = vmatmul.mubr.f32.vlgmr.msra.gmra.mrb[24].mxu0 %v10429_v13  ;;  %v8841_v61 = vand.u32 4294901760, %v8840_v44 }
 0xd8b   : > { %16970 = vmatpush3.bf16.msra.mxu0 %v16969_v51  ;;  %14814 = vmatprep.mubr.msk.f32.mxu0 %vm17826_vm4, %v26050_v6  ;;  %v26107_v51 = vand.u32 4294901760, %v22769_v60  ;;  %v16993_v8 = vpack.c.bf16 %v24981_v47, %v24982_v31  ;;  %v26118_v47 = vand.u32 4294901760, %v22727_v27 }
 0xd8c   : > { %16724 = vmatpush3.bf16.msra.mxu1 %v23009_v49  ;;  %16971 = vmatprep.subr.bf16.mxu0 %v26054_v4  ;;  %v16741_v49 = vpack.c.bf16 %v8827_v10, %v8820_v15  ;;  %v16996_v15 = vpack.c.bf16 %v24979_v63, %v24980_v32  ;;  %v24978_v10 = vand.u32 4294901760, %v23232_v62 }
 0xd8d   : > { %16725 = vmatprep.subr.bf16.mxu1 %v26054_v4  ;;  %v8847_v13 = vsub.f32 %v22769_v60, %v26107_v51  ;;  %v24975_v51 = vand.u32 4294901760, %v23251_v41 }
 0xd8f   : > { %16973 = vmatpush3.bf16.msra.mxu0 %v16972_v34  ;;  %v8848_v60 = vand.u32 4294901760, %v8847_v13  ;;  %v7632_v13 = vld [vmem:[#allocation10 + $0x180] sm:$0xff] }
 0xd90   : > { %16727 = vmatpush3.bf16.msra.mxu1 %v23045_v48  ;;  %16974 = vmatprep.subr.bf16.mxu0 %v26054_v4  ;;  %v16744_v48 = vpack.c.bf16 %v8841_v61, %v8834_v12 }
 0xd91   : > { %16740 = vmatprep.subr.bf16.mxu1 %v26054_v4  ;;  %v16747_v57 = vpack.c.bf16 %v8855_v16, %v8848_v60  ;;  %v26111_v60 = vld [vmem:[#allocation86_spill] sm:$0xff]  ;;  %v7634_v16 = vld [vmem:[#allocation10 + $0x190] sm:$0xff] }
 0xd93   : > { %14416 = vmatmul.mubr.f32.vlgmr.msra.gmra.mrb[96].mxu1 %v22700_v50  ;;  %16976 = vmatpush3.bf16.msra.mxu0 %v16975_v25  ;;  %v26110_v50 = vand.u32 4294901760, %v22782_v38  ;;  %v24977_v25 = vand.u32 4294901760, %v23234_v53 }
 0xd94   : > { %16742 = vmatpush3.bf16.msra.mxu1 %v16741_v49  ;;  %16977 = vmatprep.subr.bf16.mxu0 %v26054_v4  ;;  %v24976_v49 = vand.u32 4294901760, %v23249_v5 }
 0xd95   : > { %v8868_v34 = vsub.f32 %v22782_v38, %v26110_v50  ;;  %16743 = vmatprep.subr.bf16.mxu1 %v26054_v4  ;;  %14453 = vmatprep.mubr.msk.f32.mxu1 %vm17826_vm4, %v26050_v6  ;;  %v8862_v38 = vand.u32 4294901760, %v8861_v0  ;;  %v16999_v61 = vpack.c.bf16 %v24977_v25, %v24978_v10  ;;  %v10899_v50 = vand.u32 4294901760, %v7634_v16 }
 0xd96   : > { %v17002_v40 = vpack.c.bf16 %v24975_v51, %v24976_v49  ;;  %v7639_v51 = vld [vmem:[#allocation10 + $0x1b8] sm:$0xff]  ;;  %v10911_v25 = vand.u32 4294901760, %v7638_v55 }
 0xd97   : > { %16979 = vmatpush3.bf16.msra.mxu0 %v16978_v9  ;;  %v8869_v44 = vand.u32 4294901760, %v8868_v34  ;;  %v10893_v9 = vand.u32 4294901760, %v7632_v13  ;;  %v10902_v34 = vand.u32 4294901760, %v7635_v23  ;;  %v10914_v10 = vand.u32 4294901760, %v7639_v51 }
 0xd98   : > { %16745 = vmatpush3.bf16.msra.mxu1 %v16744_v48  ;;  %16992 = vmatprep.subr.bf16.mxu0 %v26054_v4  ;;  %v10896_v48 = vand.u32 4294901760, %v7633_v45 }
 0xd99   : > { %16746 = vmatprep.subr.bf16.mxu1 %v26054_v4  ;;  %v16750_v12 = vpack.c.bf16 %v8869_v44, %v8862_v38  ;;  %v7636_v38 = vld [vmem:[#allocation10 + $0x1a0] sm:$0xff]  ;;  %v7637_v44 = vld [vmem:[#allocation10 + $0x1a8] sm:$0xff]  ;;  %v23351_v31 = vpack.c.bf16 %v10914_v10, %v10911_v25  ;;  %v23363_v27 = vsub.f32 %v7635_v23, %v10902_v34 }
 0xd9a   : > { %14815 = vmatmul.mubr.f32.vlgmr.msra.gmra.mrb[26].mxu0 %v23187_v24  ;;  %v23316_v0 = vpack.c.bf16 %v10896_v48, %v10893_v9  ;;  %v23346_v32 = vsub.f32 %v7633_v45, %v10896_v48 }
 0xd9b   : > { %16994 = vmatpush3.bf16.msra.mxu0 %v16993_v8  ;;  %14852 = vmatprep.mubr.msk.f32.mxu0 %vm17826_vm4, %v26050_v6  ;;  %v23319_v8 = vand.u32 4294901760, %v22752_v29  ;;  %26119 = vst [vmem:[#allocation48_spill] sm:$0xff] %v23351_v31 }
 0xd9c   : > { %16748 = vmatpush3.bf16.msra.mxu1 %v16747_v57  ;;  %16995 = vmatprep.subr.bf16.mxu0 %v26054_v4  ;;  %26112 = vst [vmem:[#allocation42_spill] sm:$0xff] %v23316_v0  ;;  %v26114_v57 = vld [vmem:[#allocation110_spill] sm:$0xff] }
 0xd9d   : > { %16749 = vmatprep.subr.bf16.mxu1 %v26054_v4  ;;  %26113 = vst [vmem:[#allocation44_spill] sm:$0xff] %v23319_v8 }
 0xd9f   : > { %16997 = vmatpush3.bf16.msra.mxu0 %v16996_v15  ;;  %v23326_v15 = vpack.c.bf16 %v10902_v34, %v10899_v50  ;;  %v26124_v34 = vand.u32 4294901760, %v22892_v18 }
 0xda0   : > { %16751 = vmatpush3.bf16.msra.mxu1 %v16750_v12  ;;  %16998 = vmatprep.subr.bf16.mxu0 %v26054_v4  ;;  %v10905_v12 = vand.u32 4294901760, %v7636_v38 }
 0xda1   : > { %16764 = vmatprep.subr.bf16.mxu1 %v26054_v4  ;;  %26115 = vst [vmem:[#allocation95_spill] sm:$0xff] %v23326_v15 }
 0xda2   : > { %v23377_v23 = vsub.f32 %v7636_v38, %v10905_v12 }
 0xda3   : > { %14454 = vmatmul.mubr.f32.vlgmr.msra.gmra.mrb[98].mxu1 %v22719_v54  ;;  %17000 = vmatpush3.bf16.msra.mxu0 %v16999_v61  ;;  %v10908_v61 = vand.u32 4294901760, %v7637_v44 }
 0xda4   : > { %16766 = vmatpush3.bf16.msra.mxu1 %v26111_v60  ;;  %17001 = vmatprep.subr.bf16.mxu0 %v26054_v4  ;;  %26122 = vst [vmem:[#allocation49_spill] sm:$0xff] %v23377_v23 }
 0xda5   : > { %16767 = vmatprep.subr.bf16.mxu1 %v26054_v4  ;;  %14491 = vmatprep.mubr.msk.f32.mxu1 %vm17826_vm4, %v26050_v6  ;;  %v23338_v49 = vpack.c.bf16 %v10908_v61, %v10905_v12  ;;  %v23396_v12 = vsub.f32 %v7638_v55, %v10911_v25  ;;  %v26132_v55 = vld [vmem:[#allocation121_spill] sm:$0xff] }
 0xda6   : > { %v26133_v25 = vand.u32 4294901760, %v26132_v55 }
 0xda7   : > { %17003 = vmatpush3.bf16.msra.mxu0 %v17002_v40  ;;  %v23332_v40 = vsub.f32 %v22752_v29, %v23319_v8  ;;  %26117 = vst [vmem:[#allocation47_spill] sm:$0xff] %v23338_v49  ;;  %v23344_v29 = vsub.f32 %v7632_v13, %v10893_v9  ;;  %v23361_v13 = vsub.f32 %v7634_v16, %v10899_v50  ;;  %v26120_v9 = vand.u32 4294901760, %v22875_v19 }
 0xda8   : > { %16769 = vmatpush3.bf16.msra.mxu1 %v26114_v57  ;;  %17016 = vmatprep.subr.bf16.mxu0 %v26054_v4  ;;  %v23379_v50 = vsub.f32 %v7637_v44, %v10908_v61  ;;  %26128 = vst [vmem:[#allocation54_spill] sm:$0xff] %v23396_v12  ;;  %v23398_v61 = vsub.f32 %v7639_v51, %v10914_v10 }
 0xda9   : > { %16770 = vmatprep.subr.bf16.mxu1 %v26054_v4  ;;  %26116 = vst [vmem:[#allocation45_spill] sm:$0xff] %v23332_v40  ;;  %v24984_v63 = vand.u32 4294901760, %v23332_v40  ;;  %v9359_v48 = vsub.f32 %v22875_v19, %v26120_v9  ;;  %v26125_v19 = vld [vmem:[#allocation122_spill] sm:$0xff]  ;;  %v9394_v10 = vsub.f32 %v26132_v55, %v26133_v25  ;;  %v24992_v51 = vand.u32 4294901760, %v23344_v29 }
 0xdaa   : > { %14853 = vmatmul.mubr.f32.vlgmr.msra.gmra.mrb[28].mxu0 %v23174_v11  ;;  %26123 = vst [vmem:[#allocation50_spill] sm:$0xff] %v23379_v50  ;;  %v26126_v9 = vand.u32 4294901760, %v26125_v19  ;;  %26129 = vst [vmem:[#allocation56_spill] sm:$0xff] %v23398_v61 }
 0xdab   : > { %17018 = vmatpush3.bf16.msra.mxu0 %v23316_v0  ;;  %14890 = vmatprep.mubr.msk.f32.mxu0 %vm17826_vm4, %v26050_v6  ;;  %v10968_v26 = vsub.f32 %v23332_v40, %v24984_v63 }
 0xdac   : > { %16772 = vmatpush3.bf16.msra.mxu1 %v22721_v37  ;;  %17019 = vmatprep.subr.bf16.mxu0 %v26054_v4  ;;  %v9380_v63 = vsub.f32 %v26125_v19, %v26126_v9  ;;  %v9395_v19 = vand.u32 4294901760, %v9394_v10  ;;  %v26134_v9 = vld [vmem:[#allocation107_spill] sm:$0xff] }
 0xdad   : > { %16773 = vmatprep.subr.bf16.mxu1 %v26054_v4  ;;  %v10969_v45 = vand.u32 4294901760, %v10968_v26  ;;  %v17044_v26 = vpack.c.bf16 %v23363_v27, %v23361_v13 }
 0xdaf   : > { %17021 = vmatpush3.bf16.msra.mxu0 %v23326_v15 }
 0xdb0   : > { %16775 = vmatpush3.bf16.msra.mxu1 %v22746_v30  ;;  %17022 = vmatprep.subr.bf16.mxu0 %v26054_v4 }
 0xdb1   : > { %16788 = vmatprep.subr.bf16.mxu1 %v26054_v4 }
 0xdb3   : > { %14492 = vmatmul.mubr.f32.vlgmr.msra.gmra.mrb[100].mxu1 %v26118_v47  ;;  %17024 = vmatpush3.bf16.msra.mxu0 %v23338_v49  ;;  %v17041_v47 = vpack.c.bf16 %v23346_v32, %v23344_v29  ;;  %v7647_v49 = vld [vmem:[#allocation10 + $0x1f8] sm:$0xff] }
 0xdb4   : > { %16790 = vmatpush3.bf16.msra.mxu1 %v26111_v60  ;;  %17025 = vmatprep.subr.bf16.mxu0 %v26054_v4  ;;  %v26121_v60 = vand.u32 4294901760, %v22877_v52 }
 0xdb5   : > { %16791 = vmatprep.subr.bf16.mxu1 %v26054_v4  ;;  %14529 = vmatprep.mubr.msk.f32.mxu1 %vm17826_vm4, %v26050_v6 }
 0xdb6   : > { %v9366_v16 = vsub.f32 %v22877_v52, %v26121_v60  ;;  %v9360_v52 = vand.u32 4294901760, %v9359_v48  ;;  %v9381_v60 = vand.u32 4294901760, %v9380_v63  ;;  %v26130_v48 = vld [vmem:[#allocation114_spill] sm:$0xff]  ;;  %v17050_v63 = vpack.c.bf16 %v23398_v61, %v23396_v12 }
 0xdb7   : > { %17027 = vmatpush3.bf16.msra.mxu0 %v23351_v31  ;;  %v7646_v31 = vld [vmem:[#allocation10 + $0x1f0] sm:$0xff] }
 0xdb8   : > { %16793 = vmatpush3.bf16.msra.mxu1 %v26114_v57  ;;  %17040 = vmatprep.subr.bf16.mxu0 %v26054_v4  ;;  %v9373_v57 = vsub.f32 %v22892_v18, %v26124_v34  ;;  %v9367_v38 = vand.u32 4294901760, %v9366_v16  ;;  %v26131_v16 = vand.u32 4294901760, %v26130_v48 }
 0xdb9   : > { %16794 = vmatprep.subr.bf16.mxu1 %v26054_v4 }
 0xdba   : > { %14891 = vmatmul.mubr.f32.vlgmr.msra.gmra.mrb[30].mxu0 %v10969_v45  ;;  %v9374_v45 = vand.u32 4294901760, %v9373_v57  ;;  %v9387_v34 = vsub.f32 %v26130_v48, %v26131_v16  ;;  %v24990_v48 = vand.u32 4294901760, %v23361_v13  ;;  %v24989_v16 = vand.u32 4294901760, %v23363_v27 }
 0xdbb   : > { %17042 = vmatpush3.bf16.msra.mxu0 %v17041_v47  ;;  %14928 = vmatprep.mubr.msk.f32.mxu0 %vm17826_vm4, %v26050_v6  ;;  %v17047_v47 = vpack.c.bf16 %v23379_v50, %v23377_v23 }
 0xdbc   : > { %16796 = vmatpush3.bf16.msra.mxu1 %v22721_v37  ;;  %17043 = vmatprep.subr.bf16.mxu0 %v26054_v4  ;;  %v16813_v37 = vpack.c.bf16 %v9367_v38, %v9360_v52  ;;  %v9388_v57 = vand.u32 4294901760, %v9387_v34  ;;  %v26135_v52 = vand.u32 4294901760, %v26134_v9  ;;  %v17068_v10 = vpack.c.bf16 %v24989_v16, %v24990_v48  ;;  %v26142_v16 = vld [vmem:[#allocation120_spill] sm:$0xff] }
 0xdbd   : > { %v23393_v44 = vpop.f32.mrb[4].mxu0  ;;  %16797 = vmatprep.subr.bf16.mxu1 %v26054_v4  ;;  %v23468_v48 = vand.u32 4294901760, %v26142_v16 }
 0xdbe   : > { %26127 = vst [vmem:[#allocation53_spill] sm:$0xff] %v23393_v44  ;;  %v14398_v18 = vpop.f32.mrb[5].mxu0  ;;  %v9401_v38 = vsub.f32 %v26134_v9, %v26135_v52  ;;  %v16819_v34 = vpack.c.bf16 %v9395_v19, %v9388_v57  ;;  %v24985_v9 = vand.u32 4294901760, %v23379_v50  ;;  %v11454_v44 = vand.u32 4294901760, %v7647_v49  ;;  %v26149_v50 = vld [vmem:[#allocation108_spill] sm:$0xff] }
 0xdbf   : > { %17045 = vmatpush3.bf16.msra.mxu0 %v17044_v26  ;;  %v24991_v26 = vand.u32 4294901760, %v23346_v32  ;;  %v26136_v18 = vld [vmem:[#allocation41_spill] sm:$0xff] }
 0xdc0   : > { %16799 = vmatpush3.bf16.msra.mxu1 %v22746_v30  ;;  %17046 = vmatprep.subr.bf16.mxu0 %v26054_v4  ;;  %v16816_v30 = vpack.c.bf16 %v9381_v60, %v9374_v45  ;;  %v9402_v55 = vand.u32 4294901760, %v9401_v38  ;;  %v24988_v38 = vand.u32 4294901760, %v23396_v12 }
 0xdc1   : > { %16812 = vmatprep.subr.bf16.mxu1 %v26054_v4 }
 0xdc3   : > { %14530 = vmatmul.mubr.f32.vlgmr.msra.gmra.mrb[102].mxu1 %v22719_v54  ;;  %17048 = vmatpush3.bf16.msra.mxu0 %v17047_v47  ;;  %v26137_v54 = vand.u32 4294901760, %v26136_v18 }
 0xdc4   : > { %16814 = vmatpush3.bf16.msra.mxu1 %v16813_v37  ;;  %17049 = vmatprep.subr.bf16.mxu0 %v26054_v4  ;;  %v17065_v37 = vpack.c.bf16 %v24991_v26, %v24992_v51  ;;  %v26143_v26 = vld [vmem:[#allocation88_spill] sm:$0xff]  ;;  %v7644_v51 = vld [vmem:[#allocation10 + $0x1e0] sm:$0xff] }
 0xdc5   : > { %v9408_v47 = vsub.f32 %v26136_v18, %v26137_v54  ;;  %16815 = vmatprep.subr.bf16.mxu1 %v26054_v4  ;;  %14567 = vmatprep.mubr.msk.f32.mxu1 %vm17826_vm4, %v26050_v6  ;;  %v24987_v18 = vand.u32 4294901760, %v23398_v61  ;;  %v7640_v54 = vld [vmem:[#allocation10 + $0x1c0] sm:$0xff] }
 0xdc6   : > { %v7731_v45 = vpop.f32.mrb[76].mxu1  ;;  %v26148_v61 = vld [vmem:[#allocation106_spill] sm:$0xff] }
 0xdc7   : > { %17051 = vmatpush3.bf16.msra.mxu0 %v17050_v63  ;;  %v14208_v60 = vpop.f32.mrb[77].mxu1  ;;  %v9409_v25 = vand.u32 4294901760, %v9408_v47  ;;  %v24986_v63 = vand.u32 4294901760, %v23377_v23  ;;  %v7641_v47 = vld [vmem:[#allocation10 + $0x1c8] sm:$0xff] }
 0xdc8   : > { %16817 = vmatpush3.bf16.msra.mxu1 %v16816_v30  ;;  %17064 = vmatprep.subr.bf16.mxu0 %v26054_v4  ;;  %v26139_v60 = vld [vmem:[#allocation55_spill] sm:$0xff] }
 0xdc9   : > { %16818 = vmatprep.subr.bf16.mxu1 %v26054_v4  ;;  %v16822_v30 = vpack.c.bf16 %v9409_v25, %v9402_v55  ;;  %v17071_v52 = vpack.c.bf16 %v24985_v9, %v24986_v63  ;;  %v11436_v55 = vand.u32 4294901760, %v7641_v47  ;;  %v26140_v25 = vld [vmem:[#allocation40_spill] sm:$0xff] }
 0xdca   : > { %14929 = vmatmul.mubr.f32.vlgmr.msra.gmra.mrb[32].mxu0 %v23332_v40  ;;  %v26145_v40 = vld [vmem:[#allocation30_spill] sm:$0xff] }
 0xdcb   : > { %17066 = vmatpush3.bf16.msra.mxu0 %v17065_v37  ;;  %14966 = vmatprep.mubr.msk.f32.mxu0 %vm17826_vm4, %v26050_v6  ;;  %v17074_v37 = vpack.c.bf16 %v24987_v18, %v24988_v38 }
 0xdcc   : > { %16820 = vmatpush3.bf16.msra.mxu1 %v16819_v34  ;;  %17067 = vmatprep.subr.bf16.mxu0 %v26054_v4  ;;  %v11433_v34 = vand.u32 4294901760, %v7640_v54 }
 0xdcd   : > { %v23444_v57 = vpop.f32.mrb[6].mxu0  ;;  %16821 = vmatprep.subr.bf16.mxu1 %v26054_v4 }
 0xdce   : > { %26138 = vst [vmem:[#allocation89_spill] sm:$0xff] %v23444_v57  ;;  %v14436_v19 = vpop.f32.mrb[7].mxu0  ;;  %v23465_v63 = vpack.c.bf16 %v11436_v55, %v11433_v34  ;;  %v7645_v57 = vld [vmem:[#allocation10 + $0x1e8] sm:$0xff]  ;;  %v23495_v12 = vsub.f32 %v7640_v54, %v11433_v34 }
 0xdcf   : > { %17069 = vmatpush3.bf16.msra.mxu0 %v17068_v10  ;;  %v7642_v10 = vld [vmem:[#allocation10 + $0x1d0] sm:$0xff] }
 0xdd0   : > { %16823 = vmatpush3.bf16.msra.mxu1 %v16822_v30  ;;  %17070 = vmatprep.subr.bf16.mxu0 %v26054_v4  ;;  %v7643_v30 = vld [vmem:[#allocation10 + $0x1d8] sm:$0xff]  ;;  %26141 = vst [vmem:[#allocation92_spill] sm:$0xff] %v23465_v63  ;;  %v11439_v18 = vand.u32 4294901760, %v7642_v10 }
 0xdd1   : > { %16836 = vmatprep.subr.bf16.mxu1 %v26054_v4  ;;  %v11442_v38 = vand.u32 4294901760, %v7643_v30 }
 0xdd3   : > { %14568 = vmatmul.mubr.f32.vlgmr.msra.gmra.mrb[104].mxu1 %v26139_v60  ;;  %17072 = vmatpush3.bf16.msra.mxu0 %v17071_v52 }
 0xdd4   : > { %16838 = vmatpush3.bf16.msra.mxu1 %v26140_v25  ;;  %17073 = vmatprep.subr.bf16.mxu0 %v26054_v4 }
 0xdd5   : > { %16839 = vmatprep.subr.bf16.mxu1 %v26054_v4  ;;  %14605 = vmatprep.mubr.msk.f32.mxu1 %vm17826_vm4, %v26050_v6 }
 0xdd6   : > { %v7842_v19 = vpop.f32.mrb[78].mxu1 }
 0xdd7   : > { %v7843_v52 = vadd.f32 %v7842_v19, %v7731_v45  ;;  %v14227_v9 = vpop.f32.mrb[79].mxu1  ;;  %17075 = vmatpush3.bf16.msra.mxu0 %v17074_v37  ;;  %v23475_v45 = vpack.c.bf16 %v11442_v38, %v11439_v18  ;;  %v11448_v37 = vand.u32 4294901760, %v7645_v57  ;;  %v23481_v19 = vsub.f32 %v26142_v16, %v23468_v48 }
 0xdd8   : > { %16841 = vmatpush3.bf16.msra.mxu1 %v26143_v26  ;;  %17088 = vmatprep.subr.bf16.mxu0 %v26054_v4  ;;  %v11445_v9 = vand.u32 4294901760, %v7644_v51 }
 0xdd9   : > { %16842 = vmatprep.subr.bf16.mxu1 %v26054_v4  ;;  %26144 = vst [vmem:[#allocation97_spill] sm:$0xff] %v23475_v45  ;;  %v25016_v16 = vand.u32 4294901760, %v23481_v19 }
 0xdda   : > { %14967 = vmatmul.mubr.f32.vlgmr.msra.gmra.mrb[34].mxu0 %v23319_v8  ;;  %v23489_v0 = vpack.c.bf16 %v11448_v37, %v11445_v9  ;;  %v11451_v8 = vand.u32 4294901760, %v7646_v31 }
 0xddb   : > { %17090 = vmatpush3.bf16.msra.mxu0 %v23465_v63  ;;  %15004 = vmatprep.mubr.msk.f32.mxu0 %vm17826_vm4, %v26050_v6  ;;  %v11508_v23 = vsub.f32 %v23481_v19, %v25016_v16  ;;  %v26151_v16 = vand.u32 4294901760, %v23065_v1 }
 0xddc   : > { %16844 = vmatpush3.bf16.msra.mxu1 %v26145_v40  ;;  %17091 = vmatprep.subr.bf16.mxu0 %v26054_v4  ;;  %26147 = vst [vmem:[#allocation101_spill] sm:$0xff] %v23489_v0 }
 0xddd   : > { %v23485_v15 = vpop.f32.mrb[8].mxu0  ;;  %16845 = vmatprep.subr.bf16.mxu1 %v26054_v4 }
 0xdde   : > { %26146 = vst [vmem:[#allocation98_spill] sm:$0xff] %v23485_v15  ;;  %v14474_v63 = vpop.f32.mrb[9].mxu0  ;;  %v23497_v15 = vsub.f32 %v7641_v47, %v11436_v55  ;;  %v23514_v47 = vsub.f32 %v7643_v30, %v11442_v38  ;;  %v23530_v30 = vsub.f32 %v7645_v57, %v11448_v37  ;;  %v23549_v37 = vsub.f32 %v7647_v49, %v11454_v44 }
 0xddf   : > { %17093 = vmatpush3.bf16.msra.mxu0 %v23475_v45  ;;  %v26150_v63 = vand.u32 4294901760, %v26149_v50  ;;  %v23502_v45 = vpack.c.bf16 %v11454_v44, %v11451_v8  ;;  %v23512_v50 = vsub.f32 %v7642_v10, %v11439_v18  ;;  %v26152_v18 = vand.u32 4294901760, %v23067_v20 }
 0xde0   : > { %16847 = vmatpush3.bf16.msra.mxu1 %v26148_v61  ;;  %17094 = vmatprep.subr.bf16.mxu0 %v26054_v4  ;;  %v23528_v10 = vsub.f32 %v7644_v51, %v11445_v9  ;;  %v23547_v9 = vsub.f32 %v7646_v31, %v11451_v8  ;;  %v26156_v31 = vand.u32 4294901760, %v23100_v39 }
 0xde1   : > { %16860 = vmatprep.subr.bf16.mxu1 %v26054_v4  ;;  %v9906_v38 = vsub.f32 %v23067_v20, %v26152_v18 }
 0xde2   : > { %v9934_v49 = vsub.f32 %v23100_v39, %v26156_v31  ;;  %v17122_v8 = vpack.c.bf16 %v23549_v37, %v23547_v9  ;;  %v26157_v39 = vand.u32 4294901760, %v23109_v43  ;;  %v11560_v31 = vand.u32 4294901760, %v23547_v9 }
 0xde3   : > { %14606 = vmatmul.mubr.f32.vlgmr.msra.gmra.mrb[106].mxu1 %v26150_v63  ;;  %17096 = vmatpush3.bf16.msra.mxu0 %v23489_v0  ;;  %v17113_v63 = vpack.c.bf16 %v23497_v15, %v23495_v12  ;;  %v9899_v0 = vsub.f32 %v23065_v1, %v26151_v16  ;;  %v26154_v1 = vand.u32 4294901760, %v23089_v33  ;;  %v9907_v51 = vand.u32 4294901760, %v9906_v38 }
 0xde4   : > { %16862 = vmatpush3.bf16.msra.mxu1 %v26140_v25  ;;  %17097 = vmatprep.subr.bf16.mxu0 %v26054_v4  ;;  %v11509_v25 = vand.u32 4294901760, %v11508_v23  ;;  %v17116_v23 = vpack.c.bf16 %v23514_v47, %v23512_v50  ;;  %v9935_v18 = vand.u32 4294901760, %v9934_v49  ;;  %v9941_v38 = vsub.f32 %v23109_v43, %v26157_v39 }
 0xde5   : > { %16863 = vmatprep.subr.bf16.mxu1 %v26054_v4  ;;  %14643 = vmatprep.mubr.msk.f32.mxu1 %vm17826_vm4, %v26050_v6  ;;  %v9920_v16 = vsub.f32 %v23089_v33, %v26154_v1  ;;  %v9900_v20 = vand.u32 4294901760, %v9899_v0  ;;  %v17119_v33 = vpack.c.bf16 %v23530_v30, %v23528_v10  ;;  %v11532_v43 = vand.u32 4294901760, %v23512_v50 }
 0xde6   : > { %v7930_v54 = vpop.f32.mrb[80].mxu1  ;;  %v11567_v49 = vand.u32 4294901760, %v23549_v37 }
 0xde7   : > { %v7931_v34 = vadd.f32 %v7930_v54, %v7843_v52  ;;  %v14246_v55 = vpop.f32.mrb[81].mxu1  ;;  %17099 = vmatpush3.bf16.msra.mxu0 %v23502_v45  ;;  %v16885_v0 = vpack.c.bf16 %v9907_v51, %v9900_v20  ;;  %v11539_v20 = vand.u32 4294901760, %v23514_v47  ;;  %v9942_v51 = vand.u32 4294901760, %v9941_v38  ;;  %v26160_v38 = vld [vmem:[#allocation85_spill] sm:$0xff] }
 0xde8   : > { %16865 = vmatpush3.bf16.msra.mxu1 %v26143_v26  ;;  %17112 = vmatprep.subr.bf16.mxu0 %v26054_v4  ;;  %v26153_v26 = vand.u32 4294901760, %v23086_v35  ;;  %v9921_v55 = vand.u32 4294901760, %v9920_v16 }
 0xde9   : > { %16866 = vmatprep.subr.bf16.mxu1 %v26054_v4 }
 0xdea   : > { %15005 = vmatmul.mubr.f32.vlgmr.msra.gmra.mrb[36].mxu0 %v11509_v25  ;;  %v9913_v52 = vsub.f32 %v23086_v35, %v26153_v26  ;;  %v11525_v25 = vand.u32 4294901760, %v23497_v15 }
 0xdeb   : > { %17114 = vmatpush3.bf16.msra.mxu0 %v17113_v63  ;;  %15042 = vmatprep.mubr.msk.f32.mxu0 %vm17826_vm4, %v26050_v6 }
 0xdec   : > { %16868 = vmatpush3.bf16.msra.mxu1 %v26145_v40  ;;  %17115 = vmatprep.subr.bf16.mxu0 %v26054_v4  ;;  %v9914_v54 = vand.u32 4294901760, %v9913_v52  ;;  %v26155_v40 = vand.u32 4294901760, %v23097_v36 }
 0xded   : > { %v23544_v57 = vpop.f32.mrb[10].mxu0  ;;  %16869 = vmatprep.subr.bf16.mxu1 %v26054_v4 }
 0xdee   : > { %v14512_v35 = vpop.f32.mrb[11].mxu0  ;;  %v9927_v63 = vsub.f32 %v23097_v36, %v26155_v40  ;;  %v16888_v44 = vpack.c.bf16 %v9921_v55, %v9914_v54  ;;  %v11553_v54 = vand.u32 4294901760, %v23530_v30 }
 0xdef   : > { %17117 = vmatpush3.bf16.msra.mxu0 %v17116_v23 }
 0xdf0   : > { %16871 = vmatpush3.bf16.msra.mxu1 %v26148_v61  ;;  %17118 = vmatprep.subr.bf16.mxu0 %v26054_v4  ;;  %v11518_v61 = vand.u32 4294901760, %v23495_v12  ;;  %v9928_v36 = vand.u32 4294901760, %v9927_v63 }
 0xdf1   : > { %16884 = vmatprep.subr.bf16.mxu1 %v26054_v4 }
 0xdf2   : > { %v17137_v16 = vpack.c.bf16 %v11525_v25, %v11518_v61 }
 0xdf3   : > { %14644 = vmatmul.mubr.f32.vlgmr.msra.gmra.mrb[108].mxu1 %v26139_v60  ;;  %17120 = vmatpush3.bf16.msra.mxu0 %v17119_v33  ;;  %v26158_v60 = vand.u32 4294901760, %v23111_v42  ;;  %v11546_v33 = vand.u32 4294901760, %v23528_v10 }
 0xdf4   : > { %16886 = vmatpush3.bf16.msra.mxu1 %v16885_v0  ;;  %17121 = vmatprep.subr.bf16.mxu0 %v26054_v4 }
 0xdf5   : > { %v9948_v23 = vsub.f32 %v23111_v42, %v26158_v60  ;;  %16887 = vmatprep.subr.bf16.mxu1 %v26054_v4  ;;  %14681 = vmatprep.mubr.msk.f32.mxu1 %vm17826_vm4, %v26050_v6  ;;  %v16891_v42 = vpack.c.bf16 %v9935_v18, %v9928_v36  ;;  %v17143_v63 = vpack.c.bf16 %v11553_v54, %v11546_v33 }
 0xdf6   : > { %v8011_v26 = vpop.f32.mrb[82].mxu1 }
 0xdf7   : > { %v8012_v52 = vadd.f32 %v8011_v26, %v7931_v34  ;;  %v14265_v1 = vpop.f32.mrb[83].mxu1  ;;  %17123 = vmatpush3.bf16.msra.mxu0 %v17122_v8  ;;  %v9949_v35 = vand.u32 4294901760, %v9948_v23  ;;  %v17140_v34 = vpack.c.bf16 %v11539_v20, %v11532_v43  ;;  %v17146_v8 = vpack.c.bf16 %v11567_v49, %v11560_v31 }
 0xdf8   : > { %16889 = vmatpush3.bf16.msra.mxu1 %v16888_v44  ;;  %17136 = vmatprep.subr.bf16.mxu0 %v26054_v4  ;;  %v26159_v44 = vld [vmem:[#allocation57_spill] sm:$0xff]  ;;  %v26161_v26 = vand.u32 4294901760, %v23037_v3  ;;  %v26163_v3 = vand.u32 4294901760, %v23201_v59 }
 0xdf9   : > { %16890 = vmatprep.subr.bf16.mxu1 %v26054_v4  ;;  %v16894_v55 = vpack.c.bf16 %v9949_v35, %v9942_v51 }
 0xdfa   : > { %15043 = vmatmul.mubr.f32.vlgmr.msra.gmra.mrb[38].mxu0 %v23481_v19  ;;  %v10446_v35 = vsub.f32 %v23201_v59, %v26163_v3 }
 0xdfb   : > { %17138 = vmatpush3.bf16.msra.mxu0 %v17137_v16  ;;  %15080 = vmatprep.mubr.msk.f32.mxu0 %vm17826_vm4, %v26050_v6 }
 0xdfc   : > { %16892 = vmatpush3.bf16.msra.mxu1 %v16891_v42  ;;  %17139 = vmatprep.subr.bf16.mxu0 %v26054_v4  ;;  %v26162_v42 = vand.u32 4294901760, %v23199_v2 }
 0xdfd   : > { %v23595_v0 = vpop.f32.mrb[12].mxu0  ;;  %16893 = vmatprep.subr.bf16.mxu1 %v26054_v4 }
 0xdfe   : > { %v14550_v40 = vpop.f32.mrb[13].mxu0  ;;  %v10439_v51 = vsub.f32 %v23199_v2, %v26162_v42  ;;  %v26169_v42 = vand.u32 4294901760, %v23251_v41 }
 0xdff   : > { %17141 = vmatpush3.bf16.msra.mxu0 %v17140_v34  ;;  %v26164_v34 = vand.u32 4294901760, %v23216_v7  ;;  %v26165_v40 = vand.u32 4294901760, %v23218_v56 }
 0xe00   : > { %16895 = vmatpush3.bf16.msra.mxu1 %v16894_v55  ;;  %17142 = vmatprep.subr.bf16.mxu0 %v26054_v4 }
 0xe01   : > { %16908 = vmatprep.subr.bf16.mxu1 %v26054_v4  ;;  %v10453_v55 = vsub.f32 %v23216_v7, %v26164_v34  ;;  %v26166_v7 = vand.u32 4294901760, %v23232_v62 }
 0xe03   : > { %14682 = vmatmul.mubr.f32.vlgmr.msra.gmra.mrb[110].mxu1 %v23001_v58  ;;  %17144 = vmatpush3.bf16.msra.mxu0 %v17143_v63  ;;  %v10460_v63 = vsub.f32 %v23218_v56, %v26165_v40  ;;  %v10454_v59 = vand.u32 4294901760, %v10453_v55  ;;  %v26167_v56 = vand.u32 4294901760, %v23234_v53 }
 0xe04   : > { %16910 = vmatpush3.bf16.msra.mxu1 %v26159_v44  ;;  %17145 = vmatprep.subr.bf16.mxu0 %v26054_v4 }
 0xe05   : > { %16911 = vmatprep.subr.bf16.mxu1 %v26054_v4  ;;  %14719 = vmatprep.mubr.msk.f32.mxu1 %vm17826_vm4, %v26050_v6 }
 0xe06   : > { %v8106_v36 = vpop.f32.mrb[84].mxu1 }
 0xe07   : > { %v8107_v18 = vadd.f32 %v8106_v36, %v8012_v52  ;;  %v14284_v39 = vpop.f32.mrb[85].mxu1  ;;  %17147 = vmatpush3.bf16.msra.mxu0 %v17146_v8  ;;  %v10440_v8 = vand.u32 4294901760, %v10439_v51 }
 0xe08   : > { %16913 = vmatpush3.bf16.msra.mxu1 %v26160_v38  ;;  %17184 = vmatprep.subr.bf16.mxu0 %v26054_v4 }
 0xe09   : > { %16914 = vmatprep.subr.bf16.mxu1 %v26054_v4 }
 0xe0a   : > { %15081 = vmatmul.mubr.f32.vlgmr.msra.gmra.mrb[40].mxu0 %v23468_v48 }
 0xe0b   : > { %15169 = vmatprep.mubr.msk.f32.mxu0 %vm17826_vm4, %v26050_v6 }
 0xe0c   : > { %16916 = vmatpush3.bf16.msra.mxu1 %v23051_v46 }
 0xe0d   : > { %v23623_v60 = vpop.f32.mrb[14].mxu0  ;;  %16917 = vmatprep.subr.bf16.mxu1 %v26054_v4 }
 0xe0e   : > { %v14588_v23 = vpop.f32.mrb[15].mxu0 }
 0xe10   : > { %16919 = vmatpush3.bf16.msra.mxu1 %v23070_v14 }
 0xe11   : > { %16932 = vmatprep.subr.bf16.mxu1 %v26054_v4 }
 0xe13   : > { %14720 = vmatmul.mubr.f32.vlgmr.msra.gmra.mrb[112].mxu1 %v26161_v26 }
 0xe14   : > { %16934 = vmatpush3.bf16.msra.mxu1 %v26159_v44  ;;  %14757 = vmatprep.mubr.msk.f32.mxu1 %vm17826_vm4, %v26050_v6  ;;  %v10447_v44 = vand.u32 4294901760, %v10446_v35 }
 0xe15   : > { %16935 = vmatprep.subr.bf16.mxu1 %v26054_v4 }
 0xe16   : > { %v8185_v52 = vpop.f32.mrb[86].mxu1  ;;  %v16957_v39 = vpack.c.bf16 %v10447_v44, %v10440_v8 }
 0xe17   : > { %v23634_v1 = vadd.f32 %v8185_v52, %v8107_v18  ;;  %v14303_v16 = vpop.f32.mrb[87].mxu1  ;;  %v10461_v18 = vand.u32 4294901760, %v10460_v63 }
 0xe18   : > { %16937 = vmatpush3.bf16.msra.mxu1 %v26160_v38  ;;  %v10467_v38 = vsub.f32 %v23232_v62, %v26166_v7  ;;  %v26168_v16 = vand.u32 4294901760, %v23249_v5  ;;  %v10488_v62 = vsub.f32 %v23251_v41, %v26169_v42  ;;  %v26171_v7 = vand.u32 4294901760, %v23344_v29 }
 0xe19   : > { %16938 = vmatprep.subr.bf16.mxu1 %v26054_v4  ;;  %v16960_v23 = vpack.c.bf16 %v10461_v18, %v10454_v59 }
 0xe1a   : > { %v10468_v26 = vand.u32 4294901760, %v10467_v38  ;;  %v10489_v35 = vand.u32 4294901760, %v10488_v62  ;;  %v10979_v38 = vsub.f32 %v23344_v29, %v26171_v7  ;;  %v26175_v62 = vld [vmem:[#allocation49_spill] sm:$0xff] }
 0xe1c   : > { %16940 = vmatpush3.bf16.msra.mxu1 %v23051_v46  ;;  %v10474_v46 = vsub.f32 %v23234_v53, %v26167_v56  ;;  %v26172_v56 = vand.u32 4294901760, %v23346_v32 }
 0xe1d   : > { %v23651_v36 = vpop.f32.mrb[16].mxu0  ;;  %16941 = vmatprep.subr.bf16.mxu1 %v26054_v4 }
 0xe1e   : > { %v14626_v2 = vpop.f32.mrb[17].mxu0  ;;  %v10475_v52 = vand.u32 4294901760, %v10474_v46 }
 0xe1f   : > { %v26170_v2 = vand.u32 4294901760, %v23187_v24  ;;  %v10986_v24 = vsub.f32 %v23346_v32, %v26172_v56 }
 0xe20   : > { %16943 = vmatpush3.bf16.msra.mxu1 %v23070_v14  ;;  %v10481_v14 = vsub.f32 %v23249_v5, %v26168_v16 }
 0xe21   : > { %16956 = vmatprep.subr.bf16.mxu1 %v26054_v4 }
 0xe22   : > { %v10482_v3 = vand.u32 4294901760, %v10481_v14 }
 0xe23   : > { %14758 = vmatmul.mubr.f32.vlgmr.msra.gmra.mrb[114].mxu1 %v23001_v58  ;;  %v16963_v58 = vpack.c.bf16 %v10475_v52, %v10468_v26  ;;  %v10987_v52 = vand.u32 4294901760, %v10986_v24 }
 0xe24   : > { %16958 = vmatpush3.bf16.msra.mxu1 %v16957_v39  ;;  %14795 = vmatprep.mubr.msk.f32.mxu1 %vm17826_vm4, %v26050_v6  ;;  %v16966_v34 = vpack.c.bf16 %v10489_v35, %v10482_v3 }
 0xe25   : > { %16959 = vmatprep.subr.bf16.mxu1 %v26054_v4 }
 0xe26   : > { %v8271_v53 = vpop.f32.mrb[88].mxu1 }
 0xe27   : > { %v14322_v51 = vpop.f32.mrb[89].mxu1 }
 0xe28   : > { %16961 = vmatpush3.bf16.msra.mxu1 %v16960_v23  ;;  %v26174_v23 = vand.u32 4294901760, %v23363_v27  ;;  %v26177_v51 = vld [vmem:[#allocation50_spill] sm:$0xff] }
 0xe29   : > { %16962 = vmatprep.subr.bf16.mxu1 %v26054_v4 }
 0xe2a   : > { %v11000_v26 = vsub.f32 %v23363_v27, %v26174_v23  ;;  %v26178_v27 = vand.u32 4294901760, %v26177_v51  ;;  %v26185_v23 = vld [vmem:[#allocation42_spill] sm:$0xff] }
 0xe2c   : > { %16964 = vmatpush3.bf16.msra.mxu1 %v16963_v58  ;;  %v11001_v14 = vand.u32 4294901760, %v11000_v26 }
 0xe2d   : > { %v23673_v5 = vpop.f32.mrb[18].mxu0  ;;  %16965 = vmatprep.subr.bf16.mxu1 %v26054_v4 }
 0xe2e   : > { %v14664_v41 = vpop.f32.mrb[19].mxu0 }
 0xe30   : > { %16967 = vmatpush3.bf16.msra.mxu1 %v16966_v34  ;;  %v26179_v34 = vld [vmem:[#allocation54_spill] sm:$0xff] }
 0xe31   : > { %16980 = vmatprep.subr.bf16.mxu1 %v26054_v4  ;;  %v26180_v41 = vand.u32 4294901760, %v26179_v34 }
 0xe33   : > { %14796 = vmatmul.mubr.f32.vlgmr.msra.gmra.mrb[116].mxu1 %v23174_v11 }
 0xe34   : > { %16982 = vmatpush3.bf16.msra.mxu1 %v23171_v28  ;;  %14833 = vmatprep.mubr.msk.f32.mxu1 %vm17826_vm4, %v26050_v6 }
 0xe35   : > { %16983 = vmatprep.subr.bf16.mxu1 %v26054_v4 }
 0xe36   : > { %v8382_v55 = vpop.f32.mrb[90].mxu1 }
 0xe37   : > { %v8383_v40 = vadd.f32 %v8382_v55, %v8271_v53  ;;  %v14341_v63 = vpop.f32.mrb[91].mxu1  ;;  %v26181_v55 = vld [vmem:[#allocation56_spill] sm:$0xff] }
 0xe38   : > { %16985 = vmatpush3.bf16.msra.mxu1 %v23181_v17 }
 0xe39   : > { %16986 = vmatprep.subr.bf16.mxu1 %v26054_v4 }
 0xe3c   : > { %16988 = vmatpush3.bf16.msra.mxu1 %v23193_v21 }
 0xe3d   : > { %v23685_v8 = vpop.f32.mrb[20].mxu0  ;;  %16989 = vmatprep.subr.bf16.mxu1 %v26054_v4 }
 0xe3e   : > { %v14702_v44 = vpop.f32.mrb[21].mxu0 }
 0xe40   : > { %16991 = vmatpush3.bf16.msra.mxu1 %v23206_v22 }
 0xe41   : > { %17004 = vmatprep.subr.bf16.mxu1 %v26054_v4 }
 0xe43   : > { %14834 = vmatmul.mubr.f32.vlgmr.msra.gmra.mrb[118].mxu1 %v26170_v2 }
 0xe44   : > { %17006 = vmatpush3.bf16.msra.mxu1 %v23171_v28  ;;  %14871 = vmatprep.mubr.msk.f32.mxu1 %vm17826_vm4, %v26050_v6  ;;  %v26173_v28 = vand.u32 4294901760, %v23361_v13 }
 0xe45   : > { %17007 = vmatprep.subr.bf16.mxu1 %v26054_v4 }
 0xe46   : > { %v8470_v59 = vpop.f32.mrb[92].mxu1  ;;  %v10993_v46 = vsub.f32 %v23361_v13, %v26173_v28  ;;  %v26176_v13 = vand.u32 4294901760, %v26175_v62 }
 0xe47   : > { %v8471_v18 = vadd.f32 %v8470_v59, %v8383_v40  ;;  %v14360_v39 = vpop.f32.mrb[93].mxu1  ;;  %v26182_v40 = vand.u32 4294901760, %v26181_v55 }
 0xe48   : > { %17009 = vmatpush3.bf16.msra.mxu1 %v23181_v17  ;;  %v10980_v17 = vand.u32 4294901760, %v10979_v38  ;;  %v10994_v32 = vand.u32 4294901760, %v10993_v46  ;;  %v11007_v53 = vsub.f32 %v26175_v62, %v26176_v13  ;;  %v26183_v38 = vld [vmem:[#allocation53_spill] sm:$0xff]  ;;  %v26188_v13 = vld [vmem:[#allocation48_spill] sm:$0xff] }
 0xe49   : > { %17010 = vmatprep.subr.bf16.mxu1 %v26054_v4  ;;  %v11028_v63 = vsub.f32 %v26181_v55, %v26182_v40  ;;  %v11540_v55 = vsub.f32 %v23514_v47, %v11539_v20  ;;  %v11554_v47 = vsub.f32 %v23530_v30, %v11553_v54 }
 0xe4a   : > { %v17029_v42 = vpack.c.bf16 %v10987_v52, %v10980_v17  ;;  %v17032_v58 = vpack.c.bf16 %v11001_v14, %v10994_v32  ;;  %v11008_v3 = vand.u32 4294901760, %v11007_v53  ;;  %v26187_v14 = vld [vmem:[#allocation47_spill] sm:$0xff]  ;;  %v26189_v53 = vld [vmem:[#allocation45_spill] sm:$0xff] }
 0xe4b   : > { %v11029_v7 = vand.u32 4294901760, %v11028_v63  ;;  %v11541_v63 = vand.u32 4294901760, %v11540_v55 }
 0xe4c   : > { %17012 = vmatpush3.bf16.msra.mxu1 %v23193_v21  ;;  %v11014_v21 = vsub.f32 %v26177_v51, %v26178_v27  ;;  %v26190_v51 = vand.u32 4294901760, %v26189_v53  ;;  %v26191_v27 = vld [vmem:[#allocation89_spill] sm:$0xff] }
 0xe4d   : > { %v23711_v16 = vpop.f32.mrb[22].mxu0  ;;  %17013 = vmatprep.subr.bf16.mxu1 %v26054_v4 }
 0xe4e   : > { %v14740_v29 = vpop.f32.mrb[23].mxu0  ;;  %v11015_v35 = vand.u32 4294901760, %v11014_v21 }
 0xe4f   : > { %v26186_v29 = vld [vmem:[#allocation95_spill] sm:$0xff] }
 0xe50   : > { %17015 = vmatpush3.bf16.msra.mxu1 %v23206_v22  ;;  %v11021_v22 = vsub.f32 %v26179_v34, %v26180_v41  ;;  %v17035_v59 = vpack.c.bf16 %v11015_v35, %v11008_v3  ;;  %v11519_v3 = vsub.f32 %v23495_v12, %v11518_v61  ;;  %v11526_v35 = vsub.f32 %v23497_v15, %v11525_v25  ;;  %v26192_v34 = vld [vmem:[#allocation98_spill] sm:$0xff] }
 0xe51   : > { %17028 = vmatprep.subr.bf16.mxu1 %v26054_v4 }
 0xe52   : > { %v11022_v39 = vand.u32 4294901760, %v11021_v22  ;;  %v11533_v22 = vsub.f32 %v23512_v50, %v11532_v43  ;;  %v11520_v40 = vand.u32 4294901760, %v11519_v3  ;;  %v11527_v12 = vand.u32 4294901760, %v11526_v35 }
 0xe53   : > { %14872 = vmatmul.mubr.f32.vlgmr.msra.gmra.mrb[120].mxu1 %v23174_v11  ;;  %v11547_v50 = vsub.f32 %v23528_v10, %v11546_v33  ;;  %v11568_v10 = vsub.f32 %v23549_v37, %v11567_v49  ;;  %v26193_v49 = vld [vmem:[#allocation92_spill] sm:$0xff] }
 0xe54   : > { %17030 = vmatpush3.bf16.msra.mxu1 %v17029_v42  ;;  %14909 = vmatprep.mubr.msk.f32.mxu1 %vm17826_vm4, %v26050_v6  ;;  %v17038_v24 = vpack.c.bf16 %v11029_v7, %v11022_v39  ;;  %v11534_v25 = vand.u32 4294901760, %v11533_v22 }
 0xe55   : > { %17031 = vmatprep.subr.bf16.mxu1 %v26054_v4  ;;  %v11548_v20 = vand.u32 4294901760, %v11547_v50  ;;  %v11569_v7 = vand.u32 4294901760, %v11568_v10 }
 0xe56   : > { %v8551_v44 = vpop.f32.mrb[94].mxu1  ;;  %v17104_v43 = vpack.c.bf16 %v11541_v63, %v11534_v25  ;;  %v11985_v63 = vld [vmem:[%s24270_s15] sm:$0xff] }
 0xe57   : > { %v8552_v2 = vadd.f32 %v8551_v44, %v8471_v18  ;;  %v14379_v11 = vpop.f32.mrb[95].mxu1  ;;  %v26184_v18 = vld [vmem:[#allocation44_spill] sm:$0xff]  ;;  %v17101_v44 = vpack.c.bf16 %v11527_v12, %v11520_v40  ;;  %v12009_v50 = vand.u32 4294901760, %v11985_v63 }
 0xe58   : > { %17033 = vmatpush3.bf16.msra.mxu1 %v17032_v58  ;;  %v11561_v11 = vsub.f32 %v23547_v9, %v11560_v31 }
 0xe59   : > { %17034 = vmatprep.subr.bf16.mxu1 %v26054_v4  ;;  %v8647_v56 = vadd.f32 %v26183_v38, %v8552_v2  ;;  %v11555_v2 = vand.u32 4294901760, %v11554_v47  ;;  %v11988_v47 = vld [vmem:[%s24270_s15 + $0x18] sm:$0xff] }
 0xe5a   : > { %v11562_v39 = vand.u32 4294901760, %v11561_v11  ;;  %v23861_v11 = vsub.f32 %v11985_v63, %v12009_v50 }
 0xe5c   : > { %17036 = vmatpush3.bf16.msra.mxu1 %v17035_v59  ;;  %v17107_v59 = vpack.c.bf16 %v11555_v2, %v11548_v20  ;;  %v17110_v31 = vpack.c.bf16 %v11569_v7, %v11562_v39  ;;  %v12018_v2 = vand.u32 4294901760, %v11988_v47 }
 0xe5d   : > { %v23734_v28 = vpop.f32.mrb[24].mxu0  ;;  %17037 = vmatprep.subr.bf16.mxu1 %v26054_v4 }
 0xe5e   : > { %v14778_v46 = vpop.f32.mrb[25].mxu0 }
 0xe5f   : > { %v26194_v46 = vld [vmem:[#allocation97_spill] sm:$0xff] }
 0xe60   : > { %17039 = vmatpush3.bf16.msra.mxu1 %v17038_v24 }
 0xe61   : > { %17052 = vmatprep.subr.bf16.mxu1 %v26054_v4 }
 0xe63   : > { %14910 = vmatmul.mubr.f32.vlgmr.msra.gmra.mrb[122].mxu1 %v26184_v18 }
 0xe64   : > { %17054 = vmatpush3.bf16.msra.mxu1 %v26185_v23  ;;  %14947 = vmatprep.mubr.msk.f32.mxu1 %vm17826_vm4, %v26050_v6 }
 0xe65   : > { %17055 = vmatprep.subr.bf16.mxu1 %v26054_v4 }
 0xe66   : > { %v8725_v26 = vpop.f32.mrb[96].mxu1 }
 0xe67   : > { %v8726_v17 = vadd.f32 %v8725_v26, %v8647_v56  ;;  %v14417_v52 = vpop.f32.mrb[97].mxu1 }
 0xe68   : > { %17057 = vmatpush3.bf16.msra.mxu1 %v26186_v29  ;;  %v26196_v52 = vand.u32 4294901760, %v23481_v19 }
 0xe69   : > { %v23745_v32 = vadd.f32 %v8726_v17, %v23634_v1  ;;  %17058 = vmatprep.subr.bf16.mxu1 %v26054_v4 }
 0xe6c   : > { %17060 = vmatpush3.bf16.msra.mxu1 %v26187_v14 }
 0xe6d   : > { %v23749_v42 = vpop.f32.mrb[26].mxu0  ;;  %17061 = vmatprep.subr.bf16.mxu1 %v26054_v4 }
 0xe6e   : > { %v14816_v62 = vpop.f32.mrb[27].mxu0 }
 0xe70   : > { %17063 = vmatpush3.bf16.msra.mxu1 %v26188_v13 }
 0xe71   : > { %17076 = vmatprep.subr.bf16.mxu1 %v26054_v4 }
 0xe73   : > { %14948 = vmatmul.mubr.f32.vlgmr.msra.gmra.mrb[124].mxu1 %v26190_v51 }
 0xe74   : > { %17078 = vmatpush3.bf16.msra.mxu1 %v26185_v23  ;;  %14985 = vmatprep.mubr.msk.f32.mxu1 %vm17826_vm4, %v26050_v6  ;;  %v26195_v23 = vld [vmem:[#allocation101_spill] sm:$0xff] }
 0xe75   : > { %17079 = vmatprep.subr.bf16.mxu1 %v26054_v4 }
 0xe76   : > { %v8922_v1 = vpop.f32.mrb[98].mxu1 }
 0xe77   : > { %v8923_v21 = vadd.f32 %v8922_v1, %v26191_v27  ;;  %v14455_v58 = vpop.f32.mrb[99].mxu1 }
 0xe78   : > { %17081 = vmatpush3.bf16.msra.mxu1 %v26186_v29 }
 0xe79   : > { %17082 = vmatprep.subr.bf16.mxu1 %v26054_v4  ;;  %v9011_v41 = vadd.f32 %v26192_v34, %v8923_v21 }
 0xe7c   : > { %17084 = vmatpush3.bf16.msra.mxu1 %v26187_v14 }
 0xe7d   : > { %v23777_v61 = vpop.f32.mrb[28].mxu0  ;;  %17085 = vmatprep.subr.bf16.mxu1 %v26054_v4 }
 0xe7e   : > { %v14854_v15 = vpop.f32.mrb[29].mxu0 }
 0xe80   : > { %17087 = vmatpush3.bf16.msra.mxu1 %v26188_v13 }
 0xe81   : > { %17100 = vmatprep.subr.bf16.mxu1 %v26054_v4 }
 0xe83   : > { %14986 = vmatmul.mubr.f32.vlgmr.msra.gmra.mrb[126].mxu1 %v26184_v18 }
 0xe84   : > { %17102 = vmatpush3.bf16.msra.mxu1 %v17101_v44  ;;  %15023 = vmatprep.mubr.msk.f32.mxu1 %vm17826_vm4, %v26050_v6  ;;  %v11986_v44 = vld [vmem:[%s24270_s15 + $0x8] sm:$0xff] }
 0xe85   : > { %17103 = vmatprep.subr.bf16.mxu1 %v26054_v4 }
 0xe86   : > { %v9091_v30 = vpop.f32.mrb[100].mxu1 }
 0xe87   : > { %v9092_v33 = vadd.f32 %v9091_v30, %v9011_v41  ;;  %v14493_v54 = vpop.f32.mrb[101].mxu1 }
 0xe88   : > { %17105 = vmatpush3.bf16.msra.mxu1 %v17104_v43  ;;  %v12102_v54 = vand.u32 4294901760, %v23861_v11 }
 0xe89   : > { %17106 = vmatprep.subr.bf16.mxu1 %v26054_v4  ;;  %v9187_v9 = vadd.f32 %v23544_v57, %v9092_v33  ;;  %v23867_v33 = vsub.f32 %v11988_v47, %v12018_v2 }
 0xe8b   : > { %v12123_v7 = vand.u32 4294901760, %v23867_v33 }
 0xe8c   : > { %17108 = vmatpush3.bf16.msra.mxu1 %v17107_v59 }
 0xe8d   : > { %v23800_v38 = vpop.f32.mrb[30].mxu0  ;;  %17109 = vmatprep.subr.bf16.mxu1 %v26054_v4 }
 0xe8e   : > { %v14892_v37 = vpop.f32.mrb[31].mxu0 }
 0xe8f   : > { %v12124_v37 = vsub.f32 %v23867_v33, %v12123_v7 }
 0xe90   : > { %17111 = vmatpush3.bf16.msra.mxu1 %v17110_v31 }
 0xe91   : > { %17124 = vmatprep.subr.bf16.mxu1 %v26054_v4 }
 0xe93   : > { %15024 = vmatmul.mubr.f32.vlgmr.msra.gmra.mrb[128].mxu1 %v23468_v48 }
 0xe94   : > { %17126 = vmatpush3.bf16.msra.mxu1 %v26193_v49  ;;  %15061 = vmatprep.mubr.msk.f32.mxu1 %vm17826_vm4, %v26050_v6 }
 0xe95   : > { %17127 = vmatprep.subr.bf16.mxu1 %v26054_v4 }
 0xe96   : > { %v9265_v57 = vpop.f32.mrb[102].mxu1 }
 0xe97   : > { %v9266_v56 = vadd.f32 %v9265_v57, %v9187_v9  ;;  %v14531_v24 = vpop.f32.mrb[103].mxu1 }
 0xe98   : > { %17129 = vmatpush3.bf16.msra.mxu1 %v26194_v46  ;;  %v12125_v24 = vand.u32 4294901760, %v12124_v37 }
 0xe99   : > { %v11970_v18 = vadd.f32 %v23745_v32, %v9266_v56  ;;  %17130 = vmatprep.subr.bf16.mxu1 %v26054_v4 }
 0xe9c   : > { %17132 = vmatpush3.bf16.msra.mxu1 %v26195_v23 }
 0xe9d   : > { %v23813_v26 = vpop.f32.mrb[32].mxu0  ;;  %17133 = vmatprep.subr.bf16.mxu1 %v26054_v4 }
 0xe9e   : > { %v14930_v17 = vpop.f32.mrb[33].mxu0 }
 0xea0   : > { %17135 = vmatpush3.bf16.msra.mxu1 %v23502_v45 }
 0xea1   : > { %17148 = vmatprep.subr.bf16.mxu1 %v26054_v4 }
 0xea3   : > { %15062 = vmatmul.mubr.f32.vlgmr.msra.gmra.mrb[130].mxu1 %v26196_v52 }
 0xea4   : > { %17150 = vmatpush3.bf16.msra.mxu1 %v26193_v49  ;;  %15099 = vmatprep.mubr.msk.f32.mxu1 %vm17826_vm4, %v26050_v6 }
 0xea5   : > { %17151 = vmatprep.subr.bf16.mxu1 %v26054_v4 }
 0xea6   : > { %v9462_v29 = vpop.f32.mrb[104].mxu1 }
 0xea7   : > { %v9463_v32 = vadd.f32 %v9462_v29, %v23595_v0  ;;  %v14569_v14 = vpop.f32.mrb[105].mxu1 }
 0xea8   : > { %17153 = vmatpush3.bf16.msra.mxu1 %v26194_v46  ;;  %v11989_v46 = vld [vmem:[%s24270_s15 + $0x20] sm:$0xff] }
 0xea9   : > { %17154 = vmatprep.subr.bf16.mxu1 %v26054_v4  ;;  %v9551_v62 = vadd.f32 %v23623_v60, %v9463_v32  ;;  %v12021_v17 = vand.u32 4294901760, %v11989_v46 }
 0xeab   : > { %v23891_v32 = vsub.f32 %v11989_v46, %v12021_v17 }
 0xeac   : > { %17156 = vmatpush3.bf16.msra.mxu1 %v26195_v23 }
 0xead   : > { %v23829_v19 = vpop.f32.mrb[34].mxu0  ;;  %17157 = vmatprep.subr.bf16.mxu1 %v26054_v4 }
 0xeae   : > { %v14968_v13 = vpop.f32.mrb[35].mxu0 }
 0xeaf   : > { %v23904_v13 = vld [vmem:[%s24270_s15 + $0x38] sm:$0xff] }
 0xeb0   : > { %17159 = vmatpush3.bf16.msra.mxu1 %v23502_v45 }
 0xeb1   : > { %17160 = vmatprep.subr.bf16.mxu1 %v26054_v4 }
 0xeb3   : > { %15100 = vmatmul.mubr.f32.vlgmr.msra.gmra.mrb[132].mxu1 %v23468_v48 }
 0xeb4   : > { %15134 = vmatprep.mubr.msk.f32.mxu1 %vm17826_vm4, %v26050_v6 }
 0xeb6   : > { %v9631_v0 = vpop.f32.mrb[106].mxu1 }
 0xeb7   : > { %v9632_v53 = vadd.f32 %v9631_v0, %v9551_v62  ;;  %v14607_v51 = vpop.f32.mrb[107].mxu1  ;;  %v23899_v62 = vld [vmem:[%s24270_s15 + $0x30] sm:$0xff] }
 0xeb9   : > { %v9727_v60 = vadd.f32 %v23651_v36, %v9632_v53  ;;  %v12130_v53 = vand.u32 4294901760, %v23891_v32 }
 0xebd   : > { %v23838_v1 = vpop.f32.mrb[36].mxu0 }
 0xebe   : > { %v15006_v27 = vpop.f32.mrb[37].mxu0 }
 0xebf   : > { %v12030_v27 = vand.u32 4294901760, %v23904_v13 }
 0xec6   : > { %v9805_v21 = vpop.f32.mrb[108].mxu1 }
 0xec7   : > { %v9806_v58 = vadd.f32 %v9805_v21, %v9727_v60  ;;  %v14645_v3 = vpop.f32.mrb[109].mxu1  ;;  %v12027_v60 = vand.u32 4294901760, %v23899_v62 }
 0xec9   : > { %v23840_v35 = vadd.f32 %v11970_v18, %v9806_v58  ;;  %v11990_v18 = vld [vmem:[%s24270_s15 + $0x28] sm:$0xff] }
 0xeca   : > { %v12024_v52 = vand.u32 4294901760, %v11990_v18 }
 0xecc   : > { %v23893_v14 = vsub.f32 %v11990_v18, %v12024_v52 }
 0xecd   : > { %v23842_v45 = vpop.f32.mrb[38].mxu0 }
 0xece   : > { %v15044_v34 = vpop.f32.mrb[39].mxu0  ;;  %v25026_v51 = vand.u32 4294901760, %v23893_v14 }
 0xed6   : > { %v10002_v48 = vpop.f32.mrb[110].mxu1 }
 0xed7   : > { %v10003_v41 = vadd.f32 %v10002_v48, %v23673_v5  ;;  %v14683_v22 = vpop.f32.mrb[111].mxu1  ;;  %v11987_v5 = vld [vmem:[%s24270_s15 + $0x10] sm:$0xff]  ;;  %v23917_v48 = vld [vmem:[%s24270_s15 + $0x40] sm:$0xff] }
 0xed8   : > { %v12015_v43 = vand.u32 4294901760, %v11987_v5  ;;  %v23927_v22 = vld [vmem:[%s24270_s15 + $0x50] sm:$0xff] }
 0xed9   : > { %v10091_v55 = vadd.f32 %v23685_v8, %v10003_v41  ;;  %v12012_v8 = vand.u32 4294901760, %v11986_v44  ;;  %v23922_v41 = vld [vmem:[%s24270_s15 + $0x48] sm:$0xff] }
 0xeda   : > { %v23865_v30 = vsub.f32 %v11987_v5, %v12015_v43  ;;  %v23912_v34 = vpack.c.bf16 %v12018_v2, %v12015_v43  ;;  %v12036_v5 = vand.u32 4294901760, %v23922_v41 }
 0xedb   : > { %v23863_v10 = vsub.f32 %v11986_v44, %v12012_v8  ;;  %v23910_v3 = vpack.c.bf16 %v12012_v8, %v12009_v50  ;;  %v12033_v44 = vand.u32 4294901760, %v23917_v48  ;;  %v12039_v50 = vand.u32 4294901760, %v23927_v22 }
 0xedc   : > { %v12116_v39 = vand.u32 4294901760, %v23865_v30  ;;  %v23969_v2 = vsub.f32 %v23922_v41, %v12036_v5 }
 0xedd   : > { %v23846_v40 = vpop.f32.mrb[40].mxu0  ;;  %v12109_v59 = vand.u32 4294901760, %v23863_v10  ;;  %17162 = vmatpush3.bf16.msra.mxu1 %v23910_v3 }
 0xede   : > { %v15082_v36 = vpop.f32.mrb[41].mxu0  ;;  %v12117_v31 = vsub.f32 %v23865_v30, %v12116_v39  ;;  %17163 = vmatprep.subr.bf16.mxu1 %v26054_v4 }
 0xedf   : > { %v12110_v9 = vsub.f32 %v23863_v10, %v12109_v59  ;;  %v12138_v36 = vsub.f32 %v23893_v14, %v25026_v51 }
 0xee0   : > { %v12118_v56 = vand.u32 4294901760, %v12117_v31 }
 0xee1   : > { %v12111_v57 = vand.u32 4294901760, %v12110_v9  ;;  %v12139_v47 = vand.u32 4294901760, %v12138_v36  ;;  %v23975_v9 = vsub.f32 %v23927_v22, %v12039_v50  ;;  %17165 = vmatpush3.bf16.msra.mxu1 %v23912_v34 }
 0xee2   : > { %v17188_v29 = vpack.c.bf16 %v12125_v24, %v12118_v56  ;;  %v25021_v24 = vand.u32 4294901760, %v23969_v2  ;;  %17166 = vmatprep.subr.bf16.mxu1 %v26054_v4 }
 0xee3   : > { %v25020_v46 = vand.u32 4294901760, %v23975_v9 }
 0xee6   : > { %v10171_v12 = vpop.f32.mrb[112].mxu1 }
 0xee7   : > { %v10172_v15 = vadd.f32 %v10171_v12, %v10091_v55  ;;  %v14721_v25 = vpop.f32.mrb[113].mxu1  ;;  %v12131_v55 = vsub.f32 %v23891_v32, %v12130_v53  ;;  %v23938_v12 = vsub.f32 %v23899_v62, %v12027_v60 }
 0xee8   : > { %v23948_v25 = vld [vmem:[%s24270_s15 + $0x58] sm:$0xff] }
 0xee9   : > { %v10267_v20 = vadd.f32 %v23711_v16, %v10172_v15  ;;  %v12103_v16 = vsub.f32 %v23861_v11, %v12102_v54  ;;  %v23943_v15 = vsub.f32 %v23904_v13, %v12030_v27  ;;  %v12132_v8 = vand.u32 4294901760, %v12131_v55 }
 0xeea   : > { %v25024_v43 = vand.u32 4294901760, %v23938_v12 }
 0xeeb   : > { %v12104_v49 = vand.u32 4294901760, %v12103_v16  ;;  %v12042_v16 = vand.u32 4294901760, %v23948_v25  ;;  %v17191_v31 = vpack.c.bf16 %v12139_v47, %v12132_v8 }
 0xeec   : > { %v12145_v37 = vsub.f32 %v23938_v12, %v25024_v43 }
 0xeed   : > { %v17185_v23 = vpack.c.bf16 %v12111_v57, %v12104_v49  ;;  %v23983_v57 = vpack.c.bf16 %v12024_v52, %v12021_v17  ;;  %v23992_v18 = vsub.f32 %v23948_v25, %v12042_v16  ;;  %v12166_v52 = vsub.f32 %v23969_v2, %v25021_v24 }
 0xeef   : > { %17186 = vmatpush3.bf16.msra.mxu0 %v17185_v23  ;;  %v12146_v23 = vand.u32 4294901760, %v12145_v37  ;;  %v12167_v36 = vand.u32 4294901760, %v12166_v52  ;;  %17168 = vmatpush3.bf16.msra.mxu1 %v23983_v57  ;;  %v11998_v37 = vld [vmem:[%s24270_s15 + $0x68] sm:$0xff] }
 0xef0   : > { %17187 = vmatprep.subr.bf16.mxu0 %v26054_v4  ;;  %17169 = vmatprep.subr.bf16.mxu1 %v26054_v4 }
 0xef3   : > { %17189 = vmatpush3.bf16.msra.mxu0 %v17188_v29 }
 0xef4   : > { %17190 = vmatprep.subr.bf16.mxu0 %v26054_v4 }
 0xef6   : > { %v10345_v0 = vpop.f32.mrb[114].mxu1 }
 0xef7   : > { %v10346_v21 = vadd.f32 %v10345_v0, %v10267_v20  ;;  %v14759_v58 = vpop.f32.mrb[115].mxu1  ;;  %v25023_v20 = vand.u32 4294901760, %v23943_v15  ;;  %17192 = vmatpush3.bf16.msra.mxu0 %v17191_v31  ;;  %v12173_v0 = vsub.f32 %v23975_v9, %v25020_v46  ;;  %v11997_v31 = vld [vmem:[%s24270_s15 + $0x60] sm:$0xff]  ;;  %v11999_v46 = vld [vmem:[%s24270_s15 + $0x70] sm:$0xff] }
 0xef8   : > { %17193 = vmatprep.subr.bf16.mxu0 %v26054_v4 }
 0xef9   : > { %v23951_v63 = vadd.f32 %v23840_v35, %v10346_v21  ;;  %v23964_v35 = vsub.f32 %v23917_v48, %v12033_v44  ;;  %v12152_v49 = vsub.f32 %v23943_v15, %v25023_v20  ;;  %v25019_v21 = vand.u32 4294901760, %v23992_v18 }
 0xefa   : > { %v12174_v8 = vand.u32 4294901760, %v12173_v0  ;;  %v17209_v48 = vpack.c.bf16 %v23863_v10, %v23861_v11  ;;  %v26198_v11 = vand.u32 4294901760, %v23893_v14 }
 0xefb   : > { %v25022_v56 = vand.u32 4294901760, %v23964_v35  ;;  %v12153_v29 = vand.u32 4294901760, %v12152_v49  ;;  %v12180_v47 = vsub.f32 %v23992_v18, %v25019_v21  ;;  %v12045_v49 = vand.u32 4294901760, %v11997_v31 }
 0xefc   : > { %v17263_v10 = vpack.c.bf16 %v26198_v11, %v12130_v53 }
 0xefd   : > { %v12159_v17 = vsub.f32 %v23964_v35, %v25022_v56  ;;  %v17194_v58 = vpack.c.bf16 %v12153_v29, %v12146_v23  ;;  %v12048_v23 = vand.u32 4294901760, %v11998_v37  ;;  %v24018_v52 = vsub.f32 %v11997_v31, %v12045_v49 }
 0xeff   : > { %v12160_v55 = vand.u32 4294901760, %v12159_v17  ;;  %17195 = vmatpush3.bf16.msra.mxu0 %v17194_v58  ;;  %v12181_v17 = vand.u32 4294901760, %v12180_v47  ;;  %v24020_v0 = vsub.f32 %v11998_v37, %v12048_v23  ;;  %v12000_v58 = vld [vmem:[%s24270_s15 + $0x78] sm:$0xff]  ;;  %v25025_v56 = vand.u32 4294901760, %v24018_v52 }
 0xf00   : > { %17196 = vmatprep.subr.bf16.mxu0 %v26054_v4  ;;  %v12054_v47 = vand.u32 4294901760, %v12000_v58  ;;  %v24079_v41 = vpack.c.bf16 %v12048_v23, %v12045_v49  ;;  %v17215_v49 = vpack.c.bf16 %v23893_v14, %v23891_v32  ;;  %v17218_v23 = vpack.c.bf16 %v23943_v15, %v23938_v12 }
 0xf01   : > { %v17197_v29 = vpack.c.bf16 %v12167_v36, %v12160_v55  ;;  %v17200_v21 = vpack.c.bf16 %v12181_v17, %v12174_v8  ;;  %v12193_v55 = vand.u32 4294901760, %v24020_v0  ;;  %v12051_v36 = vand.u32 4294901760, %v11999_v46 }
 0xf02   : > { %v12187_v8 = vsub.f32 %v24018_v52, %v25025_v56  ;;  %v24040_v20 = vsub.f32 %v12000_v58, %v12054_v47  ;;  %v24073_v58 = vpack.c.bf16 %v12042_v16, %v12039_v50  ;;  %v26203_v32 = vand.u32 4294901760, %v23975_v9 }
 0xf03   : > { %17198 = vmatpush3.bf16.msra.mxu0 %v17197_v29  ;;  %v12194_v17 = vsub.f32 %v24020_v0, %v12193_v55  ;;  %v24038_v29 = vsub.f32 %v11999_v46, %v12051_v36  ;;  %v24085_v50 = vpack.c.bf16 %v12054_v47, %v12051_v36  ;;  %v26204_v14 = vand.u32 4294901760, %v23992_v18 }
 0xf04   : > { %17199 = vmatprep.subr.bf16.mxu0 %v26054_v4  ;;  %v25027_v51 = vand.u32 4294901760, %v24040_v20 }
 0xf05   : > { %v25028_v56 = vand.u32 4294901760, %v24038_v29  ;;  %v17272_v53 = vpack.c.bf16 %v26204_v14, %v26203_v32 }
 0xf06   : > { %v10542_v24 = vpop.f32.mrb[116].mxu1  ;;  %v12208_v13 = vsub.f32 %v24040_v20, %v25027_v51 }
 0xf07   : > { %v10543_v31 = vadd.f32 %v10542_v24, %v23734_v28  ;;  %v14797_v37 = vpop.f32.mrb[117].mxu1  ;;  %v24047_v28 = vpack.c.bf16 %v12030_v27, %v12027_v60  ;;  %17201 = vmatpush3.bf16.msra.mxu0 %v17200_v21  ;;  %v12188_v24 = vand.u32 4294901760, %v12187_v8  ;;  %v12201_v62 = vsub.f32 %v24038_v29, %v25028_v56 }
 0xf08   : > { %v12195_v37 = vand.u32 4294901760, %v12194_v17  ;;  %17202 = vmatprep.subr.bf16.mxu0 %v26054_v4  ;;  %v24064_v60 = vpack.c.bf16 %v12036_v5, %v12033_v44  ;;  %v12209_v46 = vand.u32 4294901760, %v12208_v13  ;;  %v17212_v44 = vpack.c.bf16 %v23867_v33, %v23865_v30 }
 0xf09   : > { %v10631_v43 = vadd.f32 %v23749_v42, %v10543_v31  ;;  %17171 = vmatpush3.bf16.msra.mxu1 %v24047_v28  ;;  %v12202_v27 = vand.u32 4294901760, %v12201_v62  ;;  %v17224_v31 = vpack.c.bf16 %v23992_v18, %v23975_v9  ;;  %v26200_v30 = vand.u32 4294901760, %v23943_v15 }
 0xf0a   : > { %17172 = vmatprep.subr.bf16.mxu1 %v26054_v4  ;;  %v17203_v42 = vpack.c.bf16 %v12195_v37, %v12188_v24  ;;  %v17230_v24 = vpack.c.bf16 %v24040_v20, %v24038_v29 }
 0xf0b   : > { %v17206_v21 = vpack.c.bf16 %v12209_v46, %v12202_v27 }
 0xf0c   : > { %17204 = vmatpush3.bf16.msra.mxu0 %v17203_v42 }
 0xf0d   : > { %17174 = vmatpush3.bf16.msra.mxu1 %v24064_v60  ;;  %17205 = vmatprep.subr.bf16.mxu0 %v26054_v4 }
 0xf0e   : > { %17175 = vmatprep.subr.bf16.mxu1 %v26054_v4 }
 0xf10   : > { %17207 = vmatpush3.bf16.msra.mxu0 %v17206_v21 }
 0xf11   : > { %17177 = vmatpush3.bf16.msra.mxu1 %v24073_v58  ;;  %17208 = vmatprep.subr.bf16.mxu0 %v26054_v4 }
 0xf12   : > { %17178 = vmatprep.subr.bf16.mxu1 %v26054_v4 }
 0xf15   : > { %17180 = vmatpush3.bf16.msra.mxu1 %v24079_v41 }
 0xf16   : > { %v10711_v22 = vpop.f32.mrb[118].mxu1  ;;  %17181 = vmatprep.subr.bf16.mxu1 %v26054_v4 }
 0xf17   : > { %v10712_v5 = vadd.f32 %v10711_v22, %v10631_v43  ;;  %v14835_v25 = vpop.f32.mrb[119].mxu1  ;;  %v17221_v43 = vpack.c.bf16 %v23969_v2, %v23964_v35 }
 0xf19   : > { %v10807_v16 = vadd.f32 %v23777_v61, %v10712_v5  ;;  %17183 = vmatpush3.bf16.msra.mxu1 %v24085_v50  ;;  %v17227_v61 = vpack.c.bf16 %v24020_v0, %v24018_v52 }
 0xf26   : > { %v10885_v36 = vpop.f32.mrb[120].mxu1 }
 0xf27   : > { %v10886_v47 = vadd.f32 %v10885_v36, %v10807_v16  ;;  %v14873_v8 = vpop.f32.mrb[121].mxu1 }
 0xf29   : > { %v11973_v17 = vadd.f32 %v23951_v63, %v10886_v47 }
 0xf36   : > { %v11082_v37 = vpop.f32.mrb[122].mxu1 }
 0xf37   : > { %v11083_v42 = vadd.f32 %v11082_v37, %v23800_v38  ;;  %v14911_v62 = vpop.f32.mrb[123].mxu1 }
 0xf39   : > { %v11171_v13 = vadd.f32 %v23813_v26, %v11083_v42 }
 0xf46   : > { %v11251_v27 = vpop.f32.mrb[124].mxu1 }
 0xf47   : > { %v11252_v46 = vadd.f32 %v11251_v27, %v11171_v13  ;;  %v14949_v21 = vpop.f32.mrb[125].mxu1 }
 0xf49   : > { %v11347_v22 = vadd.f32 %v23829_v19, %v11252_v46  ;;  %v12786_v19 = vld [vmem:[%s26197_s23] ss:$0 sm:$0xff]  ;;  %s17742_s23 = scalar_lea.vmem %s17741_s20, 256 }
 0xf4a   : > { %p17744_p9 = scmp.lt.s32.totalorder %s17742_s23, %s17736_s24 }
 0xf4c   : > { %p17745_p5 = por %p17744_p9, %p17743_p6 }
 0xf4e   : > { %p17746_p0 = pnand %p17745_p5, %p17739_p1 }
 0xf56   : > { %v11425_v5 = vpop.f32.mrb[126].mxu1 }
 0xf57   : > { %v11426_v25 = vadd.f32 %v11425_v5, %v11347_v22  ;;  %v14987_v16 = vpop.f32.mrb[127].mxu1 }
 0xf59   : > { %v11974_v36 = vadd.f32 %v11973_v17, %v11426_v25 }
 0xf66   : > { %v11622_v8 = vpop.f32.mrb[128].mxu1 }
 0xf67   : > { %v11623_v63 = vadd.f32 %v11622_v8, %v23838_v1  ;;  %v15025_v47 = vpop.f32.mrb[129].mxu1 }
 0xf69   : > { %v11711_v51 = vadd.f32 %v23842_v45, %v11623_v63 }
 0xf76   : > { %v11791_v56 = vpop.f32.mrb[130].mxu1 }
 0xf77   : > { %v11792_v38 = vadd.f32 %v11791_v56, %v11711_v51  ;;  %v15063_v37 = vpop.f32.mrb[131].mxu1  ;;  %v17257_v56 = vpack.c.bf16 %v12109_v59, %v12102_v54  ;;  %v26199_v54 = vand.u32 4294901760, %v23938_v12  ;;  %v26201_v59 = vand.u32 4294901760, %v23964_v35 }
 0xf78   : > { %v26205_v12 = vand.u32 4294901760, %v24018_v52  ;;  %v26206_v35 = vand.u32 4294901760, %v24038_v29 }
 0xf79   : > { %v11887_v26 = vadd.f32 %v23846_v40, %v11792_v38  ;;  %v17266_v33 = vpack.c.bf16 %v26200_v30, %v26199_v54 }
 0xf7a   : > { %v17275_v15 = vpack.c.bf16 %v12193_v55, %v26205_v12 }
 0xf86   : > { %v11965_v42 = vpop.f32.mrb[132].mxu1 }
 0xf87   : > { %v11966_v62 = vadd.f32 %v11965_v42, %v11887_v26  ;;  %v15101_v13 = vpop.f32.mrb[133].mxu1 }
 0xf89   : > { %v11975_v27 = vadd.f32 %v11974_v36, %v11966_v62 }
 0xf8b   : > { %v11983_v17 = vadd.f32 %v12786_v19, %v11975_v27 }
 0xf8d   : > { %v11984_v46 = vmax.f32 %v11983_v17, 0.0 }
 0xf8f   : > { %v24112_v21 = vand.u32 4294901760, %v11984_v46 }
 0xf91   : > { %v12090_v1 = vsub.f32 %v11984_v46, %v24112_v21  ;;  %15170 = vmatmul.mubr.f32.vlgmr.msra.gmra.mrb[42].mxu0 %v24112_v21 }
 0xf92   : > { %17210 = vmatpush3.bf16.msra.mxu0 %v17209_v48  ;;  %15204 = vmatprep.mubr.msk.f32.mxu0 %vm17826_vm4, %v26050_v6  ;;  %v17260_v48 = vpack.c.bf16 %v12123_v7, %v12116_v39  ;;  %v26202_v39 = vand.u32 4294901760, %v23969_v2  ;;  %v26207_v2 = vand.u32 4294901760, %v24040_v20 }
 0xf93   : > { %17211 = vmatprep.subr.bf16.mxu0 %v26054_v4  ;;  %v12091_v45 = vand.u32 4294901760, %v12090_v1 }
 0xf94   : > { %v17269_v7 = vpack.c.bf16 %v26202_v39, %v26201_v59 }
 0xf95   : > { %v12092_v40 = vsub.f32 %v12090_v1, %v12091_v45 }
 0xf96   : > { %17213 = vmatpush3.bf16.msra.mxu0 %v17212_v44  ;;  %v17278_v44 = vpack.c.bf16 %v26207_v2, %v26206_v35 }
 0xf97   : > { %17214 = vmatprep.subr.bf16.mxu0 %v26054_v4  ;;  %v12093_v51 = vand.u32 4294901760, %v12092_v40 }
 0xf99   : > { %15135 = vmatmul.mubr.f32.vlgmr.msra.gmra.mrb[134].mxu1 %v12093_v51 }
 0xf9a   : > { %17216 = vmatpush3.bf16.msra.mxu0 %v17215_v49 }
 0xf9b   : > { %17217 = vmatprep.subr.bf16.mxu0 %v26054_v4 }
 0xf9e   : > { %17219 = vmatpush3.bf16.msra.mxu0 %v17218_v23 }
 0xf9f   : > { %17220 = vmatprep.subr.bf16.mxu0 %v26054_v4 }
 0xfa2   : > { %17222 = vmatpush3.bf16.msra.mxu0 %v17221_v43 }
 0xfa3   : > { %17223 = vmatprep.subr.bf16.mxu0 %v26054_v4 }
 0xfa6   : > { %17225 = vmatpush3.bf16.msra.mxu0 %v17224_v31 }
 0xfa7   : > { %17226 = vmatprep.subr.bf16.mxu0 %v26054_v4 }
 0xfaa   : > { %17228 = vmatpush3.bf16.msra.mxu0 %v17227_v61 }
 0xfab   : > { %17229 = vmatprep.subr.bf16.mxu0 %v26054_v4 }
 0xfae   : > { %17231 = vmatpush3.bf16.msra.mxu0 %v17230_v24 }
 0xfaf   : > { %17232 = vmatprep.subr.bf16.mxu0 %v26054_v4 }
 0xfb1   : > { %15205 = vmatmul.mubr.f32.vlgmr.msra.gmra.mrb[42].mxu0 %v12090_v1 }
 0xfb2   : > { %17234 = vmatpush3.bf16.msra.mxu0 %v23910_v3  ;;  %15239 = vmatprep.mubr.msk.f32.mxu0 %vm17826_vm4, %v26050_v6 }
 0xfb3   : > { %17235 = vmatprep.subr.bf16.mxu0 %v26054_v4 }
 0xfb6   : > { %17237 = vmatpush3.bf16.msra.mxu0 %v23912_v34 }
 0xfb7   : > { %17238 = vmatprep.subr.bf16.mxu0 %v26054_v4 }
 0xfba   : > { %17240 = vmatpush3.bf16.msra.mxu0 %v23983_v57 }
 0xfbb   : > { %17241 = vmatprep.subr.bf16.mxu0 %v26054_v4 }
 0xfbe   : > { %17243 = vmatpush3.bf16.msra.mxu0 %v24047_v28 }
 0xfbf   : > { %17244 = vmatprep.subr.bf16.mxu0 %v26054_v4 }
 0xfc2   : > { %17246 = vmatpush3.bf16.msra.mxu0 %v24064_v60 }
 0xfc3   : > { %17247 = vmatprep.subr.bf16.mxu0 %v26054_v4 }
 0xfc6   : > { %17249 = vmatpush3.bf16.msra.mxu0 %v24073_v58 }
 0xfc7   : > { %17250 = vmatprep.subr.bf16.mxu0 %v26054_v4 }
 0xfca   : > { %17252 = vmatpush3.bf16.msra.mxu0 %v24079_v41 }
 0xfcb   : > { %17253 = vmatprep.subr.bf16.mxu0 %v26054_v4 }
 0xfce   : > { %17255 = vmatpush3.bf16.msra.mxu0 %v24085_v50 }
 0xfcf   : > { %17256 = vmatprep.subr.bf16.mxu0 %v26054_v4 }
 0xfd1   : > { %15240 = vmatmul.mubr.f32.vlgmr.msra.gmra.mrb[42].mxu0 %v12091_v45 }
 0xfd2   : > { %17258 = vmatpush3.bf16.msra.mxu0 %v17257_v56  ;;  %15274 = vmatprep.mubr.msk.f32.mxu0 %vm17826_vm4, %v26050_v6 }
 0xfd3   : > { %17259 = vmatprep.subr.bf16.mxu0 %v26054_v4 }
 0xfd6   : > { %17261 = vmatpush3.bf16.msra.mxu0 %v17260_v48 }
 0xfd7   : > { %17262 = vmatprep.subr.bf16.mxu0 %v26054_v4 }
 0xfda   : > { %17264 = vmatpush3.bf16.msra.mxu0 %v17263_v10 }
 0xfdb   : > { %17265 = vmatprep.subr.bf16.mxu0 %v26054_v4 }
 0xfde   : > { %17267 = vmatpush3.bf16.msra.mxu0 %v17266_v33 }
 0xfdf   : > { %17268 = vmatprep.subr.bf16.mxu0 %v26054_v4 }
 0xfe2   : > { %17270 = vmatpush3.bf16.msra.mxu0 %v17269_v7 }
 0xfe3   : > { %17271 = vmatprep.subr.bf16.mxu0 %v26054_v4 }
 0xfe6   : > { %17273 = vmatpush3.bf16.msra.mxu0 %v17272_v53 }
 0xfe7   : > { %17274 = vmatprep.subr.bf16.mxu0 %v26054_v4 }
 0xfea   : > { %17276 = vmatpush3.bf16.msra.mxu0 %v17275_v15 }
 0xfeb   : > { %17277 = vmatprep.subr.bf16.mxu0 %v26054_v4 }
 0xfee   : > { %17279 = vmatpush3.bf16.msra.mxu0 %v17278_v44 }
 0xfef   : > { %17280 = vmatprep.subr.bf16.mxu0 %v26054_v4 }
 0xff1   : > { %15275 = vmatmul.mubr.f32.vlgmr.msra.gmra.mrb[42].mxu0 %v24112_v21 }
 0xff2   : > { %17282 = vmatpush3.bf16.msra.mxu0 %v23910_v3  ;;  %15309 = vmatprep.mubr.msk.f32.mxu0 %vm17826_vm4, %v26050_v6 }
 0xff3   : > { %17283 = vmatprep.subr.bf16.mxu0 %v26054_v4 }
 0xff6   : > { %17285 = vmatpush3.bf16.msra.mxu0 %v23912_v34  ;;  %v12787_v34 = vld [vmem:[%s26210_s26] ss:$0 sm:$0xff] }
 0xff7   : > { %17286 = vmatprep.subr.bf16.mxu0 %v26054_v4 }
 0xffa   : > { %17288 = vmatpush3.bf16.msra.mxu0 %v23983_v57 }
 0xffb   : > { %17289 = vmatprep.subr.bf16.mxu0 %v26054_v4 }
 0xffe   : > { %17291 = vmatpush3.bf16.msra.mxu0 %v24047_v28 }
 0xfff   : > { %17292 = vmatprep.subr.bf16.mxu0 %v26054_v4 }
0x1002   : > { %17294 = vmatpush3.bf16.msra.mxu0 %v24064_v60 }
0x1003   : > { %17295 = vmatprep.subr.bf16.mxu0 %v26054_v4 }
0x1006   : > { %17297 = vmatpush3.bf16.msra.mxu0 %v24073_v58 }
0x1007   : > { %17298 = vmatprep.subr.bf16.mxu0 %v26054_v4 }
0x100a   : > { %17300 = vmatpush3.bf16.msra.mxu0 %v24079_v41 }
0x100b   : > { %17301 = vmatprep.subr.bf16.mxu0 %v26054_v4 }
0x100e   : > { %17303 = vmatpush3.bf16.msra.mxu0 %v24085_v50 }
0x1011   : > { %15310 = vmatmul.mubr.f32.vlgmr.msra.gmra.mrb[42].mxu0 %v24112_v21 }
0x106c   : > { %v12095_v6 = vpop.f32.mrb[134].mxu1 }
0x106d   : > { %v15136_v3 = vpop.f32.mrb[135].mxu1  ;;  %v12096_v20 = vadd.f32 %v12787_v34, %v12095_v6 }
0x10e4   : > { %v12645_v9 = vpop.f32.mrb[42].mxu0 }
0x10e5   : > { %v17325_v57 = vadd.f32 %v12645_v9, %v12096_v20  ;;  %v15311_v4 = vpop.f32.mrb[43].mxu0 }
0x10e7   : > { %12649 = vst [vmem:[%s613_s0] sm:$0xff] %v17325_v57 }
0x10e8   : > { %17749 = shalt.err (!%p17746_p0)
}
0x10e9   : > { %s17750_s17 = scalar_lea.hbm %s24213_s22, 128  ;;  %s17754_s25 = scalar_lea.hbm %s26211_s16, 256 }
0x10ea   : > { %p17751_p10 = scmp.ne.s32.totalorder %s24213_s22, %s17750_s17  ;;  %p17755_p4 = scmp.lt.u32.totalorder %s24213_s22, %s26211_s16 }
0x10eb   : > { %p17756_p12 = scmp.lt.u32.totalorder %s17754_s25, %s17750_s17  ;;  %p17758_p8 = scmp.lt.u32.totalorder %s17750_s17, %s24213_s22 }
0x10ec   : > { %p17752_p2 = pnand %p17751_p10, %p26212_p11 }
0x10ed   : > { %p17757_p7 = por %p17756_p12, %p17755_p4 }
0x10ee   : > { %p17753_p3 = pneg %p17752_p2 }
0x10ef   : > { %p17759_p13 = por %p17758_p8, %p17757_p7 }
0x10f1   : > { %p17760_p1 = pnand %p17759_p13, %p17753_p3 }
0x10f3   : > { %17763 = shalt.err (!%p17760_p1)
}
0x10f4   : > { %17514 = dma.vmem_to_hbm [thread:$0]  (%p26212_p11), %s24215_s12, 128, %s24213_s22, %s12651_s19  }
0x10f5 PF: > { %s26213_s27 = sld [smem:[#allocation19_spill]]  ;;  %s26214_s0 = sld [smem:[#allocation16_spill]] }
0x10f6   : > { %s26215_s18 = sld [smem:[#allocation23_spill]] }
0x10fb   : > { %p17546_p6 = scmp.ge.s32.totalorder %s26213_s27, 2  ;;  %s12676_s14 = sand.u32 1, %s26214_s0  }
0x10fc   : > { %p26216_p9 = scmp.ne.s32.totalorder %s26215_s18, 0  ;;  %s12677_s24 = scalar_lea.sflag [#allocation4], %s12676_s14 }
0x10fe   : > { %p17533_p5 = pnand %p17546_p6, %p26216_p9 }
0x1100   : > { %17793 = dma.done.wait (!%p17533_p5), %s12677_s24, 128  }
0x1101   : > { %17795 = vsyncadd (!%p17533_p5), %s12677_s24, 4294967168  ;;  %s26217_s27 = sld [smem:[#allocation20_spill]]  ;;  %s26218_s24 = sld [smem:[#allocation17_spill]] }
0x1102   : > { %s26219_s25 = sld [smem:[#allocation18_spill]]  ;;  %s26220_s26 = sld [smem:[#allocation21_spill]] }
0x1107   : > { %p30_p0 = scmp.ge.s32.totalorder %s26217_s27, 4  }
0x1109   :  { %32 = sbr.rel (!%p30_p0) target bundleno = 14 (0xe), region = 144 }
0x1110   :  { %12682 = vsyncpa [#allocation3], 1 }
0x1111   :  { %12684 = vsyncpa [#allocation3 + $0x1], 1 }
0x1112   :  { %12685 = vsyncpa [#allocation6], 1 }
0x1113   :  { %12686 = vsyncpa [#allocation9], 1 }
0x1114   :  { %12687 = vsyncpa [#allocation4], 1 }
0x1115   :  { %12689 = vsyncpa [#allocation4 + $0x1], 1 }

</bundles_post_ra>
